<compile_context>
chip_gen: v7x
topology: tpu7x:2x2x1
jax: 0.10.0
libtpu: 0.0.40
codegen_flags: <defaults>
</compile_context>

<pallas_src>
import numpy as np
import jax
import jax.numpy as jnp
from jax import lax
from jax.experimental import pallas as pl
from jax.experimental.pallas import tpu as pltpu

BN_EPS = 1e-5
LEAKY_SLOPE = 0.01          # nn.LeakyReLU default negative_slope
DROP_P = 0.1
GROUP = 512                 # lane-aligned column width per pool window (432 real + 80 pad)
POOLED = 432                # 27 pool positions * 16 channels


def _round_up(x, m):
    return ((x + m - 1) // m) * m


# ----------------------------------------------------------------------------
# Static index tables: fold im2col + 2x2x2 max-pool layout into the conv weight
# ----------------------------------------------------------------------------
def _build_row_indices():
    w = np.stack(np.meshgrid(np.arange(2), np.arange(2), np.arange(2),
                             indexing="ij"), -1).reshape(8, 3)    # pool-window offset
    p = np.stack(np.meshgrid(np.arange(3), np.arange(3), np.arange(3),
                             indexing="ij"), -1).reshape(27, 3)   # pool output position
    k = np.stack(np.meshgrid(np.arange(3), np.arange(3), np.arange(3),
                             indexing="ij"), -1).reshape(27, 3)   # conv kernel offset
    # conv output position = 2*p + w ; input coordinate = 2*p + w + k
    coord = 2 * p[None, :, None, :] + w[:, None, None, :] + k[None, None, :, :]
    return coord[..., 0] * 81 + coord[..., 1] * 9 + coord[..., 2]   # (8, 27, 27)


_ROWS = _build_row_indices()    # [window, pool_pos, kernel_off] -> flat xw row index (0..728)


def _build_scatter_conv(Wc, bc):
    """Conv3d(1,16,3) as a (729, 8*GROUP) 'scatter-conv' matrix + matching bias.

    Column layout: col = window*GROUP + pool_pos*16 + channel (lanes 432..511 of every
    group are zero padding).  Multiplying raw flattened xw (B,729) by this matrix yields,
    per pool window / pool position / channel, the conv value minus bias -- identical MXU
    FLOPs to the conv, with no patch expansion in HBM.
    """
    # TODO(synk): v5e-only refinement (split into 3 matmuls with K~324 per pooled-d group to
    # halve zero-multiply MXU MACs) not applied; it needs lane-unaligned input slices.
    wc = np.asarray(Wc, np.float32).reshape(16, 27)               # [c, k], k = kd*9+kh*3+kw
    out = np.zeros((729, 8 * GROUP), np.float32)
    win = np.arange(8)[:, None, None, None]
    pos = np.arange(27)[None, :, None, None]
    chn = np.arange(16)[None, None, None, :]
    cols = np.broadcast_to(win * GROUP + pos * 16 + chn, (8, 27, 27, 16))
    rows = np.broadcast_to(_ROWS[..., None], (8, 27, 27, 16))
    vals = np.broadcast_to(wc.T[None, None, :, :], (8, 27, 27, 16))   # wc.T is [k, c]
    out[rows.reshape(-1), cols.reshape(-1)] = vals.reshape(-1)    # (row, col) pairs unique
    bias = np.zeros((1, 8 * GROUP), np.float32)
    blk = np.tile(np.asarray(bc, np.float32), 27)                 # col = pos*16 + c
    for w in range(8):
        bias[0, w * GROUP: w * GROUP + POOLED] = blk
    return jnp.asarray(out, jnp.bfloat16), jnp.asarray(bias, jnp.float32)


# ----------------------------------------------------------------------------
# Pallas kernel: the entire forward pass for one batch block
# ----------------------------------------------------------------------------
def _complexnet3d_kernel(
        x9_ref, xw_ref, m1_ref, m2_ref,   # (TB,9) f32, (TB,729) bf16, dropout masks f32
        wf_ref, bf_ref,                   # Linear(9, 100)
        wcb_ref, bcw_ref,                 # scatter-conv (729, 8*GROUP) bf16 + bias (1, 8*GROUP)
        w1a_ref, w1b_ref, b1_ref,         # fc1: xi part (100,128), xw part (GROUP,128), bias
        s1_ref, sh1_ref,                  # BatchNorm1d(128) eval, folded scale/shift
        w2_ref, b2_ref,                   # fc2 (128, 16)
        s2_ref, sh2_ref,                  # BatchNorm1d(16) eval, folded scale/shift
        w3_ref, b3_ref,                   # fc3 padded to (16, 128) / (1, 128)
        out_ref):                         # (TB, 128); logits live in lanes 0..2
    f32, bf16 = jnp.float32, jnp.bfloat16

    def lrelu(x):
        return jnp.where(x >= 0, x, LEAKY_SLOPE * x)

    # --- xi branch: Linear(9, 100) + ReLU ------------------------------------
    xi = jnp.dot(x9_ref[...], wf_ref[...], preferred_element_type=f32) + bf_ref[...]
    xi = jnp.maximum(xi, 0.0)                                      # (TB, 100)

    # --- xw branch: im2col + Conv3d + LeakyReLU + MaxPool3d(2) as ONE matmul --
    conv = jnp.dot(xw_ref[...], wcb_ref[...], preferred_element_type=f32) + bcw_ref[...]
    conv = lrelu(conv)                                             # (TB, 8*GROUP)
    # 2x2x2 max-pool == max over the 8 lane-aligned 512-wide window groups
    # (LeakyReLU is monotone and applied per conv position, exactly like PyTorch).
    pooled = conv[:, 0:GROUP]
    for w in range(1, 8):
        pooled = jnp.maximum(pooled, conv[:, w * GROUP:(w + 1) * GROUP])   # (TB, GROUP)

    # --- fc1 over concat(xi, xw_flat): two bf16 matmuls (padded lanes hit zero rows) ---
    h = (jnp.dot(xi.astype(bf16), w1a_ref[...], preferred_element_type=f32)
         + jnp.dot(pooled.astype(bf16), w1b_ref[...], preferred_element_type=f32)
         + b1_ref[...])
    h = lrelu(h)                                                   # (TB, 128)

    # --- BatchNorm1d(128) eval (pre-folded) + Dropout(0.1) train (scaled mask) ---
    h = h * s1_ref[...] + sh1_ref[...]
    h = h * m1_ref[...]

    # --- fc2 + LeakyReLU + BatchNorm1d(16) eval + Dropout -----------------------
    h = jnp.dot(h.astype(bf16), w2_ref[...], preferred_element_type=f32) + b2_ref[...]
    h = lrelu(h)                                                   # (TB, 16)
    h = h * s2_ref[...] + sh2_ref[...]
    h = h * m2_ref[...]

    # --- fc3, padded to 128 output lanes (cols 3..127 zero) -> unmasked store ---
    out_ref[...] = jnp.dot(h.astype(bf16), w3_ref[...], preferred_element_type=f32) + b3_ref[...]


# ----------------------------------------------------------------------------
# Wrapper: generation-aware tiling, batch padding, pallas_call
# ----------------------------------------------------------------------------
def _hw_config(batch_block):
    try:
        kind = jax.devices()[0].device_kind.lower()
    except Exception:
        kind = ""
    is_v7 = "v7" in kind
    if batch_block is None:
        batch_block = 512 if is_v7 else 1024        # v7x: 64 MiB VMEM; v5e/v6e: 128 MiB
    vmem_limit = (44 if is_v7 else 96) * 1024 * 1024
    return batch_block, vmem_limit, is_v7


def complexnet3d_forward(xd, xp, xi_in, xg, xw, params, drop_seed=0, batch_block=None):
    # xg is accepted for signature parity with the PyTorch module but unused
    # (the reference forward never reads it).
    del xg
    B = xd.shape[0]
    batch_block, vmem_limit, is_v7 = _hw_config(batch_block)

    x9 = jnp.concatenate([xd, xp, xi_in], axis=1).astype(jnp.float32)     # (B, 9)
    xw2d = xw.reshape(B, 729).astype(jnp.bfloat16)                        # one cheap HBM pass

    # Batch tile: multiple of 8; on v7x make sure both TensorCores get grid steps.
    TB = min(batch_block, _round_up(B, 8))
    if is_v7 and B > 256:
        TB = min(TB, _round_up(-(-B // 2), 8))
    TB = max(8, _round_up(TB, 8))
    Bp = _round_up(B, TB)
    if Bp != B:
        x9 = jnp.pad(x9, ((0, Bp - B), (0, 0)))
        xw2d = jnp.pad(xw2d, ((0, Bp - B), (0, 0)))

    # Train-mode inverted-dropout masks (host-side RNG: independent of tile size).
    k1, k2 = jax.random.split(jax.random.PRNGKey(drop_seed))
    inv_keep = 1.0 / (1.0 - DROP_P)
    m1 = jax.random.bernoulli(k1, 1.0 - DROP_P, (Bp, 128)).astype(jnp.float32) * inv_keep
    m2 = jax.random.bernoulli(k2, 1.0 - DROP_P, (Bp, 16)).astype(jnp.float32) * inv_keep

    weight_args = (
        params["wf_t"], params["bf"],
        params["wcb"], params["bcw"],
        params["w1a_t"], params["w1b_t"], params["b1"],
        params["bn1_scale"], params["bn1_shift"],
        params["w2_t"], params["b2"],
        params["bn2_scale"], params["bn2_shift"],
        params["w3_t"], params["b3"],
    )

    def batch_map(i):
        return (i, 0)

    def const_map(i):
        return (0, 0)

    # Weights never change across the batch grid: constant index_map + single buffer.
    single = {"pipeline_mode": pl.Buffered(1)} if hasattr(pl, "Buffered") else {}
    weight_specs = [pl.BlockSpec(tuple(a.shape), const_map, **single) for a in weight_args]

    grid_spec = pltpu.PrefetchScalarGridSpec(
        num_scalar_prefetch=0,
        grid=(Bp // TB,),
        in_specs=[
            pl.BlockSpec((TB, 9), batch_map),
            pl.BlockSpec((TB, 729), batch_map),
            pl.BlockSpec((TB, 128), batch_map),
            pl.BlockSpec((TB, 16), batch_map),
            *weight_specs,
        ],
        out_specs=pl.BlockSpec((TB, 128), batch_map),
    )

    out = pl.pallas_call(
        _complexnet3d_kernel,
        out_shape=jax.ShapeDtypeStruct((Bp, 128), jnp.float32),
        grid_spec=grid_spec,
        compiler_params=pltpu.CompilerParams(
            dimension_semantics=("parallel",),         # megacore sharding of the batch grid
            vmem_limit_bytes=vmem_limit,
        ),
    )(x9, xw2d, m1, m2, *weight_args)
    return out[:B, :3]


# ----------------------------------------------------------------------------
# Deterministic parameter initialization (PyTorch-style uniform bounds) and
# one-time repacking into kernel layouts.
# ----------------------------------------------------------------------------
def init_params(key):
    ks = jax.random.split(key, 10)

    def unif(k, shape, fan_in):
        bnd = 1.0 / np.sqrt(fan_in)
        return jax.random.uniform(k, shape, jnp.float32, -bnd, bnd)

    Wf = unif(ks[0], (100, 9), 9)
    bf = unif(ks[1], (100,), 9)
    Wc = unif(ks[2], (16, 1, 3, 3, 3), 27)
    bc = unif(ks[3], (16,), 27)
    W1 = unif(ks[4], (128, 532), 532)       # fc1 over [xi(100) | xw.view(B,-1)(432)]
    b1 = unif(ks[5], (128,), 532)
    W2 = unif(ks[6], (16, 128), 128)
    b2 = unif(ks[7], (16,), 128)
    W3 = unif(ks[8], (3, 16), 16)
    b3 = unif(ks[9], (3,), 16)

    # BatchNorm1d defaults of a freshly-built module (used in eval mode) -> fold.
    g1 = jnp.ones((128,), jnp.float32); be1 = jnp.zeros((128,), jnp.float32)
    m1 = jnp.zeros((128,), jnp.float32); v1 = jnp.ones((128,), jnp.float32)
    g2 = jnp.ones((16,), jnp.float32); be2 = jnp.zeros((16,), jnp.float32)
    m2 = jnp.zeros((16,), jnp.float32); v2 = jnp.ones((16,), jnp.float32)
    s1 = g1 * lax.rsqrt(v1 + BN_EPS); sh1 = be1 - m1 * s1
    s2 = g2 * lax.rsqrt(v2 + BN_EPS); sh2 = be2 - m2 * s2

    # Conv3d + im2col + pool layout fused into one bf16 scatter matrix.
    wcb, bcw = _build_scatter_conv(Wc, bc)

    # fc1 xw-part: torch flatten order is c*27 + p; kernel pooled layout is p*16 + c,
    # padded to GROUP rows (zero rows line up with the zero-padded pooled lanes).
    w1b = np.zeros((GROUP, 128), np.float32)
    w1b[:POOLED] = np.transpose(
        np.asarray(W1[:, 100:], np.float32).reshape(128, 16, 27), (2, 1, 0)
    ).reshape(POOLED, 128)

    # fc3 padded to 128 output lanes.
    w3p = np.zeros((16, 128), np.float32); w3p[:, :3] = np.asarray(W3, np.float32).T
    b3p = np.zeros((1, 128), np.float32); b3p[0, :3] = np.asarray(b3, np.float32)

    bf16 = jnp.bfloat16
    return dict(
        wf_t=Wf.T, bf=bf.reshape(1, 100),
        wcb=wcb, bcw=bcw,
        w1a_t=W1[:, :100].T.astype(bf16),
        w1b_t=jnp.asarray(w1b, bf16),
        b1=b1.reshape(1, 128),
        bn1_scale=s1.reshape(1, 128), bn1_shift=sh1.reshape(1, 128),
        w2_t=W2.T.astype(bf16), b2=b2.reshape(1, 16),
        bn2_scale=s2.reshape(1, 16), bn2_shift=sh2.reshape(1, 16),
        w3_t=jnp.asarray(w3p, bf16), b3=jnp.asarray(b3p),
    )


if __name__ == "__main__":
    key = jax.random.PRNGKey(0)
    kp, kd, kpp, ki, kg, kw = jax.random.split(key, 6)

    B = 2
    params = init_params(kp)
    xd_in = jax.random.normal(kd, (B, 3), jnp.float32)
    xp_in = jax.random.normal(kpp, (B, 3), jnp.float32)
    xi_in = jax.random.normal(ki, (B, 3), jnp.float32)
    xg_in = jax.random.normal(kg, (B, 1), jnp.float32)    # unused by the forward
    xw_in = jax.random.normal(kw, (B, 1, 9, 9, 9), jnp.float32)

    out = complexnet3d_forward(xd_in, xp_in, xi_in, xg_in, xw_in, params, drop_seed=0)
    out = jax.block_until_ready(out)
    assert out.shape == (B, 3) and out.dtype == jnp.float32
    assert bool(jnp.all(jnp.isfinite(out)))
    print("KERNEL_OK")
</pallas_src>

<mosaic_0001>
module attributes {stable_mosaic.version = 11 : i64} {
  func.func @_complexnet3d_kernel(%arg0: i32, %arg1: memref<8x9xf32, #tpu.memory_space<vmem>>, %arg2: memref<8x729xbf16, #tpu.memory_space<vmem>>, %arg3: memref<8x128xf32, #tpu.memory_space<vmem>>, %arg4: memref<8x16xf32, #tpu.memory_space<vmem>>, %arg5: memref<9x100xf32, #tpu.memory_space<vmem>>, %arg6: memref<1x100xf32, #tpu.memory_space<vmem>>, %arg7: memref<729x4096xbf16, #tpu.memory_space<vmem>>, %arg8: memref<1x4096xf32, #tpu.memory_space<vmem>>, %arg9: memref<100x128xbf16, #tpu.memory_space<vmem>>, %arg10: memref<512x128xbf16, #tpu.memory_space<vmem>>, %arg11: memref<1x128xf32, #tpu.memory_space<vmem>>, %arg12: memref<1x128xf32, #tpu.memory_space<vmem>>, %arg13: memref<1x128xf32, #tpu.memory_space<vmem>>, %arg14: memref<128x16xbf16, #tpu.memory_space<vmem>>, %arg15: memref<1x16xf32, #tpu.memory_space<vmem>>, %arg16: memref<1x16xf32, #tpu.memory_space<vmem>>, %arg17: memref<1x16xf32, #tpu.memory_space<vmem>>, %arg18: memref<16x128xbf16, #tpu.memory_space<vmem>>, %arg19: memref<1x128xf32, #tpu.memory_space<vmem>>, %arg20: memref<8x128xf32, #tpu.memory_space<vmem>>) attributes {dimension_semantics = [#tpu.dimension_semantics<parallel>], iteration_bounds = array<i64: 1>, scalar_prefetch = 0 : i64, scratch_operands = 0 : i64, tpu.core_type = #tpu.core_type<tc>, window_params = [{transform_indices = @transform_0, window_bounds = array<i64: 8, 9>}, {transform_indices = @transform_1, window_bounds = array<i64: 8, 729>}, {transform_indices = @transform_2, window_bounds = array<i64: 8, 128>}, {transform_indices = @transform_3, window_bounds = array<i64: 8, 16>}, {pipeline_mode = #tpu.pipeline_mode<synchronous>, transform_indices = @transform_4, window_bounds = array<i64: 9, 100>}, {pipeline_mode = #tpu.pipeline_mode<synchronous>, transform_indices = @transform_5, window_bounds = array<i64: 1, 100>}, {pipeline_mode = #tpu.pipeline_mode<synchronous>, transform_indices = @transform_6, window_bounds = array<i64: 729, 4096>}, {pipeline_mode = #tpu.pipeline_mode<synchronous>, transform_indices = @transform_7, window_bounds = array<i64: 1, 4096>}, {pipeline_mode = #tpu.pipeline_mode<synchronous>, transform_indices = @transform_8, window_bounds = array<i64: 100, 128>}, {pipeline_mode = #tpu.pipeline_mode<synchronous>, transform_indices = @transform_9, window_bounds = array<i64: 512, 128>}, {pipeline_mode = #tpu.pipeline_mode<synchronous>, transform_indices = @transform_10, window_bounds = array<i64: 1, 128>}, {pipeline_mode = #tpu.pipeline_mode<synchronous>, transform_indices = @transform_11, window_bounds = array<i64: 1, 128>}, {pipeline_mode = #tpu.pipeline_mode<synchronous>, transform_indices = @transform_12, window_bounds = array<i64: 1, 128>}, {pipeline_mode = #tpu.pipeline_mode<synchronous>, transform_indices = @transform_13, window_bounds = array<i64: 128, 16>}, {pipeline_mode = #tpu.pipeline_mode<synchronous>, transform_indices = @transform_14, window_bounds = array<i64: 1, 16>}, {pipeline_mode = #tpu.pipeline_mode<synchronous>, transform_indices = @transform_15, window_bounds = array<i64: 1, 16>}, {pipeline_mode = #tpu.pipeline_mode<synchronous>, transform_indices = @transform_16, window_bounds = array<i64: 1, 16>}, {pipeline_mode = #tpu.pipeline_mode<synchronous>, transform_indices = @transform_17, window_bounds = array<i64: 16, 128>}, {pipeline_mode = #tpu.pipeline_mode<synchronous>, transform_indices = @transform_18, window_bounds = array<i64: 1, 128>}, {transform_indices = @transform_19, window_bounds = array<i64: 8, 128>}]} {
    %c0 = arith.constant 0 : index
    %c0_0 = arith.constant 0 : index
    %0 = vector.load %arg1[%c0, %c0_0] : memref<8x9xf32, #tpu.memory_space<vmem>>, vector<8x9xf32>
    %c0_1 = arith.constant 0 : index
    %c0_2 = arith.constant 0 : index
    %1 = vector.load %arg5[%c0_1, %c0_2] : memref<9x100xf32, #tpu.memory_space<vmem>>, vector<9x100xf32>
    %cst = arith.constant dense<0.000000e+00> : vector<8x100xf32>
    %2 = tpu.matmul %0, %1, %cst {dimension_numbers = #tpu.dot_dimension_numbers<[1], [0], [0], [1], [0, 0, 1, 1], [], []>} : vector<8x9xf32>, vector<9x100xf32>, vector<8x100xf32> -> vector<8x100xf32>
    %c0_3 = arith.constant 0 : index
    %c0_4 = arith.constant 0 : index
    %3 = vector.load %arg6[%c0_3, %c0_4] : memref<1x100xf32, #tpu.memory_space<vmem>>, vector<1x100xf32>
    %4 = vector.broadcast %3 : vector<1x100xf32> to vector<8x100xf32>
    %5 = arith.addf %2, %4 : vector<8x100xf32>
    %cst_5 = arith.constant 0.000000e+00 : f32
    %6 = vector.broadcast %cst_5 : f32 to vector<8x100xf32>
    %7 = arith.maximumf %5, %6 : vector<8x100xf32>
    %c0_6 = arith.constant 0 : index
    %c0_7 = arith.constant 0 : index
    %8 = vector.load %arg2[%c0_6, %c0_7] : memref<8x729xbf16, #tpu.memory_space<vmem>>, vector<8x729xbf16>
    %c0_8 = arith.constant 0 : index
    %c0_9 = arith.constant 0 : index
    %9 = vector.load %arg7[%c0_8, %c0_9] : memref<729x4096xbf16, #tpu.memory_space<vmem>>, vector<729x4096xbf16>
    %cst_10 = arith.constant dense<0.000000e+00> : vector<8x4096xf32>
    %10 = tpu.matmul %8, %9, %cst_10 {dimension_numbers = #tpu.dot_dimension_numbers<[1], [0], [0], [1], [0, 0, 1, 1], [], []>} : vector<8x729xbf16>, vector<729x4096xbf16>, vector<8x4096xf32> -> vector<8x4096xf32>
    %c0_11 = arith.constant 0 : index
    %c0_12 = arith.constant 0 : index
    %11 = vector.load %arg8[%c0_11, %c0_12] : memref<1x4096xf32, #tpu.memory_space<vmem>>, vector<1x4096xf32>
    %12 = vector.broadcast %11 : vector<1x4096xf32> to vector<8x4096xf32>
    %13 = arith.addf %10, %12 : vector<8x4096xf32>
    %cst_13 = arith.constant 0.000000e+00 : f32
    %14 = vector.broadcast %cst_13 : f32 to vector<8x4096xf32>
    %15 = arith.cmpf oge, %13, %14 : vector<8x4096xf32>
    %cst_14 = arith.constant 0.00999999977 : f32
    %16 = vector.broadcast %cst_14 : f32 to vector<8x4096xf32>
    %17 = arith.mulf %16, %13 : vector<8x4096xf32>
    %18 = arith.select %15, %13, %17 : vector<8x4096xi1>, vector<8x4096xf32>
    %19 = vector.extract_strided_slice %18 {offsets = [0, 0], sizes = [8, 512], strides = [1, 1]} : vector<8x4096xf32> to vector<8x512xf32>
    %20 = vector.extract_strided_slice %18 {offsets = [0, 512], sizes = [8, 512], strides = [1, 1]} : vector<8x4096xf32> to vector<8x512xf32>
    %21 = arith.maximumf %19, %20 : vector<8x512xf32>
    %22 = vector.extract_strided_slice %18 {offsets = [0, 1024], sizes = [8, 512], strides = [1, 1]} : vector<8x4096xf32> to vector<8x512xf32>
    %23 = arith.maximumf %21, %22 : vector<8x512xf32>
    %24 = vector.extract_strided_slice %18 {offsets = [0, 1536], sizes = [8, 512], strides = [1, 1]} : vector<8x4096xf32> to vector<8x512xf32>
    %25 = arith.maximumf %23, %24 : vector<8x512xf32>
    %26 = vector.extract_strided_slice %18 {offsets = [0, 2048], sizes = [8, 512], strides = [1, 1]} : vector<8x4096xf32> to vector<8x512xf32>
    %27 = arith.maximumf %25, %26 : vector<8x512xf32>
    %28 = vector.extract_strided_slice %18 {offsets = [0, 2560], sizes = [8, 512], strides = [1, 1]} : vector<8x4096xf32> to vector<8x512xf32>
    %29 = arith.maximumf %27, %28 : vector<8x512xf32>
    %30 = vector.extract_strided_slice %18 {offsets = [0, 3072], sizes = [8, 512], strides = [1, 1]} : vector<8x4096xf32> to vector<8x512xf32>
    %31 = arith.maximumf %29, %30 : vector<8x512xf32>
    %32 = vector.extract_strided_slice %18 {offsets = [0, 3584], sizes = [8, 512], strides = [1, 1]} : vector<8x4096xf32> to vector<8x512xf32>
    %33 = arith.maximumf %31, %32 : vector<8x512xf32>
    %34 = arith.truncf %7 : vector<8x100xf32> to vector<8x100xbf16>
    %c0_15 = arith.constant 0 : index
    %c0_16 = arith.constant 0 : index
    %35 = vector.load %arg9[%c0_15, %c0_16] : memref<100x128xbf16, #tpu.memory_space<vmem>>, vector<100x128xbf16>
    %cst_17 = arith.constant dense<0.000000e+00> : vector<8x128xf32>
    %36 = tpu.matmul %34, %35, %cst_17 {dimension_numbers = #tpu.dot_dimension_numbers<[1], [0], [0], [1], [0, 0, 1, 1], [], []>} : vector<8x100xbf16>, vector<100x128xbf16>, vector<8x128xf32> -> vector<8x128xf32>
    %37 = arith.truncf %33 : vector<8x512xf32> to vector<8x512xbf16>
    %c0_18 = arith.constant 0 : index
    %c0_19 = arith.constant 0 : index
    %38 = vector.load %arg10[%c0_18, %c0_19] : memref<512x128xbf16, #tpu.memory_space<vmem>>, vector<512x128xbf16>
    %cst_20 = arith.constant dense<0.000000e+00> : vector<8x128xf32>
    %39 = tpu.matmul %37, %38, %cst_20 {dimension_numbers = #tpu.dot_dimension_numbers<[1], [0], [0], [1], [0, 0, 1, 1], [], []>} : vector<8x512xbf16>, vector<512x128xbf16>, vector<8x128xf32> -> vector<8x128xf32>
    %40 = arith.addf %36, %39 : vector<8x128xf32>
    %c0_21 = arith.constant 0 : index
    %c0_22 = arith.constant 0 : index
    %41 = vector.load %arg11[%c0_21, %c0_22] : memref<1x128xf32, #tpu.memory_space<vmem>>, vector<1x128xf32>
    %42 = vector.broadcast %41 : vector<1x128xf32> to vector<8x128xf32>
    %43 = arith.addf %40, %42 : vector<8x128xf32>
    %cst_23 = arith.constant 0.000000e+00 : f32
    %44 = vector.broadcast %cst_23 : f32 to vector<8x128xf32>
    %45 = arith.cmpf oge, %43, %44 : vector<8x128xf32>
    %cst_24 = arith.constant 0.00999999977 : f32
    %46 = vector.broadcast %cst_24 : f32 to vector<8x128xf32>
    %47 = arith.mulf %46, %43 : vector<8x128xf32>
    %48 = arith.select %45, %43, %47 : vector<8x128xi1>, vector<8x128xf32>
    %c0_25 = arith.constant 0 : index
    %c0_26 = arith.constant 0 : index
    %49 = vector.load %arg12[%c0_25, %c0_26] : memref<1x128xf32, #tpu.memory_space<vmem>>, vector<1x128xf32>
    %50 = vector.broadcast %49 : vector<1x128xf32> to vector<8x128xf32>
    %51 = arith.mulf %48, %50 : vector<8x128xf32>
    %c0_27 = arith.constant 0 : index
    %c0_28 = arith.constant 0 : index
    %52 = vector.load %arg13[%c0_27, %c0_28] : memref<1x128xf32, #tpu.memory_space<vmem>>, vector<1x128xf32>
    %53 = vector.broadcast %52 : vector<1x128xf32> to vector<8x128xf32>
    %54 = arith.addf %51, %53 : vector<8x128xf32>
    %c0_29 = arith.constant 0 : index
    %c0_30 = arith.constant 0 : index
    %55 = vector.load %arg3[%c0_29, %c0_30] : memref<8x128xf32, #tpu.memory_space<vmem>>, vector<8x128xf32>
    %56 = arith.mulf %54, %55 : vector<8x128xf32>
    %57 = arith.truncf %56 : vector<8x128xf32> to vector<8x128xbf16>
    %c0_31 = arith.constant 0 : index
    %c0_32 = arith.constant 0 : index
    %58 = vector.load %arg14[%c0_31, %c0_32] : memref<128x16xbf16, #tpu.memory_space<vmem>>, vector<128x16xbf16>
    %cst_33 = arith.constant dense<0.000000e+00> : vector<8x16xf32>
    %59 = tpu.matmul %57, %58, %cst_33 {dimension_numbers = #tpu.dot_dimension_numbers<[1], [0], [0], [1], [0, 0, 1, 1], [], []>} : vector<8x128xbf16>, vector<128x16xbf16>, vector<8x16xf32> -> vector<8x16xf32>
    %c0_34 = arith.constant 0 : index
    %c0_35 = arith.constant 0 : index
    %60 = vector.load %arg15[%c0_34, %c0_35] : memref<1x16xf32, #tpu.memory_space<vmem>>, vector<1x16xf32>
    %61 = vector.broadcast %60 : vector<1x16xf32> to vector<8x16xf32>
    %62 = arith.addf %59, %61 : vector<8x16xf32>
    %cst_36 = arith.constant 0.000000e+00 : f32
    %63 = vector.broadcast %cst_36 : f32 to vector<8x16xf32>
    %64 = arith.cmpf oge, %62, %63 : vector<8x16xf32>
    %cst_37 = arith.constant 0.00999999977 : f32
    %65 = vector.broadcast %cst_37 : f32 to vector<8x16xf32>
    %66 = arith.mulf %65, %62 : vector<8x16xf32>
    %67 = arith.select %64, %62, %66 : vector<8x16xi1>, vector<8x16xf32>
    %c0_38 = arith.constant 0 : index
    %c0_39 = arith.constant 0 : index
    %68 = vector.load %arg16[%c0_38, %c0_39] : memref<1x16xf32, #tpu.memory_space<vmem>>, vector<1x16xf32>
    %69 = vector.broadcast %68 : vector<1x16xf32> to vector<8x16xf32>
    %70 = arith.mulf %67, %69 : vector<8x16xf32>
    %c0_40 = arith.constant 0 : index
    %c0_41 = arith.constant 0 : index
    %71 = vector.load %arg17[%c0_40, %c0_41] : memref<1x16xf32, #tpu.memory_space<vmem>>, vector<1x16xf32>
    %72 = vector.broadcast %71 : vector<1x16xf32> to vector<8x16xf32>
    %73 = arith.addf %70, %72 : vector<8x16xf32>
    %c0_42 = arith.constant 0 : index
    %c0_43 = arith.constant 0 : index
    %74 = vector.load %arg4[%c0_42, %c0_43] : memref<8x16xf32, #tpu.memory_space<vmem>>, vector<8x16xf32>
    %75 = arith.mulf %73, %74 : vector<8x16xf32>
    %76 = arith.truncf %75 : vector<8x16xf32> to vector<8x16xbf16>
    %c0_44 = arith.constant 0 : index
    %c0_45 = arith.constant 0 : index
    %77 = vector.load %arg18[%c0_44, %c0_45] : memref<16x128xbf16, #tpu.memory_space<vmem>>, vector<16x128xbf16>
    %cst_46 = arith.constant dense<0.000000e+00> : vector<8x128xf32>
    %78 = tpu.matmul %76, %77, %cst_46 {dimension_numbers = #tpu.dot_dimension_numbers<[1], [0], [0], [1], [0, 0, 1, 1], [], []>} : vector<8x16xbf16>, vector<16x128xbf16>, vector<8x128xf32> -> vector<8x128xf32>
    %c0_47 = arith.constant 0 : index
    %c0_48 = arith.constant 0 : index
    %79 = vector.load %arg19[%c0_47, %c0_48] : memref<1x128xf32, #tpu.memory_space<vmem>>, vector<1x128xf32>
    %80 = vector.broadcast %79 : vector<1x128xf32> to vector<8x128xf32>
    %81 = arith.addf %78, %80 : vector<8x128xf32>
    %c0_49 = arith.constant 0 : index
    %c0_50 = arith.constant 0 : index
    %82 = vector.load %arg20[%c0_49, %c0_50] : memref<8x128xf32, #tpu.memory_space<vmem>>, vector<8x128xf32>
    tpu.vector_store %arg20[%c0_49, %c0_50], %81 {strides = array<i32>} : memref<8x128xf32, #tpu.memory_space<vmem>>, vector<8x128xf32>,
    return
  }
  func.func @transform_0(%arg0: i32) -> (i32, i32) {
    %c0_i32 = arith.constant 0 : i32
    %c0_i32_0 = arith.constant 0 : i32
    return %arg0, %c0_i32 : i32, i32
  }
  func.func @transform_1(%arg0: i32) -> (i32, i32) {
    %c0_i32 = arith.constant 0 : i32
    %c0_i32_0 = arith.constant 0 : i32
    return %arg0, %c0_i32 : i32, i32
  }
  func.func @transform_2(%arg0: i32) -> (i32, i32) {
    %c0_i32 = arith.constant 0 : i32
    %c0_i32_0 = arith.constant 0 : i32
    return %arg0, %c0_i32 : i32, i32
  }
  func.func @transform_3(%arg0: i32) -> (i32, i32) {
    %c0_i32 = arith.constant 0 : i32
    %c0_i32_0 = arith.constant 0 : i32
    return %arg0, %c0_i32 : i32, i32
  }
  func.func @transform_4(%arg0: i32) -> (i32, i32) {
    %c0_i32 = arith.constant 0 : i32
    %c0_i32_0 = arith.constant 0 : i32
    %c0_i32_1 = arith.constant 0 : i32
    return %c0_i32, %c0_i32_0 : i32, i32
  }
  func.func @transform_5(%arg0: i32) -> (i32, i32) {
    %c0_i32 = arith.constant 0 : i32
    %c0_i32_0 = arith.constant 0 : i32
    %c0_i32_1 = arith.constant 0 : i32
    return %c0_i32, %c0_i32_0 : i32, i32
  }
  func.func @transform_6(%arg0: i32) -> (i32, i32) {
    %c0_i32 = arith.constant 0 : i32
    %c0_i32_0 = arith.constant 0 : i32
    %c0_i32_1 = arith.constant 0 : i32
    return %c0_i32, %c0_i32_0 : i32, i32
  }
  func.func @transform_7(%arg0: i32) -> (i32, i32) {
    %c0_i32 = arith.constant 0 : i32
    %c0_i32_0 = arith.constant 0 : i32
    %c0_i32_1 = arith.constant 0 : i32
    return %c0_i32, %c0_i32_0 : i32, i32
  }
  func.func @transform_8(%arg0: i32) -> (i32, i32) {
    %c0_i32 = arith.constant 0 : i32
    %c0_i32_0 = arith.constant 0 : i32
    %c0_i32_1 = arith.constant 0 : i32
    return %c0_i32, %c0_i32_0 : i32, i32
  }
  func.func @transform_9(%arg0: i32) -> (i32, i32) {
    %c0_i32 = arith.constant 0 : i32
    %c0_i32_0 = arith.constant 0 : i32
    %c0_i32_1 = arith.constant 0 : i32
    return %c0_i32, %c0_i32_0 : i32, i32
  }
  func.func @transform_10(%arg0: i32) -> (i32, i32) {
    %c0_i32 = arith.constant 0 : i32
    %c0_i32_0 = arith.constant 0 : i32
    %c0_i32_1 = arith.constant 0 : i32
    return %c0_i32, %c0_i32_0 : i32, i32
  }
  func.func @transform_11(%arg0: i32) -> (i32, i32) {
    %c0_i32 = arith.constant 0 : i32
    %c0_i32_0 = arith.constant 0 : i32
    %c0_i32_1 = arith.constant 0 : i32
    return %c0_i32, %c0_i32_0 : i32, i32
  }
  func.func @transform_12(%arg0: i32) -> (i32, i32) {
    %c0_i32 = arith.constant 0 : i32
    %c0_i32_0 = arith.constant 0 : i32
    %c0_i32_1 = arith.constant 0 : i32
    return %c0_i32, %c0_i32_0 : i32, i32
  }
  func.func @transform_13(%arg0: i32) -> (i32, i32) {
    %c0_i32 = arith.constant 0 : i32
    %c0_i32_0 = arith.constant 0 : i32
    %c0_i32_1 = arith.constant 0 : i32
    return %c0_i32, %c0_i32_0 : i32, i32
  }
  func.func @transform_14(%arg0: i32) -> (i32, i32) {
    %c0_i32 = arith.constant 0 : i32
    %c0_i32_0 = arith.constant 0 : i32
    %c0_i32_1 = arith.constant 0 : i32
    return %c0_i32, %c0_i32_0 : i32, i32
  }
  func.func @transform_15(%arg0: i32) -> (i32, i32) {
    %c0_i32 = arith.constant 0 : i32
    %c0_i32_0 = arith.constant 0 : i32
    %c0_i32_1 = arith.constant 0 : i32
    return %c0_i32, %c0_i32_0 : i32, i32
  }
  func.func @transform_16(%arg0: i32) -> (i32, i32) {
    %c0_i32 = arith.constant 0 : i32
    %c0_i32_0 = arith.constant 0 : i32
    %c0_i32_1 = arith.constant 0 : i32
    return %c0_i32, %c0_i32_0 : i32, i32
  }
  func.func @transform_17(%arg0: i32) -> (i32, i32) {
    %c0_i32 = arith.constant 0 : i32
    %c0_i32_0 = arith.constant 0 : i32
    %c0_i32_1 = arith.constant 0 : i32
    return %c0_i32, %c0_i32_0 : i32, i32
  }
  func.func @transform_18(%arg0: i32) -> (i32, i32) {
    %c0_i32 = arith.constant 0 : i32
    %c0_i32_0 = arith.constant 0 : i32
    %c0_i32_1 = arith.constant 0 : i32
    return %c0_i32, %c0_i32_0 : i32, i32
  }
  func.func @transform_19(%arg0: i32) -> (i32, i32) {
    %c0_i32 = arith.constant 0 : i32
    %c0_i32_0 = arith.constant 0 : i32
    return %arg0, %c0_i32 : i32, i32
  }
}

</mosaic_0001>

<bundles_post_ra>
// kernel: tpu_custom_call.1
= control target key start
LH: loop header
LB: loop body
LE: loop exit
PB: predicated region body
PF: predicated region fallthrough
CT: control target
= control target key end

     0   :  { %s15472_s0 = inlined_call_operand.hbm [shape: f32[8,9], index: 0, kind: input, shape index: {}]   ;;  %s15473_s1 = inlined_call_operand.hbm [shape: bf16[8,729], index: 1, kind: input, shape index: {}]   ;;  %s15474_s2 = inlined_call_operand.hbm [shape: f32[8,128], index: 2, kind: input, shape index: {}]   ;;  %s15475_s3 = inlined_call_operand.hbm [shape: f32[8,16], index: 3, kind: input, shape index: {}]   ;;  %s15476_s4 = inlined_call_operand.hbm [shape: f32[9,100], index: 4, kind: input, shape index: {}]   ;;  %s15477_s5 = inlined_call_operand.hbm [shape: f32[1,100], index: 5, kind: input, shape index: {}]   ;;  %s15478_s6 = inlined_call_operand.hbm [shape: bf16[729,4096], index: 6, kind: input, shape index: {}]   ;;  %s15479_s7 = inlined_call_operand.hbm [shape: f32[1,4096], index: 7, kind: input, shape index: {}]   ;;  %s15480_s8 = inlined_call_operand.hbm [shape: bf16[100,128], index: 8, kind: input, shape index: {}]   ;;  %s15481_s9 = inlined_call_operand.hbm [shape: bf16[512,128], index: 9, kind: input, shape index: {}]   ;;  %s15482_s10 = inlined_call_operand.hbm [shape: f32[1,128], index: 10, kind: input, shape index: {}]   ;;  %s15483_s11 = inlined_call_operand.hbm [shape: f32[1,128], index: 11, kind: input, shape index: {}]   ;;  %s15484_s12 = inlined_call_operand.hbm [shape: f32[1,128], index: 12, kind: input, shape index: {}]   ;;  %s15485_s13 = inlined_call_operand.hbm [shape: bf16[128,16], index: 13, kind: input, shape index: {}]   ;;  %s15486_s14 = inlined_call_operand.hbm [shape: f32[1,16], index: 14, kind: input, shape index: {}]   ;;  %s15487_s15 = inlined_call_operand.hbm [shape: f32[1,16], index: 15, kind: input, shape index: {}]   ;;  %s15488_s16 = inlined_call_operand.hbm [shape: f32[1,16], index: 16, kind: input, shape index: {}]   ;;  %s15489_s17 = inlined_call_operand.hbm [shape: bf16[16,128], index: 17, kind: input, shape index: {}]   ;;  %s15490_s18 = inlined_call_operand.hbm [shape: f32[1,128], index: 18, kind: input, shape index: {}]   ;;  %s15491_s19 = inlined_call_operand.hbm [shape: f32[8,128], index: 19, kind: output, shape index: {}]  }
   0x1   :  { %15496 = sst [smem:[#allocation44_spill]] %s15472_s0 }
   0x2   :  { %15497 = sst [smem:[#allocation45_spill]] %s15473_s1 }
   0x3   :  { %15498 = sst [smem:[#allocation46_spill]] %s15474_s2 }
   0x4   :  { %15499 = sst [smem:[#allocation47_spill]] %s15475_s3 }
   0x5   :  { %24 = vsyncpa [#allocation3], 0 }
   0x6   :  { %25 = vsyncpa [#allocation6], 0 }
   0x7   :  { %26 = vsyncpa [#allocation9], 0 }
   0x8   :  { %27 = vsyncpa [#allocation12], 0 }
   0x9   :  { %28 = vsyncpa [#allocation15], 0 }
   0xa   :  { %29 = vsyncpa [#allocation18], 0 }
   0xb   :  { %30 = vsyncpa [#allocation21], 0 }
   0xc   :  { %31 = vsyncpa [#allocation24], 0 }
   0xd   :  { %32 = vsyncpa [#allocation27], 0 }
   0xe   :  { %33 = vsyncpa [#allocation30], 0 }
   0xf   :  { %34 = vsyncpa [#allocation4], 0  ;;  %s14642_s0 = smov [#allocation5]   ;;  %s14643_s20 = smov [#allocation8]  }
  0x10   :  { %s51_s30 = sshll.u32 %s14642_s0, 4  ;;  %s71_s21 = sshll.u32 %s14643_s20, 4  ;;  %s52_s30 = int_to_ptr.vmem [resolvable:$true] %s51_s30  ;;  %s72_s21 = int_to_ptr.vmem [resolvable:$true] %s71_s21 }
  0x11   :  { %s15500_s2 = sld [smem:[#allocation45_spill]] }
  0x17   :  { %s14180_s23 = scalar_lea.hbm %s15500_s2, 384 }
  0x18   :  { %p14181_p0 = scmp.ne.s32.totalorder %s15500_s2, %s14180_s23  ;;  %p14184_p1 = scmp.lt.u32.totalorder %s14180_s23, %s15500_s2 }
  0x1a   :  { %p14186_p2 = pnand %p14184_p1, %p14181_p0 }
  0x1c   :  { %14189 = shalt.err (!%p14186_p2)
}
  0x1d   :  { %s14190_s27 = scalar_lea.vmem %s52_s30, 384  ;;  %p14195_p4 = scmp.lt.s32.totalorder %s52_s30, %s52_s30 }
  0x1e   :  { %p14191_p3 = scmp.ne.s32.totalorder %s52_s30, %s14190_s27  ;;  %p14196_p5 = scmp.lt.s32.totalorder %s14190_s27, %s14190_s27 }
  0x20   :  { %p14197_p6 = por %p14196_p5, %p14195_p4 }
  0x22   :  { %p14198_p7 = pnand %p14197_p6, %p14191_p3 }
  0x24   :  { %14201 = shalt.err (!%p14198_p7)
}
  0x25   :  { %54 = dma.hbm_to_vmem [thread:$0]  %s15500_s2, 384, %s52_s30, [#allocation6]  }
  0x26   :  { %s15501_s1 = sld [smem:[#allocation47_spill]] }
  0x2c   :  { %s14202_s22 = scalar_lea.hbm %s15501_s1, 128 }
  0x2d   :  { %p14203_p8 = scmp.ne.s32.totalorder %s15501_s1, %s14202_s22  ;;  %p14206_p9 = scmp.lt.u32.totalorder %s14202_s22, %s15501_s1 }
  0x2f   :  { %p14208_p10 = pnand %p14206_p9, %p14203_p8 }
  0x31   :  { %14211 = shalt.err (!%p14208_p10)
}
  0x32   :  { %s14212_s26 = scalar_lea.vmem %s72_s21, 128  ;;  %p14217_p12 = scmp.lt.s32.totalorder %s72_s21, %s72_s21 }
  0x33   :  { %p14213_p11 = scmp.ne.s32.totalorder %s72_s21, %s14212_s26  ;;  %p14218_p13 = scmp.lt.s32.totalorder %s14212_s26, %s14212_s26 }
  0x35   :  { %p14219_p0 = por %p14218_p13, %p14217_p12 }
  0x37   :  { %p14220_p1 = pnand %p14219_p0, %p14213_p11 }
  0x39   :  { %14223 = shalt.err (!%p14220_p1)
}
  0x3a   :  { %74 = dma.hbm_to_vmem [thread:$0]  %s15501_s1, 128, %s72_s21, [#allocation9]  }
  0x3b   :  { %s14644_s27 = smov [#allocation11]   ;;  %s14645_s29 = smov [#allocation14]  }
  0x3c   :  { %s93_s28 = sshll.u32 %s14644_s27, 4  ;;  %s115_s0 = sshll.u32 %s14645_s29, 4  ;;  %s94_s28 = int_to_ptr.vmem [resolvable:$true] %s93_s28  ;;  %s116_s0 = int_to_ptr.vmem [resolvable:$true] %s115_s0 }
  0x3d   :  { %s14224_s24 = scalar_lea.hbm %s15477_s5, 16 }
  0x3e   :  { %p14225_p2 = scmp.ne.s32.totalorder %s15477_s5, %s14224_s24  ;;  %p14228_p3 = scmp.lt.u32.totalorder %s14224_s24, %s15477_s5 }
  0x40   :  { %p14230_p4 = pnand %p14228_p3, %p14225_p2 }
  0x42   :  { %14233 = shalt.err (!%p14230_p4)
}
  0x43   :  { %s14234_s21 = scalar_lea.vmem %s94_s28, 16  ;;  %s14238_s1 = scalar_lea.vmem %s94_s28, 32 }
  0x44   :  { %p14235_p5 = scmp.ne.s32.totalorder %s94_s28, %s14234_s21  ;;  %p14239_p6 = scmp.lt.s32.totalorder %s94_s28, %s94_s28 }
  0x45   :  { %p14240_p7 = scmp.lt.s32.totalorder %s14238_s1, %s14234_s21 }
  0x47   :  { %p14241_p8 = por %p14240_p7, %p14239_p6 }
  0x49   :  { %p14242_p9 = pnand %p14241_p8, %p14235_p5 }
  0x4b   :  { %14245 = shalt.err (!%p14242_p9)
}
  0x4c   :  { %96 = dma.hbm_to_vmem [thread:$0]  %s15477_s5, 16, %s94_s28, [#allocation12]  }
  0x4d   :  { %s14246_s20 = scalar_lea.hbm %s15479_s7, 512 }
  0x4e   :  { %p14247_p10 = scmp.ne.s32.totalorder %s15479_s7, %s14246_s20  ;;  %p14250_p11 = scmp.lt.u32.totalorder %s14246_s20, %s15479_s7 }
  0x50   :  { %p14252_p12 = pnand %p14250_p11, %p14247_p10 }
  0x52   :  { %14255 = shalt.err (!%p14252_p12)
}
  0x53   :  { %s14256_s3 = scalar_lea.vmem %s116_s0, 512  ;;  %p14261_p0 = scmp.lt.s32.totalorder %s116_s0, %s116_s0 }
  0x54   :  { %p14257_p13 = scmp.ne.s32.totalorder %s116_s0, %s14256_s3  ;;  %p14262_p1 = scmp.lt.s32.totalorder %s14256_s3, %s14256_s3 }
  0x56   :  { %p14263_p2 = por %p14262_p1, %p14261_p0 }
  0x58   :  { %p14264_p3 = pnand %p14263_p2, %p14257_p13 }
  0x5a   :  { %14267 = shalt.err (!%p14264_p3)
}
  0x5b   :  { %118 = dma.hbm_to_vmem [thread:$0]  %s15479_s7, 512, %s116_s0, [#allocation15]  }
  0x5c   :  { %s14646_s26 = smov [#allocation17]   ;;  %s14647_s1 = smov [#allocation20]  }
  0x5d   :  { %s136_s21 = sshll.u32 %s14646_s26, 4  ;;  %s159_s30 = sshll.u32 %s14647_s1, 4  ;;  %s137_s21 = int_to_ptr.vmem [resolvable:$true] %s136_s21  ;;  %s14820_s30 = int_to_ptr.vmem [resolvable:$true] %s159_s30 }
  0x5e   :  { %s14268_s29 = scalar_lea.hbm %s15481_s9, 4096 }
  0x5f   :  { %p14269_p4 = scmp.ne.s32.totalorder %s15481_s9, %s14268_s29  ;;  %p14272_p5 = scmp.lt.u32.totalorder %s14268_s29, %s15481_s9 }
  0x61   :  { %p14274_p6 = pnand %p14272_p5, %p14269_p4 }
  0x63   :  { %14277 = shalt.err (!%p14274_p6)
}
  0x64   :  { %s14278_s7 = scalar_lea.vmem %s137_s21, 4096  ;;  %p14283_p8 = scmp.lt.s32.totalorder %s137_s21, %s137_s21 }
  0x65   :  { %p14279_p7 = scmp.ne.s32.totalorder %s137_s21, %s14278_s7  ;;  %p14284_p9 = scmp.lt.s32.totalorder %s14278_s7, %s14278_s7 }
  0x67   :  { %p14285_p10 = por %p14284_p9, %p14283_p8 }
  0x69   :  { %p14286_p11 = pnand %p14285_p10, %p14279_p7 }
  0x6b   :  { %14289 = shalt.err (!%p14286_p11)
}
  0x6c   :  { %s14648_s0 = smov 64   ;;  %s14649_s23 = smov 4  }
  0x6d   :  { %142 = dma.hbm_to_vmem [thread:$0]  %s15481_s9, 4096, %s137_s21, [#allocation18], %s14648_s0, %s14648_s0, %s14649_s23  }
  0x6e   :  { %s14290_s1 = scalar_lea.hbm %s15483_s11, 16 }
  0x6f   :  { %p14291_p12 = scmp.ne.s32.totalorder %s15483_s11, %s14290_s1  ;;  %p14294_p13 = scmp.lt.u32.totalorder %s14290_s1, %s15483_s11 }
  0x71   :  { %p14296_p0 = pnand %p14294_p13, %p14291_p12 }
  0x73   :  { %14299 = shalt.err (!%p14296_p0)
}
  0x74   :  { %s14300_s22 = scalar_lea.vmem %s14820_s30, 16  ;;  %s14304_s9 = scalar_lea.vmem %s14820_s30, 32 }
  0x75   :  { %p14301_p1 = scmp.ne.s32.totalorder %s14820_s30, %s14300_s22  ;;  %p14305_p2 = scmp.lt.s32.totalorder %s14820_s30, %s14820_s30 }
  0x76   :  { %p14306_p3 = scmp.lt.s32.totalorder %s14304_s9, %s14300_s22 }
  0x78   :  { %p14307_p4 = por %p14306_p3, %p14305_p2 }
  0x7a   :  { %p14308_p5 = pnand %p14307_p4, %p14301_p1 }
  0x7c   :  { %14311 = shalt.err (!%p14308_p5)
}
  0x7d   :  { %162 = dma.hbm_to_vmem [thread:$0]  %s15483_s11, 16, %s14820_s30, [#allocation21]  }
  0x7e   :  { %s14650_s25 = smov [#allocation23]   ;;  %s14651_s3 = smov [#allocation26]  }
  0x7f   :  { %s178_s7 = sshll.u32 %s14650_s25, 4  ;;  %s201_s5 = sshll.u32 %s14651_s3, 4  ;;  %s179_s7 = int_to_ptr.vmem [resolvable:$true] %s178_s7  ;;  %s202_s5 = int_to_ptr.vmem [resolvable:$true] %s201_s5 }
  0x80   :  { %s14312_s1 = scalar_lea.hbm %s15485_s13, 1024 }
  0x81   :  { %p14313_p6 = scmp.ne.s32.totalorder %s15485_s13, %s14312_s1  ;;  %p14316_p7 = scmp.lt.u32.totalorder %s14312_s1, %s15485_s13 }
  0x83   :  { %p14318_p8 = pnand %p14316_p7, %p14313_p6 }
  0x85   :  { %14321 = shalt.err (!%p14318_p8)
}
  0x86   :  { %s14322_s11 = scalar_lea.vmem %s179_s7, 1024  ;;  %p14327_p10 = scmp.lt.s32.totalorder %s179_s7, %s179_s7 }
  0x87   :  { %p14323_p9 = scmp.ne.s32.totalorder %s179_s7, %s14322_s11  ;;  %p14328_p11 = scmp.lt.s32.totalorder %s14322_s11, %s14322_s11 }
  0x89   :  { %p14329_p12 = por %p14328_p11, %p14327_p10 }
  0x8b   :  { %p14330_p13 = pnand %p14329_p12, %p14323_p9 }
  0x8d   :  { %14333 = shalt.err (!%p14330_p13)
}
  0x8e   :  { %184 = dma.hbm_to_vmem [thread:$0]  %s15485_s13, 1024, %s179_s7, [#allocation24], %s14648_s0, %s14648_s0, %s14649_s23  }
  0x8f   :  { %s14334_s24 = scalar_lea.hbm %s15487_s15, 16 }
  0x90   :  { %p14335_p0 = scmp.ne.s32.totalorder %s15487_s15, %s14334_s24  ;;  %p14338_p1 = scmp.lt.u32.totalorder %s14334_s24, %s15487_s15 }
  0x92   :  { %p14340_p2 = pnand %p14338_p1, %p14335_p0 }
  0x94   :  { %14343 = shalt.err (!%p14340_p2)
}
  0x95   :  { %s14344_s1 = scalar_lea.vmem %s202_s5, 16  ;;  %s14348_s2 = scalar_lea.vmem %s202_s5, 32 }
  0x96   :  { %p14345_p3 = scmp.ne.s32.totalorder %s202_s5, %s14344_s1  ;;  %p14349_p4 = scmp.lt.s32.totalorder %s202_s5, %s202_s5 }
  0x97   :  { %p14350_p5 = scmp.lt.s32.totalorder %s14348_s2, %s14344_s1 }
  0x99   :  { %p14351_p6 = por %p14350_p5, %p14349_p4 }
  0x9b   :  { %p14352_p7 = pnand %p14351_p6, %p14345_p3 }
  0x9d   :  { %14355 = shalt.err (!%p14352_p7)
}
  0x9e   :  { %204 = dma.hbm_to_vmem [thread:$0]  %s15487_s15, 16, %s202_s5, [#allocation27]  }
  0x9f   :  { %s14652_s27 = smov [#allocation29]   ;;  %s14653_s20 = smov [#allocation2]  }
  0xa0   :  { %s220_s29 = sshll.u32 %s14652_s27, 4  ;;  %s41_s11 = sshll.u32 %s14653_s20, 4  ;;  %s221_s29 = int_to_ptr.vmem [resolvable:$true] %s220_s29  ;;  %s42_s11 = int_to_ptr.vmem [resolvable:$true] %s41_s11 }
  0xa1   :  { %s14356_s9 = scalar_lea.hbm %s15489_s17, 128 }
  0xa2   :  { %p14357_p8 = scmp.ne.s32.totalorder %s15489_s17, %s14356_s9  ;;  %p14360_p9 = scmp.lt.u32.totalorder %s14356_s9, %s15489_s17 }
  0xa4   :  { %p14362_p10 = pnand %p14360_p9, %p14357_p8 }
  0xa6   :  { %14365 = shalt.err (!%p14362_p10)
}
  0xa7   :  { %s14366_s15 = scalar_lea.vmem %s221_s29, 128  ;;  %p14371_p12 = scmp.lt.s32.totalorder %s221_s29, %s221_s29 }
  0xa8   :  { %p14367_p11 = scmp.ne.s32.totalorder %s221_s29, %s14366_s15  ;;  %p14372_p13 = scmp.lt.s32.totalorder %s14366_s15, %s14366_s15 }
  0xaa   :  { %p14373_p0 = por %p14372_p13, %p14371_p12 }
  0xac   :  { %p14374_p1 = pnand %p14373_p0, %p14367_p11 }
  0xae   :  { %14377 = shalt.err (!%p14374_p1)
}
  0xaf   :  { %226 = dma.hbm_to_vmem [thread:$0]  %s15489_s17, 128, %s221_s29, [#allocation30], %s14648_s0, %s14648_s0, %s14649_s23  }
  0xb0   :  { %s15502_s2 = sld [smem:[#allocation44_spill]] }
  0xb6   :  { %s14378_s13 = scalar_lea.hbm %s15502_s2, 128 }
  0xb7   :  { %p14379_p2 = scmp.ne.s32.totalorder %s15502_s2, %s14378_s13  ;;  %p14382_p3 = scmp.lt.u32.totalorder %s14378_s13, %s15502_s2 }
  0xb9   :  { %p14384_p4 = pnand %p14382_p3, %p14379_p2 }
  0xbb   :  { %14387 = shalt.err (!%p14384_p4)
}
  0xbc   :  { %s14388_s22 = scalar_lea.vmem %s42_s11, 128  ;;  %p14393_p6 = scmp.lt.s32.totalorder %s42_s11, %s42_s11 }
  0xbd   :  { %p14389_p5 = scmp.ne.s32.totalorder %s42_s11, %s14388_s22  ;;  %p14394_p7 = scmp.lt.s32.totalorder %s14388_s22, %s14388_s22 }
  0xbf   :  { %p14395_p8 = por %p14394_p7, %p14393_p6 }
  0xc1   :  { %p14396_p9 = pnand %p14395_p8, %p14389_p5 }
  0xc3   :  { %14399 = shalt.err (!%p14396_p9)
}
  0xc4   :  { %44 = dma.hbm_to_vmem [thread:$0]  %s15502_s2, 128, %s42_s11, [#allocation3]  }
  0xc5   :  { %s14654_s9 = smov [#allocation7]   ;;  %s14655_s24 = smov [#allocation10]  }
  0xc6   :  { %s61_s21 = sshll.u32 %s14654_s9, 4  ;;  %s80_s25 = sshll.u32 %s14655_s24, 4  ;;  %s62_s21 = int_to_ptr.vmem [resolvable:$true] %s61_s21  ;;  %s14909_s25 = int_to_ptr.vmem [resolvable:$true] %s80_s25 }
  0xc7   :  { %s15503_s5 = sld [smem:[#allocation46_spill]] }
  0xcd   :  { %s14400_s28 = scalar_lea.hbm %s15503_s5, 128 }
  0xce   :  { %p14401_p10 = scmp.ne.s32.totalorder %s15503_s5, %s14400_s28  ;;  %p14404_p11 = scmp.lt.u32.totalorder %s14400_s28, %s15503_s5 }
  0xd0   :  { %p14406_p12 = pnand %p14404_p11, %p14401_p10 }
  0xd2   :  { %14409 = shalt.err (!%p14406_p12)
}
  0xd3   :  { %s14410_s11 = scalar_lea.vmem %s62_s21, 128  ;;  %p14415_p0 = scmp.lt.s32.totalorder %s62_s21, %s62_s21 }
  0xd4   :  { %p14411_p13 = scmp.ne.s32.totalorder %s62_s21, %s14410_s11  ;;  %p14416_p1 = scmp.lt.s32.totalorder %s14410_s11, %s14410_s11 }
  0xd6   :  { %p14417_p2 = por %p14416_p1, %p14415_p0 }
  0xd8   :  { %p14418_p3 = pnand %p14417_p2, %p14411_p13 }
  0xda   :  { %14421 = shalt.err (!%p14418_p3)
}
  0xdb   :  { %64 = dma.hbm_to_vmem [thread:$0]  %s15503_s5, 128, %s62_s21, [#allocation6]  }
  0xdc   :  { %s14422_s22 = scalar_lea.hbm %s15476_s4, 256 }
  0xdd   :  { %p14423_p4 = scmp.ne.s32.totalorder %s15476_s4, %s14422_s22  ;;  %p14426_p5 = scmp.lt.u32.totalorder %s14422_s22, %s15476_s4 }
  0xdf   :  { %p14428_p6 = pnand %p14426_p5, %p14423_p4 }
  0xe1   :  { %14431 = shalt.err (!%p14428_p6)
}
  0xe2   :  { %s14432_s3 = scalar_lea.vmem %s14909_s25, 256  ;;  %p14437_p8 = scmp.lt.s32.totalorder %s14909_s25, %s14909_s25 }
  0xe3   :  { %p14433_p7 = scmp.ne.s32.totalorder %s14909_s25, %s14432_s3  ;;  %p14438_p9 = scmp.lt.s32.totalorder %s14432_s3, %s14432_s3 }
  0xe5   :  { %p14439_p10 = por %p14438_p9, %p14437_p8 }
  0xe7   :  { %p14440_p11 = pnand %p14439_p10, %p14433_p7 }
  0xe9   :  { %14443 = shalt.err (!%p14440_p11)
}
  0xea   :  { %s14656_s21 = smov 128   ;;  %s14657_s15 = smov 8  }
  0xeb   :  { %86 = dma.hbm_to_vmem [thread:$0]  %s15476_s4, 256, %s14909_s25, [#allocation9], %s14656_s21, %s14656_s21, %s14657_s15  }
  0xec   :  { %s14658_s26 = smov [#allocation13]   ;;  %s14659_s13 = smov [#allocation16]  }
  0xed   :  { %s102_s1 = sshll.u32 %s14658_s26, 4  ;;  %s124_s7 = sshll.u32 %s14659_s13, 4  ;;  %s103_s1 = int_to_ptr.vmem [resolvable:$true] %s102_s1  ;;  %s125_s7 = int_to_ptr.vmem [resolvable:$true] %s124_s7 }
  0xee   :  { %s14444_s27 = scalar_lea.hbm %s15478_s6, 188416 }
  0xef   :  { %p14445_p12 = scmp.ne.s32.totalorder %s15478_s6, %s14444_s27  ;;  %p14448_p13 = scmp.lt.u32.totalorder %s14444_s27, %s15478_s6 }
  0xf1   :  { %p14450_p0 = pnand %p14448_p13, %p14445_p12 }
  0xf3   :  { %14453 = shalt.err (!%p14450_p0)
}
  0xf4   :  { %s14454_s4 = scalar_lea.vmem %s103_s1, 188416  ;;  %p14459_p2 = scmp.lt.s32.totalorder %s103_s1, %s103_s1 }
  0xf5   :  { %p14455_p1 = scmp.ne.s32.totalorder %s103_s1, %s14454_s4  ;;  %p14460_p3 = scmp.lt.s32.totalorder %s14454_s4, %s14454_s4 }
  0xf7   :  { %p14461_p4 = por %p14460_p3, %p14459_p2 }
  0xf9   :  { %p14462_p5 = pnand %p14461_p4, %p14455_p1 }
  0xfb   :  { %14465 = shalt.err (!%p14462_p5)
}
  0xfc   :  { %s14660_s25 = smov 2048   ;;  %s14466_s15 = scalar_lea.hbm %s15480_s8, 832 }
  0xfd   :  { %108 = dma.hbm_to_vmem [thread:$0]  %s15478_s6, 188416, %s103_s1, [#allocation12], %s14660_s25, %s14660_s25, %s14656_s21  }
  0xfe   :  { %p14467_p6 = scmp.ne.s32.totalorder %s15480_s8, %s14466_s15  ;;  %p14470_p7 = scmp.lt.u32.totalorder %s14466_s15, %s15480_s8 }
 0x100   :  { %p14472_p8 = pnand %p14470_p7, %p14467_p6 }
 0x102   :  { %14475 = shalt.err (!%p14472_p8)
}
 0x103   :  { %s14476_s11 = scalar_lea.vmem %s125_s7, 832  ;;  %p14481_p10 = scmp.lt.s32.totalorder %s125_s7, %s125_s7 }
 0x104   :  { %p14477_p9 = scmp.ne.s32.totalorder %s125_s7, %s14476_s11  ;;  %p14482_p11 = scmp.lt.s32.totalorder %s14476_s11, %s14476_s11 }
 0x106   :  { %p14483_p12 = por %p14482_p11, %p14481_p10 }
 0x108   :  { %p14484_p13 = pnand %p14483_p12, %p14477_p9 }
 0x10a   :  { %14487 = shalt.err (!%p14484_p13)
}
 0x10b   :  { %130 = dma.hbm_to_vmem [thread:$0]  %s15480_s8, 832, %s125_s7, [#allocation15], %s14648_s0, %s14648_s0, %s14649_s23  }
 0x10c   :  { %s14661_s1 = smov [#allocation19]   ;;  %s14662_s27 = smov [#allocation22]  }
 0x10d   :  { %s149_s2 = sshll.u32 %s14661_s1, 4  ;;  %s169_s20 = sshll.u32 %s14662_s27, 4  ;;  %s150_s2 = int_to_ptr.vmem [resolvable:$true] %s149_s2  ;;  %s170_s20 = int_to_ptr.vmem [resolvable:$true] %s169_s20 }
 0x10e   :  { %s14488_s17 = scalar_lea.hbm %s15482_s10, 16 }
 0x10f   :  { %p14489_p0 = scmp.ne.s32.totalorder %s15482_s10, %s14488_s17  ;;  %p14492_p1 = scmp.lt.u32.totalorder %s14488_s17, %s15482_s10 }
 0x111   :  { %p14494_p2 = pnand %p14492_p1, %p14489_p0 }
 0x113   :  { %14497 = shalt.err (!%p14494_p2)
}
 0x114   :  { %s14498_s8 = scalar_lea.vmem %s150_s2, 16  ;;  %s14502_s0 = scalar_lea.vmem %s150_s2, 32 }
 0x115   :  { %p14499_p3 = scmp.ne.s32.totalorder %s150_s2, %s14498_s8  ;;  %p14503_p4 = scmp.lt.s32.totalorder %s150_s2, %s150_s2 }
 0x116   :  { %p14504_p5 = scmp.lt.s32.totalorder %s14502_s0, %s14498_s8 }
 0x118   :  { %p14505_p6 = por %p14504_p5, %p14503_p4 }
 0x11a   :  { %p14506_p7 = pnand %p14505_p6, %p14499_p3 }
 0x11c   :  { %14509 = shalt.err (!%p14506_p7)
}
 0x11d   :  { %152 = dma.hbm_to_vmem [thread:$0]  %s15482_s10, 16, %s150_s2, [#allocation18]  }
 0x11e   :  { %s14510_s15 = scalar_lea.hbm %s15484_s12, 16 }
 0x11f   :  { %p14511_p8 = scmp.ne.s32.totalorder %s15484_s12, %s14510_s15  ;;  %p14514_p9 = scmp.lt.u32.totalorder %s14510_s15, %s15484_s12 }
 0x121   :  { %p14516_p10 = pnand %p14514_p9, %p14511_p8 }
 0x123   :  { %14519 = shalt.err (!%p14516_p10)
}
 0x124   :  { %s14520_s11 = scalar_lea.vmem %s170_s20, 16  ;;  %s14524_s6 = scalar_lea.vmem %s170_s20, 32 }
 0x125   :  { %p14521_p11 = scmp.ne.s32.totalorder %s170_s20, %s14520_s11  ;;  %p14525_p12 = scmp.lt.s32.totalorder %s170_s20, %s170_s20 }
 0x126   :  { %p14526_p13 = scmp.lt.s32.totalorder %s14524_s6, %s14520_s11 }
 0x128   :  { %p14527_p0 = por %p14526_p13, %p14525_p12 }
 0x12a   :  { %p14528_p1 = pnand %p14527_p0, %p14521_p11 }
 0x12c   :  { %14531 = shalt.err (!%p14528_p1)
}
 0x12d   :  { %172 = dma.hbm_to_vmem [thread:$0]  %s15484_s12, 16, %s170_s20, [#allocation21]  }
 0x12e   :  { %s14663_s1 = smov [#allocation25]   ;;  %s14664_s27 = smov [#allocation28]  }
 0x12f   :  { %s191_s2 = sshll.u32 %s14663_s1, 4  ;;  %s211_s30 = sshll.u32 %s14664_s27, 4  ;;  %s192_s2 = int_to_ptr.vmem [resolvable:$true] %s191_s2  ;;  %s212_s30 = int_to_ptr.vmem [resolvable:$true] %s211_s30 }
 0x130   :  { %s14532_s4 = scalar_lea.hbm %s15486_s14, 16 }
 0x131   :  { %p14533_p2 = scmp.ne.s32.totalorder %s15486_s14, %s14532_s4  ;;  %p14536_p3 = scmp.lt.u32.totalorder %s14532_s4, %s15486_s14 }
 0x133   :  { %p14538_p4 = pnand %p14536_p3, %p14533_p2 }
 0x135   :  { %14541 = shalt.err (!%p14538_p4)
}
 0x136   :  { %s14542_s12 = scalar_lea.vmem %s192_s2, 16  ;;  %s14546_s20 = scalar_lea.vmem %s192_s2, 32 }
 0x137   :  { %p14543_p5 = scmp.ne.s32.totalorder %s192_s2, %s14542_s12  ;;  %p14547_p6 = scmp.lt.s32.totalorder %s192_s2, %s192_s2 }
 0x138   :  { %p14548_p7 = scmp.lt.s32.totalorder %s14546_s20, %s14542_s12 }
 0x13a   :  { %p14549_p8 = por %p14548_p7, %p14547_p6 }
 0x13c   :  { %p14550_p9 = pnand %p14549_p8, %p14543_p5 }
 0x13e   :  { %14553 = shalt.err (!%p14550_p9)
}
 0x13f   :  { %194 = dma.hbm_to_vmem [thread:$0]  %s15486_s14, 16, %s192_s2, [#allocation24]  }
 0x140   :  { %s14554_s3 = scalar_lea.hbm %s15488_s16, 16 }
 0x141   :  { %p14555_p10 = scmp.ne.s32.totalorder %s15488_s16, %s14554_s3  ;;  %p14558_p11 = scmp.lt.u32.totalorder %s14554_s3, %s15488_s16 }
 0x143   :  { %p14560_p12 = pnand %p14558_p11, %p14555_p10 }
 0x145   :  { %14563 = shalt.err (!%p14560_p12)
}
 0x146   :  { %s14564_s13 = scalar_lea.vmem %s212_s30, 16  ;;  %s14568_s11 = scalar_lea.vmem %s212_s30, 32 }
 0x147   :  { %p14565_p13 = scmp.ne.s32.totalorder %s212_s30, %s14564_s13  ;;  %p14569_p0 = scmp.lt.s32.totalorder %s212_s30, %s212_s30 }
 0x148   :  { %p14570_p1 = scmp.lt.s32.totalorder %s14568_s11, %s14564_s13 }
 0x14a   :  { %p14571_p2 = por %p14570_p1, %p14569_p0 }
 0x14c   :  { %p14572_p3 = pnand %p14571_p2, %p14565_p13 }
 0x14e   :  { %14575 = shalt.err (!%p14572_p3)
}
 0x14f   :  { %214 = dma.hbm_to_vmem [thread:$0]  %s15488_s16, 16, %s212_s30, [#allocation27]  }
 0x150   :  { %s14665_s10 = smov [#allocation31]   ;;  %s14576_s27 = scalar_lea.hbm %s15490_s18, 16 }
 0x151   :  { %s233_s21 = sshll.u32 %s14665_s10, 4  ;;  %p14577_p4 = scmp.ne.s32.totalorder %s15490_s18, %s14576_s27  ;;  %s234_s21 = int_to_ptr.vmem [resolvable:$true] %s233_s21 }
 0x152   :  { %p14580_p5 = scmp.lt.u32.totalorder %s14576_s27, %s15490_s18 }
 0x154   :  { %p14582_p6 = pnand %p14580_p5, %p14577_p4 }
 0x156   :  { %14585 = shalt.err (!%p14582_p6)
}
 0x157   :  { %s14586_s29 = scalar_lea.vmem %s234_s21, 16  ;;  %s14590_s16 = scalar_lea.vmem %s234_s21, 32 }
 0x158   :  { %p14587_p7 = scmp.ne.s32.totalorder %s234_s21, %s14586_s29  ;;  %p14591_p8 = scmp.lt.s32.totalorder %s234_s21, %s234_s21 }
 0x159   :  { %p14592_p9 = scmp.lt.s32.totalorder %s14590_s16, %s14586_s29 }
 0x15b   :  { %p14593_p10 = por %p14592_p9, %p14591_p8 }
 0x15d   :  { %p14594_p11 = pnand %p14593_p10, %p14587_p7 }
 0x15f   :  { %14597 = shalt.err (!%p14594_p11)
}
 0x160   :  { %236 = dma.hbm_to_vmem [thread:$0]  %s15490_s18, 16, %s234_s21, [#allocation30]  }
 0x161   :  { %14620 = dma.done.wait [#allocation3], 128  }
 0x162   :  { %14621 = vsyncadd [#allocation3], 4294967168 }
 0x163   :  { %14622 = dma.done.wait [#allocation6], 512  }
 0x164   :  { %14623 = vsyncadd [#allocation6], 4294966784 }
 0x165   :  { %14624 = dma.done.wait [#allocation9], 384  }
 0x166   :  { %14625 = vsyncadd [#allocation9], 4294966912 }
 0x167   :  { %14626 = dma.done.wait [#allocation12], 188432  }
 0x168   :  { %14627 = vsyncadd [#allocation12], 4294778864 }
 0x169   :  { %14628 = dma.done.wait [#allocation15], 1344  }
 0x16a   :  { %14629 = vsyncadd [#allocation15], 4294965952 }
 0x16b   :  { %14630 = dma.done.wait [#allocation18], 4112  }
 0x16c   :  { %14631 = vsyncadd [#allocation18], 4294963184 }
 0x16d   :  { %14632 = dma.done.wait [#allocation21], 32  }
 0x16e   :  { %14633 = vsyncadd [#allocation21], 4294967264 }
 0x16f   :  { %14634 = dma.done.wait [#allocation24], 1040  }
 0x170   :  { %14635 = vsyncadd [#allocation24], 4294966256 }
 0x171   :  { %14636 = dma.done.wait [#allocation27], 32  }
 0x172   :  { %14637 = vsyncadd [#allocation27], 4294967264 }
 0x173   :  { %14638 = dma.done.wait [#allocation30], 144  }
 0x174   :  { %14639 = vsyncadd [#allocation30], 4294967152  ;;  %v14666_v0 = vmov 0.0|0.0   ;;  %vm14667_vm0 = vmmov 0   ;;  %v14668_v1 = vmov 0.0   ;;  %vm309_vm1 = vcmask 1040384  }
 0x175   :  { %13930 = vmatprep.subr.bf16.mxu0 %v14666_v0  ;;  %13883 = vmatprep.mubr.msk.f32.mxu0 %vm14667_vm0, %v14668_v1  ;;  %vm14669_vm2 = vmmov 1   ;;  %v296_v2 = vld [vmem:[#allocation10] sm:$0xff]  ;;  %v297_v3 = vld [vmem:[#allocation10 + $0x8] sm:$0x1]  ;;  %v387_v4 = vld [vmem:[#allocation13] sm:$0xff]  ;;  %vm305_vm4 = vcmask 72704  }
 0x176   :  { %vm13932_vm3 = vmpackc.low %vm309_vm1, %vm14669_vm2  ;;  %v13931_v5 = vpack.c.bf16 %v297_v3, %v296_v2  ;;  %v403_v6 = vld [vmem:[#allocation13 + $0x80] sm:$0xff]  ;;  %v388_v7 = vld [vmem:[#allocation13 + $0x8] sm:$0xff]  ;;  %vm9375_vm5 = vcmask 728064   ;;  %vm9379_vm6 = vcmask 1043456   ;;  %vm9380_vm7 = vcmask 1044480   ;;  %s14671_s18 = smov [#allocation32]  }
 0x177   :  { %v404_v8 = vld [vmem:[#allocation13 + $0x88] sm:$0xff]  ;;  %v12269_v9 = vcombine.high %v387_v4, %v403_v6  ;;  %v12268_v10 = vcombine.low %v387_v4, %v403_v6  ;;  %v295_v12 = vld [vmem:[#allocation2] sm:$0xff]  ;;  %s12241_s8 = sshll.u32 %s14671_s18, 4  ;;  %s12242_s8 = int_to_ptr.vmem [resolvable:$true] %s12241_s8 }
 0x178   :  { %v12271_v11 = vcombine.high %v388_v7, %v404_v8  ;;  %v419_v13 = vld [vmem:[#allocation13 + $0x100] sm:$0xff]  ;;  %13933 = vmatpush3.bf16.msk.msra.mxu0 %vm13932_vm3, %v13931_v5  ;;  %v12270_v15 = vcombine.low %v388_v7, %v404_v8  ;;  %v420_v17 = vld [vmem:[#allocation13 + $0x108] sm:$0xff]  ;;  %s14598_s12 = scalar_lea.vmem %s12242_s8, 128  ;;  %p14603_p13 = scmp.lt.s32.totalorder %s12242_s8, %s12242_s8 }
 0x179   :  { %v435_v14 = vld [vmem:[#allocation13 + $0x180] sm:$0xff]  ;;  %v436_v18 = vld [vmem:[#allocation13 + $0x188] sm:$0xff]  ;;  %9479 = vmatprep.subr.bf16.mxu1 %v12269_v9  ;;  %p14599_p12 = scmp.ne.s32.totalorder %s12242_s8, %s14598_s12  ;;  %p14604_p0 = scmp.lt.s32.totalorder %s14598_s12, %s14598_s12 }
 0x17a   :  { %v12301_v16 = vcombine.high %v419_v13, %v435_v14  ;;  %v451_v19 = vld [vmem:[#allocation13 + $0x200] sm:$0xff]  ;;  %9602 = vmatprep.subr.bf16.mxu0 %v12271_v11  ;;  %v12303_v20 = vcombine.high %v420_v17, %v436_v18  ;;  %9480 = vmatpush1.bf16.msra.mxu1 %v12268_v10  ;;  %v12300_v22 = vcombine.low %v419_v13, %v435_v14  ;;  %v452_v23 = vld [vmem:[#allocation13 + $0x208] sm:$0xff] }
 0x17b   :  { %v467_v21 = vld [vmem:[#allocation13 + $0x280] sm:$0xff]  ;;  %v468_v24 = vld [vmem:[#allocation13 + $0x288] sm:$0xff]  ;;  %13884 = vmatmul.mubr.msk.f32.vlgmr.msra.gmra.mrb[0].mxu0 %vm305_vm4, %v295_v12  ;;  %v12302_v26 = vcombine.low %v420_v17, %v436_v18  ;;  %p14605_p1 = por %p14604_p0, %p14603_p13 }
 0x17c   :  { %9481 = vmatprep.subr.bf16.mxu1 %v12301_v16  ;;  %v12333_v25 = vcombine.high %v451_v19, %v467_v21  ;;  %9603 = vmatpush1.bf16.msra.mxu0 %v12270_v15  ;;  %v483_v27 = vld [vmem:[#allocation13 + $0x300] sm:$0xff]  ;;  %v12335_v29 = vcombine.high %v452_v23, %v468_v24  ;;  %v12332_v30 = vcombine.low %v451_v19, %v467_v21  ;;  %v484_v31 = vld [vmem:[#allocation13 + $0x308] sm:$0xff] }
 0x17d   :  { %v499_v28 = vld [vmem:[#allocation13 + $0x380] sm:$0xff]  ;;  %9604 = vmatprep.subr.bf16.mxu0 %v12303_v20  ;;  %v500_v32 = vld [vmem:[#allocation13 + $0x388] sm:$0xff]  ;;  %v12334_v34 = vcombine.low %v452_v23, %v468_v24  ;;  %p14606_p2 = pnand %p14605_p1, %p14599_p12 }
 0x17e   :  { %9482 = vmatpush1.bf16.msra.mxu1 %v12300_v22  ;;  %v12365_v33 = vcombine.high %v483_v27, %v499_v28  ;;  %v515_v35 = vld [vmem:[#allocation13 + $0x400] sm:$0xff]  ;;  %v12367_v37 = vcombine.high %v484_v31, %v500_v32  ;;  %v12364_v38 = vcombine.low %v483_v27, %v499_v28  ;;  %v516_v39 = vld [vmem:[#allocation13 + $0x408] sm:$0xff]  ;;  %v12366_v42 = vcombine.low %v484_v31, %v500_v32 }
 0x17f   :  { %9483 = vmatprep.subr.bf16.mxu1 %v12333_v25  ;;  %v531_v36 = vld [vmem:[#allocation13 + $0x480] sm:$0xff]  ;;  %v532_v40 = vld [vmem:[#allocation13 + $0x488] sm:$0xff] }
 0x180   :  { %9605 = vmatpush1.bf16.msra.mxu0 %v12302_v26  ;;  %v12397_v41 = vcombine.high %v515_v35, %v531_v36  ;;  %v547_v43 = vld [vmem:[#allocation13 + $0x500] sm:$0xff]  ;;  %v12399_v45 = vcombine.high %v516_v39, %v532_v40  ;;  %v12396_v46 = vcombine.low %v515_v35, %v531_v36  ;;  %v548_v47 = vld [vmem:[#allocation13 + $0x508] sm:$0xff]  ;;  %v12398_v50 = vcombine.low %v516_v39, %v532_v40 }
 0x181   :  { %9606 = vmatprep.subr.bf16.mxu0 %v12335_v29  ;;  %v563_v44 = vld [vmem:[#allocation13 + $0x580] sm:$0xff]  ;;  %v564_v48 = vld [vmem:[#allocation13 + $0x588] sm:$0xff] }
 0x182   :  { %9484 = vmatpush1.bf16.msra.mxu1 %v12332_v30  ;;  %v12429_v49 = vcombine.high %v547_v43, %v563_v44  ;;  %v579_v51 = vld [vmem:[#allocation13 + $0x600] sm:$0xff]  ;;  %v12431_v53 = vcombine.high %v548_v47, %v564_v48  ;;  %v12428_v54 = vcombine.low %v547_v43, %v563_v44  ;;  %v580_v55 = vld [vmem:[#allocation13 + $0x608] sm:$0xff]  ;;  %v12430_v59 = vcombine.low %v548_v47, %v564_v48 }
 0x183   :  { %9485 = vmatprep.subr.bf16.mxu1 %v12365_v33  ;;  %v595_v52 = vld [vmem:[#allocation13 + $0x680] sm:$0xff]  ;;  %v596_v56 = vld [vmem:[#allocation13 + $0x688] sm:$0xff] }
 0x184   :  { %9607 = vmatpush1.bf16.msra.mxu0 %v12334_v34  ;;  %v12461_v57 = vcombine.high %v579_v51, %v595_v52  ;;  %v15029_v58 = vld [vmem:[#allocation5] sm:$0xff]  ;;  %v12463_v63 = vcombine.high %v580_v55, %v596_v56  ;;  %v12460_v0 = vcombine.low %v579_v51, %v595_v52  ;;  %v12462_v5 = vcombine.low %v580_v55, %v596_v56 }
 0x185   :  { %9608 = vmatprep.subr.bf16.mxu0 %v12367_v37  ;;  %v611_v60 = vld [vmem:[#allocation13 + $0x700] sm:$0xff]  ;;  %v15033_v62 = vcombine.high %v15029_v58, %v15029_v58  ;;  %v612_v2 = vld [vmem:[#allocation13 + $0x708] sm:$0xff] }
 0x186   :  { %9486 = vmatpush1.bf16.msra.mxu1 %v12364_v38  ;;  %v627_v61 = vld [vmem:[#allocation13 + $0x780] sm:$0xff]  ;;  %v628_v3 = vld [vmem:[#allocation13 + $0x788] sm:$0xff] }
 0x187   :  { %9487 = vmatprep.subr.bf16.mxu1 %v12397_v41  ;;  %9511 = vmatprep.mubr.bf16.mxu1 %v15033_v62  ;;  %v12493_v4 = vcombine.high %v611_v60, %v627_v61  ;;  %v643_v6 = vld [vmem:[#allocation13 + $0x800] sm:$0xff]  ;;  %v12495_v8 = vcombine.high %v612_v2, %v628_v3  ;;  %v12492_v9 = vcombine.low %v611_v60, %v627_v61  ;;  %v644_v10 = vld [vmem:[#allocation13 + $0x808] sm:$0xff] }
 0x188   :  { %9609 = vmatpush1.bf16.msra.mxu0 %v12366_v42  ;;  %9634 = vmatprep.mubr.bf16.mxu0 %v15033_v62  ;;  %v659_v7 = vld [vmem:[#allocation13 + $0x880] sm:$0xff]  ;;  %v660_v11 = vld [vmem:[#allocation13 + $0x888] sm:$0xff]  ;;  %v12494_v13 = vcombine.low %v612_v2, %v628_v3 }
 0x189   :  { %9610 = vmatprep.subr.bf16.mxu0 %v12399_v45  ;;  %v12525_v12 = vcombine.high %v643_v6, %v659_v7  ;;  %v675_v14 = vld [vmem:[#allocation13 + $0x900] sm:$0xff]  ;;  %v12527_v16 = vcombine.high %v644_v10, %v660_v11  ;;  %v12524_v17 = vcombine.low %v643_v6, %v659_v7  ;;  %v676_v18 = vld [vmem:[#allocation13 + $0x908] sm:$0xff]  ;;  %v12526_v21 = vcombine.low %v644_v10, %v660_v11 }
 0x18a   :  { %9488 = vmatpush1.bf16.msra.mxu1 %v12396_v46  ;;  %v691_v15 = vld [vmem:[#allocation13 + $0x980] sm:$0xff]  ;;  %v692_v19 = vld [vmem:[#allocation13 + $0x988] sm:$0xff] }
 0x18b   :  { %9489 = vmatprep.subr.bf16.mxu1 %v12429_v49  ;;  %v12557_v20 = vcombine.high %v675_v14, %v691_v15  ;;  %v707_v22 = vld [vmem:[#allocation13 + $0xa00] sm:$0xff]  ;;  %v12559_v24 = vcombine.high %v676_v18, %v692_v19  ;;  %v12556_v25 = vcombine.low %v675_v14, %v691_v15  ;;  %v708_v26 = vld [vmem:[#allocation13 + $0xa08] sm:$0xff]  ;;  %v12558_v29 = vcombine.low %v676_v18, %v692_v19 }
 0x18c   :  { %9611 = vmatpush1.bf16.msra.mxu0 %v12398_v50  ;;  %v723_v23 = vld [vmem:[#allocation13 + $0xa80] sm:$0xff]  ;;  %v724_v27 = vld [vmem:[#allocation13 + $0xa88] sm:$0xff] }
 0x18d   :  { %9612 = vmatprep.subr.bf16.mxu0 %v12431_v53  ;;  %v12589_v28 = vcombine.high %v707_v22, %v723_v23  ;;  %v739_v30 = vld [vmem:[#allocation13 + $0xb00] sm:$0xff]  ;;  %v12591_v32 = vcombine.high %v708_v26, %v724_v27  ;;  %v12588_v33 = vcombine.low %v707_v22, %v723_v23  ;;  %v740_v34 = vld [vmem:[#allocation13 + $0xb08] sm:$0xff]  ;;  %v12590_v37 = vcombine.low %v708_v26, %v724_v27 }
 0x18e   :  { %9490 = vmatpush1.bf16.msra.mxu1 %v12428_v54  ;;  %v755_v31 = vld [vmem:[#allocation13 + $0xb80] sm:$0xff]  ;;  %v756_v35 = vld [vmem:[#allocation13 + $0xb88] sm:$0xff] }
 0x18f   :  { %9491 = vmatprep.subr.bf16.mxu1 %v12461_v57  ;;  %v12621_v36 = vcombine.high %v739_v30, %v755_v31  ;;  %v771_v38 = vld [vmem:[#allocation13 + $0xc00] sm:$0xff]  ;;  %v12623_v40 = vcombine.high %v740_v34, %v756_v35  ;;  %v12620_v41 = vcombine.low %v739_v30, %v755_v31  ;;  %v772_v42 = vld [vmem:[#allocation13 + $0xc08] sm:$0xff]  ;;  %v12622_v45 = vcombine.low %v740_v34, %v756_v35 }
 0x190   :  { %9613 = vmatpush1.bf16.msra.mxu0 %v12430_v59  ;;  %v787_v39 = vld [vmem:[#allocation13 + $0xc80] sm:$0xff]  ;;  %v788_v43 = vld [vmem:[#allocation13 + $0xc88] sm:$0xff] }
 0x191   :  { %9614 = vmatprep.subr.bf16.mxu0 %v12463_v63  ;;  %v12653_v44 = vcombine.high %v771_v38, %v787_v39  ;;  %v803_v46 = vld [vmem:[#allocation13 + $0xd00] sm:$0xff]  ;;  %v12655_v48 = vcombine.high %v772_v42, %v788_v43  ;;  %v12652_v49 = vcombine.low %v771_v38, %v787_v39  ;;  %v804_v50 = vld [vmem:[#allocation13 + $0xd08] sm:$0xff]  ;;  %v12654_v53 = vcombine.low %v772_v42, %v788_v43 }
 0x192   :  { %9492 = vmatpush1.bf16.msra.mxu1 %v12460_v0  ;;  %v819_v47 = vld [vmem:[#allocation13 + $0xd80] sm:$0xff]  ;;  %v820_v51 = vld [vmem:[#allocation13 + $0xd88] sm:$0xff] }
 0x193   :  { %9493 = vmatprep.subr.bf16.mxu1 %v12493_v4  ;;  %v12685_v52 = vcombine.high %v803_v46, %v819_v47  ;;  %v835_v54 = vld [vmem:[#allocation13 + $0xe00] sm:$0xff]  ;;  %v12687_v56 = vcombine.high %v804_v50, %v820_v51  ;;  %v12684_v57 = vcombine.low %v803_v46, %v819_v47  ;;  %v836_v59 = vld [vmem:[#allocation13 + $0xe08] sm:$0xff]  ;;  %v12686_v63 = vcombine.low %v804_v50, %v820_v51 }
 0x194   :  { %9615 = vmatpush1.bf16.msra.mxu0 %v12462_v5  ;;  %v851_v55 = vld [vmem:[#allocation13 + $0xe80] sm:$0xff]  ;;  %v852_v60 = vld [vmem:[#allocation13 + $0xe88] sm:$0xff] }
 0x195   :  { %9616 = vmatprep.subr.bf16.mxu0 %v12495_v8  ;;  %v12717_v61 = vcombine.high %v835_v54, %v851_v55  ;;  %v867_v0 = vld [vmem:[#allocation13 + $0xf00] sm:$0xff]  ;;  %v12719_v3 = vcombine.high %v836_v59, %v852_v60  ;;  %v12716_v4 = vcombine.low %v835_v54, %v851_v55  ;;  %v868_v5 = vld [vmem:[#allocation13 + $0xf08] sm:$0xff]  ;;  %v12718_v8 = vcombine.low %v836_v59, %v852_v60 }
 0x196   :  { %9494 = vmatpush1.bf16.msra.mxu1 %v12492_v9  ;;  %v883_v2 = vld [vmem:[#allocation13 + $0xf80] sm:$0xff]  ;;  %v884_v6 = vld [vmem:[#allocation13 + $0xf88] sm:$0xff] }
 0x197   :  { %9495 = vmatprep.subr.bf16.mxu1 %v12525_v12  ;;  %v12749_v7 = vcombine.high %v867_v0, %v883_v2  ;;  %v899_v9 = vld [vmem:[#allocation13 + $0x1000] sm:$0xff]  ;;  %v12751_v11 = vcombine.high %v868_v5, %v884_v6  ;;  %v12748_v12 = vcombine.low %v867_v0, %v883_v2  ;;  %v916_v14 = vld [vmem:[#allocation13 + $0x1088] sm:$0xff] }
 0x198   :  { %9617 = vmatpush1.bf16.msra.mxu0 %v12494_v13  ;;  %v915_v10 = vld [vmem:[#allocation13 + $0x1080] sm:$0xff]  ;;  %v900_v13 = vld [vmem:[#allocation13 + $0x1008] sm:$0xff] }
 0x199   :  { %9618 = vmatprep.subr.bf16.mxu0 %v12527_v16  ;;  %v12781_v15 = vcombine.high %v899_v9, %v915_v10  ;;  %v15037_v16 = vld [vmem:[#allocation5 + $0x8] sm:$0xff]  ;;  %v931_v18 = vld [vmem:[#allocation13 + $0x1100] sm:$0xff]  ;;  %v12780_v22 = vcombine.low %v899_v9, %v915_v10 }
 0x19a   :  { %9496 = vmatpush1.bf16.msra.mxu1 %v12524_v17  ;;  %v12750_v17 = vcombine.low %v868_v5, %v884_v6  ;;  %v947_v19 = vld [vmem:[#allocation13 + $0x1180] sm:$0xff]  ;;  %v932_v23 = vld [vmem:[#allocation13 + $0x1108] sm:$0xff] }
 0x19b   :  { %9497 = vmatprep.subr.bf16.mxu1 %v12557_v20  ;;  %v15041_v20 = vcombine.low %v15029_v58, %v15029_v58  ;;  %v12813_v26 = vcombine.high %v931_v18, %v947_v19  ;;  %v963_v27 = vld [vmem:[#allocation13 + $0x1200] sm:$0xff]  ;;  %v964_v30 = vld [vmem:[#allocation13 + $0x1208] sm:$0xff] }
 0x19c   :  { %9619 = vmatpush1.bf16.msra.mxu0 %v12526_v21  ;;  %v12783_v21 = vcombine.high %v900_v13, %v916_v14  ;;  %v980_v31 = vld [vmem:[#allocation13 + $0x1288] sm:$0xff]  ;;  %v1011_v34 = vld [vmem:[#allocation13 + $0x1380] sm:$0xff] }
 0x19d   :  { %9620 = vmatprep.subr.bf16.mxu0 %v12559_v24  ;;  %v948_v24 = vld [vmem:[#allocation13 + $0x1188] sm:$0xff]  ;;  %v1043_v42 = vld [vmem:[#allocation13 + $0x1480] sm:$0xff] }
 0x19e   :  { %9498 = vmatpush1.bf16.msra.mxu1 %v12556_v25  ;;  %v15045_v25 = vcombine.high %v15037_v16, %v15037_v16  ;;  %v12815_v58 = vcombine.high %v932_v23, %v948_v24  ;;  %v996_v38 = vld [vmem:[#allocation13 + $0x1308] sm:$0xff]  ;;  %v1075_v50 = vld [vmem:[#allocation13 + $0x1580] sm:$0xff] }
 0x19f   :  { %9499 = vmatprep.subr.bf16.mxu1 %v12589_v28  ;;  %v979_v28 = vld [vmem:[#allocation13 + $0x1280] sm:$0xff]  ;;  %v1012_v39 = vld [vmem:[#allocation13 + $0x1388] sm:$0xff] }
 0x1a0   :  { %9621 = vmatpush1.bf16.msra.mxu0 %v12558_v29  ;;  %v12782_v29 = vcombine.low %v900_v13, %v916_v14  ;;  %v12845_v35 = vcombine.high %v963_v27, %v979_v28  ;;  %v1028_v46 = vld [vmem:[#allocation13 + $0x1408] sm:$0xff]  ;;  %v1107_v59 = vld [vmem:[#allocation13 + $0x1680] sm:$0xff] }
 0x1a1   :  { %9622 = vmatprep.subr.bf16.mxu0 %v12591_v32  ;;  %v12812_v32 = vcombine.low %v931_v18, %v947_v19  ;;  %v1044_v47 = vld [vmem:[#allocation13 + $0x1488] sm:$0xff]  ;;  %v1139_v5 = vld [vmem:[#allocation13 + $0x1780] sm:$0xff] }
 0x1a2   :  { %9500 = vmatpush1.bf16.msra.mxu1 %v12588_v33  ;;  %v995_v33 = vld [vmem:[#allocation13 + $0x1300] sm:$0xff]  ;;  %v1060_v54 = vld [vmem:[#allocation13 + $0x1508] sm:$0xff] }
 0x1a3   :  { %9501 = vmatprep.subr.bf16.mxu1 %v12621_v36  ;;  %v12814_v36 = vcombine.low %v932_v23, %v948_v24  ;;  %v12877_v43 = vcombine.high %v995_v33, %v1011_v34  ;;  %v1076_v55 = vld [vmem:[#allocation13 + $0x1588] sm:$0xff]  ;;  %v1171_v13 = vld [vmem:[#allocation13 + $0x1880] sm:$0xff] }
 0x1a4   :  { %9623 = vmatpush1.bf16.msra.mxu0 %v12590_v37  ;;  %v12847_v37 = vcombine.high %v964_v30, %v980_v31  ;;  %v1092_v0 = vld [vmem:[#allocation13 + $0x1608] sm:$0xff]  ;;  %v1203_v23 = vld [vmem:[#allocation13 + $0x1980] sm:$0xff] }
 0x1a5   :  { %9624 = vmatprep.subr.bf16.mxu0 %v12623_v40  ;;  %v12844_v40 = vcombine.low %v963_v27, %v979_v28  ;;  %v1108_v2 = vld [vmem:[#allocation13 + $0x1688] sm:$0xff] }
 0x1a6   :  { %9502 = vmatpush1.bf16.msra.mxu1 %v12620_v41  ;;  %v1027_v41 = vld [vmem:[#allocation13 + $0x1400] sm:$0xff]  ;;  %v1124_v9 = vld [vmem:[#allocation13 + $0x1708] sm:$0xff] }
 0x1a7   :  { %9503 = vmatprep.subr.bf16.mxu1 %v12653_v44  ;;  %v12846_v44 = vcombine.low %v964_v30, %v980_v31  ;;  %v12909_v51 = vcombine.high %v1027_v41, %v1043_v42  ;;  %v1140_v10 = vld [vmem:[#allocation13 + $0x1788] sm:$0xff]  ;;  %v1219_v30 = vld [vmem:[#allocation13 + $0x1a00] sm:$0xff] }
 0x1a8   :  { %9625 = vmatpush1.bf16.msra.mxu0 %v12622_v45  ;;  %v12879_v45 = vcombine.high %v996_v38, %v1012_v39  ;;  %v1156_v18 = vld [vmem:[#allocation13 + $0x1808] sm:$0xff]  ;;  %v1235_v31 = vld [vmem:[#allocation13 + $0x1a80] sm:$0xff] }
 0x1a9   :  { %9626 = vmatprep.subr.bf16.mxu0 %v12655_v48  ;;  %v12876_v48 = vcombine.low %v995_v33, %v1011_v34  ;;  %v1172_v19 = vld [vmem:[#allocation13 + $0x1888] sm:$0xff] }
 0x1aa   :  { %9504 = vmatpush1.bf16.msra.mxu1 %v12652_v49  ;;  %v1059_v49 = vld [vmem:[#allocation13 + $0x1500] sm:$0xff]  ;;  %v13039_v27 = vcombine.high %v1156_v18, %v1172_v19  ;;  %v1188_v28 = vld [vmem:[#allocation13 + $0x1908] sm:$0xff]  ;;  %v13038_v33 = vcombine.low %v1156_v18, %v1172_v19 }
 0x1ab   :  { %9505 = vmatprep.subr.bf16.mxu1 %v12685_v52  ;;  %v12878_v52 = vcombine.low %v996_v38, %v1012_v39  ;;  %v12941_v60 = vcombine.high %v1059_v49, %v1075_v50  ;;  %v1251_v38 = vld [vmem:[#allocation13 + $0x1b00] sm:$0xff] }
 0x1ac   :  { %9627 = vmatpush1.bf16.msra.mxu0 %v12654_v53  ;;  %v12911_v53 = vcombine.high %v1028_v46, %v1044_v47  ;;  %v1267_v39 = vld [vmem:[#allocation13 + $0x1b80] sm:$0xff] }
 0x1ad   :  { %9628 = vmatprep.subr.bf16.mxu0 %v12687_v56  ;;  %v12908_v56 = vcombine.low %v1027_v41, %v1043_v42 }
 0x1ae   :  { %9506 = vmatpush1.bf16.msra.mxu1 %v12684_v57  ;;  %v1091_v57 = vld [vmem:[#allocation13 + $0x1600] sm:$0xff] }
 0x1af   :  { %9507 = vmatprep.subr.bf16.mxu1 %v12717_v61  ;;  %v12910_v61 = vcombine.low %v1028_v46, %v1044_v47  ;;  %v12973_v6 = vcombine.high %v1091_v57, %v1107_v59  ;;  %v1283_v46 = vld [vmem:[#allocation13 + $0x1c00] sm:$0xff]  ;;  %v13133_v47 = vcombine.high %v1251_v38, %v1267_v39 }
 0x1b0   :  { %9629 = vmatpush1.bf16.msra.mxu0 %v12686_v63  ;;  %v12943_v63 = vcombine.high %v1060_v54, %v1076_v55 }
 0x1b1   :  { %9630 = vmatprep.subr.bf16.mxu0 %v12719_v3  ;;  %v12940_v3 = vcombine.low %v1059_v49, %v1075_v50  ;;  %v1299_v49 = vld [vmem:[#allocation13 + $0x1c80] sm:$0xff] }
 0x1b2   :  { %9508 = vmatpush1.bf16.msra.mxu1 %v12716_v4  ;;  %v1123_v4 = vld [vmem:[#allocation13 + $0x1700] sm:$0xff] }
 0x1b3   :  { %9509 = vmatprep.subr.bf16.mxu1 %v12749_v7  ;;  %v12942_v7 = vcombine.low %v1060_v54, %v1076_v55  ;;  %v13005_v14 = vcombine.high %v1123_v4, %v1139_v5  ;;  %v1315_v54 = vld [vmem:[#allocation13 + $0x1d00] sm:$0xff] }
 0x1b4   :  { %9631 = vmatpush1.bf16.msra.mxu0 %v12718_v8  ;;  %v12975_v8 = vcombine.high %v1092_v0, %v1108_v2  ;;  %v1331_v55 = vld [vmem:[#allocation13 + $0x1d80] sm:$0xff] }
 0x1b5   :  { %9632 = vmatprep.subr.bf16.mxu0 %v12751_v11  ;;  %v12972_v11 = vcombine.low %v1091_v57, %v1107_v59 }
 0x1b6   :  { %9510 = vmatpush1.bf16.msra.mxu1 %v12748_v12  ;;  %v1155_v12 = vld [vmem:[#allocation13 + $0x1800] sm:$0xff] }
 0x1b7   :  { %9520 = vmatprep.subr.bf16.mxu1 %v12781_v15  ;;  %v12974_v15 = vcombine.low %v1092_v0, %v1108_v2  ;;  %v13037_v24 = vcombine.high %v1155_v12, %v1171_v13  ;;  %v13197_v0 = vcombine.high %v1315_v54, %v1331_v55 }
 0x1b8   :  { %9633 = vmatpush1.bf16.msra.mxu0 %v12750_v17  ;;  %v13007_v17 = vcombine.high %v1124_v9, %v1140_v10 }
 0x1b9   :  { %9512 = vmatmul.mubr.bf16.vlgmr.msra.gmra.mrb[0].mxu1 %v15041_v20  ;;  %9643 = vmatprep.subr.bf16.mxu0 %v12783_v21  ;;  %v13004_v21 = vcombine.low %v1123_v4, %v1139_v5  ;;  %v1363_v4 = vld [vmem:[#allocation13 + $0x1e80] sm:$0xff] }
 0x1ba   :  { %9521 = vmatpush1.bf16.msra.mxu1 %v12780_v22  ;;  %9552 = vmatprep.mubr.bf16.mxu1 %v15045_v25  ;;  %v1187_v22 = vld [vmem:[#allocation13 + $0x1900] sm:$0xff] }
 0x1bb   :  { %9522 = vmatprep.subr.bf16.mxu1 %v12813_v26  ;;  %9635 = vmatmul.mubr.bf16.vlgmr.msra.gmra.mrb[4].mxu0 %v15041_v20  ;;  %v13006_v26 = vcombine.low %v1124_v9, %v1140_v10 }
 0x1bc   :  { %9644 = vmatpush1.bf16.msra.mxu0 %v12782_v29  ;;  %9675 = vmatprep.mubr.bf16.mxu0 %v15045_v25  ;;  %v1204_v29 = vld [vmem:[#allocation13 + $0x1988] sm:$0xff] }
 0x1bd   :  { %9645 = vmatprep.subr.bf16.mxu0 %v12815_v58  ;;  %v13036_v58 = vcombine.low %v1155_v12, %v1171_v13  ;;  %v13071_v34 = vcombine.high %v1188_v28, %v1204_v29  ;;  %v13070_v41 = vcombine.low %v1188_v28, %v1204_v29  ;;  %v1395_v12 = vld [vmem:[#allocation13 + $0x1f80] sm:$0xff]  ;;  %v15051_v29 = vld [vmem:[#allocation5 + $0x10] sm:$0xff] }
 0x1be   :  { %9523 = vmatpush1.bf16.msra.mxu1 %v12812_v32  ;;  %v13069_v32 = vcombine.high %v1187_v22, %v1203_v23 }
 0x1bf   :  { %9524 = vmatprep.subr.bf16.mxu1 %v12845_v35  ;;  %v1220_v35 = vld [vmem:[#allocation13 + $0x1a08] sm:$0xff] }
 0x1c0   :  { %9646 = vmatpush1.bf16.msra.mxu0 %v12814_v36  ;;  %v1236_v36 = vld [vmem:[#allocation13 + $0x1a88] sm:$0xff] }
 0x1c1   :  { %9647 = vmatprep.subr.bf16.mxu0 %v12847_v37  ;;  %v13068_v37 = vcombine.low %v1187_v22, %v1203_v23  ;;  %v13103_v42 = vcombine.high %v1220_v35, %v1236_v36  ;;  %v1427_v22 = vld [vmem:[#allocation13 + $0x2080] sm:$0xff] }
 0x1c2   :  { %9525 = vmatpush1.bf16.msra.mxu1 %v12844_v40  ;;  %v13101_v40 = vcombine.high %v1219_v30, %v1235_v31 }
 0x1c3   :  { %9526 = vmatprep.subr.bf16.mxu1 %v12877_v43  ;;  %v1252_v43 = vld [vmem:[#allocation13 + $0x1b08] sm:$0xff] }
 0x1c4   :  { %9648 = vmatpush1.bf16.msra.mxu0 %v12846_v44  ;;  %v13100_v44 = vcombine.low %v1219_v30, %v1235_v31  ;;  %v1443_v30 = vld [vmem:[#allocation13 + $0x2100] sm:$0xff] }
 0x1c5   :  { %9649 = vmatprep.subr.bf16.mxu0 %v12879_v45  ;;  %v1268_v45 = vld [vmem:[#allocation13 + $0x1b88] sm:$0xff]  ;;  %v1459_v31 = vld [vmem:[#allocation13 + $0x2180] sm:$0xff] }
 0x1c6   :  { %9527 = vmatpush1.bf16.msra.mxu1 %v12876_v48  ;;  %v13102_v48 = vcombine.low %v1220_v35, %v1236_v36  ;;  %v13135_v50 = vcombine.high %v1252_v43, %v1268_v45  ;;  %v13134_v57 = vcombine.low %v1252_v43, %v1268_v45  ;;  %v1444_v35 = vld [vmem:[#allocation13 + $0x2108] sm:$0xff] }
 0x1c7   :  { %9528 = vmatprep.subr.bf16.mxu1 %v12909_v51  ;;  %v1284_v51 = vld [vmem:[#allocation13 + $0x1c08] sm:$0xff] }
 0x1c8   :  { %9650 = vmatpush1.bf16.msra.mxu0 %v12878_v52  ;;  %v1300_v52 = vld [vmem:[#allocation13 + $0x1c88] sm:$0xff] }
 0x1c9   :  { %9651 = vmatprep.subr.bf16.mxu0 %v12911_v53  ;;  %v13132_v53 = vcombine.low %v1251_v38, %v1267_v39  ;;  %v13167_v59 = vcombine.high %v1284_v51, %v1300_v52  ;;  %v13166_v2 = vcombine.low %v1284_v51, %v1300_v52  ;;  %v1460_v36 = vld [vmem:[#allocation13 + $0x2188] sm:$0xff]  ;;  %v13325_v38 = vcombine.high %v1443_v30, %v1459_v31 }
 0x1ca   :  { %9529 = vmatpush1.bf16.msra.mxu1 %v12908_v56  ;;  %v13165_v56 = vcombine.high %v1283_v46, %v1299_v49  ;;  %v1476_v43 = vld [vmem:[#allocation13 + $0x2208] sm:$0xff] }
 0x1cb   :  { %9530 = vmatprep.subr.bf16.mxu1 %v12941_v60  ;;  %v13164_v60 = vcombine.low %v1283_v46, %v1299_v49  ;;  %v13326_v46 = vcombine.low %v1444_v35, %v1460_v36  ;;  %v1508_v51 = vld [vmem:[#allocation13 + $0x2308] sm:$0xff] }
 0x1cc   :  { %9652 = vmatpush1.bf16.msra.mxu0 %v12910_v61  ;;  %v1316_v61 = vld [vmem:[#allocation13 + $0x1d08] sm:$0xff] }
 0x1cd   :  { %9653 = vmatprep.subr.bf16.mxu0 %v12943_v63  ;;  %v1332_v63 = vld [vmem:[#allocation13 + $0x1d88] sm:$0xff] }
 0x1ce   :  { %9531 = vmatpush1.bf16.msra.mxu1 %v12940_v3  ;;  %v1347_v3 = vld [vmem:[#allocation13 + $0x1e00] sm:$0xff]  ;;  %v13199_v5 = vcombine.high %v1316_v61, %v1332_v63  ;;  %v13198_v10 = vcombine.low %v1316_v61, %v1332_v63  ;;  %v1524_v52 = vld [vmem:[#allocation13 + $0x2388] sm:$0xff] }
 0x1cf   :  { %9532 = vmatprep.subr.bf16.mxu1 %v12973_v6  ;;  %v13196_v6 = vcombine.low %v1315_v54, %v1331_v55  ;;  %v13229_v9 = vcombine.high %v1347_v3, %v1363_v4  ;;  %v1539_v55 = vld [vmem:[#allocation13 + $0x2400] sm:$0xff]  ;;  %v1556_v61 = vld [vmem:[#allocation13 + $0x2488] sm:$0xff] }
 0x1d0   :  { %9654 = vmatpush1.bf16.msra.mxu0 %v12942_v7  ;;  %v1348_v7 = vld [vmem:[#allocation13 + $0x1e08] sm:$0xff] }
 0x1d1   :  { %9655 = vmatprep.subr.bf16.mxu0 %v12975_v8  ;;  %v1364_v8 = vld [vmem:[#allocation13 + $0x1e88] sm:$0xff] }
 0x1d2   :  { %9533 = vmatpush1.bf16.msra.mxu1 %v12972_v11  ;;  %v1379_v11 = vld [vmem:[#allocation13 + $0x1f00] sm:$0xff]  ;;  %v13231_v13 = vcombine.high %v1348_v7, %v1364_v8  ;;  %v13230_v19 = vcombine.low %v1348_v7, %v1364_v8  ;;  %v1588_v7 = vld [vmem:[#allocation13 + $0x2588] sm:$0xff] }
 0x1d3   :  { %9534 = vmatprep.subr.bf16.mxu1 %v13005_v14  ;;  %v13228_v14 = vcombine.low %v1347_v3, %v1363_v4  ;;  %v13261_v18 = vcombine.high %v1379_v11, %v1395_v12  ;;  %v1587_v3 = vld [vmem:[#allocation13 + $0x2580] sm:$0xff] }
 0x1d4   :  { %9656 = vmatpush1.bf16.msra.mxu0 %v12974_v15  ;;  %v1380_v15 = vld [vmem:[#allocation13 + $0x1f08] sm:$0xff] }
 0x1d5   :  { %9657 = vmatprep.subr.bf16.mxu0 %v13007_v17  ;;  %v1396_v17 = vld [vmem:[#allocation13 + $0x1f88] sm:$0xff] }
 0x1d6   :  { %9535 = vmatpush1.bf16.msra.mxu1 %v13004_v21  ;;  %v1411_v21 = vld [vmem:[#allocation13 + $0x2000] sm:$0xff]  ;;  %v13263_v23 = vcombine.high %v1380_v15, %v1396_v17 }
 0x1d7   :  { %9536 = vmatprep.subr.bf16.mxu1 %v13037_v24  ;;  %v13260_v24 = vcombine.low %v1379_v11, %v1395_v12  ;;  %v13293_v28 = vcombine.high %v1411_v21, %v1427_v22  ;;  %v1619_v11 = vld [vmem:[#allocation13 + $0x2680] sm:$0xff] }
 0x1d8   :  { %9658 = vmatpush1.bf16.msra.mxu0 %v13006_v26  ;;  %v1412_v26 = vld [vmem:[#allocation13 + $0x2008] sm:$0xff] }
 0x1d9   :  { %9659 = vmatprep.subr.bf16.mxu0 %v13039_v27  ;;  %v1428_v27 = vld [vmem:[#allocation13 + $0x2088] sm:$0xff] }
 0x1da   :  { %9537 = vmatpush1.bf16.msra.mxu1 %v13036_v58  ;;  %v13262_v58 = vcombine.low %v1380_v15, %v1396_v17  ;;  %v13294_v39 = vcombine.low %v1412_v26, %v1428_v27  ;;  %v1620_v15 = vld [vmem:[#allocation13 + $0x2688] sm:$0xff] }
 0x1db   :  { %9538 = vmatprep.subr.bf16.mxu1 %v13069_v32  ;;  %v15055_v32 = vcombine.low %v15037_v16, %v15037_v16  ;;  %v13327_v16 = vcombine.high %v1444_v35, %v1460_v36  ;;  %v1684_v35 = vld [vmem:[#allocation13 + $0x2888] sm:$0xff] }
 0x1dc   :  { %9660 = vmatpush1.bf16.msra.mxu0 %v13038_v33  ;;  %v13295_v33 = vcombine.high %v1412_v26, %v1428_v27  ;;  %v1652_v26 = vld [vmem:[#allocation13 + $0x2788] sm:$0xff] }
 0x1dd   :  { %9661 = vmatprep.subr.bf16.mxu0 %v13071_v34  ;;  %v13292_v34 = vcombine.low %v1411_v21, %v1427_v22  ;;  %v1651_v21 = vld [vmem:[#allocation13 + $0x2780] sm:$0xff] }
 0x1de   :  { %9539 = vmatpush1.bf16.msra.mxu1 %v13068_v37  ;;  %v15059_v37 = vcombine.high %v15051_v29, %v15051_v29 }
 0x1df   :  { %9540 = vmatprep.subr.bf16.mxu1 %v13101_v40  ;;  %v1475_v40 = vld [vmem:[#allocation13 + $0x2200] sm:$0xff] }
 0x1e0   :  { %9662 = vmatpush1.bf16.msra.mxu0 %v13070_v41  ;;  %v1491_v41 = vld [vmem:[#allocation13 + $0x2280] sm:$0xff] }
 0x1e1   :  { %9663 = vmatprep.subr.bf16.mxu0 %v13103_v42  ;;  %v13324_v42 = vcombine.low %v1443_v30, %v1459_v31  ;;  %v13357_v45 = vcombine.high %v1475_v40, %v1491_v41  ;;  %v1683_v30 = vld [vmem:[#allocation13 + $0x2880] sm:$0xff] }
 0x1e2   :  { %9541 = vmatpush1.bf16.msra.mxu1 %v13100_v44  ;;  %v1492_v44 = vld [vmem:[#allocation13 + $0x2288] sm:$0xff] }
 0x1e3   :  { %9542 = vmatprep.subr.bf16.mxu1 %v13133_v47  ;;  %v1507_v47 = vld [vmem:[#allocation13 + $0x2300] sm:$0xff]  ;;  %v13359_v49 = vcombine.high %v1476_v43, %v1492_v44  ;;  %v13358_v54 = vcombine.low %v1476_v43, %v1492_v44  ;;  %v1716_v43 = vld [vmem:[#allocation13 + $0x2988] sm:$0xff] }
 0x1e4   :  { %9664 = vmatpush1.bf16.msra.mxu0 %v13102_v48  ;;  %v1523_v48 = vld [vmem:[#allocation13 + $0x2380] sm:$0xff] }
 0x1e5   :  { %9665 = vmatprep.subr.bf16.mxu0 %v13135_v50  ;;  %v13356_v50 = vcombine.low %v1475_v40, %v1491_v41  ;;  %v1715_v40 = vld [vmem:[#allocation13 + $0x2980] sm:$0xff] }
 0x1e6   :  { %9543 = vmatpush1.bf16.msra.mxu1 %v13132_v53  ;;  %v13389_v53 = vcombine.high %v1507_v47, %v1523_v48 }
 0x1e7   :  { %9544 = vmatprep.subr.bf16.mxu1 %v13165_v56  ;;  %v1555_v56 = vld [vmem:[#allocation13 + $0x2480] sm:$0xff] }
 0x1e8   :  { %9666 = vmatpush1.bf16.msra.mxu0 %v13134_v57  ;;  %v13391_v57 = vcombine.high %v1508_v51, %v1524_v52  ;;  %v13421_v63 = vcombine.high %v1539_v55, %v1555_v56 }
 0x1e9   :  { %9667 = vmatprep.subr.bf16.mxu0 %v13167_v59  ;;  %v13388_v59 = vcombine.low %v1507_v47, %v1523_v48  ;;  %v1747_v47 = vld [vmem:[#allocation13 + $0x2a80] sm:$0xff] }
 0x1ea   :  { %9545 = vmatpush1.bf16.msra.mxu1 %v13164_v60  ;;  %v1540_v60 = vld [vmem:[#allocation13 + $0x2408] sm:$0xff] }
 0x1eb   :  { %9546 = vmatprep.subr.bf16.mxu1 %v13197_v0  ;;  %v13390_v0 = vcombine.low %v1508_v51, %v1524_v52  ;;  %v13423_v4 = vcombine.high %v1540_v60, %v1556_v61  ;;  %v1748_v51 = vld [vmem:[#allocation13 + $0x2a88] sm:$0xff] }
 0x1ec   :  { %9668 = vmatpush1.bf16.msra.mxu0 %v13166_v2  ;;  %v1571_v2 = vld [vmem:[#allocation13 + $0x2500] sm:$0xff] }
 0x1ed   :  { %9669 = vmatprep.subr.bf16.mxu0 %v13199_v5  ;;  %v13420_v5 = vcombine.low %v1539_v55, %v1555_v56  ;;  %v13453_v8 = vcombine.high %v1571_v2, %v1587_v3  ;;  %v1779_v55 = vld [vmem:[#allocation13 + $0x2b80] sm:$0xff] }
 0x1ee   :  { %9547 = vmatpush1.bf16.msra.mxu1 %v13196_v6  ;;  %v1572_v6 = vld [vmem:[#allocation13 + $0x2508] sm:$0xff] }
 0x1ef   :  { %9548 = vmatprep.subr.bf16.mxu1 %v13229_v9  ;;  %v13422_v9 = vcombine.low %v1540_v60, %v1556_v61  ;;  %v13455_v12 = vcombine.high %v1572_v6, %v1588_v7  ;;  %v1780_v60 = vld [vmem:[#allocation13 + $0x2b88] sm:$0xff] }
 0x1f0   :  { %9670 = vmatpush1.bf16.msra.mxu0 %v13198_v10  ;;  %v1603_v10 = vld [vmem:[#allocation13 + $0x2600] sm:$0xff] }
 0x1f1   :  { %9671 = vmatprep.subr.bf16.mxu0 %v13231_v13  ;;  %v13452_v13 = vcombine.low %v1571_v2, %v1587_v3  ;;  %v13485_v17 = vcombine.high %v1603_v10, %v1619_v11  ;;  %v1811_v2 = vld [vmem:[#allocation13 + $0x2c80] sm:$0xff] }
 0x1f2   :  { %9549 = vmatpush1.bf16.msra.mxu1 %v13228_v14  ;;  %v1604_v14 = vld [vmem:[#allocation13 + $0x2608] sm:$0xff]  ;;  %v1827_v3 = vld [vmem:[#allocation13 + $0x2d00] sm:$0xff] }
 0x1f3   :  { %9550 = vmatprep.subr.bf16.mxu1 %v13261_v18  ;;  %v13454_v18 = vcombine.low %v1572_v6, %v1588_v7  ;;  %v13487_v22 = vcombine.high %v1604_v14, %v1620_v15  ;;  %v1796_v6 = vld [vmem:[#allocation13 + $0x2c08] sm:$0xff]  ;;  %v14670_v7 = vmov 65535  }
 0x1f4   :  { %9672 = vmatpush1.bf16.msra.mxu0 %v13230_v19  ;;  %v1635_v19 = vld [vmem:[#allocation13 + $0x2700] sm:$0xff] }
 0x1f5   :  { %9673 = vmatprep.subr.bf16.mxu0 %v13263_v23  ;;  %v13484_v23 = vcombine.low %v1603_v10, %v1619_v11  ;;  %v13517_v27 = vcombine.high %v1635_v19, %v1651_v21  ;;  %v1812_v10 = vld [vmem:[#allocation13 + $0x2c88] sm:$0xff] }
 0x1f6   :  { %9551 = vmatpush1.bf16.msra.mxu1 %v13260_v24  ;;  %v1636_v24 = vld [vmem:[#allocation13 + $0x2708] sm:$0xff] }
 0x1f7   :  { %9561 = vmatprep.subr.bf16.mxu1 %v13293_v28  ;;  %v13486_v28 = vcombine.low %v1604_v14, %v1620_v15  ;;  %v13519_v31 = vcombine.high %v1636_v24, %v1652_v26  ;;  %v1828_v11 = vld [vmem:[#allocation13 + $0x2d08] sm:$0xff] }
 0x1f8   :  { %9674 = vmatpush1.bf16.msra.mxu0 %v13262_v58  ;;  %v1667_v58 = vld [vmem:[#allocation13 + $0x2800] sm:$0xff] }
 0x1f9   :  { %9553 = vmatmul.mubr.bf16.vlgmr.msra.gmra.mrb[0].mxu1 %v15055_v32  ;;  %9684 = vmatprep.subr.bf16.mxu0 %v13295_v33  ;;  %v13516_v33 = vcombine.low %v1635_v19, %v1651_v21  ;;  %v13549_v36 = vcombine.high %v1667_v58, %v1683_v30 }
 0x1fa   :  { %9562 = vmatpush1.bf16.msra.mxu1 %v13292_v34  ;;  %13740 = vmatprep.mubr.msk.bf16.mxu1 %vm9375_vm5, %v15059_v37  ;;  %v1668_v34 = vld [vmem:[#allocation13 + $0x2808] sm:$0xff] }
 0x1fb   :  { %9563 = vmatprep.subr.bf16.mxu1 %v13325_v38  ;;  %9676 = vmatmul.mubr.bf16.vlgmr.msra.gmra.mrb[4].mxu0 %v15055_v32  ;;  %v13518_v38 = vcombine.low %v1636_v24, %v1652_v26  ;;  %v13551_v41 = vcombine.high %v1668_v34, %v1684_v35  ;;  %v13678_v24 = vcombine.low %v1796_v6, %v1812_v10 }
 0x1fc   :  { %9685 = vmatpush1.bf16.msra.mxu0 %v13294_v39  ;;  %13741 = vmatprep.mubr.msk.bf16.mxu0 %vm9375_vm5, %v15059_v37  ;;  %v1699_v39 = vld [vmem:[#allocation13 + $0x2900] sm:$0xff] }
 0x1fd   :  { %9686 = vmatprep.subr.bf16.mxu0 %v13327_v16  ;;  %v13548_v16 = vcombine.low %v1667_v58, %v1683_v30  ;;  %v13581_v44 = vcombine.high %v1699_v39, %v1715_v40 }
 0x1fe   :  { %9564 = vmatpush1.bf16.msra.mxu1 %v13324_v42  ;;  %v1700_v42 = vld [vmem:[#allocation13 + $0x2908] sm:$0xff] }
 0x1ff   :  { %9565 = vmatprep.subr.bf16.mxu1 %v13357_v45  ;;  %v13550_v45 = vcombine.low %v1668_v34, %v1684_v35  ;;  %v13583_v48 = vcombine.high %v1700_v42, %v1716_v43 }
 0x200   :  { %9687 = vmatpush1.bf16.msra.mxu0 %v13326_v46  ;;  %v1731_v46 = vld [vmem:[#allocation13 + $0x2a00] sm:$0xff] }
 0x201   :  { %9688 = vmatprep.subr.bf16.mxu0 %v13359_v49  ;;  %v13580_v49 = vcombine.low %v1699_v39, %v1715_v40  ;;  %v13613_v52 = vcombine.high %v1731_v46, %v1747_v47  ;;  %v15075_v39 = vcombine.low %v15051_v29, %v15051_v29  ;;  %v470_v29 = vld [vmem:[#allocation13 + $0x298] sm:$0xff] }
 0x202   :  { %9566 = vmatpush1.bf16.msra.mxu1 %v13356_v50  ;;  %v1732_v50 = vld [vmem:[#allocation13 + $0x2a08] sm:$0xff] }
 0x203   :  { %9567 = vmatprep.subr.bf16.mxu1 %v13389_v53  ;;  %v13582_v53 = vcombine.low %v1700_v42, %v1716_v43  ;;  %v13615_v56 = vcombine.high %v1732_v50, %v1748_v51  ;;  %v438_v42 = vld [vmem:[#allocation13 + $0x198] sm:$0xff] }
 0x204   :  { %9689 = vmatpush1.bf16.msra.mxu0 %v13358_v54  ;;  %v1763_v54 = vld [vmem:[#allocation13 + $0x2b00] sm:$0xff] }
 0x205   :  { %9690 = vmatprep.subr.bf16.mxu0 %v13391_v57  ;;  %v13612_v57 = vcombine.low %v1731_v46, %v1747_v47  ;;  %v13645_v61 = vcombine.high %v1763_v54, %v1779_v55  ;;  %v469_v46 = vld [vmem:[#allocation13 + $0x290] sm:$0xff] }
 0x206   :  { %9568 = vmatpush1.bf16.msra.mxu1 %v13388_v59  ;;  %v1764_v59 = vld [vmem:[#allocation13 + $0x2b08] sm:$0xff] }
 0x207   :  { %9569 = vmatprep.subr.bf16.mxu1 %v13421_v63  ;;  %v1795_v63 = vld [vmem:[#allocation13 + $0x2c00] sm:$0xff]  ;;  %v13646_v15 = vcombine.low %v1764_v59, %v1780_v60 }
 0x208   :  { %9691 = vmatpush1.bf16.msra.mxu0 %v13390_v0  ;;  %v13614_v0 = vcombine.low %v1732_v50, %v1748_v51  ;;  %v13676_v21 = vcombine.low %v1795_v63, %v1811_v2 }
 0x209   :  { %9692 = vmatprep.subr.bf16.mxu0 %v13423_v4  ;;  %v1843_v4 = vld [vmem:[#allocation13 + $0x2d80] sm:$0x11] }
 0x20a   :  { %9570 = vmatpush1.bf16.msra.mxu1 %v13420_v5  ;;  %v13647_v5 = vcombine.high %v1764_v59, %v1780_v60  ;;  %v13709_v14 = vcombine.high %v1827_v3, %v1843_v4 }
 0x20b   :  { %9571 = vmatprep.subr.bf16.mxu1 %v13453_v8  ;;  %v9381_v8 = vsel %vm9379_vm6, 4294967295, %v14670_v7  ;;  %v549_v7 = vld [vmem:[#allocation13 + $0x510] sm:$0xff] }
 0x20c   :  { %9693 = vmatpush1.bf16.msra.mxu0 %v13422_v9  ;;  %v13644_v9 = vcombine.low %v1763_v54, %v1779_v55 }
 0x20d   :  { %9694 = vmatprep.subr.bf16.mxu0 %v13455_v12  ;;  %v1844_v12 = vld [vmem:[#allocation13 + $0x2d88] sm:$0x11] }
 0x20e   :  { %9572 = vmatpush1.bf16.msra.mxu1 %v13452_v13  ;;  %v13677_v13 = vcombine.high %v1795_v63, %v1811_v2  ;;  %v13711_v19 = vcombine.high %v1828_v11, %v1844_v12  ;;  %v13710_v26 = vcombine.low %v1828_v11, %v1844_v12  ;;  %v533_v63 = vld [vmem:[#allocation13 + $0x490] sm:$0xff]  ;;  %v550_v11 = vld [vmem:[#allocation13 + $0x518] sm:$0xff] }
 0x20f   :  { %9573 = vmatprep.subr.bf16.mxu1 %v13485_v17  ;;  %v15067_v17 = vsel %vm9380_vm7, %v9381_v8, 0  ;;  %v565_v8 = vld [vmem:[#allocation13 + $0x590] sm:$0xff]  ;;  %v566_v12 = vld [vmem:[#allocation13 + $0x598] sm:$0xff] }
 0x210   :  { %9695 = vmatpush1.bf16.msra.mxu0 %v13454_v18  ;;  %v13679_v18 = vcombine.high %v1796_v6, %v1812_v10  ;;  %v9393_v58 = vand.u32 %v13711_v19, %v15067_v17  ;;  %v9390_v35 = vand.u32 %v13710_v26, %v15067_v17  ;;  %v12435_v19 = vcombine.high %v550_v11, %v566_v12 }
 0x211   :  { %9696 = vmatprep.subr.bf16.mxu0 %v13487_v22  ;;  %v13708_v22 = vcombine.low %v1827_v3, %v1843_v4  ;;  %v518_v3 = vld [vmem:[#allocation13 + $0x418] sm:$0xff]  ;;  %v12434_v26 = vcombine.low %v550_v11, %v566_v12 }
 0x212   :  { %9574 = vmatpush1.bf16.msra.mxu1 %v13484_v23  ;;  %v9387_v23 = vand.u32 %v13709_v14, %v15067_v17  ;;  %v534_v4 = vld [vmem:[#allocation13 + $0x498] sm:$0xff] }
 0x213   :  { %9575 = vmatprep.subr.bf16.mxu1 %v13517_v27  ;;  %v389_v27 = vld [vmem:[#allocation13 + $0x10] sm:$0xff]  ;;  %v9384_v30 = vand.u32 %v13708_v22, %v15067_v17  ;;  %v12402_v14 = vcombine.low %v518_v3, %v534_v4  ;;  %v582_v22 = vld [vmem:[#allocation13 + $0x618] sm:$0xff] }
 0x214   :  { %9697 = vmatpush1.bf16.msra.mxu0 %v13486_v28  ;;  %v405_v28 = vld [vmem:[#allocation13 + $0x90] sm:$0xff] }
 0x215   :  { %9698 = vmatprep.subr.bf16.mxu0 %v13519_v31  ;;  %v390_v31 = vld [vmem:[#allocation13 + $0x18] sm:$0xff]  ;;  %v12273_v34 = vcombine.high %v389_v27, %v405_v28 }
 0x216   :  { %9576 = vmatpush1.bf16.msra.mxu1 %v13516_v33  ;;  %v406_v33 = vld [vmem:[#allocation13 + $0x98] sm:$0xff] }
 0x217   :  { %9577 = vmatprep.subr.bf16.mxu1 %v13549_v36  ;;  %v421_v36 = vld [vmem:[#allocation13 + $0x110] sm:$0xff]  ;;  %v12275_v40 = vcombine.high %v390_v31, %v406_v33 }
 0x218   :  { %9699 = vmatpush1.bf16.msra.mxu0 %v13518_v38  ;;  %v437_v38 = vld [vmem:[#allocation13 + $0x190] sm:$0xff] }
 0x219   :  { %9700 = vmatprep.subr.bf16.mxu0 %v13551_v41  ;;  %v12272_v41 = vcombine.low %v389_v27, %v405_v28  ;;  %v12305_v43 = vcombine.high %v421_v36, %v437_v38  ;;  %v613_v27 = vld [vmem:[#allocation13 + $0x710] sm:$0xff] }
 0x21a   :  { %9578 = vmatpush1.bf16.msra.mxu1 %v13548_v16  ;;  %v422_v16 = vld [vmem:[#allocation13 + $0x118] sm:$0xff]  ;;  %v629_v28 = vld [vmem:[#allocation13 + $0x790] sm:$0xff] }
 0x21b   :  { %9579 = vmatprep.subr.bf16.mxu1 %v13581_v44  ;;  %v12274_v44 = vcombine.low %v390_v31, %v406_v33  ;;  %v12307_v47 = vcombine.high %v422_v16, %v438_v42  ;;  %v12306_v51 = vcombine.low %v422_v16, %v438_v42  ;;  %v614_v31 = vld [vmem:[#allocation13 + $0x718] sm:$0xff] }
 0x21c   :  { %9701 = vmatpush1.bf16.msra.mxu0 %v13550_v45  ;;  %v453_v45 = vld [vmem:[#allocation13 + $0x210] sm:$0xff]  ;;  %v630_v33 = vld [vmem:[#allocation13 + $0x798] sm:$0xff] }
 0x21d   :  { %9702 = vmatprep.subr.bf16.mxu0 %v13583_v48  ;;  %v12304_v48 = vcombine.low %v421_v36, %v437_v38  ;;  %v12337_v50 = vcombine.high %v453_v45, %v469_v46  ;;  %v12336_v55 = vcombine.low %v453_v45, %v469_v46  ;;  %v645_v36 = vld [vmem:[#allocation13 + $0x810] sm:$0xff]  ;;  %v646_v16 = vld [vmem:[#allocation13 + $0x818] sm:$0xff] }
 0x21e   :  { %9580 = vmatpush1.bf16.msra.mxu1 %v13580_v49  ;;  %v454_v49 = vld [vmem:[#allocation13 + $0x218] sm:$0xff]  ;;  %v661_v38 = vld [vmem:[#allocation13 + $0x890] sm:$0xff] }
 0x21f   :  { %9581 = vmatprep.subr.bf16.mxu1 %v13613_v52  ;;  %v485_v52 = vld [vmem:[#allocation13 + $0x310] sm:$0xff]  ;;  %v12339_v54 = vcombine.high %v454_v49, %v470_v29  ;;  %v12338_v60 = vcombine.low %v454_v49, %v470_v29  ;;  %v662_v42 = vld [vmem:[#allocation13 + $0x898] sm:$0xff] }
 0x220   :  { %9703 = vmatpush1.bf16.msra.mxu0 %v13582_v53  ;;  %v501_v53 = vld [vmem:[#allocation13 + $0x390] sm:$0xff]  ;;  %v678_v49 = vld [vmem:[#allocation13 + $0x918] sm:$0xff] }
 0x221   :  { %9704 = vmatprep.subr.bf16.mxu0 %v13615_v56  ;;  %v486_v56 = vld [vmem:[#allocation13 + $0x318] sm:$0xff]  ;;  %v12369_v59 = vcombine.high %v485_v52, %v501_v53  ;;  %v12368_v2 = vcombine.low %v485_v52, %v501_v53  ;;  %v677_v45 = vld [vmem:[#allocation13 + $0x910] sm:$0xff]  ;;  %v12530_v53 = vcombine.low %v646_v16, %v662_v42 }
 0x222   :  { %9582 = vmatpush1.bf16.msra.mxu1 %v13612_v57  ;;  %v502_v57 = vld [vmem:[#allocation13 + $0x398] sm:$0xff]  ;;  %v693_v46 = vld [vmem:[#allocation13 + $0x990] sm:$0xff] }
 0x223   :  { %9583 = vmatprep.subr.bf16.mxu1 %v13645_v61  ;;  %v517_v61 = vld [vmem:[#allocation13 + $0x410] sm:$0xff]  ;;  %v12370_v6 = vcombine.low %v486_v56, %v502_v57  ;;  %v694_v29 = vld [vmem:[#allocation13 + $0x998] sm:$0xff] }
 0x224   :  { %9705 = vmatpush1.bf16.msra.mxu0 %v13614_v0  ;;  %v12371_v0 = vcombine.high %v486_v56, %v502_v57  ;;  %v12400_v10 = vcombine.low %v517_v61, %v533_v63  ;;  %v12563_v56 = vcombine.high %v678_v49, %v694_v29  ;;  %v12560_v57 = vcombine.low %v677_v45, %v693_v46 }
 0x225   :  { %9706 = vmatprep.subr.bf16.mxu0 %v13647_v5  ;;  %v12401_v5 = vcombine.high %v517_v61, %v533_v63  ;;  %v12562_v63 = vcombine.low %v678_v49, %v694_v29 }
 0x226   :  { %9584 = vmatpush1.bf16.msra.mxu1 %v13644_v9  ;;  %v12403_v9 = vcombine.high %v518_v3, %v534_v4 }
 0x227   :  { %9585 = vmatprep.subr.bf16.mxu1 %v13677_v13  ;;  %v12433_v13 = vcombine.high %v549_v7, %v565_v8 }
 0x228   :  { %9707 = vmatpush1.bf16.msra.mxu0 %v13646_v15  ;;  %v581_v15 = vld [vmem:[#allocation13 + $0x610] sm:$0xff] }
 0x229   :  { %9708 = vmatprep.subr.bf16.mxu0 %v13679_v18  ;;  %v597_v18 = vld [vmem:[#allocation13 + $0x690] sm:$0xff] }
 0x22a   :  { %9586 = vmatpush1.bf16.msra.mxu1 %v13676_v21  ;;  %v12432_v21 = vcombine.low %v549_v7, %v565_v8 }
 0x22b   :  { %9587 = vmatprep.subr.bf16.mxu1 %v9387_v23  ;;  %v598_v23 = vld [vmem:[#allocation13 + $0x698] sm:$0xff] }
 0x22c   :  { %9709 = vmatpush1.bf16.msra.mxu0 %v13678_v24  ;;  %v12465_v24 = vcombine.high %v581_v15, %v597_v18 }
 0x22d   :  { %9710 = vmatprep.subr.bf16.mxu0 %v9393_v58  ;;  %v12467_v58 = vcombine.high %v582_v22, %v598_v23 }
 0x22e   :  { %9588 = vmatpush1.bf16.msra.mxu1 %v9384_v30  ;;  %v12464_v30 = vcombine.low %v581_v15, %v597_v18 }
 0x22f   :  { %9725 = vmatprep.subr.bf16.mxu1 %v12273_v34  ;;  %v12497_v34 = vcombine.high %v613_v27, %v629_v28 }
 0x230   :  { %9711 = vmatpush1.bf16.msra.mxu0 %v9390_v35  ;;  %v12466_v35 = vcombine.low %v582_v22, %v598_v23 }
 0x231   :  { %9594 = vmatmul.mubr.bf16.vlgmr.msra.gmra.mrb[0].mxu1 %v15075_v39  ;;  %9848 = vmatprep.subr.bf16.mxu0 %v12275_v40  ;;  %v12499_v40 = vcombine.high %v614_v31, %v630_v33 }
 0x232   :  { %9726 = vmatpush1.bf16.msra.mxu1 %v12272_v41  ;;  %9757 = vmatprep.mubr.bf16.mxu1 %v15033_v62  ;;  %v12496_v41 = vcombine.low %v613_v27, %v629_v28 }
 0x233   :  { %9717 = vmatmul.mubr.bf16.vlgmr.msra.gmra.mrb[4].mxu0 %v15075_v39  ;;  %9727 = vmatprep.subr.bf16.mxu1 %v12305_v43  ;;  %v12529_v43 = vcombine.high %v645_v36, %v661_v38 }
 0x234   :  { %9849 = vmatpush1.bf16.msra.mxu0 %v12274_v44  ;;  %9880 = vmatprep.mubr.bf16.mxu0 %v15033_v62  ;;  %v12498_v44 = vcombine.low %v614_v31, %v630_v33 }
 0x235   :  { %9850 = vmatprep.subr.bf16.mxu0 %v12307_v47  ;;  %v12531_v47 = vcombine.high %v646_v16, %v662_v42 }
 0x236   :  { %9728 = vmatpush1.bf16.msra.mxu1 %v12304_v48  ;;  %v12528_v48 = vcombine.low %v645_v36, %v661_v38 }
 0x237   :  { %9729 = vmatprep.subr.bf16.mxu1 %v12337_v50 }
 0x238   :  { %9851 = vmatpush1.bf16.msra.mxu0 %v12306_v51  ;;  %v12561_v51 = vcombine.high %v677_v45, %v693_v46 }
 0x239   :  { %9852 = vmatprep.subr.bf16.mxu0 %v12339_v54  ;;  %v709_v54 = vld [vmem:[#allocation13 + $0xa10] sm:$0xff] }
 0x23a   :  { %9730 = vmatpush1.bf16.msra.mxu1 %v12336_v55  ;;  %v725_v55 = vld [vmem:[#allocation13 + $0xa90] sm:$0xff] }
 0x23b   :  { %9731 = vmatprep.subr.bf16.mxu1 %v12369_v59  ;;  %v710_v59 = vld [vmem:[#allocation13 + $0xa18] sm:$0xff]  ;;  %v12593_v61 = vcombine.high %v709_v54, %v725_v55  ;;  %v12592_v4 = vcombine.low %v709_v54, %v725_v55  ;;  %v933_v55 = vld [vmem:[#allocation13 + $0x1110] sm:$0xff] }
 0x23c   :  { %9853 = vmatpush1.bf16.msra.mxu0 %v12338_v60  ;;  %v726_v60 = vld [vmem:[#allocation13 + $0xa98] sm:$0xff] }
 0x23d   :  { %9854 = vmatprep.subr.bf16.mxu0 %v12371_v0  ;;  %v741_v0 = vld [vmem:[#allocation13 + $0xb10] sm:$0xff]  ;;  %v12595_v3 = vcombine.high %v710_v59, %v726_v60  ;;  %v12594_v8 = vcombine.low %v710_v59, %v726_v60  ;;  %v934_v60 = vld [vmem:[#allocation13 + $0x1118] sm:$0xff] }
 0x23e   :  { %9732 = vmatpush1.bf16.msra.mxu1 %v12368_v2  ;;  %v757_v2 = vld [vmem:[#allocation13 + $0xb90] sm:$0xff] }
 0x23f   :  { %9733 = vmatprep.subr.bf16.mxu1 %v12401_v5  ;;  %v742_v5 = vld [vmem:[#allocation13 + $0xb18] sm:$0xff]  ;;  %v12625_v7 = vcombine.high %v741_v0, %v757_v2  ;;  %v12624_v12 = vcombine.low %v741_v0, %v757_v2  ;;  %v965_v2 = vld [vmem:[#allocation13 + $0x1210] sm:$0xff] }
 0x240   :  { %9855 = vmatpush1.bf16.msra.mxu0 %v12370_v6  ;;  %v758_v6 = vld [vmem:[#allocation13 + $0xb98] sm:$0xff] }
 0x241   :  { %9856 = vmatprep.subr.bf16.mxu0 %v12403_v9  ;;  %v773_v9 = vld [vmem:[#allocation13 + $0xc10] sm:$0xff]  ;;  %v12627_v11 = vcombine.high %v742_v5, %v758_v6  ;;  %v12626_v18 = vcombine.low %v742_v5, %v758_v6  ;;  %v966_v6 = vld [vmem:[#allocation13 + $0x1218] sm:$0xff] }
 0x242   :  { %9734 = vmatpush1.bf16.msra.mxu1 %v12400_v10  ;;  %v789_v10 = vld [vmem:[#allocation13 + $0xc90] sm:$0xff] }
 0x243   :  { %9735 = vmatprep.subr.bf16.mxu1 %v12433_v13  ;;  %v774_v13 = vld [vmem:[#allocation13 + $0xc18] sm:$0xff]  ;;  %v12657_v15 = vcombine.high %v773_v9, %v789_v10  ;;  %v12656_v23 = vcombine.low %v773_v9, %v789_v10  ;;  %v997_v10 = vld [vmem:[#allocation13 + $0x1310] sm:$0xff] }
 0x244   :  { %9857 = vmatpush1.bf16.msra.mxu0 %v12402_v14  ;;  %v790_v14 = vld [vmem:[#allocation13 + $0xc98] sm:$0xff] }
 0x245   :  { %9858 = vmatprep.subr.bf16.mxu0 %v12435_v19  ;;  %v805_v19 = vld [vmem:[#allocation13 + $0xd10] sm:$0xff]  ;;  %v12659_v22 = vcombine.high %v774_v13, %v790_v14  ;;  %v12658_v28 = vcombine.low %v774_v13, %v790_v14  ;;  %v998_v14 = vld [vmem:[#allocation13 + $0x1318] sm:$0xff] }
 0x246   :  { %9736 = vmatpush1.bf16.msra.mxu1 %v12432_v21  ;;  %v821_v21 = vld [vmem:[#allocation13 + $0xd90] sm:$0xff] }
 0x247   :  { %9737 = vmatprep.subr.bf16.mxu1 %v12465_v24  ;;  %v806_v24 = vld [vmem:[#allocation13 + $0xd18] sm:$0xff]  ;;  %v12689_v27 = vcombine.high %v805_v19, %v821_v21  ;;  %v12688_v33 = vcombine.low %v805_v19, %v821_v21  ;;  %v1029_v21 = vld [vmem:[#allocation13 + $0x1410] sm:$0xff] }
 0x248   :  { %9859 = vmatpush1.bf16.msra.mxu0 %v12434_v26  ;;  %v822_v26 = vld [vmem:[#allocation13 + $0xd98] sm:$0xff] }
 0x249   :  { %9860 = vmatprep.subr.bf16.mxu0 %v12467_v58  ;;  %v837_v58 = vld [vmem:[#allocation13 + $0xe10] sm:$0xff]  ;;  %v12691_v31 = vcombine.high %v806_v24, %v822_v26  ;;  %v12690_v38 = vcombine.low %v806_v24, %v822_v26  ;;  %v1030_v26 = vld [vmem:[#allocation13 + $0x1418] sm:$0xff] }
 0x24a   :  { %9738 = vmatpush1.bf16.msra.mxu1 %v12464_v30  ;;  %v853_v30 = vld [vmem:[#allocation13 + $0xe90] sm:$0xff] }
 0x24b   :  { %9739 = vmatprep.subr.bf16.mxu1 %v12497_v34  ;;  %v838_v34 = vld [vmem:[#allocation13 + $0xe18] sm:$0xff]  ;;  %v12721_v36 = vcombine.high %v837_v58, %v853_v30  ;;  %v12720_v42 = vcombine.low %v837_v58, %v853_v30  ;;  %v1061_v30 = vld [vmem:[#allocation13 + $0x1510] sm:$0xff] }
 0x24c   :  { %9861 = vmatpush1.bf16.msra.mxu0 %v12466_v35  ;;  %v854_v35 = vld [vmem:[#allocation13 + $0xe98] sm:$0xff] }
 0x24d   :  { %9862 = vmatprep.subr.bf16.mxu0 %v12499_v40  ;;  %v869_v40 = vld [vmem:[#allocation13 + $0xf10] sm:$0xff]  ;;  %v12723_v16 = vcombine.high %v838_v34, %v854_v35  ;;  %v12722_v46 = vcombine.low %v838_v34, %v854_v35  ;;  %v1062_v35 = vld [vmem:[#allocation13 + $0x1518] sm:$0xff] }
 0x24e   :  { %9740 = vmatpush1.bf16.msra.mxu1 %v12496_v41  ;;  %v15081_v50 = vpop.f32.mrb[0].mxu0  ;;  %v885_v41 = vld [vmem:[#allocation13 + $0xf90] sm:$0xff] }
 0x24f   :  { %9741 = vmatprep.subr.bf16.mxu1 %v12529_v43  ;;  %v13885_v52 = vpop.f32.mrb[1].mxu0  ;;  %v870_v43 = vld [vmem:[#allocation13 + $0xf18] sm:$0xff]  ;;  %v12753_v45 = vcombine.high %v869_v40, %v885_v41  ;;  %v12752_v29 = vcombine.low %v869_v40, %v885_v41  ;;  %v1093_v41 = vld [vmem:[#allocation13 + $0x1610] sm:$0xff] }
 0x250   :  { %9863 = vmatpush1.bf16.msra.mxu0 %v12498_v44  ;;  %v886_v44 = vld [vmem:[#allocation13 + $0xf98] sm:$0xff] }
 0x251   :  { %9864 = vmatprep.subr.bf16.mxu0 %v12531_v47  ;;  %v901_v47 = vld [vmem:[#allocation13 + $0x1010] sm:$0xff]  ;;  %v12755_v49 = vcombine.high %v870_v43, %v886_v44  ;;  %v918_v52 = vld [vmem:[#allocation13 + $0x1098] sm:$0xff]  ;;  %v12754_v54 = vcombine.low %v870_v43, %v886_v44 }
 0x252   :  { %9742 = vmatpush1.bf16.msra.mxu1 %v12528_v48  ;;  %v917_v48 = vld [vmem:[#allocation13 + $0x1090] sm:$0xff]  ;;  %v1094_v44 = vld [vmem:[#allocation13 + $0x1618] sm:$0xff] }
 0x253   :  { %9743 = vmatprep.subr.bf16.mxu1 %v12561_v51  ;;  %v902_v51 = vld [vmem:[#allocation13 + $0x1018] sm:$0xff]  ;;  %v12784_v59 = vcombine.low %v901_v47, %v917_v48 }
 0x254   :  { %9865 = vmatpush1.bf16.msra.mxu0 %v12530_v53  ;;  %v12785_v53 = vcombine.high %v901_v47, %v917_v48  ;;  %v12786_v0 = vcombine.low %v902_v51, %v918_v52  ;;  %v1125_v48 = vld [vmem:[#allocation13 + $0x1710] sm:$0xff] }
 0x255   :  { %9866 = vmatprep.subr.bf16.mxu0 %v12563_v56  ;;  %v949_v56 = vld [vmem:[#allocation13 + $0x1190] sm:$0xff] }
 0x256   :  { %9744 = vmatpush1.bf16.msra.mxu1 %v12560_v57  ;;  %v12787_v57 = vcombine.high %v902_v51, %v918_v52  ;;  %v12816_v5 = vcombine.low %v933_v55, %v949_v56  ;;  %v1126_v52 = vld [vmem:[#allocation13 + $0x1718] sm:$0xff] }
 0x257   :  { %9745 = vmatprep.subr.bf16.mxu1 %v12593_v61  ;;  %v950_v61 = vld [vmem:[#allocation13 + $0x1198] sm:$0xff] }
 0x258   :  { %9867 = vmatpush1.bf16.msra.mxu0 %v12562_v63  ;;  %v12817_v63 = vcombine.high %v933_v55, %v949_v56  ;;  %v12818_v9 = vcombine.low %v934_v60, %v950_v61  ;;  %v1157_v56 = vld [vmem:[#allocation13 + $0x1810] sm:$0xff] }
 0x259   :  { %9868 = vmatprep.subr.bf16.mxu0 %v12595_v3  ;;  %v981_v3 = vld [vmem:[#allocation13 + $0x1290] sm:$0xff] }
 0x25a   :  { %9746 = vmatpush1.bf16.msra.mxu1 %v12592_v4  ;;  %v12819_v4 = vcombine.high %v934_v60, %v950_v61  ;;  %v12848_v13 = vcombine.low %v965_v2, %v981_v3  ;;  %v1158_v61 = vld [vmem:[#allocation13 + $0x1818] sm:$0xff] }
 0x25b   :  { %9747 = vmatprep.subr.bf16.mxu1 %v12625_v7  ;;  %v982_v7 = vld [vmem:[#allocation13 + $0x1298] sm:$0xff] }
 0x25c   :  { %9869 = vmatpush1.bf16.msra.mxu0 %v12594_v8  ;;  %v12849_v8 = vcombine.high %v965_v2, %v981_v3  ;;  %v12850_v19 = vcombine.low %v966_v6, %v982_v7  ;;  %v1189_v3 = vld [vmem:[#allocation13 + $0x1910] sm:$0xff] }
 0x25d   :  { %9870 = vmatprep.subr.bf16.mxu0 %v12627_v11  ;;  %v1013_v11 = vld [vmem:[#allocation13 + $0x1390] sm:$0xff] }
 0x25e   :  { %9748 = vmatpush1.bf16.msra.mxu1 %v12624_v12  ;;  %v12851_v12 = vcombine.high %v966_v6, %v982_v7  ;;  %v12880_v24 = vcombine.low %v997_v10, %v1013_v11  ;;  %v1190_v7 = vld [vmem:[#allocation13 + $0x1918] sm:$0xff] }
 0x25f   :  { %9749 = vmatprep.subr.bf16.mxu1 %v12657_v15  ;;  %v1014_v15 = vld [vmem:[#allocation13 + $0x1398] sm:$0xff] }
 0x260   :  { %9871 = vmatpush1.bf16.msra.mxu0 %v12626_v18  ;;  %v12881_v18 = vcombine.high %v997_v10, %v1013_v11  ;;  %v12882_v58 = vcombine.low %v998_v14, %v1014_v15  ;;  %v1221_v11 = vld [vmem:[#allocation13 + $0x1a10] sm:$0xff] }
 0x261   :  { %9872 = vmatprep.subr.bf16.mxu0 %v12659_v22  ;;  %v1045_v22 = vld [vmem:[#allocation13 + $0x1490] sm:$0xff] }
 0x262   :  { %9750 = vmatpush1.bf16.msra.mxu1 %v12656_v23  ;;  %v12883_v23 = vcombine.high %v998_v14, %v1014_v15  ;;  %v12912_v34 = vcombine.low %v1029_v21, %v1045_v22  ;;  %v1222_v15 = vld [vmem:[#allocation13 + $0x1a18] sm:$0xff] }
 0x263   :  { %9751 = vmatprep.subr.bf16.mxu1 %v12689_v27  ;;  %v1046_v27 = vld [vmem:[#allocation13 + $0x1498] sm:$0xff] }
 0x264   :  { %9873 = vmatpush1.bf16.msra.mxu0 %v12658_v28  ;;  %v12913_v28 = vcombine.high %v1029_v21, %v1045_v22  ;;  %v12914_v40 = vcombine.low %v1030_v26, %v1046_v27  ;;  %v1253_v22 = vld [vmem:[#allocation13 + $0x1b10] sm:$0xff] }
 0x265   :  { %9874 = vmatprep.subr.bf16.mxu0 %v12691_v31  ;;  %v1077_v31 = vld [vmem:[#allocation13 + $0x1590] sm:$0xff] }
 0x266   :  { %9752 = vmatpush1.bf16.msra.mxu1 %v12688_v33  ;;  %v12915_v33 = vcombine.high %v1030_v26, %v1046_v27  ;;  %v12944_v43 = vcombine.low %v1061_v30, %v1077_v31  ;;  %v1254_v27 = vld [vmem:[#allocation13 + $0x1b18] sm:$0xff] }
 0x267   :  { %9753 = vmatprep.subr.bf16.mxu1 %v12721_v36  ;;  %v1078_v36 = vld [vmem:[#allocation13 + $0x1598] sm:$0xff] }
 0x268   :  { %9875 = vmatpush1.bf16.msra.mxu0 %v12690_v38  ;;  %v12945_v38 = vcombine.high %v1061_v30, %v1077_v31  ;;  %v12946_v47 = vcombine.low %v1062_v35, %v1078_v36  ;;  %v1285_v31 = vld [vmem:[#allocation13 + $0x1c10] sm:$0xff] }
 0x269   :  { %9876 = vmatprep.subr.bf16.mxu0 %v12723_v16  ;;  %v1109_v16 = vld [vmem:[#allocation13 + $0x1690] sm:$0xff] }
 0x26a   :  { %9754 = vmatpush1.bf16.msra.mxu1 %v12720_v42  ;;  %v12947_v42 = vcombine.high %v1062_v35, %v1078_v36  ;;  %v12976_v51 = vcombine.low %v1093_v41, %v1109_v16  ;;  %v1286_v36 = vld [vmem:[#allocation13 + $0x1c18] sm:$0xff] }
 0x26b   :  { %9755 = vmatprep.subr.bf16.mxu1 %v12753_v45  ;;  %v1110_v45 = vld [vmem:[#allocation13 + $0x1698] sm:$0xff] }
 0x26c   :  { %9877 = vmatpush1.bf16.msra.mxu0 %v12722_v46  ;;  %v12977_v46 = vcombine.high %v1093_v41, %v1109_v16  ;;  %v12978_v55 = vcombine.low %v1094_v44, %v1110_v45  ;;  %v1317_v16 = vld [vmem:[#allocation13 + $0x1d10] sm:$0xff] }
 0x26d   :  { %9878 = vmatprep.subr.bf16.mxu0 %v12755_v49  ;;  %v1141_v49 = vld [vmem:[#allocation13 + $0x1790] sm:$0xff] }
 0x26e   :  { %9756 = vmatpush1.bf16.msra.mxu1 %v12752_v29  ;;  %v12979_v29 = vcombine.high %v1094_v44, %v1110_v45  ;;  %v13008_v60 = vcombine.low %v1125_v48, %v1141_v49  ;;  %v1318_v45 = vld [vmem:[#allocation13 + $0x1d18] sm:$0xff] }
 0x26f   :  { %9766 = vmatprep.subr.bf16.mxu1 %v12785_v53  ;;  %v1142_v53 = vld [vmem:[#allocation13 + $0x1798] sm:$0xff] }
 0x270   :  { %9879 = vmatpush1.bf16.msra.mxu0 %v12754_v54  ;;  %v13009_v54 = vcombine.high %v1125_v48, %v1141_v49  ;;  %v13010_v2 = vcombine.low %v1126_v52, %v1142_v53  ;;  %v1349_v49 = vld [vmem:[#allocation13 + $0x1e10] sm:$0xff] }
 0x271   :  { %9758 = vmatmul.mubr.bf16.vlgmr.msra.gmra.mrb[4].mxu1 %v15041_v20  ;;  %9889 = vmatprep.subr.bf16.mxu0 %v12787_v57  ;;  %v1173_v57 = vld [vmem:[#allocation13 + $0x1890] sm:$0xff] }
 0x272   :  { %9767 = vmatpush1.bf16.msra.mxu1 %v12784_v59  ;;  %9798 = vmatprep.mubr.bf16.mxu1 %v15045_v25  ;;  %v13011_v59 = vcombine.high %v1126_v52, %v1142_v53  ;;  %v13040_v6 = vcombine.low %v1157_v56, %v1173_v57  ;;  %v1350_v53 = vld [vmem:[#allocation13 + $0x1e18] sm:$0xff] }
 0x273   :  { %9768 = vmatprep.subr.bf16.mxu1 %v12817_v63  ;;  %9881 = vmatmul.mubr.bf16.vlgmr.msra.gmra.mrb[8].mxu0 %v15041_v20  ;;  %v1174_v63 = vld [vmem:[#allocation13 + $0x1898] sm:$0xff] }
 0x274   :  { %9890 = vmatpush1.bf16.msra.mxu0 %v12786_v0  ;;  %9921 = vmatprep.mubr.bf16.mxu0 %v15045_v25  ;;  %v13041_v0 = vcombine.high %v1157_v56, %v1173_v57  ;;  %v13042_v10 = vcombine.low %v1158_v61, %v1174_v63  ;;  %v1381_v57 = vld [vmem:[#allocation13 + $0x1f10] sm:$0xff] }
 0x275   :  { %9891 = vmatprep.subr.bf16.mxu0 %v12819_v4  ;;  %v1205_v4 = vld [vmem:[#allocation13 + $0x1990] sm:$0xff] }
 0x276   :  { %9769 = vmatpush1.bf16.msra.mxu1 %v12816_v5  ;;  %v13043_v5 = vcombine.high %v1158_v61, %v1174_v63  ;;  %v13072_v14 = vcombine.low %v1189_v3, %v1205_v4  ;;  %v1382_v63 = vld [vmem:[#allocation13 + $0x1f18] sm:$0xff] }
 0x277   :  { %9770 = vmatprep.subr.bf16.mxu1 %v12849_v8  ;;  %v1206_v8 = vld [vmem:[#allocation13 + $0x1998] sm:$0xff] }
 0x278   :  { %9892 = vmatpush1.bf16.msra.mxu0 %v12818_v9  ;;  %v13073_v9 = vcombine.high %v1189_v3, %v1205_v4  ;;  %v13074_v21 = vcombine.low %v1190_v7, %v1206_v8  ;;  %v1413_v4 = vld [vmem:[#allocation13 + $0x2010] sm:$0xff] }
 0x279   :  { %9893 = vmatprep.subr.bf16.mxu0 %v12851_v12  ;;  %v1237_v12 = vld [vmem:[#allocation13 + $0x1a90] sm:$0xff] }
 0x27a   :  { %9771 = vmatpush1.bf16.msra.mxu1 %v12848_v13  ;;  %v13075_v13 = vcombine.high %v1190_v7, %v1206_v8  ;;  %v13104_v26 = vcombine.low %v1221_v11, %v1237_v12  ;;  %v1414_v8 = vld [vmem:[#allocation13 + $0x2018] sm:$0xff] }
 0x27b   :  { %9772 = vmatprep.subr.bf16.mxu1 %v12881_v18  ;;  %v1238_v18 = vld [vmem:[#allocation13 + $0x1a98] sm:$0xff] }
 0x27c   :  { %9894 = vmatpush1.bf16.msra.mxu0 %v12850_v19  ;;  %v13105_v19 = vcombine.high %v1221_v11, %v1237_v12  ;;  %v13106_v30 = vcombine.low %v1222_v15, %v1238_v18  ;;  %v1445_v12 = vld [vmem:[#allocation13 + $0x2110] sm:$0xff] }
 0x27d   :  { %9895 = vmatprep.subr.bf16.mxu0 %v12883_v23  ;;  %v1269_v23 = vld [vmem:[#allocation13 + $0x1b90] sm:$0xff] }
 0x27e   :  { %9773 = vmatpush1.bf16.msra.mxu1 %v12880_v24  ;;  %v13107_v24 = vcombine.high %v1222_v15, %v1238_v18  ;;  %v13136_v35 = vcombine.low %v1253_v22, %v1269_v23  ;;  %v1446_v18 = vld [vmem:[#allocation13 + $0x2118] sm:$0xff] }
 0x27f   :  { %9774 = vmatprep.subr.bf16.mxu1 %v12913_v28  ;;  %v1270_v28 = vld [vmem:[#allocation13 + $0x1b98] sm:$0xff] }
 0x280   :  { %9896 = vmatpush1.bf16.msra.mxu0 %v12882_v58  ;;  %v13137_v58 = vcombine.high %v1253_v22, %v1269_v23  ;;  %v13138_v41 = vcombine.low %v1254_v27, %v1270_v28  ;;  %v1477_v23 = vld [vmem:[#allocation13 + $0x2210] sm:$0xff] }
 0x281   :  { %9897 = vmatprep.subr.bf16.mxu0 %v12915_v33  ;;  %v1301_v33 = vld [vmem:[#allocation13 + $0x1c90] sm:$0xff] }
 0x282   :  { %9775 = vmatpush1.bf16.msra.mxu1 %v12912_v34  ;;  %v13139_v34 = vcombine.high %v1254_v27, %v1270_v28  ;;  %v13168_v44 = vcombine.low %v1285_v31, %v1301_v33  ;;  %v1478_v28 = vld [vmem:[#allocation13 + $0x2218] sm:$0xff] }
 0x283   :  { %9776 = vmatprep.subr.bf16.mxu1 %v12945_v38  ;;  %v1302_v38 = vld [vmem:[#allocation13 + $0x1c98] sm:$0xff] }
 0x284   :  { %9898 = vmatpush1.bf16.msra.mxu0 %v12914_v40  ;;  %v13169_v40 = vcombine.high %v1285_v31, %v1301_v33  ;;  %v13170_v48 = vcombine.low %v1286_v36, %v1302_v38  ;;  %v1509_v33 = vld [vmem:[#allocation13 + $0x2310] sm:$0xff] }
 0x285   :  { %9899 = vmatprep.subr.bf16.mxu0 %v12947_v42  ;;  %v1333_v42 = vld [vmem:[#allocation13 + $0x1d90] sm:$0xff] }
 0x286   :  { %9777 = vmatpush1.bf16.msra.mxu1 %v12944_v43  ;;  %v13171_v43 = vcombine.high %v1286_v36, %v1302_v38  ;;  %v13200_v52 = vcombine.low %v1317_v16, %v1333_v42  ;;  %v1510_v38 = vld [vmem:[#allocation13 + $0x2318] sm:$0xff] }
 0x287   :  { %9778 = vmatprep.subr.bf16.mxu1 %v12977_v46  ;;  %v1334_v46 = vld [vmem:[#allocation13 + $0x1d98] sm:$0xff] }
 0x288   :  { %9900 = vmatpush1.bf16.msra.mxu0 %v12946_v47  ;;  %v13201_v47 = vcombine.high %v1317_v16, %v1333_v42  ;;  %v13202_v56 = vcombine.low %v1318_v45, %v1334_v46  ;;  %v1541_v42 = vld [vmem:[#allocation13 + $0x2410] sm:$0xff] }
 0x289   :  { %9901 = vmatprep.subr.bf16.mxu0 %v12979_v29  ;;  %v1365_v29 = vld [vmem:[#allocation13 + $0x1e90] sm:$0xff] }
 0x28a   :  { %9779 = vmatpush1.bf16.msra.mxu1 %v12976_v51  ;;  %v13203_v51 = vcombine.high %v1318_v45, %v1334_v46  ;;  %v13232_v61 = vcombine.low %v1349_v49, %v1365_v29  ;;  %v1542_v46 = vld [vmem:[#allocation13 + $0x2418] sm:$0xff] }
 0x28b   :  { %9780 = vmatprep.subr.bf16.mxu1 %v13009_v54  ;;  %v1366_v54 = vld [vmem:[#allocation13 + $0x1e98] sm:$0xff] }
 0x28c   :  { %9902 = vmatpush1.bf16.msra.mxu0 %v12978_v55  ;;  %v13233_v55 = vcombine.high %v1349_v49, %v1365_v29  ;;  %v13234_v3 = vcombine.low %v1350_v53, %v1366_v54  ;;  %v1573_v29 = vld [vmem:[#allocation13 + $0x2510] sm:$0xff] }
 0x28d   :  { %9903 = vmatprep.subr.bf16.mxu0 %v13011_v59  ;;  %v1397_v59 = vld [vmem:[#allocation13 + $0x1f90] sm:$0xff] }
 0x28e   :  { %9781 = vmatpush1.bf16.msra.mxu1 %v13008_v60  ;;  %v13235_v60 = vcombine.high %v1350_v53, %v1366_v54  ;;  %v13264_v7 = vcombine.low %v1381_v57, %v1397_v59  ;;  %v1574_v54 = vld [vmem:[#allocation13 + $0x2518] sm:$0xff] }
 0x28f   :  { %9782 = vmatprep.subr.bf16.mxu1 %v13041_v0  ;;  %v1398_v0 = vld [vmem:[#allocation13 + $0x1f98] sm:$0xff] }
 0x290   :  { %9904 = vmatpush1.bf16.msra.mxu0 %v13010_v2  ;;  %v13265_v2 = vcombine.high %v1381_v57, %v1397_v59  ;;  %v13266_v11 = vcombine.low %v1382_v63, %v1398_v0  ;;  %v1605_v59 = vld [vmem:[#allocation13 + $0x2610] sm:$0xff] }
 0x291   :  { %9905 = vmatprep.subr.bf16.mxu0 %v13043_v5  ;;  %v1429_v5 = vld [vmem:[#allocation13 + $0x2090] sm:$0xff] }
 0x292   :  { %9783 = vmatpush1.bf16.msra.mxu1 %v13040_v6  ;;  %v13267_v6 = vcombine.high %v1382_v63, %v1398_v0  ;;  %v13296_v15 = vcombine.low %v1413_v4, %v1429_v5  ;;  %v1606_v0 = vld [vmem:[#allocation13 + $0x2618] sm:$0xff] }
 0x293   :  { %9784 = vmatprep.subr.bf16.mxu1 %v13073_v9  ;;  %v1430_v9 = vld [vmem:[#allocation13 + $0x2098] sm:$0xff] }
 0x294   :  { %9906 = vmatpush1.bf16.msra.mxu0 %v13042_v10  ;;  %v13297_v10 = vcombine.high %v1413_v4, %v1429_v5  ;;  %v13298_v22 = vcombine.low %v1414_v8, %v1430_v9  ;;  %v1637_v5 = vld [vmem:[#allocation13 + $0x2710] sm:$0xff] }
 0x295   :  { %9907 = vmatprep.subr.bf16.mxu0 %v13075_v13  ;;  %v1461_v13 = vld [vmem:[#allocation13 + $0x2190] sm:$0xff] }
 0x296   :  { %9785 = vmatpush1.bf16.msra.mxu1 %v13072_v14  ;;  %v13299_v14 = vcombine.high %v1414_v8, %v1430_v9  ;;  %v13328_v27 = vcombine.low %v1445_v12, %v1461_v13  ;;  %v1638_v9 = vld [vmem:[#allocation13 + $0x2718] sm:$0xff] }
 0x297   :  { %9786 = vmatprep.subr.bf16.mxu1 %v13105_v19  ;;  %v1462_v19 = vld [vmem:[#allocation13 + $0x2198] sm:$0xff] }
 0x298   :  { %9908 = vmatpush1.bf16.msra.mxu0 %v13074_v21  ;;  %v13329_v21 = vcombine.high %v1445_v12, %v1461_v13  ;;  %v13330_v31 = vcombine.low %v1446_v18, %v1462_v19  ;;  %v1669_v13 = vld [vmem:[#allocation13 + $0x2810] sm:$0xff] }
 0x299   :  { %9909 = vmatprep.subr.bf16.mxu0 %v13107_v24  ;;  %v1493_v24 = vld [vmem:[#allocation13 + $0x2290] sm:$0xff] }
 0x29a   :  { %9787 = vmatpush1.bf16.msra.mxu1 %v13104_v26  ;;  %v13331_v26 = vcombine.high %v1446_v18, %v1462_v19  ;;  %v13360_v36 = vcombine.low %v1477_v23, %v1493_v24  ;;  %v1670_v19 = vld [vmem:[#allocation13 + $0x2818] sm:$0xff] }
 0x29b   :  { %9788 = vmatprep.subr.bf16.mxu1 %v13137_v58  ;;  %v1494_v58 = vld [vmem:[#allocation13 + $0x2298] sm:$0xff] }
 0x29c   :  { %9910 = vmatpush1.bf16.msra.mxu0 %v13106_v30  ;;  %v13361_v30 = vcombine.high %v1477_v23, %v1493_v24  ;;  %v13362_v16 = vcombine.low %v1478_v28, %v1494_v58  ;;  %v1701_v24 = vld [vmem:[#allocation13 + $0x2910] sm:$0xff] }
 0x29d   :  { %9911 = vmatprep.subr.bf16.mxu0 %v13139_v34  ;;  %v1525_v34 = vld [vmem:[#allocation13 + $0x2390] sm:$0xff] }
 0x29e   :  { %9789 = vmatpush1.bf16.msra.mxu1 %v13136_v35  ;;  %v13363_v35 = vcombine.high %v1478_v28, %v1494_v58  ;;  %v13392_v45 = vcombine.low %v1509_v33, %v1525_v34  ;;  %v1702_v58 = vld [vmem:[#allocation13 + $0x2918] sm:$0xff] }
 0x29f   :  { %9790 = vmatprep.subr.bf16.mxu1 %v13169_v40  ;;  %v1526_v40 = vld [vmem:[#allocation13 + $0x2398] sm:$0xff] }
 0x2a0   :  { %9912 = vmatpush1.bf16.msra.mxu0 %v13138_v41  ;;  %v13393_v41 = vcombine.high %v1509_v33, %v1525_v34  ;;  %v13394_v49 = vcombine.low %v1510_v38, %v1526_v40  ;;  %v1733_v34 = vld [vmem:[#allocation13 + $0x2a10] sm:$0xff] }
 0x2a1   :  { %9913 = vmatprep.subr.bf16.mxu0 %v13171_v43  ;;  %v1557_v43 = vld [vmem:[#allocation13 + $0x2490] sm:$0xff] }
 0x2a2   :  { %9791 = vmatpush1.bf16.msra.mxu1 %v13168_v44  ;;  %v13395_v44 = vcombine.high %v1510_v38, %v1526_v40  ;;  %v13424_v53 = vcombine.low %v1541_v42, %v1557_v43  ;;  %v1734_v40 = vld [vmem:[#allocation13 + $0x2a18] sm:$0xff] }
 0x2a3   :  { %9792 = vmatprep.subr.bf16.mxu1 %v13201_v47  ;;  %v1558_v47 = vld [vmem:[#allocation13 + $0x2498] sm:$0xff] }
 0x2a4   :  { %9914 = vmatpush1.bf16.msra.mxu0 %v13170_v48  ;;  %v13425_v48 = vcombine.high %v1541_v42, %v1557_v43  ;;  %v13426_v57 = vcombine.low %v1542_v46, %v1558_v47  ;;  %v1765_v43 = vld [vmem:[#allocation13 + $0x2b10] sm:$0xff] }
 0x2a5   :  { %9915 = vmatprep.subr.bf16.mxu0 %v13203_v51  ;;  %v1589_v51 = vld [vmem:[#allocation13 + $0x2590] sm:$0xff] }
 0x2a6   :  { %9793 = vmatpush1.bf16.msra.mxu1 %v13200_v52  ;;  %v13427_v52 = vcombine.high %v1542_v46, %v1558_v47  ;;  %v13456_v63 = vcombine.low %v1573_v29, %v1589_v51  ;;  %v1766_v47 = vld [vmem:[#allocation13 + $0x2b18] sm:$0xff] }
 0x2a7   :  { %9794 = vmatprep.subr.bf16.mxu1 %v13233_v55  ;;  %v1590_v55 = vld [vmem:[#allocation13 + $0x2598] sm:$0xff] }
 0x2a8   :  { %9916 = vmatpush1.bf16.msra.mxu0 %v13202_v56  ;;  %v13457_v56 = vcombine.high %v1573_v29, %v1589_v51  ;;  %v13458_v4 = vcombine.low %v1574_v54, %v1590_v55  ;;  %v1797_v29 = vld [vmem:[#allocation13 + $0x2c10] sm:$0xff] }
 0x2a9   :  { %9917 = vmatprep.subr.bf16.mxu0 %v13235_v60  ;;  %v1621_v60 = vld [vmem:[#allocation13 + $0x2690] sm:$0xff] }
 0x2aa   :  { %9795 = vmatpush1.bf16.msra.mxu1 %v13232_v61  ;;  %v13459_v61 = vcombine.high %v1574_v54, %v1590_v55  ;;  %v13488_v8 = vcombine.low %v1605_v59, %v1621_v60  ;;  %v1845_v54 = vld [vmem:[#allocation13 + $0x2d90] sm:$0x11] }
 0x2ab   :  { %9796 = vmatprep.subr.bf16.mxu1 %v13265_v2  ;;  %v1622_v2 = vld [vmem:[#allocation13 + $0x2698] sm:$0xff] }
 0x2ac   :  { %9918 = vmatpush1.bf16.msra.mxu0 %v13234_v3  ;;  %v13489_v3 = vcombine.high %v1605_v59, %v1621_v60  ;;  %v13490_v12 = vcombine.low %v1606_v0, %v1622_v2  ;;  %v1814_v59 = vld [vmem:[#allocation13 + $0x2c98] sm:$0xff] }
 0x2ad   :  { %9919 = vmatprep.subr.bf16.mxu0 %v13267_v6  ;;  %v1653_v6 = vld [vmem:[#allocation13 + $0x2790] sm:$0xff]  ;;  %v1830_v60 = vld [vmem:[#allocation13 + $0x2d18] sm:$0xff] }
 0x2ae   :  { %9797 = vmatpush1.bf16.msra.mxu1 %v13264_v7  ;;  %v13491_v7 = vcombine.high %v1606_v0, %v1622_v2  ;;  %v13520_v18 = vcombine.low %v1637_v5, %v1653_v6 }
 0x2af   :  { %9807 = vmatprep.subr.bf16.mxu1 %v13297_v10  ;;  %v1654_v10 = vld [vmem:[#allocation13 + $0x2798] sm:$0xff] }
 0x2b0   :  { %9920 = vmatpush1.bf16.msra.mxu0 %v13266_v11  ;;  %v13521_v11 = vcombine.high %v1637_v5, %v1653_v6  ;;  %v13522_v23 = vcombine.low %v1638_v9, %v1654_v10 }
 0x2b1   :  { %9799 = vmatmul.mubr.bf16.vlgmr.msra.gmra.mrb[4].mxu1 %v15055_v32  ;;  %9930 = vmatprep.subr.bf16.mxu0 %v13299_v14  ;;  %v1685_v14 = vld [vmem:[#allocation13 + $0x2890] sm:$0xff] }
 0x2b2   :  { %9808 = vmatpush1.bf16.msra.mxu1 %v13296_v15  ;;  %13742 = vmatprep.mubr.msk.bf16.mxu1 %vm9375_vm5, %v15059_v37  ;;  %v13523_v15 = vcombine.high %v1638_v9, %v1654_v10  ;;  %v13552_v28 = vcombine.low %v1669_v13, %v1685_v14  ;;  %v391_v10 = vld [vmem:[#allocation13 + $0x20] sm:$0xff] }
 0x2b3   :  { %9809 = vmatprep.subr.bf16.mxu1 %v13329_v21  ;;  %9922 = vmatmul.mubr.bf16.vlgmr.msra.gmra.mrb[8].mxu0 %v15055_v32  ;;  %v1686_v21 = vld [vmem:[#allocation13 + $0x2898] sm:$0xff] }
 0x2b4   :  { %9931 = vmatpush1.bf16.msra.mxu0 %v13298_v22  ;;  %13743 = vmatprep.mubr.msk.bf16.mxu0 %vm9375_vm5, %v15059_v37  ;;  %v13553_v22 = vcombine.high %v1669_v13, %v1685_v14  ;;  %v13554_v33 = vcombine.low %v1670_v19, %v1686_v21  ;;  %v392_v14 = vld [vmem:[#allocation13 + $0x28] sm:$0xff] }
 0x2b5   :  { %9932 = vmatprep.subr.bf16.mxu0 %v13331_v26  ;;  %v1717_v26 = vld [vmem:[#allocation13 + $0x2990] sm:$0xff] }
 0x2b6   :  { %9810 = vmatpush1.bf16.msra.mxu1 %v13328_v27  ;;  %v13555_v27 = vcombine.high %v1670_v19, %v1686_v21  ;;  %v13584_v38 = vcombine.low %v1701_v24, %v1717_v26  ;;  %v423_v21 = vld [vmem:[#allocation13 + $0x120] sm:$0xff] }
 0x2b7   :  { %9811 = vmatprep.subr.bf16.mxu1 %v13361_v30  ;;  %v1718_v30 = vld [vmem:[#allocation13 + $0x2998] sm:$0xff] }
 0x2b8   :  { %9933 = vmatpush1.bf16.msra.mxu0 %v13330_v31  ;;  %v13585_v31 = vcombine.high %v1701_v24, %v1717_v26  ;;  %v13586_v42 = vcombine.low %v1702_v58, %v1718_v30  ;;  %v424_v26 = vld [vmem:[#allocation13 + $0x128] sm:$0xff] }
 0x2b9   :  { %9934 = vmatprep.subr.bf16.mxu0 %v13363_v35  ;;  %v1749_v35 = vld [vmem:[#allocation13 + $0x2a90] sm:$0xff] }
 0x2ba   :  { %9812 = vmatpush1.bf16.msra.mxu1 %v13360_v36  ;;  %v13587_v36 = vcombine.high %v1702_v58, %v1718_v30  ;;  %v13616_v46 = vcombine.low %v1733_v34, %v1749_v35  ;;  %v455_v30 = vld [vmem:[#allocation13 + $0x220] sm:$0xff] }
 0x2bb   :  { %9813 = vmatprep.subr.bf16.mxu1 %v13393_v41  ;;  %v1750_v41 = vld [vmem:[#allocation13 + $0x2a98] sm:$0xff] }
 0x2bc   :  { %9935 = vmatpush1.bf16.msra.mxu0 %v13362_v16  ;;  %v13617_v16 = vcombine.high %v1733_v34, %v1749_v35  ;;  %v13618_v51 = vcombine.low %v1734_v40, %v1750_v41  ;;  %v456_v35 = vld [vmem:[#allocation13 + $0x228] sm:$0xff] }
 0x2bd   :  { %9936 = vmatprep.subr.bf16.mxu0 %v13395_v44  ;;  %v1781_v44 = vld [vmem:[#allocation13 + $0x2b90] sm:$0xff] }
 0x2be   :  { %9814 = vmatpush1.bf16.msra.mxu1 %v13392_v45  ;;  %v13619_v45 = vcombine.high %v1734_v40, %v1750_v41  ;;  %v487_v41 = vld [vmem:[#allocation13 + $0x320] sm:$0xff] }
 0x2bf   :  { %9815 = vmatprep.subr.bf16.mxu1 %v13425_v48  ;;  %v1782_v48 = vld [vmem:[#allocation13 + $0x2b98] sm:$0xff] }
 0x2c0   :  { %9937 = vmatpush1.bf16.msra.mxu0 %v13394_v49  ;;  %v13649_v49 = vcombine.high %v1765_v43, %v1781_v44  ;;  %v13651_v55 = vcombine.high %v1766_v47, %v1782_v48  ;;  %v13650_v2 = vcombine.low %v1766_v47, %v1782_v48  ;;  %v519_v48 = vld [vmem:[#allocation13 + $0x420] sm:$0xff] }
 0x2c1   :  { %9938 = vmatprep.subr.bf16.mxu0 %v13427_v52  ;;  %v1813_v52 = vld [vmem:[#allocation13 + $0x2c90] sm:$0xff] }
 0x2c2   :  { %9816 = vmatpush1.bf16.msra.mxu1 %v13424_v53  ;;  %v1829_v53 = vld [vmem:[#allocation13 + $0x2d10] sm:$0xff]  ;;  %v13680_v5 = vcombine.low %v1797_v29, %v1813_v52 }
 0x2c3   :  { %9817 = vmatprep.subr.bf16.mxu1 %v13457_v56  ;;  %v1798_v56 = vld [vmem:[#allocation13 + $0x2c18] sm:$0xff]  ;;  %v13713_v0 = vcombine.high %v1829_v53, %v1845_v54  ;;  %v13712_v6 = vcombine.low %v1829_v53, %v1845_v54  ;;  %v536_v53 = vld [vmem:[#allocation13 + $0x4a8] sm:$0xff] }
 0x2c4   :  { %9939 = vmatpush1.bf16.msra.mxu0 %v13426_v57  ;;  %v13648_v57 = vcombine.low %v1765_v43, %v1781_v44  ;;  %v488_v44 = vld [vmem:[#allocation13 + $0x328] sm:$0xff] }
 0x2c5   :  { %9940 = vmatprep.subr.bf16.mxu0 %v13459_v61  ;;  %v1846_v61 = vld [vmem:[#allocation13 + $0x2d98] sm:$0x11]  ;;  %v9396_v13 = vand.u32 %v13712_v6, %v15067_v17 }
 0x2c6   :  { %9818 = vmatpush1.bf16.msra.mxu1 %v13456_v63  ;;  %v13681_v63 = vcombine.high %v1797_v29, %v1813_v52  ;;  %v13714_v9 = vcombine.low %v1830_v60, %v1846_v61  ;;  %v520_v52 = vld [vmem:[#allocation13 + $0x428] sm:$0xff] }
 0x2c7   :  { %9819 = vmatprep.subr.bf16.mxu1 %v13489_v3  ;;  %v13683_v3 = vcombine.high %v1798_v56, %v1814_v59 }
 0x2c8   :  { %9941 = vmatpush1.bf16.msra.mxu0 %v13458_v4  ;;  %v13715_v4 = vcombine.high %v1830_v60, %v1846_v61  ;;  %v9402_v19 = vand.u32 %v13714_v9, %v15067_v17  ;;  %v552_v61 = vld [vmem:[#allocation13 + $0x528] sm:$0xff] }
 0x2c9   :  { %9942 = vmatprep.subr.bf16.mxu0 %v13491_v7  ;;  %v9399_v7 = vand.u32 %v13713_v0, %v15067_v17 }
 0x2ca   :  { %9820 = vmatpush1.bf16.msra.mxu1 %v13488_v8  ;;  %v13682_v8 = vcombine.low %v1798_v56, %v1814_v59  ;;  %v551_v56 = vld [vmem:[#allocation13 + $0x520] sm:$0xff]  ;;  %v12407_v59 = vcombine.high %v520_v52, %v536_v53 }
 0x2cb   :  { %9821 = vmatprep.subr.bf16.mxu1 %v13521_v11  ;;  %v407_v11 = vld [vmem:[#allocation13 + $0xa0] sm:$0xff] }
 0x2cc   :  { %9943 = vmatpush1.bf16.msra.mxu0 %v13490_v12  ;;  %v9405_v12 = vand.u32 %v13715_v4, %v15067_v17  ;;  %v12276_v24 = vcombine.low %v391_v10, %v407_v11  ;;  %v599_v4 = vld [vmem:[#allocation13 + $0x6a0] sm:$0xff] }
 0x2cd   :  { %9944 = vmatprep.subr.bf16.mxu0 %v13523_v15  ;;  %v408_v15 = vld [vmem:[#allocation13 + $0xa8] sm:$0xff] }
 0x2ce   :  { %9822 = vmatpush1.bf16.msra.mxu1 %v13520_v18  ;;  %v12277_v18 = vcombine.high %v391_v10, %v407_v11  ;;  %v12278_v58 = vcombine.low %v392_v14, %v408_v15  ;;  %v615_v11 = vld [vmem:[#allocation13 + $0x720] sm:$0xff] }
 0x2cf   :  { %9823 = vmatprep.subr.bf16.mxu1 %v13553_v22  ;;  %v439_v22 = vld [vmem:[#allocation13 + $0x1a0] sm:$0xff] }
 0x2d0   :  { %9945 = vmatpush1.bf16.msra.mxu0 %v13522_v23  ;;  %v12279_v23 = vcombine.high %v392_v14, %v408_v15  ;;  %v12308_v34 = vcombine.low %v423_v21, %v439_v22  ;;  %v616_v15 = vld [vmem:[#allocation13 + $0x728] sm:$0xff] }
 0x2d1   :  { %9946 = vmatprep.subr.bf16.mxu0 %v13555_v27  ;;  %v440_v27 = vld [vmem:[#allocation13 + $0x1a8] sm:$0xff] }
 0x2d2   :  { %9824 = vmatpush1.bf16.msra.mxu1 %v13552_v28  ;;  %v12309_v28 = vcombine.high %v423_v21, %v439_v22  ;;  %v12310_v40 = vcombine.low %v424_v26, %v440_v27  ;;  %v647_v22 = vld [vmem:[#allocation13 + $0x820] sm:$0xff] }
 0x2d3   :  { %9825 = vmatprep.subr.bf16.mxu1 %v13585_v31  ;;  %v471_v31 = vld [vmem:[#allocation13 + $0x2a0] sm:$0xff] }
 0x2d4   :  { %9947 = vmatpush1.bf16.msra.mxu0 %v13554_v33  ;;  %v12311_v33 = vcombine.high %v424_v26, %v440_v27  ;;  %v12340_v43 = vcombine.low %v455_v30, %v471_v31  ;;  %v648_v27 = vld [vmem:[#allocation13 + $0x828] sm:$0xff] }
 0x2d5   :  { %9948 = vmatprep.subr.bf16.mxu0 %v13587_v36  ;;  %v472_v36 = vld [vmem:[#allocation13 + $0x2a8] sm:$0xff] }
 0x2d6   :  { %9826 = vmatpush1.bf16.msra.mxu1 %v13584_v38  ;;  %v12341_v38 = vcombine.high %v455_v30, %v471_v31  ;;  %v12342_v47 = vcombine.low %v456_v35, %v472_v36 }
 0x2d7   :  { %9827 = vmatprep.subr.bf16.mxu1 %v13617_v16  ;;  %v503_v16 = vld [vmem:[#allocation13 + $0x3a0] sm:$0xff] }
 0x2d8   :  { %9949 = vmatpush1.bf16.msra.mxu0 %v13586_v42  ;;  %v12343_v42 = vcombine.high %v456_v35, %v472_v36 }
 0x2d9   :  { %9950 = vmatprep.subr.bf16.mxu0 %v13619_v45  ;;  %v504_v45 = vld [vmem:[#allocation13 + $0x3a8] sm:$0xff] }
 0x2da   :  { %9828 = vmatpush1.bf16.msra.mxu1 %v13616_v46  ;;  %v12373_v46 = vcombine.high %v487_v41, %v503_v16  ;;  %v12375_v29 = vcombine.high %v488_v44, %v504_v45 }
 0x2db   :  { %9829 = vmatprep.subr.bf16.mxu1 %v13649_v49  ;;  %v535_v49 = vld [vmem:[#allocation13 + $0x4a0] sm:$0xff] }
 0x2dc   :  { %9951 = vmatpush1.bf16.msra.mxu0 %v13618_v51  ;;  %v12372_v51 = vcombine.low %v487_v41, %v503_v16  ;;  %v12405_v54 = vcombine.high %v519_v48, %v535_v49  ;;  %v12404_v60 = vcombine.low %v519_v48, %v535_v49  ;;  %v680_v16 = vld [vmem:[#allocation13 + $0x928] sm:$0xff]  ;;  %v711_v48 = vld [vmem:[#allocation13 + $0xa20] sm:$0xff] }
 0x2dd   :  { %9952 = vmatprep.subr.bf16.mxu0 %v13651_v55  ;;  %v12374_v55 = vcombine.low %v488_v44, %v504_v45  ;;  %v727_v49 = vld [vmem:[#allocation13 + $0xaa0] sm:$0xff] }
 0x2de   :  { %9830 = vmatpush1.bf16.msra.mxu1 %v13648_v57  ;;  %v567_v57 = vld [vmem:[#allocation13 + $0x5a0] sm:$0xff] }
 0x2df   :  { %9831 = vmatprep.subr.bf16.mxu1 %v13681_v63  ;;  %v568_v63 = vld [vmem:[#allocation13 + $0x5a8] sm:$0xff]  ;;  %v12437_v0 = vcombine.high %v551_v56, %v567_v57  ;;  %v12436_v6 = vcombine.low %v551_v56, %v567_v57  ;;  %v743_v57 = vld [vmem:[#allocation13 + $0xb20] sm:$0xff] }
 0x2e0   :  { %9953 = vmatpush1.bf16.msra.mxu0 %v13650_v2  ;;  %v12406_v2 = vcombine.low %v520_v52, %v536_v53  ;;  %v12438_v10 = vcombine.low %v552_v61, %v568_v63  ;;  %v712_v53 = vld [vmem:[#allocation13 + $0xa28] sm:$0xff] }
 0x2e1   :  { %9954 = vmatprep.subr.bf16.mxu0 %v13683_v3  ;;  %v583_v3 = vld [vmem:[#allocation13 + $0x620] sm:$0xff] }
 0x2e2   :  { %9832 = vmatpush1.bf16.msra.mxu1 %v13680_v5  ;;  %v12439_v5 = vcombine.high %v552_v61, %v568_v63  ;;  %v12469_v9 = vcombine.high %v583_v3, %v599_v4  ;;  %v12468_v14 = vcombine.low %v583_v3, %v599_v4  ;;  %v12596_v61 = vcombine.low %v711_v48, %v727_v49  ;;  %v744_v63 = vld [vmem:[#allocation13 + $0xb28] sm:$0xff]  ;;  %v775_v4 = vld [vmem:[#allocation13 + $0xc20] sm:$0xff] }
 0x2e3   :  { %9833 = vmatprep.subr.bf16.mxu1 %v9399_v7  ;;  %v584_v7 = vld [vmem:[#allocation13 + $0x628] sm:$0xff] }
 0x2e4   :  { %9955 = vmatpush1.bf16.msra.mxu0 %v13682_v8  ;;  %v600_v8 = vld [vmem:[#allocation13 + $0x6a8] sm:$0xff] }
 0x2e5   :  { %9956 = vmatprep.subr.bf16.mxu0 %v9405_v12  ;;  %v631_v12 = vld [vmem:[#allocation13 + $0x7a0] sm:$0xff]  ;;  %v12470_v21 = vcombine.low %v584_v7, %v600_v8 }
 0x2e6   :  { %9834 = vmatpush1.bf16.msra.mxu1 %v9396_v13  ;;  %v12471_v13 = vcombine.high %v584_v7, %v600_v8  ;;  %v12500_v26 = vcombine.low %v615_v11, %v631_v12  ;;  %v776_v8 = vld [vmem:[#allocation13 + $0xc28] sm:$0xff] }
 0x2e7   :  { %9971 = vmatprep.subr.bf16.mxu1 %v12277_v18  ;;  %v632_v18 = vld [vmem:[#allocation13 + $0x7a8] sm:$0xff] }
 0x2e8   :  { %9957 = vmatpush1.bf16.msra.mxu0 %v9402_v19  ;;  %v12501_v19 = vcombine.high %v615_v11, %v631_v12  ;;  %v12502_v31 = vcombine.low %v616_v15, %v632_v18  ;;  %v807_v12 = vld [vmem:[#allocation13 + $0xd20] sm:$0xff] }
 0x2e9   :  { %9840 = vmatmul.mubr.bf16.vlgmr.msra.gmra.mrb[4].mxu1 %v15075_v39  ;;  %10094 = vmatprep.subr.bf16.mxu0 %v12279_v23  ;;  %v663_v23 = vld [vmem:[#allocation13 + $0x8a0] sm:$0xff] }
 0x2ea   :  { %9972 = vmatpush1.bf16.msra.mxu1 %v12276_v24  ;;  %10003 = vmatprep.mubr.bf16.mxu1 %v15033_v62  ;;  %v12503_v24 = vcombine.high %v616_v15, %v632_v18  ;;  %v12532_v41 = vcombine.low %v647_v22, %v663_v23  ;;  %v808_v18 = vld [vmem:[#allocation13 + $0xd28] sm:$0xff] }
 0x2eb   :  { %9963 = vmatmul.mubr.bf16.vlgmr.msra.gmra.mrb[8].mxu0 %v15075_v39  ;;  %9973 = vmatprep.subr.bf16.mxu1 %v12309_v28  ;;  %v664_v28 = vld [vmem:[#allocation13 + $0x8a8] sm:$0xff] }
 0x2ec   :  { %10095 = vmatpush1.bf16.msra.mxu0 %v12278_v58  ;;  %10126 = vmatprep.mubr.bf16.mxu0 %v15033_v62  ;;  %v12533_v58 = vcombine.high %v647_v22, %v663_v23  ;;  %v12535_v36 = vcombine.high %v648_v27, %v664_v28  ;;  %v839_v23 = vld [vmem:[#allocation13 + $0xe20] sm:$0xff] }
 0x2ed   :  { %10096 = vmatprep.subr.bf16.mxu0 %v12311_v33  ;;  %v679_v33 = vld [vmem:[#allocation13 + $0x920] sm:$0xff] }
 0x2ee   :  { %9974 = vmatpush1.bf16.msra.mxu1 %v12308_v34  ;;  %v695_v34 = vld [vmem:[#allocation13 + $0x9a0] sm:$0xff] }
 0x2ef   :  { %9975 = vmatprep.subr.bf16.mxu1 %v12341_v38  ;;  %v12565_v45 = vcombine.high %v679_v33, %v695_v34  ;;  %v12564_v52 = vcombine.low %v679_v33, %v695_v34  ;;  %v871_v34 = vld [vmem:[#allocation13 + $0xf20] sm:$0xff] }
 0x2f0   :  { %10097 = vmatpush1.bf16.msra.mxu0 %v12310_v40 }
 0x2f1   :  { %10098 = vmatprep.subr.bf16.mxu0 %v12343_v42  ;;  %v696_v42 = vld [vmem:[#allocation13 + $0x9a8] sm:$0xff] }
 0x2f2   :  { %9976 = vmatpush1.bf16.msra.mxu1 %v12340_v43  ;;  %v12566_v56 = vcombine.low %v680_v16, %v696_v42 }
 0x2f3   :  { %9977 = vmatprep.subr.bf16.mxu1 %v12373_v46 }
 0x2f4   :  { %10099 = vmatpush1.bf16.msra.mxu0 %v12342_v47  ;;  %v12534_v47 = vcombine.low %v648_v27, %v664_v28  ;;  %v840_v28 = vld [vmem:[#allocation13 + $0xe28] sm:$0xff] }
 0x2f5   :  { %10100 = vmatprep.subr.bf16.mxu0 %v12375_v29 }
 0x2f6   :  { %9978 = vmatpush1.bf16.msra.mxu1 %v12372_v51  ;;  %v12567_v51 = vcombine.high %v680_v16, %v696_v42  ;;  %v872_v16 = vld [vmem:[#allocation13 + $0xf28] sm:$0xff] }
 0x2f7   :  { %9979 = vmatprep.subr.bf16.mxu1 %v12405_v54  ;;  %v728_v54 = vld [vmem:[#allocation13 + $0xaa8] sm:$0xff] }
 0x2f8   :  { %10101 = vmatpush1.bf16.msra.mxu0 %v12374_v55  ;;  %v12597_v55 = vcombine.high %v711_v48, %v727_v49  ;;  %v12598_v3 = vcombine.low %v712_v53, %v728_v54  ;;  %v888_v42 = vld [vmem:[#allocation13 + $0xfa8] sm:$0xff] }
 0x2f9   :  { %10102 = vmatprep.subr.bf16.mxu0 %v12407_v59  ;;  %v759_v59 = vld [vmem:[#allocation13 + $0xba0] sm:$0xff]  ;;  %v12759_v48 = vcombine.high %v872_v16, %v888_v42 }
 0x2fa   :  { %9980 = vmatpush1.bf16.msra.mxu1 %v12404_v60  ;;  %v12599_v60 = vcombine.high %v712_v53, %v728_v54  ;;  %v12628_v7 = vcombine.low %v743_v57, %v759_v59  ;;  %v12758_v53 = vcombine.low %v872_v16, %v888_v42  ;;  %v935_v54 = vld [vmem:[#allocation13 + $0x1120] sm:$0xff] }
 0x2fb   :  { %9981 = vmatprep.subr.bf16.mxu1 %v12437_v0  ;;  %v760_v0 = vld [vmem:[#allocation13 + $0xba8] sm:$0xff]  ;;  %v1095_v42 = vld [vmem:[#allocation13 + $0x1620] sm:$0xff] }
 0x2fc   :  { %10103 = vmatpush1.bf16.msra.mxu0 %v12406_v2  ;;  %v12629_v2 = vcombine.high %v743_v57, %v759_v59  ;;  %v12630_v11 = vcombine.low %v744_v63, %v760_v0  ;;  %v936_v59 = vld [vmem:[#allocation13 + $0x1128] sm:$0xff] }
 0x2fd   :  { %10104 = vmatprep.subr.bf16.mxu0 %v12439_v5  ;;  %v791_v5 = vld [vmem:[#allocation13 + $0xca0] sm:$0xff] }
 0x2fe   :  { %9982 = vmatpush1.bf16.msra.mxu1 %v12436_v6  ;;  %v12631_v6 = vcombine.high %v744_v63, %v760_v0  ;;  %v12660_v15 = vcombine.low %v775_v4, %v791_v5  ;;  %v967_v0 = vld [vmem:[#allocation13 + $0x1220] sm:$0xff] }
 0x2ff   :  { %9983 = vmatprep.subr.bf16.mxu1 %v12469_v9  ;;  %v792_v9 = vld [vmem:[#allocation13 + $0xca8] sm:$0xff] }
 0x300   :  { %10105 = vmatpush1.bf16.msra.mxu0 %v12438_v10  ;;  %v12661_v10 = vcombine.high %v775_v4, %v791_v5  ;;  %v12662_v22 = vcombine.low %v776_v8, %v792_v9  ;;  %v968_v5 = vld [vmem:[#allocation13 + $0x1228] sm:$0xff] }
 0x301   :  { %10106 = vmatprep.subr.bf16.mxu0 %v12471_v13  ;;  %v823_v13 = vld [vmem:[#allocation13 + $0xda0] sm:$0xff] }
 0x302   :  { %9984 = vmatpush1.bf16.msra.mxu1 %v12468_v14  ;;  %v12663_v14 = vcombine.high %v776_v8, %v792_v9  ;;  %v12692_v27 = vcombine.low %v807_v12, %v823_v13  ;;  %v999_v9 = vld [vmem:[#allocation13 + $0x1320] sm:$0xff] }
 0x303   :  { %9985 = vmatprep.subr.bf16.mxu1 %v12501_v19  ;;  %v824_v19 = vld [vmem:[#allocation13 + $0xda8] sm:$0xff] }
 0x304   :  { %v15101_v30 = vpop.f32.mrb[0].mxu1  ;;  %10107 = vmatpush1.bf16.msra.mxu0 %v12470_v21  ;;  %v12693_v21 = vcombine.high %v807_v12, %v823_v13  ;;  %v12694_v33 = vcombine.low %v808_v18, %v824_v19  ;;  %v1000_v13 = vld [vmem:[#allocation13 + $0x1328] sm:$0xff] }
 0x305   :  { %v15103_v35 = vpop.f32.mrb[1].mxu1  ;;  %10108 = vmatprep.subr.bf16.mxu0 %v12503_v24  ;;  %v855_v24 = vld [vmem:[#allocation13 + $0xea0] sm:$0xff] }
 0x306   :  { %v9599_v38 = vpop.f32.mrb[2].mxu1  ;;  %9986 = vmatpush1.bf16.msra.mxu1 %v12500_v26  ;;  %v15105_v40 = vpop.f32.mrb[4].mxu0  ;;  %v12695_v26 = vcombine.high %v808_v18, %v824_v19  ;;  %v1031_v19 = vld [vmem:[#allocation13 + $0x1420] sm:$0xff] }
 0x307   :  { %v9600_v43 = vpop.f32.mrb[3].mxu1  ;;  %v15107_v44 = vpop.f32.mrb[5].mxu0  ;;  %9987 = vmatprep.subr.bf16.mxu1 %v12533_v58  ;;  %v856_v58 = vld [vmem:[#allocation13 + $0xea8] sm:$0xff] }
 0x308   :  { %v9722_v46 = vpop.f32.mrb[6].mxu0  ;;  %10109 = vmatpush1.bf16.msra.mxu0 %v12502_v31  ;;  %v12725_v31 = vcombine.high %v839_v23, %v855_v24  ;;  %v12727_v38 = vcombine.high %v840_v28, %v856_v58 }
 0x309   :  { %v9723_v29 = vpop.f32.mrb[7].mxu0  ;;  %10110 = vmatprep.subr.bf16.mxu0 %v12535_v36  ;;  %v887_v36 = vld [vmem:[#allocation13 + $0xfa0] sm:$0xff] }
 0x30a   :  { %9988 = vmatpush1.bf16.msra.mxu1 %v12532_v41  ;;  %v12724_v41 = vcombine.low %v839_v23, %v855_v24  ;;  %v12757_v43 = vcombine.high %v871_v34, %v887_v36  ;;  %v903_v46 = vld [vmem:[#allocation13 + $0x1020] sm:$0xff]  ;;  %v12756_v49 = vcombine.low %v871_v34, %v887_v36  ;;  %v904_v29 = vld [vmem:[#allocation13 + $0x1028] sm:$0xff] }
 0x30b   :  { %9989 = vmatprep.subr.bf16.mxu1 %v12565_v45  ;;  %v12726_v45 = vcombine.low %v840_v28, %v856_v58  ;;  %v1032_v24 = vld [vmem:[#allocation13 + $0x1428] sm:$0xff]  ;;  %v1063_v58 = vld [vmem:[#allocation13 + $0x1520] sm:$0xff] }
 0x30c   :  { %10111 = vmatpush1.bf16.msra.mxu0 %v12534_v47  ;;  %v919_v47 = vld [vmem:[#allocation13 + $0x10a0] sm:$0xff]  ;;  %v1064_v36 = vld [vmem:[#allocation13 + $0x1528] sm:$0xff] }
 0x30d   :  { %10112 = vmatprep.subr.bf16.mxu0 %v12567_v51  ;;  %v920_v51 = vld [vmem:[#allocation13 + $0x10a8] sm:$0xff]  ;;  %v12788_v57 = vcombine.low %v903_v46, %v919_v47 }
 0x30e   :  { %9990 = vmatpush1.bf16.msra.mxu1 %v12564_v52  ;;  %v12789_v52 = vcombine.high %v903_v46, %v919_v47  ;;  %v12790_v63 = vcombine.low %v904_v29, %v920_v51  ;;  %v1096_v47 = vld [vmem:[#allocation13 + $0x1628] sm:$0xff] }
 0x30f   :  { %9991 = vmatprep.subr.bf16.mxu1 %v12597_v55  ;;  %v951_v55 = vld [vmem:[#allocation13 + $0x11a0] sm:$0xff] }
 0x310   :  { %10113 = vmatpush1.bf16.msra.mxu0 %v12566_v56  ;;  %v12791_v56 = vcombine.high %v904_v29, %v920_v51  ;;  %v12820_v4 = vcombine.low %v935_v54, %v951_v55  ;;  %v1127_v51 = vld [vmem:[#allocation13 + $0x1720] sm:$0xff] }
 0x311   :  { %10114 = vmatprep.subr.bf16.mxu0 %v12599_v60  ;;  %v952_v60 = vld [vmem:[#allocation13 + $0x11a8] sm:$0xff] }
 0x312   :  { %9992 = vmatpush1.bf16.msra.mxu1 %v12596_v61  ;;  %v12821_v61 = vcombine.high %v935_v54, %v951_v55  ;;  %v12822_v8 = vcombine.low %v936_v59, %v952_v60  ;;  %v1128_v55 = vld [vmem:[#allocation13 + $0x1728] sm:$0xff] }
 0x313   :  { %9993 = vmatprep.subr.bf16.mxu1 %v12629_v2  ;;  %v983_v2 = vld [vmem:[#allocation13 + $0x12a0] sm:$0xff] }
 0x314   :  { %10115 = vmatpush1.bf16.msra.mxu0 %v12598_v3  ;;  %v12823_v3 = vcombine.high %v936_v59, %v952_v60  ;;  %v12852_v12 = vcombine.low %v967_v0, %v983_v2  ;;  %v1159_v60 = vld [vmem:[#allocation13 + $0x1820] sm:$0xff] }
 0x315   :  { %10116 = vmatprep.subr.bf16.mxu0 %v12631_v6  ;;  %v984_v6 = vld [vmem:[#allocation13 + $0x12a8] sm:$0xff] }
 0x316   :  { %9994 = vmatpush1.bf16.msra.mxu1 %v12628_v7  ;;  %v12853_v7 = vcombine.high %v967_v0, %v983_v2  ;;  %v12854_v18 = vcombine.low %v968_v5, %v984_v6  ;;  %v1160_v2 = vld [vmem:[#allocation13 + $0x1828] sm:$0xff] }
 0x317   :  { %9995 = vmatprep.subr.bf16.mxu1 %v12661_v10  ;;  %v1015_v10 = vld [vmem:[#allocation13 + $0x13a0] sm:$0xff] }
 0x318   :  { %10117 = vmatpush1.bf16.msra.mxu0 %v12630_v11  ;;  %v12855_v11 = vcombine.high %v968_v5, %v984_v6  ;;  %v12884_v23 = vcombine.low %v999_v9, %v1015_v10  ;;  %v1191_v6 = vld [vmem:[#allocation13 + $0x1920] sm:$0xff] }
 0x319   :  { %10118 = vmatprep.subr.bf16.mxu0 %v12663_v14  ;;  %v1016_v14 = vld [vmem:[#allocation13 + $0x13a8] sm:$0xff] }
 0x31a   :  { %9996 = vmatpush1.bf16.msra.mxu1 %v12660_v15  ;;  %v12885_v15 = vcombine.high %v999_v9, %v1015_v10  ;;  %v12886_v28 = vcombine.low %v1000_v13, %v1016_v14  ;;  %v1192_v10 = vld [vmem:[#allocation13 + $0x1928] sm:$0xff] }
 0x31b   :  { %9997 = vmatprep.subr.bf16.mxu1 %v12693_v21  ;;  %v1047_v21 = vld [vmem:[#allocation13 + $0x14a0] sm:$0xff] }
 0x31c   :  { %10119 = vmatpush1.bf16.msra.mxu0 %v12662_v22  ;;  %v12887_v22 = vcombine.high %v1000_v13, %v1016_v14  ;;  %v12916_v34 = vcombine.low %v1031_v19, %v1047_v21  ;;  %v1223_v14 = vld [vmem:[#allocation13 + $0x1a20] sm:$0xff] }
 0x31d   :  { %10120 = vmatprep.subr.bf16.mxu0 %v12695_v26  ;;  %v1048_v26 = vld [vmem:[#allocation13 + $0x14a8] sm:$0xff] }
 0x31e   :  { %9998 = vmatpush1.bf16.msra.mxu1 %v12692_v27  ;;  %v12917_v27 = vcombine.high %v1031_v19, %v1047_v21  ;;  %v12918_v16 = vcombine.low %v1032_v24, %v1048_v26  ;;  %v1224_v21 = vld [vmem:[#allocation13 + $0x1a28] sm:$0xff] }
 0x31f   :  { %9999 = vmatprep.subr.bf16.mxu1 %v12725_v31  ;;  %v1079_v31 = vld [vmem:[#allocation13 + $0x15a0] sm:$0xff] }
 0x320   :  { %10121 = vmatpush1.bf16.msra.mxu0 %v12694_v33  ;;  %v12919_v33 = vcombine.high %v1032_v24, %v1048_v26  ;;  %v12948_v46 = vcombine.low %v1063_v58, %v1079_v31  ;;  %v1255_v26 = vld [vmem:[#allocation13 + $0x1b20] sm:$0xff] }
 0x321   :  { %10122 = vmatprep.subr.bf16.mxu0 %v12727_v38  ;;  %v1080_v38 = vld [vmem:[#allocation13 + $0x15a8] sm:$0xff] }
 0x322   :  { %10000 = vmatpush1.bf16.msra.mxu1 %v12724_v41  ;;  %v12949_v41 = vcombine.high %v1063_v58, %v1079_v31  ;;  %v12950_v29 = vcombine.low %v1064_v36, %v1080_v38  ;;  %v1256_v31 = vld [vmem:[#allocation13 + $0x1b28] sm:$0xff] }
 0x323   :  { %10001 = vmatprep.subr.bf16.mxu1 %v12757_v43  ;;  %v1111_v43 = vld [vmem:[#allocation13 + $0x16a0] sm:$0xff] }
 0x324   :  { %10123 = vmatpush1.bf16.msra.mxu0 %v12726_v45  ;;  %v12951_v45 = vcombine.high %v1064_v36, %v1080_v38  ;;  %v12980_v54 = vcombine.low %v1095_v42, %v1111_v43  ;;  %v1287_v38 = vld [vmem:[#allocation13 + $0x1c20] sm:$0xff] }
 0x325   :  { %10124 = vmatprep.subr.bf16.mxu0 %v12759_v48  ;;  %v1112_v48 = vld [vmem:[#allocation13 + $0x16a8] sm:$0xff] }
 0x326   :  { %10002 = vmatpush1.bf16.msra.mxu1 %v12756_v49  ;;  %v12981_v49 = vcombine.high %v1095_v42, %v1111_v43  ;;  %v12982_v59 = vcombine.low %v1096_v47, %v1112_v48  ;;  %v1288_v43 = vld [vmem:[#allocation13 + $0x1c28] sm:$0xff] }
 0x327   :  { %10012 = vmatprep.subr.bf16.mxu1 %v12789_v52  ;;  %v1143_v52 = vld [vmem:[#allocation13 + $0x17a0] sm:$0xff] }
 0x328   :  { %10125 = vmatpush1.bf16.msra.mxu0 %v12758_v53  ;;  %v12983_v53 = vcombine.high %v1096_v47, %v1112_v48  ;;  %v13012_v0 = vcombine.low %v1127_v51, %v1143_v52  ;;  %v1319_v48 = vld [vmem:[#allocation13 + $0x1d20] sm:$0xff] }
 0x329   :  { %10004 = vmatmul.mubr.bf16.vlgmr.msra.gmra.mrb[8].mxu1 %v15041_v20  ;;  %10135 = vmatprep.subr.bf16.mxu0 %v12791_v56  ;;  %v1144_v56 = vld [vmem:[#allocation13 + $0x17a8] sm:$0xff] }
 0x32a   :  { %10013 = vmatpush1.bf16.msra.mxu1 %v12788_v57  ;;  %10044 = vmatprep.mubr.bf16.mxu1 %v15045_v25  ;;  %v13013_v57 = vcombine.high %v1127_v51, %v1143_v52  ;;  %v13014_v5 = vcombine.low %v1128_v55, %v1144_v56  ;;  %v1320_v52 = vld [vmem:[#allocation13 + $0x1d28] sm:$0xff] }
 0x32b   :  { %10014 = vmatprep.subr.bf16.mxu1 %v12821_v61  ;;  %10127 = vmatmul.mubr.bf16.vlgmr.msra.gmra.mrb[12].mxu0 %v15041_v20  ;;  %v1175_v61 = vld [vmem:[#allocation13 + $0x18a0] sm:$0xff] }
 0x32c   :  { %10136 = vmatpush1.bf16.msra.mxu0 %v12790_v63  ;;  %10167 = vmatprep.mubr.bf16.mxu0 %v15045_v25  ;;  %v13015_v63 = vcombine.high %v1128_v55, %v1144_v56  ;;  %v13044_v9 = vcombine.low %v1159_v60, %v1175_v61  ;;  %v1351_v56 = vld [vmem:[#allocation13 + $0x1e20] sm:$0xff] }
 0x32d   :  { %10137 = vmatprep.subr.bf16.mxu0 %v12823_v3  ;;  %v1176_v3 = vld [vmem:[#allocation13 + $0x18a8] sm:$0xff] }
 0x32e   :  { %10015 = vmatpush1.bf16.msra.mxu1 %v12820_v4  ;;  %v13045_v4 = vcombine.high %v1159_v60, %v1175_v61  ;;  %v13046_v13 = vcombine.low %v1160_v2, %v1176_v3  ;;  %v1352_v61 = vld [vmem:[#allocation13 + $0x1e28] sm:$0xff] }
 0x32f   :  { %10016 = vmatprep.subr.bf16.mxu1 %v12853_v7  ;;  %v1207_v7 = vld [vmem:[#allocation13 + $0x19a0] sm:$0xff] }
 0x330   :  { %10138 = vmatpush1.bf16.msra.mxu0 %v12822_v8  ;;  %v13047_v8 = vcombine.high %v1160_v2, %v1176_v3  ;;  %v13076_v19 = vcombine.low %v1191_v6, %v1207_v7  ;;  %v1383_v3 = vld [vmem:[#allocation13 + $0x1f20] sm:$0xff] }
 0x331   :  { %10139 = vmatprep.subr.bf16.mxu0 %v12855_v11  ;;  %v1208_v11 = vld [vmem:[#allocation13 + $0x19a8] sm:$0xff] }
 0x332   :  { %10017 = vmatpush1.bf16.msra.mxu1 %v12852_v12  ;;  %v13077_v12 = vcombine.high %v1191_v6, %v1207_v7  ;;  %v13078_v24 = vcombine.low %v1192_v10, %v1208_v11  ;;  %v1384_v7 = vld [vmem:[#allocation13 + $0x1f28] sm:$0xff] }
 0x333   :  { %10018 = vmatprep.subr.bf16.mxu1 %v12885_v15  ;;  %v1239_v15 = vld [vmem:[#allocation13 + $0x1aa0] sm:$0xff] }
 0x334   :  { %10140 = vmatpush1.bf16.msra.mxu0 %v12854_v18  ;;  %v13079_v18 = vcombine.high %v1192_v10, %v1208_v11  ;;  %v13108_v58 = vcombine.low %v1223_v14, %v1239_v15  ;;  %v1415_v11 = vld [vmem:[#allocation13 + $0x2020] sm:$0xff] }
 0x335   :  { %10141 = vmatprep.subr.bf16.mxu0 %v12887_v22  ;;  %v1240_v22 = vld [vmem:[#allocation13 + $0x1aa8] sm:$0xff] }
 0x336   :  { %10019 = vmatpush1.bf16.msra.mxu1 %v12884_v23  ;;  %v13109_v23 = vcombine.high %v1223_v14, %v1239_v15  ;;  %v13110_v36 = vcombine.low %v1224_v21, %v1240_v22  ;;  %v1416_v15 = vld [vmem:[#allocation13 + $0x2028] sm:$0xff] }
 0x337   :  { %10020 = vmatprep.subr.bf16.mxu1 %v12917_v27  ;;  %v1271_v27 = vld [vmem:[#allocation13 + $0x1ba0] sm:$0xff] }
 0x338   :  { %10142 = vmatpush1.bf16.msra.mxu0 %v12886_v28  ;;  %v13111_v28 = vcombine.high %v1224_v21, %v1240_v22  ;;  %v13140_v42 = vcombine.low %v1255_v26, %v1271_v27  ;;  %v1447_v22 = vld [vmem:[#allocation13 + $0x2120] sm:$0xff] }
 0x339   :  { %10143 = vmatprep.subr.bf16.mxu0 %v12919_v33  ;;  %v1272_v33 = vld [vmem:[#allocation13 + $0x1ba8] sm:$0xff] }
 0x33a   :  { %10021 = vmatpush1.bf16.msra.mxu1 %v12916_v34  ;;  %v13141_v34 = vcombine.high %v1255_v26, %v1271_v27  ;;  %v13142_v47 = vcombine.low %v1256_v31, %v1272_v33  ;;  %v1448_v27 = vld [vmem:[#allocation13 + $0x2128] sm:$0xff] }
 0x33b   :  { %10022 = vmatprep.subr.bf16.mxu1 %v12949_v41  ;;  %v1303_v41 = vld [vmem:[#allocation13 + $0x1ca0] sm:$0xff] }
 0x33c   :  { %10144 = vmatpush1.bf16.msra.mxu0 %v12918_v16  ;;  %v13143_v16 = vcombine.high %v1256_v31, %v1272_v33  ;;  %v13172_v51 = vcombine.low %v1287_v38, %v1303_v41  ;;  %v1479_v33 = vld [vmem:[#allocation13 + $0x2220] sm:$0xff] }
 0x33d   :  { %10145 = vmatprep.subr.bf16.mxu0 %v12951_v45  ;;  %v1304_v45 = vld [vmem:[#allocation13 + $0x1ca8] sm:$0xff] }
 0x33e   :  { %10023 = vmatpush1.bf16.msra.mxu1 %v12948_v46  ;;  %v13173_v46 = vcombine.high %v1287_v38, %v1303_v41  ;;  %v13174_v55 = vcombine.low %v1288_v43, %v1304_v45  ;;  %v1480_v41 = vld [vmem:[#allocation13 + $0x2228] sm:$0xff] }
 0x33f   :  { %10024 = vmatprep.subr.bf16.mxu1 %v12981_v49  ;;  %v1335_v49 = vld [vmem:[#allocation13 + $0x1da0] sm:$0xff] }
 0x340   :  { %10146 = vmatpush1.bf16.msra.mxu0 %v12950_v29  ;;  %v13175_v29 = vcombine.high %v1288_v43, %v1304_v45  ;;  %v13204_v60 = vcombine.low %v1319_v48, %v1335_v49  ;;  %v1511_v45 = vld [vmem:[#allocation13 + $0x2320] sm:$0xff] }
 0x341   :  { %10147 = vmatprep.subr.bf16.mxu0 %v12983_v53  ;;  %v1336_v53 = vld [vmem:[#allocation13 + $0x1da8] sm:$0xff] }
 0x342   :  { %10025 = vmatpush1.bf16.msra.mxu1 %v12980_v54  ;;  %v13205_v54 = vcombine.high %v1319_v48, %v1335_v49  ;;  %v13206_v2 = vcombine.low %v1320_v52, %v1336_v53  ;;  %v1512_v49 = vld [vmem:[#allocation13 + $0x2328] sm:$0xff] }
 0x343   :  { %10026 = vmatprep.subr.bf16.mxu1 %v13013_v57  ;;  %v1367_v57 = vld [vmem:[#allocation13 + $0x1ea0] sm:$0xff] }
 0x344   :  { %10148 = vmatpush1.bf16.msra.mxu0 %v12982_v59  ;;  %v13207_v59 = vcombine.high %v1320_v52, %v1336_v53  ;;  %v13236_v6 = vcombine.low %v1351_v56, %v1367_v57  ;;  %v1543_v53 = vld [vmem:[#allocation13 + $0x2420] sm:$0xff] }
 0x345   :  { %10149 = vmatprep.subr.bf16.mxu0 %v13015_v63  ;;  %v1368_v63 = vld [vmem:[#allocation13 + $0x1ea8] sm:$0xff] }
 0x346   :  { %10027 = vmatpush1.bf16.msra.mxu1 %v13012_v0  ;;  %v13237_v0 = vcombine.high %v1351_v56, %v1367_v57  ;;  %v13238_v10 = vcombine.low %v1352_v61, %v1368_v63  ;;  %v1544_v57 = vld [vmem:[#allocation13 + $0x2428] sm:$0xff] }
 0x347   :  { %10028 = vmatprep.subr.bf16.mxu1 %v13045_v4  ;;  %v1399_v4 = vld [vmem:[#allocation13 + $0x1fa0] sm:$0xff] }
 0x348   :  { %10150 = vmatpush1.bf16.msra.mxu0 %v13014_v5  ;;  %v13239_v5 = vcombine.high %v1352_v61, %v1368_v63  ;;  %v13268_v14 = vcombine.low %v1383_v3, %v1399_v4  ;;  %v1575_v63 = vld [vmem:[#allocation13 + $0x2520] sm:$0xff] }
 0x349   :  { %10151 = vmatprep.subr.bf16.mxu0 %v13047_v8  ;;  %v1400_v8 = vld [vmem:[#allocation13 + $0x1fa8] sm:$0xff] }
 0x34a   :  { %10029 = vmatpush1.bf16.msra.mxu1 %v13044_v9  ;;  %v13269_v9 = vcombine.high %v1383_v3, %v1399_v4  ;;  %v13270_v21 = vcombine.low %v1384_v7, %v1400_v8  ;;  %v1576_v4 = vld [vmem:[#allocation13 + $0x2528] sm:$0xff] }
 0x34b   :  { %10030 = vmatprep.subr.bf16.mxu1 %v13077_v12  ;;  %v1431_v12 = vld [vmem:[#allocation13 + $0x20a0] sm:$0xff] }
 0x34c   :  { %10152 = vmatpush1.bf16.msra.mxu0 %v13046_v13  ;;  %v13271_v13 = vcombine.high %v1384_v7, %v1400_v8  ;;  %v13300_v26 = vcombine.low %v1415_v11, %v1431_v12  ;;  %v1607_v8 = vld [vmem:[#allocation13 + $0x2620] sm:$0xff] }
 0x34d   :  { %10153 = vmatprep.subr.bf16.mxu0 %v13079_v18  ;;  %v1432_v18 = vld [vmem:[#allocation13 + $0x20a8] sm:$0xff] }
 0x34e   :  { %10031 = vmatpush1.bf16.msra.mxu1 %v13076_v19  ;;  %v13301_v19 = vcombine.high %v1415_v11, %v1431_v12  ;;  %v13302_v31 = vcombine.low %v1416_v15, %v1432_v18  ;;  %v1608_v12 = vld [vmem:[#allocation13 + $0x2628] sm:$0xff] }
 0x34f   :  { %10032 = vmatprep.subr.bf16.mxu1 %v13109_v23  ;;  %v1463_v23 = vld [vmem:[#allocation13 + $0x21a0] sm:$0xff] }
 0x350   :  { %10154 = vmatpush1.bf16.msra.mxu0 %v13078_v24  ;;  %v13303_v24 = vcombine.high %v1416_v15, %v1432_v18  ;;  %v13332_v38 = vcombine.low %v1447_v22, %v1463_v23  ;;  %v1639_v18 = vld [vmem:[#allocation13 + $0x2720] sm:$0xff] }
 0x351   :  { %10155 = vmatprep.subr.bf16.mxu0 %v13111_v28  ;;  %v1464_v28 = vld [vmem:[#allocation13 + $0x21a8] sm:$0xff] }
 0x352   :  { %10033 = vmatpush1.bf16.msra.mxu1 %v13108_v58  ;;  %v13333_v58 = vcombine.high %v1447_v22, %v1463_v23  ;;  %v13334_v43 = vcombine.low %v1448_v27, %v1464_v28  ;;  %v1640_v23 = vld [vmem:[#allocation13 + $0x2728] sm:$0xff] }
 0x353   :  { %10034 = vmatprep.subr.bf16.mxu1 %v13141_v34  ;;  %v1495_v34 = vld [vmem:[#allocation13 + $0x22a0] sm:$0xff] }
 0x354   :  { %10156 = vmatpush1.bf16.msra.mxu0 %v13110_v36  ;;  %v13335_v36 = vcombine.high %v1448_v27, %v1464_v28  ;;  %v13364_v48 = vcombine.low %v1479_v33, %v1495_v34  ;;  %v1671_v28 = vld [vmem:[#allocation13 + $0x2820] sm:$0xff] }
 0x355   :  { %10157 = vmatprep.subr.bf16.mxu0 %v13143_v16  ;;  %v1496_v16 = vld [vmem:[#allocation13 + $0x22a8] sm:$0xff] }
 0x356   :  { %10035 = vmatpush1.bf16.msra.mxu1 %v13140_v42  ;;  %v13365_v42 = vcombine.high %v1479_v33, %v1495_v34  ;;  %v13366_v52 = vcombine.low %v1480_v41, %v1496_v16  ;;  %v1672_v34 = vld [vmem:[#allocation13 + $0x2828] sm:$0xff] }
 0x357   :  { %10036 = vmatprep.subr.bf16.mxu1 %v13173_v46  ;;  %v1527_v46 = vld [vmem:[#allocation13 + $0x23a0] sm:$0xff] }
 0x358   :  { %10158 = vmatpush1.bf16.msra.mxu0 %v13142_v47  ;;  %v13367_v47 = vcombine.high %v1480_v41, %v1496_v16  ;;  %v13396_v56 = vcombine.low %v1511_v45, %v1527_v46  ;;  %v1703_v16 = vld [vmem:[#allocation13 + $0x2920] sm:$0xff] }
 0x359   :  { %10159 = vmatprep.subr.bf16.mxu0 %v13175_v29  ;;  %v1528_v29 = vld [vmem:[#allocation13 + $0x23a8] sm:$0xff] }
 0x35a   :  { %10037 = vmatpush1.bf16.msra.mxu1 %v13172_v51  ;;  %v13397_v51 = vcombine.high %v1511_v45, %v1527_v46  ;;  %v13398_v61 = vcombine.low %v1512_v49, %v1528_v29  ;;  %v1704_v46 = vld [vmem:[#allocation13 + $0x2928] sm:$0xff] }
 0x35b   :  { %10038 = vmatprep.subr.bf16.mxu1 %v13205_v54  ;;  %v1559_v54 = vld [vmem:[#allocation13 + $0x24a0] sm:$0xff] }
 0x35c   :  { %10160 = vmatpush1.bf16.msra.mxu0 %v13174_v55  ;;  %v13399_v55 = vcombine.high %v1512_v49, %v1528_v29  ;;  %v13428_v3 = vcombine.low %v1543_v53, %v1559_v54  ;;  %v1735_v29 = vld [vmem:[#allocation13 + $0x2a20] sm:$0xff] }
 0x35d   :  { %10161 = vmatprep.subr.bf16.mxu0 %v13207_v59  ;;  %v1560_v59 = vld [vmem:[#allocation13 + $0x24a8] sm:$0xff] }
 0x35e   :  { %10039 = vmatpush1.bf16.msra.mxu1 %v13204_v60  ;;  %v13429_v60 = vcombine.high %v1543_v53, %v1559_v54  ;;  %v13430_v7 = vcombine.low %v1544_v57, %v1560_v59  ;;  %v1736_v54 = vld [vmem:[#allocation13 + $0x2a28] sm:$0xff] }
 0x35f   :  { %10040 = vmatprep.subr.bf16.mxu1 %v13237_v0  ;;  %v1591_v0 = vld [vmem:[#allocation13 + $0x25a0] sm:$0xff] }
 0x360   :  { %10162 = vmatpush1.bf16.msra.mxu0 %v13206_v2  ;;  %v13431_v2 = vcombine.high %v1544_v57, %v1560_v59  ;;  %v13460_v11 = vcombine.low %v1575_v63, %v1591_v0  ;;  %v1767_v59 = vld [vmem:[#allocation13 + $0x2b20] sm:$0xff] }
 0x361   :  { %10163 = vmatprep.subr.bf16.mxu0 %v13239_v5  ;;  %v1592_v5 = vld [vmem:[#allocation13 + $0x25a8] sm:$0xff] }
 0x362   :  { %10041 = vmatpush1.bf16.msra.mxu1 %v13236_v6  ;;  %v13461_v6 = vcombine.high %v1575_v63, %v1591_v0  ;;  %v13462_v15 = vcombine.low %v1576_v4, %v1592_v5  ;;  %v1768_v0 = vld [vmem:[#allocation13 + $0x2b28] sm:$0xff] }
 0x363   :  { %10042 = vmatprep.subr.bf16.mxu1 %v13269_v9  ;;  %v1623_v9 = vld [vmem:[#allocation13 + $0x26a0] sm:$0xff] }
 0x364   :  { %10164 = vmatpush1.bf16.msra.mxu0 %v13238_v10  ;;  %v13463_v10 = vcombine.high %v1576_v4, %v1592_v5  ;;  %v13492_v22 = vcombine.low %v1607_v8, %v1623_v9  ;;  %v1799_v4 = vld [vmem:[#allocation13 + $0x2c20] sm:$0xff] }
 0x365   :  { %10165 = vmatprep.subr.bf16.mxu0 %v13271_v13  ;;  %v1624_v13 = vld [vmem:[#allocation13 + $0x26a8] sm:$0xff] }
 0x366   :  { %10043 = vmatpush1.bf16.msra.mxu1 %v13268_v14  ;;  %v13493_v14 = vcombine.high %v1607_v8, %v1623_v9  ;;  %v13494_v27 = vcombine.low %v1608_v12, %v1624_v13  ;;  %v1847_v8 = vld [vmem:[#allocation13 + $0x2da0] sm:$0x11] }
 0x367   :  { %10053 = vmatprep.subr.bf16.mxu1 %v13301_v19  ;;  %v1655_v19 = vld [vmem:[#allocation13 + $0x27a0] sm:$0xff] }
 0x368   :  { %10166 = vmatpush1.bf16.msra.mxu0 %v13270_v21  ;;  %v13495_v21 = vcombine.high %v1608_v12, %v1624_v13  ;;  %v13524_v33 = vcombine.low %v1639_v18, %v1655_v19  ;;  %v1816_v12 = vld [vmem:[#allocation13 + $0x2ca8] sm:$0xff] }
 0x369   :  { %10045 = vmatmul.mubr.bf16.vlgmr.msra.gmra.mrb[8].mxu1 %v15055_v32  ;;  %10176 = vmatprep.subr.bf16.mxu0 %v13303_v24  ;;  %v1656_v24 = vld [vmem:[#allocation13 + $0x27a8] sm:$0xff] }
 0x36a   :  { %10054 = vmatpush1.bf16.msra.mxu1 %v13300_v26  ;;  %13744 = vmatprep.mubr.msk.bf16.mxu1 %vm9375_vm5, %v15059_v37  ;;  %v13525_v26 = vcombine.high %v1639_v18, %v1655_v19  ;;  %v13526_v41 = vcombine.low %v1640_v23, %v1656_v24  ;;  %v1832_v13 = vld [vmem:[#allocation13 + $0x2d28] sm:$0xff] }
 0x36b   :  { %10055 = vmatprep.subr.bf16.mxu1 %v13333_v58  ;;  %10168 = vmatmul.mubr.bf16.vlgmr.msra.gmra.mrb[12].mxu0 %v15055_v32  ;;  %v1687_v58 = vld [vmem:[#allocation13 + $0x28a0] sm:$0xff] }
 0x36c   :  { %10177 = vmatpush1.bf16.msra.mxu0 %v13302_v31  ;;  %13745 = vmatprep.mubr.msk.bf16.mxu0 %vm9375_vm5, %v15059_v37  ;;  %v13527_v31 = vcombine.high %v1640_v23, %v1656_v24  ;;  %v13556_v45 = vcombine.low %v1671_v28, %v1687_v58 }
 0x36d   :  { %10178 = vmatprep.subr.bf16.mxu0 %v13335_v36  ;;  %v1688_v36 = vld [vmem:[#allocation13 + $0x28a8] sm:$0xff] }
 0x36e   :  { %10056 = vmatpush1.bf16.msra.mxu1 %v13332_v38  ;;  %v13557_v38 = vcombine.high %v1671_v28, %v1687_v58  ;;  %v13558_v49 = vcombine.low %v1672_v34, %v1688_v36  ;;  %v393_v58 = vld [vmem:[#allocation13 + $0x30] sm:$0xff] }
 0x36f   :  { %10057 = vmatprep.subr.bf16.mxu1 %v13365_v42  ;;  %v1719_v42 = vld [vmem:[#allocation13 + $0x29a0] sm:$0xff] }
 0x370   :  { %10179 = vmatpush1.bf16.msra.mxu0 %v13334_v43  ;;  %v13559_v43 = vcombine.high %v1672_v34, %v1688_v36  ;;  %v13588_v53 = vcombine.low %v1703_v16, %v1719_v42  ;;  %v394_v36 = vld [vmem:[#allocation13 + $0x38] sm:$0xff] }
 0x371   :  { %10180 = vmatprep.subr.bf16.mxu0 %v13367_v47  ;;  %v1720_v47 = vld [vmem:[#allocation13 + $0x29a8] sm:$0xff] }
 0x372   :  { %10058 = vmatpush1.bf16.msra.mxu1 %v13364_v48  ;;  %v13589_v48 = vcombine.high %v1703_v16, %v1719_v42  ;;  %v13590_v57 = vcombine.low %v1704_v46, %v1720_v47  ;;  %v425_v42 = vld [vmem:[#allocation13 + $0x130] sm:$0xff] }
 0x373   :  { %10059 = vmatprep.subr.bf16.mxu1 %v13397_v51  ;;  %v1751_v51 = vld [vmem:[#allocation13 + $0x2aa0] sm:$0xff] }
 0x374   :  { %10181 = vmatpush1.bf16.msra.mxu0 %v13366_v52  ;;  %v13591_v52 = vcombine.high %v1704_v46, %v1720_v47  ;;  %v13620_v63 = vcombine.low %v1735_v29, %v1751_v51  ;;  %v426_v47 = vld [vmem:[#allocation13 + $0x138] sm:$0xff] }
 0x375   :  { %10182 = vmatprep.subr.bf16.mxu0 %v13399_v55  ;;  %v1752_v55 = vld [vmem:[#allocation13 + $0x2aa8] sm:$0xff] }
 0x376   :  { %10060 = vmatpush1.bf16.msra.mxu1 %v13396_v56  ;;  %v13621_v56 = vcombine.high %v1735_v29, %v1751_v51  ;;  %v13622_v5 = vcombine.low %v1736_v54, %v1752_v55  ;;  %v457_v51 = vld [vmem:[#allocation13 + $0x230] sm:$0xff] }
 0x377   :  { %10061 = vmatprep.subr.bf16.mxu1 %v13429_v60  ;;  %v1783_v60 = vld [vmem:[#allocation13 + $0x2ba0] sm:$0xff] }
 0x378   :  { %10183 = vmatpush1.bf16.msra.mxu0 %v13398_v61  ;;  %v13623_v61 = vcombine.high %v1736_v54, %v1752_v55  ;;  %v458_v55 = vld [vmem:[#allocation13 + $0x238] sm:$0xff] }
 0x379   :  { %10184 = vmatprep.subr.bf16.mxu0 %v13431_v2  ;;  %v1784_v2 = vld [vmem:[#allocation13 + $0x2ba8] sm:$0xff] }
 0x37a   :  { %10062 = vmatpush1.bf16.msra.mxu1 %v13428_v3  ;;  %v13653_v3 = vcombine.high %v1767_v59, %v1783_v60  ;;  %v13655_v9 = vcombine.high %v1768_v0, %v1784_v2  ;;  %v13654_v19 = vcombine.low %v1768_v0, %v1784_v2 }
 0x37b   :  { %10063 = vmatprep.subr.bf16.mxu1 %v13461_v6  ;;  %v1815_v6 = vld [vmem:[#allocation13 + $0x2ca0] sm:$0xff] }
 0x37c   :  { %10185 = vmatpush1.bf16.msra.mxu0 %v13430_v7  ;;  %v1831_v7 = vld [vmem:[#allocation13 + $0x2d20] sm:$0xff]  ;;  %v13684_v23 = vcombine.low %v1799_v4, %v1815_v6 }
 0x37d   :  { %10186 = vmatprep.subr.bf16.mxu0 %v13463_v10  ;;  %v1800_v10 = vld [vmem:[#allocation13 + $0x2c28] sm:$0xff]  ;;  %v13717_v18 = vcombine.high %v1831_v7, %v1847_v8  ;;  %v13716_v24 = vcombine.low %v1831_v7, %v1847_v8  ;;  %v521_v8 = vld [vmem:[#allocation13 + $0x430] sm:$0xff] }
 0x37e   :  { %10064 = vmatpush1.bf16.msra.mxu1 %v13460_v11  ;;  %v13652_v11 = vcombine.low %v1767_v59, %v1783_v60 }
 0x37f   :  { %10065 = vmatprep.subr.bf16.mxu1 %v13493_v14  ;;  %v1848_v14 = vld [vmem:[#allocation13 + $0x2da8] sm:$0x11]  ;;  %v9408_v34 = vand.u32 %v13716_v24, %v15067_v17 }
 0x380   :  { %10187 = vmatpush1.bf16.msra.mxu0 %v13462_v15  ;;  %v13685_v15 = vcombine.high %v1799_v4, %v1815_v6  ;;  %v13718_v28 = vcombine.low %v1832_v13, %v1848_v14  ;;  %v506_v4 = vld [vmem:[#allocation13 + $0x3b8] sm:$0xff] }
 0x381   :  { %10188 = vmatprep.subr.bf16.mxu0 %v13495_v21  ;;  %v13687_v21 = vcombine.high %v1800_v10, %v1816_v12 }
 0x382   :  { %10066 = vmatpush1.bf16.msra.mxu1 %v13492_v22  ;;  %v13719_v22 = vcombine.high %v1832_v13, %v1848_v14  ;;  %v9414_v16 = vand.u32 %v13718_v28, %v15067_v17  ;;  %v538_v13 = vld [vmem:[#allocation13 + $0x4b8] sm:$0xff] }
 0x383   :  { %10067 = vmatprep.subr.bf16.mxu1 %v13525_v26  ;;  %v9411_v26 = vand.u32 %v13717_v18, %v15067_v17  ;;  %v15132_v18 = vld [vmem:[#allocation14] sm:$0xff]  ;;  %v570_v28 = vld [vmem:[#allocation13 + $0x5b8] sm:$0xff] }
 0x384   :  { %10189 = vmatpush1.bf16.msra.mxu0 %v13494_v27  ;;  %v13686_v27 = vcombine.low %v1800_v10, %v1816_v12  ;;  %v522_v12 = vld [vmem:[#allocation13 + $0x438] sm:$0xff] }
 0x385   :  { %10190 = vmatprep.subr.bf16.mxu0 %v13527_v31  ;;  %v409_v31 = vld [vmem:[#allocation13 + $0xb0] sm:$0xff]  ;;  %v12411_v24 = vcombine.high %v522_v12, %v538_v13 }
 0x386   :  { %10068 = vmatpush1.bf16.msra.mxu1 %v13524_v33  ;;  %v9417_v33 = vand.u32 %v13719_v22, %v15067_v17  ;;  %v12280_v46 = vcombine.low %v393_v58, %v409_v31  ;;  %v569_v22 = vld [vmem:[#allocation13 + $0x5b0] sm:$0xff] }
 0x387   :  { %10069 = vmatprep.subr.bf16.mxu1 %v13557_v38  ;;  %v410_v38 = vld [vmem:[#allocation13 + $0xb8] sm:$0xff] }
 0x388   :  { %10191 = vmatpush1.bf16.msra.mxu0 %v13526_v41  ;;  %v12281_v41 = vcombine.high %v393_v58, %v409_v31  ;;  %v12282_v29 = vcombine.low %v394_v36, %v410_v38 }
 0x389   :  { %10192 = vmatprep.subr.bf16.mxu0 %v13559_v43  ;;  %v441_v43 = vld [vmem:[#allocation13 + $0x1b0] sm:$0xff] }
 0x38a   :  { %10070 = vmatpush1.bf16.msra.mxu1 %v13556_v45  ;;  %v12283_v45 = vcombine.high %v394_v36, %v410_v38  ;;  %v12312_v54 = vcombine.low %v425_v42, %v441_v43  ;;  %v585_v36 = vld [vmem:[#allocation13 + $0x630] sm:$0xff] }
 0x38b   :  { %10071 = vmatprep.subr.bf16.mxu1 %v13589_v48  ;;  %v442_v48 = vld [vmem:[#allocation13 + $0x1b8] sm:$0xff]  ;;  %v601_v38 = vld [vmem:[#allocation13 + $0x6b0] sm:$0xff] }
 0x38c   :  { %10193 = vmatpush1.bf16.msra.mxu0 %v13558_v49  ;;  %v12313_v49 = vcombine.high %v425_v42, %v441_v43  ;;  %v12314_v60 = vcombine.low %v426_v47, %v442_v48 }
 0x38d   :  { %10194 = vmatprep.subr.bf16.mxu0 %v13591_v52  ;;  %v473_v52 = vld [vmem:[#allocation13 + $0x2b0] sm:$0xff] }
 0x38e   :  { %10072 = vmatpush1.bf16.msra.mxu1 %v13588_v53  ;;  %v12315_v53 = vcombine.high %v426_v47, %v442_v48  ;;  %v12345_v59 = vcombine.high %v457_v51, %v473_v52  ;;  %v12344_v2 = vcombine.low %v457_v51, %v473_v52  ;;  %v12473_v48 = vcombine.high %v585_v36, %v601_v38  ;;  %v617_v51 = vld [vmem:[#allocation13 + $0x730] sm:$0xff] }
 0x38f   :  { %10073 = vmatprep.subr.bf16.mxu1 %v13621_v56  ;;  %v474_v56 = vld [vmem:[#allocation13 + $0x2b8] sm:$0xff]  ;;  %v633_v52 = vld [vmem:[#allocation13 + $0x7b0] sm:$0xff] }
 0x390   :  { %10195 = vmatpush1.bf16.msra.mxu0 %v13590_v57  ;;  %v1867_v57 = vlaneseq  ;;  %v12347_v0 = vcombine.high %v458_v55, %v474_v56  ;;  %v12346_v7 = vcombine.low %v458_v55, %v474_v56 }
 0x391   :  { %10196 = vmatprep.subr.bf16.mxu0 %v13623_v61  ;;  %v489_v61 = vld [vmem:[#allocation13 + $0x330] sm:$0xff] }
 0x392   :  { %10074 = vmatpush1.bf16.msra.mxu1 %v13620_v63  ;;  %v505_v63 = vld [vmem:[#allocation13 + $0x3b0] sm:$0xff] }
 0x393   :  { %10075 = vmatprep.subr.bf16.mxu1 %v13653_v3  ;;  %v490_v3 = vld [vmem:[#allocation13 + $0x338] sm:$0xff]  ;;  %v12377_v6 = vcombine.high %v489_v61, %v505_v63 }
 0x394   :  { %10197 = vmatpush1.bf16.msra.mxu0 %v13622_v5  ;;  %v15127_v5 = vshrl.u32 %v1867_v57, 7  ;;  %v12379_v10 = vcombine.high %v490_v3, %v506_v4 }
 0x395   :  { %10198 = vmatprep.subr.bf16.mxu0 %v13655_v9  ;;  %v537_v9 = vld [vmem:[#allocation13 + $0x4b0] sm:$0xff] }
 0x396   :  { %10076 = vmatpush1.bf16.msra.mxu1 %v13652_v11  ;;  %v12376_v11 = vcombine.low %v489_v61, %v505_v63  ;;  %v15130_v14 = vsub.s32 0, %v15127_v5  ;;  %v15154_v55 = vsub.s32 4, %v15127_v5  ;;  %v15157_v57 = vsub.s32 5, %v15127_v5 }
 0x397   :  { %10077 = vmatprep.subr.bf16.mxu1 %v13685_v15  ;;  %v12409_v15 = vcombine.high %v521_v8, %v537_v9  ;;  %v12505_v63 = vcombine.high %v617_v51, %v633_v52 }
 0x398   :  { %10199 = vmatpush1.bf16.msra.mxu0 %v13654_v19  ;;  %v12378_v19 = vcombine.low %v490_v3, %v506_v4  ;;  %v1870_v58 = vrot.slane %v15132_v18, %v15130_v14  ;;  %v15166_v3 = vsub.s32 7, %v15127_v5  ;;  %v15168_v4 = vld [vmem:[#allocation13 + $0x830] sm:$0xff] }
 0x399   :  { %10200 = vmatprep.subr.bf16.mxu0 %v13687_v21  ;;  %v553_v21 = vld [vmem:[#allocation13 + $0x530] sm:$0xff] }
 0x39a   :  { %10078 = vmatpush1.bf16.msra.mxu1 %v13684_v23  ;;  %v15135_v23 = vsub.s32 1, %v15127_v5  ;;  %v12441_v31 = vcombine.high %v553_v21, %v569_v22  ;;  %v12440_v43 = vcombine.low %v553_v21, %v569_v22  ;;  %v13934_v47 = vadd.f32 %v15101_v30, %v1870_v58 }
 0x39b   :  { %10079 = vmatprep.subr.bf16.mxu1 %v9411_v26  ;;  %v12408_v26 = vcombine.low %v521_v8, %v537_v9  ;;  %v12472_v30 = vcombine.low %v585_v36, %v601_v38  ;;  %v1886_v9 = vrot.slane %v15132_v18, %v15154_v55  ;;  %v1898_v22 = vrot.slane %v15132_v18, %v15166_v3 }
 0x39c   :  { %10201 = vmatpush1.bf16.msra.mxu0 %v13686_v27  ;;  %v554_v27 = vld [vmem:[#allocation13 + $0x538] sm:$0xff]  ;;  %v11479_v61 = vmul.f32 0.01, %v13934_v47  ;;  %vm11447_vm8 = vcmp.ge.f32.partialorder %v13934_v47, 0.0 }
 0x39d   :  { %10202 = vmatprep.subr.bf16.mxu0 %v9417_v33  ;;  %v15140_v33 = vsub.s32 2, %v15127_v5  ;;  %v12443_v42 = vcombine.high %v554_v27, %v570_v28 }
 0x39e   :  { %10080 = vmatpush1.bf16.msra.mxu1 %v9408_v34  ;;  %v12410_v34 = vcombine.low %v522_v12, %v538_v13  ;;  %v15181_v12 = vld [vmem:[#allocation13 + $0x8b8] sm:$0xff]  ;;  %v15184_v13 = vsel %vm11447_vm8, %v13934_v47, %v11479_v61 }
 0x39f   :  { %10217 = vmatprep.subr.bf16.mxu1 %v12281_v41  ;;  %v1874_v41 = vrot.slane %v15132_v18, %v15135_v23 }
 0x3a0   :  { %10203 = vmatpush1.bf16.msra.mxu0 %v9414_v16  ;;  %v15145_v16 = vsub.s32 3, %v15127_v5 }
 0x3a1   :  { %10086 = vmatmul.mubr.bf16.vlgmr.msra.gmra.mrb[8].mxu1 %v15075_v39  ;;  %10340 = vmatprep.subr.bf16.mxu0 %v12283_v45  ;;  %v586_v45 = vld [vmem:[#allocation13 + $0x638] sm:$0xff] }
 0x3a2   :  { %10218 = vmatpush1.bf16.msra.mxu1 %v12280_v46  ;;  %10249 = vmatprep.mubr.bf16.mxu1 %v15033_v62  ;;  %v602_v46 = vld [vmem:[#allocation13 + $0x6b8] sm:$0xff] }
 0x3a3   :  { %10209 = vmatmul.mubr.bf16.vlgmr.msra.gmra.mrb[12].mxu0 %v15075_v39  ;;  %10219 = vmatprep.subr.bf16.mxu1 %v12313_v49  ;;  %v1878_v49 = vrot.slane %v15132_v18, %v15140_v33  ;;  %v12475_v56 = vcombine.high %v586_v45, %v602_v46 }
 0x3a4   :  { %10341 = vmatpush1.bf16.msra.mxu0 %v12282_v29  ;;  %10372 = vmatprep.mubr.bf16.mxu0 %v15033_v62  ;;  %v12442_v29 = vcombine.low %v554_v27, %v570_v28  ;;  %v697_v27 = vld [vmem:[#allocation13 + $0x9b0] sm:$0xff] }
 0x3a5   :  { %10342 = vmatprep.subr.bf16.mxu0 %v12315_v53  ;;  %v13935_v53 = vadd.f32 %v15103_v35, %v1874_v41  ;;  %v15160_v35 = vsub.s32 6, %v15127_v5  ;;  %v12504_v5 = vcombine.low %v617_v51, %v633_v52 }
 0x3a6   :  { %10220 = vmatpush1.bf16.msra.mxu1 %v12312_v54  ;;  %v1882_v54 = vrot.slane %v15132_v18, %v15145_v16 }
 0x3a7   :  { %10221 = vmatprep.subr.bf16.mxu1 %v12345_v59  ;;  %v618_v59 = vld [vmem:[#allocation13 + $0x738] sm:$0xff]  ;;  %vm11448_vm9 = vcmp.ge.f32.partialorder %v13935_v53, 0.0 }
 0x3a8   :  { %10343 = vmatpush1.bf16.msra.mxu0 %v12314_v60  ;;  %v634_v60 = vld [vmem:[#allocation13 + $0x7b8] sm:$0xff]  ;;  %v15173_v8 = vadd.f32 %v15107_v44, %v1882_v54  ;;  %v1894_v44 = vrot.slane %v15132_v18, %v15160_v35 }
 0x3a9   :  { %10344 = vmatprep.subr.bf16.mxu0 %v12347_v0  ;;  %v15163_v0 = vadd.f32 %v15105_v40, %v1878_v49  ;;  %v1890_v40 = vrot.slane %v15132_v18, %v15157_v57 }
 0x3aa   :  { %10222 = vmatpush1.bf16.msra.mxu1 %v12344_v2  ;;  %v12474_v2 = vcombine.low %v586_v45, %v602_v46  ;;  %vm11450_vm11 = vcmp.ge.f32.partialorder %v15173_v8, 0.0  ;;  %v11482_v36 = vmul.f32 0.01, %v15173_v8  ;;  %v682_v45 = vld [vmem:[#allocation13 + $0x938] sm:$0xff] }
 0x3ab   :  { %10223 = vmatprep.subr.bf16.mxu1 %v12377_v6  ;;  %v15170_v6 = vld [vmem:[#allocation13 + $0x8b0] sm:$0xff]  ;;  %vm11449_vm10 = vcmp.ge.f32.partialorder %v15163_v0, 0.0  ;;  %v698_v46 = vld [vmem:[#allocation13 + $0x9b8] sm:$0xff] }
 0x3ac   :  { %10345 = vmatpush1.bf16.msra.mxu0 %v12346_v7  ;;  %v11480_v7 = vmul.f32 0.01, %v13935_v53 }
 0x3ad   :  { %10346 = vmatprep.subr.bf16.mxu0 %v12379_v10  ;;  %v12507_v10 = vcombine.high %v618_v59, %v634_v60 }
 0x3ae   :  { %10224 = vmatpush1.bf16.msra.mxu1 %v12376_v11  ;;  %v15179_v11 = vld [vmem:[#allocation13 + $0x838] sm:$0xff]  ;;  %v15195_v28 = vsel %vm11448_vm9, %v13935_v53, %v11480_v7 }
 0x3af   :  { %10225 = vmatprep.subr.bf16.mxu1 %v12409_v15  ;;  %v12537_v15 = vcombine.high %v15168_v4, %v15170_v6 }
 0x3b0   :  { %10347 = vmatpush1.bf16.msra.mxu0 %v12378_v19  ;;  %v11481_v19 = vmul.f32 0.01, %v15163_v0 }
 0x3b1   :  { %10348 = vmatprep.subr.bf16.mxu0 %v12411_v24  ;;  %v12506_v24 = vcombine.low %v618_v59, %v634_v60  ;;  %v729_v59 = vld [vmem:[#allocation13 + $0xab0] sm:$0xff] }
 0x3b2   :  { %10226 = vmatpush1.bf16.msra.mxu1 %v12408_v26  ;;  %v681_v26 = vld [vmem:[#allocation13 + $0x930] sm:$0xff] }
 0x3b3   :  { %10227 = vmatprep.subr.bf16.mxu1 %v12441_v31  ;;  %v12569_v51 = vcombine.high %v681_v26, %v697_v27 }
 0x3b4   :  { %10349 = vmatpush1.bf16.msra.mxu0 %v12410_v34  ;;  %v12539_v34 = vcombine.high %v15179_v11, %v15181_v12 }
 0x3b5   :  { %10350 = vmatprep.subr.bf16.mxu0 %v12443_v42  ;;  %v12536_v42 = vcombine.low %v15168_v4, %v15170_v6 }
 0x3b6   :  { %10228 = vmatpush1.bf16.msra.mxu1 %v12440_v43  ;;  %v12538_v43 = vcombine.low %v15179_v11, %v15181_v12 }
 0x3b7   :  { %10229 = vmatprep.subr.bf16.mxu1 %v12473_v48 }
 0x3b8   :  { %10351 = vmatpush1.bf16.msra.mxu0 %v12442_v29 }
 0x3b9   :  { %10352 = vmatprep.subr.bf16.mxu0 %v12475_v56  ;;  %v12568_v56 = vcombine.low %v681_v26, %v697_v27 }
 0x3ba   :  { %10230 = vmatpush1.bf16.msra.mxu1 %v12472_v30  ;;  %v713_v30 = vld [vmem:[#allocation13 + $0xa30] sm:$0xff] }
 0x3bb   :  { %10231 = vmatprep.subr.bf16.mxu1 %v12505_v63  ;;  %v12601_v12 = vcombine.high %v713_v30, %v729_v59  ;;  %v12600_v27 = vcombine.low %v713_v30, %v729_v59  ;;  %v857_v30 = vld [vmem:[#allocation13 + $0xeb0] sm:$0xff] }
 0x3bc   :  { %v9841_v21 = vpop.f32.mrb[4].mxu1  ;;  %10353 = vmatpush1.bf16.msra.mxu0 %v12474_v2  ;;  %v12571_v2 = vcombine.high %v682_v45, %v698_v46 }
 0x3bd   :  { %v13938_v58 = vadd.f32 %v9841_v21, %v1886_v9  ;;  %v9843_v31 = vpop.f32.mrb[5].mxu1  ;;  %10354 = vmatprep.subr.bf16.mxu0 %v12507_v10  ;;  %v714_v9 = vld [vmem:[#allocation13 + $0xa38] sm:$0xff] }
 0x3be   :  { %v13939_v38 = vadd.f32 %v9843_v31, %v1890_v40  ;;  %v9845_v41 = vpop.f32.mrb[6].mxu1  ;;  %10232 = vmatpush1.bf16.msra.mxu1 %v12504_v5  ;;  %v9964_v18 = vpop.f32.mrb[8].mxu0  ;;  %v730_v10 = vld [vmem:[#allocation13 + $0xab8] sm:$0xff]  ;;  %v15214_v40 = vsel %vm11449_vm10, %v15163_v0, %v11481_v19  ;;  %v12570_v0 = vcombine.low %v682_v45, %v698_v46  ;;  %v745_v19 = vld [vmem:[#allocation13 + $0xb30] sm:$0xff] }
 0x3bf   :  { %vm11451_vm12 = vcmp.ge.f32.partialorder %v13938_v58, 0.0  ;;  %v11483_v47 = vmul.f32 0.01, %v13938_v58  ;;  %v9846_v48 = vpop.f32.mrb[7].mxu1  ;;  %v13940_v49 = vadd.f32 %v9964_v18, %v1894_v44  ;;  %v9966_v29 = vpop.f32.mrb[9].mxu0  ;;  %10233 = vmatprep.subr.bf16.mxu1 %v12537_v15  ;;  %v15223_v44 = vsel %vm11450_vm11, %v15173_v8, %v11482_v36  ;;  %v762_v31 = vld [vmem:[#allocation13 + $0xbb8] sm:$0xff] }
 0x3c0   :  { %vm11452_vm13 = vcmp.ge.f32.partialorder %v13939_v38, 0.0  ;;  %v11484_v52 = vmul.f32 0.01, %v13939_v38  ;;  %v13941_v53 = vadd.f32 %v9966_v29, %v1898_v22  ;;  %v9968_v54 = vpop.f32.mrb[10].mxu0  ;;  %10355 = vmatpush1.bf16.msra.mxu0 %v12506_v24  ;;  %v761_v22 = vld [vmem:[#allocation13 + $0xbb0] sm:$0xff]  ;;  %v12603_v26 = vcombine.high %v714_v9, %v730_v10 }
 0x3c1   :  { %v15205_v60 = vsel %vm11451_vm12, %v13938_v58, %v11483_v47  ;;  %vm11453_vm14 = vcmp.ge.f32.partialorder %v13940_v49, 0.0  ;;  %v11485_v61 = vmul.f32 0.01, %v13940_v49  ;;  %v9969_v63 = vpop.f32.mrb[11].mxu0  ;;  %10356 = vmatprep.subr.bf16.mxu0 %v12539_v34  ;;  %v746_v58 = vld [vmem:[#allocation13 + $0xb38] sm:$0xff]  ;;  %v12633_v8 = vcombine.high %v745_v19, %v761_v22  ;;  %v777_v36 = vld [vmem:[#allocation13 + $0xc30] sm:$0xff] }
 0x3c2   :  { %v11543_v4 = vmax.f32 %v15184_v13, %v15205_v60  ;;  %v15209_v6 = vsel %vm11452_vm13, %v13939_v38, %v11484_v52  ;;  %vm11454_vm15 = vcmp.ge.f32.partialorder %v13941_v53, 0.0  ;;  %v11486_v7 = vmul.f32 0.01, %v13941_v53  ;;  %10234 = vmatpush1.bf16.msra.mxu1 %v12536_v42  ;;  %v793_v38 = vld [vmem:[#allocation13 + $0xcb0] sm:$0xff]  ;;  %v778_v42 = vld [vmem:[#allocation13 + $0xc38] sm:$0xff] }
 0x3c3   :  { %v11544_v5 = vmax.f32 %v15195_v28, %v15209_v6  ;;  %v15218_v11 = vsel %vm11453_vm14, %v13940_v49, %v11485_v61  ;;  %10235 = vmatprep.subr.bf16.mxu1 %v12569_v51  ;;  %v12602_v34 = vcombine.low %v714_v9, %v730_v10  ;;  %v12635_v41 = vcombine.high %v746_v58, %v762_v31  ;;  %v809_v47 = vld [vmem:[#allocation13 + $0xd30] sm:$0xff]  ;;  %v810_v51 = vld [vmem:[#allocation13 + $0xd38] sm:$0xff] }
 0x3c4   :  { %v11545_v15 = vmax.f32 %v15214_v40, %v15218_v11  ;;  %v15227_v21 = vsel %vm11454_vm15, %v13941_v53, %v11486_v7  ;;  %10357 = vmatpush1.bf16.msra.mxu0 %v12538_v43  ;;  %v12632_v18 = vcombine.low %v745_v19, %v761_v22  ;;  %v794_v43 = vld [vmem:[#allocation13 + $0xcb8] sm:$0xff]  ;;  %v12665_v45 = vcombine.high %v777_v36, %v793_v38  ;;  %v825_v48 = vld [vmem:[#allocation13 + $0xdb0] sm:$0xff] }
 0x3c5   :  { %v11546_v24 = vmax.f32 %v15223_v44, %v15227_v21  ;;  %10358 = vmatprep.subr.bf16.mxu0 %v12571_v2  ;;  %v12634_v46 = vcombine.low %v746_v58, %v762_v31  ;;  %v12667_v49 = vcombine.high %v778_v42, %v794_v43  ;;  %v12664_v29 = vcombine.low %v777_v36, %v793_v38  ;;  %v826_v52 = vld [vmem:[#allocation13 + $0xdb8] sm:$0xff]  ;;  %v873_v10 = vld [vmem:[#allocation13 + $0xf30] sm:$0xff]  ;;  %v796_v44 = vld [vmem:[#allocation13 + $0xcc8] sm:$0xff] }
 0x3c6   :  { %10236 = vmatpush1.bf16.msra.mxu1 %v12568_v56  ;;  %v12697_v53 = vcombine.high %v809_v47, %v825_v48  ;;  %v12666_v54 = vcombine.low %v778_v42, %v794_v43  ;;  %v841_v56 = vld [vmem:[#allocation13 + $0xe30] sm:$0xff]  ;;  %v12699_v59 = vcombine.high %v810_v51, %v826_v52  ;;  %v12696_v61 = vcombine.low %v809_v47, %v825_v48  ;;  %v842_v63 = vld [vmem:[#allocation13 + $0xe38] sm:$0xff] }
 0x3c7   :  { %10237 = vmatprep.subr.bf16.mxu1 %v12601_v12  ;;  %v858_v2 = vld [vmem:[#allocation13 + $0xeb8] sm:$0xff]  ;;  %v12729_v7 = vcombine.high %v841_v56, %v857_v30  ;;  %v12698_v9 = vcombine.low %v810_v51, %v826_v52  ;;  %v889_v12 = vld [vmem:[#allocation13 + $0xfb0] sm:$0xff]  ;;  %v12728_v19 = vcombine.low %v841_v56, %v857_v30 }
 0x3c8   :  { %10359 = vmatpush1.bf16.msra.mxu0 %v12570_v0  ;;  %v12731_v0 = vcombine.high %v842_v63, %v858_v2  ;;  %v874_v22 = vld [vmem:[#allocation13 + $0xf38] sm:$0xff]  ;;  %v12730_v58 = vcombine.low %v842_v63, %v858_v2  ;;  %v905_v31 = vld [vmem:[#allocation13 + $0x1030] sm:$0xff]  ;;  %v12760_v36 = vcombine.low %v873_v10, %v889_v12 }
 0x3c9   :  { %10360 = vmatprep.subr.bf16.mxu0 %v12603_v26  ;;  %v890_v26 = vld [vmem:[#allocation13 + $0xfb8] sm:$0xff]  ;;  %v937_v43 = vld [vmem:[#allocation13 + $0x1130] sm:$0xff] }
 0x3ca   :  { %10238 = vmatpush1.bf16.msra.mxu1 %v12600_v27  ;;  %v12761_v27 = vcombine.high %v873_v10, %v889_v12  ;;  %v906_v38 = vld [vmem:[#allocation13 + $0x1038] sm:$0xff]  ;;  %v12762_v42 = vcombine.low %v874_v22, %v890_v26  ;;  %v969_v52 = vld [vmem:[#allocation13 + $0x1230] sm:$0xff] }
 0x3cb   :  { %10239 = vmatprep.subr.bf16.mxu1 %v12633_v8  ;;  %v921_v8 = vld [vmem:[#allocation13 + $0x10b0] sm:$0xff]  ;;  %v938_v48 = vld [vmem:[#allocation13 + $0x1138] sm:$0xff] }
 0x3cc   :  { %10361 = vmatpush1.bf16.msra.mxu0 %v12602_v34  ;;  %v12763_v34 = vcombine.high %v874_v22, %v890_v26  ;;  %v12792_v47 = vcombine.low %v905_v31, %v921_v8  ;;  %v970_v30 = vld [vmem:[#allocation13 + $0x1238] sm:$0xff]  ;;  %v1001_v2 = vld [vmem:[#allocation13 + $0x1330] sm:$0xff] }
 0x3cd   :  { %10362 = vmatprep.subr.bf16.mxu0 %v12635_v41  ;;  %v922_v41 = vld [vmem:[#allocation13 + $0x10b8] sm:$0xff]  ;;  %v1033_v26 = vld [vmem:[#allocation13 + $0x1430] sm:$0xff] }
 0x3ce   :  { %10240 = vmatpush1.bf16.msra.mxu1 %v12632_v18  ;;  %v12793_v18 = vcombine.high %v905_v31, %v921_v8  ;;  %v12794_v51 = vcombine.low %v906_v38, %v922_v41  ;;  %v1002_v12 = vld [vmem:[#allocation13 + $0x1338] sm:$0xff] }
 0x3cf   :  { %10241 = vmatprep.subr.bf16.mxu1 %v12665_v45  ;;  %v953_v45 = vld [vmem:[#allocation13 + $0x11b0] sm:$0xff]  ;;  %v1034_v8 = vld [vmem:[#allocation13 + $0x1438] sm:$0xff] }
 0x3d0   :  { %10363 = vmatpush1.bf16.msra.mxu0 %v12634_v46  ;;  %v12795_v46 = vcombine.high %v906_v38, %v922_v41  ;;  %v12824_v56 = vcombine.low %v937_v43, %v953_v45  ;;  %v1065_v41 = vld [vmem:[#allocation13 + $0x1530] sm:$0xff] }
 0x3d1   :  { %10364 = vmatprep.subr.bf16.mxu0 %v12667_v49  ;;  %v954_v49 = vld [vmem:[#allocation13 + $0x11b8] sm:$0xff] }
 0x3d2   :  { %10242 = vmatpush1.bf16.msra.mxu1 %v12664_v29  ;;  %v12825_v29 = vcombine.high %v937_v43, %v953_v45  ;;  %v12826_v63 = vcombine.low %v938_v48, %v954_v49  ;;  %v1066_v45 = vld [vmem:[#allocation13 + $0x1538] sm:$0xff] }
 0x3d3   :  { %10243 = vmatprep.subr.bf16.mxu1 %v12697_v53  ;;  %v985_v53 = vld [vmem:[#allocation13 + $0x12b0] sm:$0xff] }
 0x3d4   :  { %10365 = vmatpush1.bf16.msra.mxu0 %v12666_v54  ;;  %v12827_v54 = vcombine.high %v938_v48, %v954_v49  ;;  %v12856_v10 = vcombine.low %v969_v52, %v985_v53  ;;  %v1097_v49 = vld [vmem:[#allocation13 + $0x1630] sm:$0xff] }
 0x3d5   :  { %10366 = vmatprep.subr.bf16.mxu0 %v12699_v59  ;;  %v986_v59 = vld [vmem:[#allocation13 + $0x12b8] sm:$0xff] }
 0x3d6   :  { %10244 = vmatpush1.bf16.msra.mxu1 %v12696_v61  ;;  %v12857_v61 = vcombine.high %v969_v52, %v985_v53  ;;  %v12858_v22 = vcombine.low %v970_v30, %v986_v59  ;;  %v1098_v53 = vld [vmem:[#allocation13 + $0x1638] sm:$0xff] }
 0x3d7   :  { %10245 = vmatprep.subr.bf16.mxu1 %v12729_v7  ;;  %v1017_v7 = vld [vmem:[#allocation13 + $0x13b0] sm:$0xff] }
 0x3d8   :  { %10367 = vmatpush1.bf16.msra.mxu0 %v12698_v9  ;;  %v12859_v9 = vcombine.high %v970_v30, %v986_v59  ;;  %v12888_v31 = vcombine.low %v1001_v2, %v1017_v7  ;;  %v1129_v59 = vld [vmem:[#allocation13 + $0x1730] sm:$0xff] }
 0x3d9   :  { %10368 = vmatprep.subr.bf16.mxu0 %v12731_v0  ;;  %v1018_v0 = vld [vmem:[#allocation13 + $0x13b8] sm:$0xff] }
 0x3da   :  { %10246 = vmatpush1.bf16.msra.mxu1 %v12728_v19  ;;  %v12889_v19 = vcombine.high %v1001_v2, %v1017_v7  ;;  %v12890_v38 = vcombine.low %v1002_v12, %v1018_v0  ;;  %v1130_v7 = vld [vmem:[#allocation13 + $0x1738] sm:$0xff] }
 0x3db   :  { %10247 = vmatprep.subr.bf16.mxu1 %v12761_v27  ;;  %v1049_v27 = vld [vmem:[#allocation13 + $0x14b0] sm:$0xff] }
 0x3dc   :  { %10369 = vmatpush1.bf16.msra.mxu0 %v12730_v58  ;;  %v12891_v58 = vcombine.high %v1002_v12, %v1018_v0  ;;  %v12920_v43 = vcombine.low %v1033_v26, %v1049_v27  ;;  %v1161_v0 = vld [vmem:[#allocation13 + $0x1830] sm:$0xff] }
 0x3dd   :  { %10370 = vmatprep.subr.bf16.mxu0 %v12763_v34  ;;  %v1050_v34 = vld [vmem:[#allocation13 + $0x14b8] sm:$0xff] }
 0x3de   :  { %10248 = vmatpush1.bf16.msra.mxu1 %v12760_v36  ;;  %v12921_v36 = vcombine.high %v1033_v26, %v1049_v27  ;;  %v12922_v48 = vcombine.low %v1034_v8, %v1050_v34  ;;  %v1162_v27 = vld [vmem:[#allocation13 + $0x1838] sm:$0xff] }
 0x3df   :  { %10258 = vmatprep.subr.bf16.mxu1 %v12793_v18  ;;  %v1081_v18 = vld [vmem:[#allocation13 + $0x15b0] sm:$0xff] }
 0x3e0   :  { %10371 = vmatpush1.bf16.msra.mxu0 %v12762_v42  ;;  %v12923_v42 = vcombine.high %v1034_v8, %v1050_v34  ;;  %v12952_v52 = vcombine.low %v1065_v41, %v1081_v18  ;;  %v1193_v34 = vld [vmem:[#allocation13 + $0x1930] sm:$0xff] }
 0x3e1   :  { %10250 = vmatmul.mubr.bf16.vlgmr.msra.gmra.mrb[12].mxu1 %v15041_v20  ;;  %10381 = vmatprep.subr.bf16.mxu0 %v12795_v46  ;;  %v1082_v46 = vld [vmem:[#allocation13 + $0x15b8] sm:$0xff] }
 0x3e2   :  { %10259 = vmatpush1.bf16.msra.mxu1 %v12792_v47  ;;  %10290 = vmatprep.mubr.bf16.mxu1 %v15045_v25  ;;  %v12953_v47 = vcombine.high %v1065_v41, %v1081_v18  ;;  %v12954_v30 = vcombine.low %v1066_v45, %v1082_v46  ;;  %v1194_v18 = vld [vmem:[#allocation13 + $0x1938] sm:$0xff] }
 0x3e3   :  { %10260 = vmatprep.subr.bf16.mxu1 %v12825_v29  ;;  %10373 = vmatmul.mubr.bf16.vlgmr.msra.gmra.mrb[16].mxu0 %v15041_v20  ;;  %v1113_v29 = vld [vmem:[#allocation13 + $0x16b0] sm:$0xff] }
 0x3e4   :  { %10382 = vmatpush1.bf16.msra.mxu0 %v12794_v51  ;;  %10413 = vmatprep.mubr.bf16.mxu0 %v15045_v25  ;;  %v12955_v51 = vcombine.high %v1066_v45, %v1082_v46  ;;  %v12984_v2 = vcombine.low %v1097_v49, %v1113_v29  ;;  %v1225_v46 = vld [vmem:[#allocation13 + $0x1a30] sm:$0xff] }
 0x3e5   :  { %10383 = vmatprep.subr.bf16.mxu0 %v12827_v54  ;;  %v1114_v54 = vld [vmem:[#allocation13 + $0x16b8] sm:$0xff] }
 0x3e6   :  { %10261 = vmatpush1.bf16.msra.mxu1 %v12824_v56  ;;  %v12985_v56 = vcombine.high %v1097_v49, %v1113_v29  ;;  %v12986_v12 = vcombine.low %v1098_v53, %v1114_v54  ;;  %v1226_v29 = vld [vmem:[#allocation13 + $0x1a38] sm:$0xff] }
 0x3e7   :  { %10262 = vmatprep.subr.bf16.mxu1 %v12857_v61  ;;  %v1145_v61 = vld [vmem:[#allocation13 + $0x17b0] sm:$0xff] }
 0x3e8   :  { %10384 = vmatpush1.bf16.msra.mxu0 %v12826_v63  ;;  %v12987_v63 = vcombine.high %v1098_v53, %v1114_v54  ;;  %v13016_v26 = vcombine.low %v1129_v59, %v1145_v61  ;;  %v1257_v54 = vld [vmem:[#allocation13 + $0x1b30] sm:$0xff] }
 0x3e9   :  { %10385 = vmatprep.subr.bf16.mxu0 %v12859_v9  ;;  %v1146_v9 = vld [vmem:[#allocation13 + $0x17b8] sm:$0xff] }
 0x3ea   :  { %10263 = vmatpush1.bf16.msra.mxu1 %v12856_v10  ;;  %v13017_v10 = vcombine.high %v1129_v59, %v1145_v61  ;;  %v13018_v8 = vcombine.low %v1130_v7, %v1146_v9  ;;  %v1258_v61 = vld [vmem:[#allocation13 + $0x1b38] sm:$0xff] }
 0x3eb   :  { %10264 = vmatprep.subr.bf16.mxu1 %v12889_v19  ;;  %v1177_v19 = vld [vmem:[#allocation13 + $0x18b0] sm:$0xff] }
 0x3ec   :  { %10386 = vmatpush1.bf16.msra.mxu0 %v12858_v22  ;;  %v13019_v22 = vcombine.high %v1130_v7, %v1146_v9  ;;  %v13048_v41 = vcombine.low %v1161_v0, %v1177_v19  ;;  %v1289_v9 = vld [vmem:[#allocation13 + $0x1c30] sm:$0xff] }
 0x3ed   :  { %10387 = vmatprep.subr.bf16.mxu0 %v12891_v58  ;;  %v1178_v58 = vld [vmem:[#allocation13 + $0x18b8] sm:$0xff] }
 0x3ee   :  { %10265 = vmatpush1.bf16.msra.mxu1 %v12888_v31  ;;  %v13049_v31 = vcombine.high %v1161_v0, %v1177_v19  ;;  %v13050_v45 = vcombine.low %v1162_v27, %v1178_v58  ;;  %v1290_v19 = vld [vmem:[#allocation13 + $0x1c38] sm:$0xff] }
 0x3ef   :  { %10266 = vmatprep.subr.bf16.mxu1 %v12921_v36  ;;  %v1209_v36 = vld [vmem:[#allocation13 + $0x19b0] sm:$0xff] }
 0x3f0   :  { %10388 = vmatpush1.bf16.msra.mxu0 %v12890_v38  ;;  %v13051_v38 = vcombine.high %v1162_v27, %v1178_v58  ;;  %v13080_v49 = vcombine.low %v1193_v34, %v1209_v36  ;;  %v1321_v58 = vld [vmem:[#allocation13 + $0x1d30] sm:$0xff] }
 0x3f1   :  { %10389 = vmatprep.subr.bf16.mxu0 %v12923_v42  ;;  %v1210_v42 = vld [vmem:[#allocation13 + $0x19b8] sm:$0xff] }
 0x3f2   :  { %10267 = vmatpush1.bf16.msra.mxu1 %v12920_v43  ;;  %v13081_v43 = vcombine.high %v1193_v34, %v1209_v36  ;;  %v13082_v53 = vcombine.low %v1194_v18, %v1210_v42  ;;  %v1322_v36 = vld [vmem:[#allocation13 + $0x1d38] sm:$0xff] }
 0x3f3   :  { %10268 = vmatprep.subr.bf16.mxu1 %v12953_v47  ;;  %v1241_v47 = vld [vmem:[#allocation13 + $0x1ab0] sm:$0xff] }
 0x3f4   :  { %10390 = vmatpush1.bf16.msra.mxu0 %v12922_v48  ;;  %v13083_v48 = vcombine.high %v1194_v18, %v1210_v42  ;;  %v13112_v59 = vcombine.low %v1225_v46, %v1241_v47  ;;  %v1353_v42 = vld [vmem:[#allocation13 + $0x1e30] sm:$0xff] }
 0x3f5   :  { %10391 = vmatprep.subr.bf16.mxu0 %v12955_v51  ;;  %v1242_v51 = vld [vmem:[#allocation13 + $0x1ab8] sm:$0xff] }
 0x3f6   :  { %10269 = vmatpush1.bf16.msra.mxu1 %v12952_v52  ;;  %v13113_v52 = vcombine.high %v1225_v46, %v1241_v47  ;;  %v13114_v7 = vcombine.low %v1226_v29, %v1242_v51  ;;  %v1354_v47 = vld [vmem:[#allocation13 + $0x1e38] sm:$0xff] }
 0x3f7   :  { %10270 = vmatprep.subr.bf16.mxu1 %v12985_v56  ;;  %v1273_v56 = vld [vmem:[#allocation13 + $0x1bb0] sm:$0xff] }
 0x3f8   :  { %10392 = vmatpush1.bf16.msra.mxu0 %v12954_v30  ;;  %v13115_v30 = vcombine.high %v1226_v29, %v1242_v51  ;;  %v13144_v0 = vcombine.low %v1257_v54, %v1273_v56  ;;  %v1385_v51 = vld [vmem:[#allocation13 + $0x1f30] sm:$0xff] }
 0x3f9   :  { %10393 = vmatprep.subr.bf16.mxu0 %v12987_v63  ;;  %v1274_v63 = vld [vmem:[#allocation13 + $0x1bb8] sm:$0xff] }
 0x3fa   :  { %10271 = vmatpush1.bf16.msra.mxu1 %v12984_v2  ;;  %v13145_v2 = vcombine.high %v1257_v54, %v1273_v56  ;;  %v13146_v27 = vcombine.low %v1258_v61, %v1274_v63  ;;  %v1386_v56 = vld [vmem:[#allocation13 + $0x1f38] sm:$0xff] }
 0x3fb   :  { %10272 = vmatprep.subr.bf16.mxu1 %v13017_v10  ;;  %v1305_v10 = vld [vmem:[#allocation13 + $0x1cb0] sm:$0xff] }
 0x3fc   :  { %10394 = vmatpush1.bf16.msra.mxu0 %v12986_v12  ;;  %v13147_v12 = vcombine.high %v1258_v61, %v1274_v63  ;;  %v13176_v34 = vcombine.low %v1289_v9, %v1305_v10  ;;  %v1417_v63 = vld [vmem:[#allocation13 + $0x2030] sm:$0xff] }
 0x3fd   :  { %10395 = vmatprep.subr.bf16.mxu0 %v13019_v22  ;;  %v1306_v22 = vld [vmem:[#allocation13 + $0x1cb8] sm:$0xff] }
 0x3fe   :  { %10273 = vmatpush1.bf16.msra.mxu1 %v13016_v26  ;;  %v13177_v26 = vcombine.high %v1289_v9, %v1305_v10  ;;  %v13178_v18 = vcombine.low %v1290_v19, %v1306_v22  ;;  %v1418_v10 = vld [vmem:[#allocation13 + $0x2038] sm:$0xff] }
 0x3ff   :  { %10274 = vmatprep.subr.bf16.mxu1 %v13049_v31  ;;  %v1337_v31 = vld [vmem:[#allocation13 + $0x1db0] sm:$0xff] }
 0x400   :  { %10396 = vmatpush1.bf16.msra.mxu0 %v13018_v8  ;;  %v13179_v8 = vcombine.high %v1290_v19, %v1306_v22  ;;  %v13208_v46 = vcombine.low %v1321_v58, %v1337_v31  ;;  %v1449_v22 = vld [vmem:[#allocation13 + $0x2130] sm:$0xff] }
 0x401   :  { %10397 = vmatprep.subr.bf16.mxu0 %v13051_v38  ;;  %v1338_v38 = vld [vmem:[#allocation13 + $0x1db8] sm:$0xff] }
 0x402   :  { %10275 = vmatpush1.bf16.msra.mxu1 %v13048_v41  ;;  %v13209_v41 = vcombine.high %v1321_v58, %v1337_v31  ;;  %v13210_v29 = vcombine.low %v1322_v36, %v1338_v38  ;;  %v1450_v31 = vld [vmem:[#allocation13 + $0x2138] sm:$0xff] }
 0x403   :  { %10276 = vmatprep.subr.bf16.mxu1 %v13081_v43  ;;  %v1369_v43 = vld [vmem:[#allocation13 + $0x1eb0] sm:$0xff] }
 0x404   :  { %10398 = vmatpush1.bf16.msra.mxu0 %v13050_v45  ;;  %v13211_v45 = vcombine.high %v1322_v36, %v1338_v38  ;;  %v13240_v54 = vcombine.low %v1353_v42, %v1369_v43  ;;  %v1481_v38 = vld [vmem:[#allocation13 + $0x2230] sm:$0xff] }
 0x405   :  { %10399 = vmatprep.subr.bf16.mxu0 %v13083_v48  ;;  %v1370_v48 = vld [vmem:[#allocation13 + $0x1eb8] sm:$0xff] }
 0x406   :  { %10277 = vmatpush1.bf16.msra.mxu1 %v13080_v49  ;;  %v13241_v49 = vcombine.high %v1353_v42, %v1369_v43  ;;  %v13242_v61 = vcombine.low %v1354_v47, %v1370_v48  ;;  %v1482_v43 = vld [vmem:[#allocation13 + $0x2238] sm:$0xff] }
 0x407   :  { %10278 = vmatprep.subr.bf16.mxu1 %v13113_v52  ;;  %v1401_v52 = vld [vmem:[#allocation13 + $0x1fb0] sm:$0xff] }
 0x408   :  { %10400 = vmatpush1.bf16.msra.mxu0 %v13082_v53  ;;  %v13243_v53 = vcombine.high %v1354_v47, %v1370_v48  ;;  %v13272_v9 = vcombine.low %v1385_v51, %v1401_v52  ;;  %v1513_v48 = vld [vmem:[#allocation13 + $0x2330] sm:$0xff] }
 0x409   :  { %10401 = vmatprep.subr.bf16.mxu0 %v13115_v30  ;;  %v1402_v30 = vld [vmem:[#allocation13 + $0x1fb8] sm:$0xff] }
 0x40a   :  { %10279 = vmatpush1.bf16.msra.mxu1 %v13112_v59  ;;  %v13273_v59 = vcombine.high %v1385_v51, %v1401_v52  ;;  %v13274_v19 = vcombine.low %v1386_v56, %v1402_v30  ;;  %v1514_v52 = vld [vmem:[#allocation13 + $0x2338] sm:$0xff] }
 0x40b   :  { %10280 = vmatprep.subr.bf16.mxu1 %v13145_v2  ;;  %v1433_v2 = vld [vmem:[#allocation13 + $0x20b0] sm:$0xff] }
 0x40c   :  { %10402 = vmatpush1.bf16.msra.mxu0 %v13114_v7  ;;  %v13275_v7 = vcombine.high %v1386_v56, %v1402_v30  ;;  %v13304_v58 = vcombine.low %v1417_v63, %v1433_v2  ;;  %v1545_v30 = vld [vmem:[#allocation13 + $0x2430] sm:$0xff] }
 0x40d   :  { %10403 = vmatprep.subr.bf16.mxu0 %v13147_v12  ;;  %v1434_v12 = vld [vmem:[#allocation13 + $0x20b8] sm:$0xff] }
 0x40e   :  { %10281 = vmatpush1.bf16.msra.mxu1 %v13144_v0  ;;  %v13305_v0 = vcombine.high %v1417_v63, %v1433_v2  ;;  %v13306_v36 = vcombine.low %v1418_v10, %v1434_v12  ;;  %v1546_v2 = vld [vmem:[#allocation13 + $0x2438] sm:$0xff] }
 0x40f   :  { %10282 = vmatprep.subr.bf16.mxu1 %v13177_v26  ;;  %v1465_v26 = vld [vmem:[#allocation13 + $0x21b0] sm:$0xff] }
 0x410   :  { %10404 = vmatpush1.bf16.msra.mxu0 %v13146_v27  ;;  %v13307_v27 = vcombine.high %v1418_v10, %v1434_v12  ;;  %v13336_v42 = vcombine.low %v1449_v22, %v1465_v26  ;;  %v1577_v12 = vld [vmem:[#allocation13 + $0x2530] sm:$0xff] }
 0x411   :  { %10405 = vmatprep.subr.bf16.mxu0 %v13179_v8  ;;  %v1466_v8 = vld [vmem:[#allocation13 + $0x21b8] sm:$0xff] }
 0x412   :  { %10283 = vmatpush1.bf16.msra.mxu1 %v13176_v34  ;;  %v13337_v34 = vcombine.high %v1449_v22, %v1465_v26  ;;  %v13338_v47 = vcombine.low %v1450_v31, %v1466_v8  ;;  %v1578_v26 = vld [vmem:[#allocation13 + $0x2538] sm:$0xff] }
 0x413   :  { %10284 = vmatprep.subr.bf16.mxu1 %v13209_v41  ;;  %v1497_v41 = vld [vmem:[#allocation13 + $0x22b0] sm:$0xff] }
 0x414   :  { %10406 = vmatpush1.bf16.msra.mxu0 %v13178_v18  ;;  %v13339_v18 = vcombine.high %v1450_v31, %v1466_v8  ;;  %v13368_v51 = vcombine.low %v1481_v38, %v1497_v41  ;;  %v1609_v8 = vld [vmem:[#allocation13 + $0x2630] sm:$0xff] }
 0x415   :  { %10407 = vmatprep.subr.bf16.mxu0 %v13211_v45  ;;  %v1498_v45 = vld [vmem:[#allocation13 + $0x22b8] sm:$0xff] }
 0x416   :  { %10285 = vmatpush1.bf16.msra.mxu1 %v13208_v46  ;;  %v13369_v46 = vcombine.high %v1481_v38, %v1497_v41  ;;  %v13370_v56 = vcombine.low %v1482_v43, %v1498_v45  ;;  %v1610_v41 = vld [vmem:[#allocation13 + $0x2638] sm:$0xff] }
 0x417   :  { %10286 = vmatprep.subr.bf16.mxu1 %v13241_v49  ;;  %v1529_v49 = vld [vmem:[#allocation13 + $0x23b0] sm:$0xff] }
 0x418   :  { %10408 = vmatpush1.bf16.msra.mxu0 %v13210_v29  ;;  %v13371_v29 = vcombine.high %v1482_v43, %v1498_v45  ;;  %v13400_v63 = vcombine.low %v1513_v48, %v1529_v49  ;;  %v1641_v45 = vld [vmem:[#allocation13 + $0x2730] sm:$0xff] }
 0x419   :  { %10409 = vmatprep.subr.bf16.mxu0 %v13243_v53  ;;  %v1530_v53 = vld [vmem:[#allocation13 + $0x23b8] sm:$0xff] }
 0x41a   :  { %10287 = vmatpush1.bf16.msra.mxu1 %v13240_v54  ;;  %v13401_v54 = vcombine.high %v1513_v48, %v1529_v49  ;;  %v13402_v10 = vcombine.low %v1514_v52, %v1530_v53  ;;  %v1642_v49 = vld [vmem:[#allocation13 + $0x2738] sm:$0xff] }
 0x41b   :  { %10288 = vmatprep.subr.bf16.mxu1 %v13273_v59  ;;  %v1561_v59 = vld [vmem:[#allocation13 + $0x24b0] sm:$0xff] }
 0x41c   :  { %10410 = vmatpush1.bf16.msra.mxu0 %v13242_v61  ;;  %v13403_v61 = vcombine.high %v1514_v52, %v1530_v53  ;;  %v13432_v22 = vcombine.low %v1545_v30, %v1561_v59  ;;  %v1673_v53 = vld [vmem:[#allocation13 + $0x2830] sm:$0xff] }
 0x41d   :  { %10411 = vmatprep.subr.bf16.mxu0 %v13275_v7  ;;  %v1562_v7 = vld [vmem:[#allocation13 + $0x24b8] sm:$0xff] }
 0x41e   :  { %10289 = vmatpush1.bf16.msra.mxu1 %v13272_v9  ;;  %v13433_v9 = vcombine.high %v1545_v30, %v1561_v59  ;;  %v13434_v31 = vcombine.low %v1546_v2, %v1562_v7  ;;  %v1674_v59 = vld [vmem:[#allocation13 + $0x2838] sm:$0xff] }
 0x41f   :  { %10299 = vmatprep.subr.bf16.mxu1 %v13305_v0  ;;  %v1593_v0 = vld [vmem:[#allocation13 + $0x25b0] sm:$0xff] }
 0x420   :  { %10412 = vmatpush1.bf16.msra.mxu0 %v13274_v19  ;;  %v13435_v19 = vcombine.high %v1546_v2, %v1562_v7  ;;  %v13464_v38 = vcombine.low %v1577_v12, %v1593_v0  ;;  %v1705_v7 = vld [vmem:[#allocation13 + $0x2930] sm:$0xff] }
 0x421   :  { %10291 = vmatmul.mubr.bf16.vlgmr.msra.gmra.mrb[12].mxu1 %v15055_v32  ;;  %10422 = vmatprep.subr.bf16.mxu0 %v13307_v27  ;;  %v1594_v27 = vld [vmem:[#allocation13 + $0x25b8] sm:$0xff] }
 0x422   :  { %10300 = vmatpush1.bf16.msra.mxu1 %v13304_v58  ;;  %13746 = vmatprep.mubr.msk.bf16.mxu1 %vm9375_vm5, %v15059_v37  ;;  %v13465_v58 = vcombine.high %v1577_v12, %v1593_v0  ;;  %v13466_v43 = vcombine.low %v1578_v26, %v1594_v27  ;;  %v1706_v0 = vld [vmem:[#allocation13 + $0x2938] sm:$0xff] }
 0x423   :  { %10301 = vmatprep.subr.bf16.mxu1 %v13337_v34  ;;  %10414 = vmatmul.mubr.bf16.vlgmr.msra.gmra.mrb[16].mxu0 %v15055_v32  ;;  %v1625_v34 = vld [vmem:[#allocation13 + $0x26b0] sm:$0xff] }
 0x424   :  { %10423 = vmatpush1.bf16.msra.mxu0 %v13306_v36  ;;  %13747 = vmatprep.mubr.msk.bf16.mxu0 %vm9375_vm5, %v15059_v37  ;;  %v13467_v36 = vcombine.high %v1578_v26, %v1594_v27  ;;  %v13496_v48 = vcombine.low %v1609_v8, %v1625_v34  ;;  %v1737_v27 = vld [vmem:[#allocation13 + $0x2a30] sm:$0xff] }
 0x425   :  { %10424 = vmatprep.subr.bf16.mxu0 %v13339_v18  ;;  %v1626_v18 = vld [vmem:[#allocation13 + $0x26b8] sm:$0xff] }
 0x426   :  { %10302 = vmatpush1.bf16.msra.mxu1 %v13336_v42  ;;  %v13497_v42 = vcombine.high %v1609_v8, %v1625_v34  ;;  %v13498_v52 = vcombine.low %v1610_v41, %v1626_v18  ;;  %v1738_v34 = vld [vmem:[#allocation13 + $0x2a38] sm:$0xff] }
 0x427   :  { %10303 = vmatprep.subr.bf16.mxu1 %v13369_v46  ;;  %v1657_v46 = vld [vmem:[#allocation13 + $0x27b0] sm:$0xff] }
 0x428   :  { %10425 = vmatpush1.bf16.msra.mxu0 %v13338_v47  ;;  %v13499_v47 = vcombine.high %v1610_v41, %v1626_v18  ;;  %v13528_v30 = vcombine.low %v1641_v45, %v1657_v46  ;;  %v1769_v18 = vld [vmem:[#allocation13 + $0x2b30] sm:$0xff] }
 0x429   :  { %10426 = vmatprep.subr.bf16.mxu0 %v13371_v29  ;;  %v1658_v29 = vld [vmem:[#allocation13 + $0x27b8] sm:$0xff] }
 0x42a   :  { %10304 = vmatpush1.bf16.msra.mxu1 %v13368_v51  ;;  %v13529_v51 = vcombine.high %v1641_v45, %v1657_v46  ;;  %v13530_v2 = vcombine.low %v1642_v49, %v1658_v29  ;;  %v1770_v46 = vld [vmem:[#allocation13 + $0x2b38] sm:$0xff] }
 0x42b   :  { %10305 = vmatprep.subr.bf16.mxu1 %v13401_v54  ;;  %v1689_v54 = vld [vmem:[#allocation13 + $0x28b0] sm:$0xff] }
 0x42c   :  { %10427 = vmatpush1.bf16.msra.mxu0 %v13370_v56  ;;  %v13531_v56 = vcombine.high %v1642_v49, %v1658_v29  ;;  %v13560_v12 = vcombine.low %v1673_v53, %v1689_v54  ;;  %v1801_v49 = vld [vmem:[#allocation13 + $0x2c30] sm:$0xff] }
 0x42d   :  { %10428 = vmatprep.subr.bf16.mxu0 %v13403_v61  ;;  %v1690_v61 = vld [vmem:[#allocation13 + $0x28b8] sm:$0xff] }
 0x42e   :  { %10306 = vmatpush1.bf16.msra.mxu1 %v13400_v63  ;;  %v13561_v63 = vcombine.high %v1673_v53, %v1689_v54  ;;  %v13562_v26 = vcombine.low %v1674_v59, %v1690_v61  ;;  %v1849_v53 = vld [vmem:[#allocation13 + $0x2db0] sm:$0x11] }
 0x42f   :  { %10307 = vmatprep.subr.bf16.mxu1 %v13433_v9  ;;  %v1721_v9 = vld [vmem:[#allocation13 + $0x29b0] sm:$0xff] }
 0x430   :  { %10429 = vmatpush1.bf16.msra.mxu0 %v13402_v10  ;;  %v13563_v10 = vcombine.high %v1674_v59, %v1690_v61  ;;  %v13592_v8 = vcombine.low %v1705_v7, %v1721_v9  ;;  %v1818_v59 = vld [vmem:[#allocation13 + $0x2cb8] sm:$0xff] }
 0x431   :  { %10430 = vmatprep.subr.bf16.mxu0 %v13435_v19  ;;  %v1722_v19 = vld [vmem:[#allocation13 + $0x29b8] sm:$0xff] }
 0x432   :  { %10308 = vmatpush1.bf16.msra.mxu1 %v13432_v22  ;;  %v13593_v22 = vcombine.high %v1705_v7, %v1721_v9  ;;  %v13594_v41 = vcombine.low %v1706_v0, %v1722_v19  ;;  %v1834_v61 = vld [vmem:[#allocation13 + $0x2d38] sm:$0xff] }
 0x433   :  { %10309 = vmatprep.subr.bf16.mxu1 %v13465_v58  ;;  %v1753_v58 = vld [vmem:[#allocation13 + $0x2ab0] sm:$0xff] }
 0x434   :  { %10431 = vmatpush1.bf16.msra.mxu0 %v13434_v31  ;;  %v13595_v31 = vcombine.high %v1706_v0, %v1722_v19  ;;  %v13624_v45 = vcombine.low %v1737_v27, %v1753_v58 }
 0x435   :  { %10432 = vmatprep.subr.bf16.mxu0 %v13467_v36  ;;  %v1754_v36 = vld [vmem:[#allocation13 + $0x2ab8] sm:$0xff] }
 0x436   :  { %10310 = vmatpush1.bf16.msra.mxu1 %v13464_v38  ;;  %v13625_v38 = vcombine.high %v1737_v27, %v1753_v58  ;;  %v13626_v29 = vcombine.low %v1738_v34, %v1754_v36  ;;  %v395_v58 = vld [vmem:[#allocation13 + $0x40] sm:$0xff] }
 0x437   :  { %10311 = vmatprep.subr.bf16.mxu1 %v13497_v42  ;;  %v1785_v42 = vld [vmem:[#allocation13 + $0x2bb0] sm:$0xff] }
 0x438   :  { %10433 = vmatpush1.bf16.msra.mxu0 %v13466_v43  ;;  %v13627_v43 = vcombine.high %v1738_v34, %v1754_v36  ;;  %v396_v36 = vld [vmem:[#allocation13 + $0x48] sm:$0xff] }
 0x439   :  { %10434 = vmatprep.subr.bf16.mxu0 %v13499_v47  ;;  %v1786_v47 = vld [vmem:[#allocation13 + $0x2bb8] sm:$0xff] }
 0x43a   :  { %10312 = vmatpush1.bf16.msra.mxu1 %v13496_v48  ;;  %v13657_v48 = vcombine.high %v1769_v18, %v1785_v42  ;;  %v13659_v54 = vcombine.high %v1770_v46, %v1786_v47  ;;  %v13658_v9 = vcombine.low %v1770_v46, %v1786_v47  ;;  %v428_v47 = vld [vmem:[#allocation13 + $0x148] sm:$0xff] }
 0x43b   :  { %10313 = vmatprep.subr.bf16.mxu1 %v13529_v51  ;;  %v1817_v51 = vld [vmem:[#allocation13 + $0x2cb0] sm:$0xff] }
 0x43c   :  { %10435 = vmatpush1.bf16.msra.mxu0 %v13498_v52  ;;  %v1833_v52 = vld [vmem:[#allocation13 + $0x2d30] sm:$0xff]  ;;  %v13688_v0 = vcombine.low %v1801_v49, %v1817_v51 }
 0x43d   :  { %10436 = vmatprep.subr.bf16.mxu0 %v13531_v56  ;;  %v1802_v56 = vld [vmem:[#allocation13 + $0x2c38] sm:$0xff]  ;;  %v13721_v7 = vcombine.high %v1833_v52, %v1849_v53  ;;  %v13720_v19 = vcombine.low %v1833_v52, %v1849_v53  ;;  %v475_v52 = vld [vmem:[#allocation13 + $0x2c0] sm:$0xff] }
 0x43e   :  { %10314 = vmatpush1.bf16.msra.mxu1 %v13528_v30  ;;  %v13656_v30 = vcombine.low %v1769_v18, %v1785_v42  ;;  %v427_v42 = vld [vmem:[#allocation13 + $0x140] sm:$0xff] }
 0x43f   :  { %10315 = vmatprep.subr.bf16.mxu1 %v13561_v63  ;;  %v1850_v63 = vld [vmem:[#allocation13 + $0x2db8] sm:$0x11]  ;;  %v9420_v34 = vand.u32 %v13720_v19, %v15067_v17 }
 0x440   :  { %10437 = vmatpush1.bf16.msra.mxu0 %v13530_v2  ;;  %v13689_v2 = vcombine.high %v1801_v49, %v1817_v51  ;;  %v13722_v27 = vcombine.low %v1834_v61, %v1850_v63  ;;  %v459_v51 = vld [vmem:[#allocation13 + $0x240] sm:$0xff] }
 0x441   :  { %10438 = vmatprep.subr.bf16.mxu0 %v13563_v10  ;;  %v13691_v10 = vcombine.high %v1802_v56, %v1818_v59 }
 0x442   :  { %10316 = vmatpush1.bf16.msra.mxu1 %v13560_v12  ;;  %v13723_v12 = vcombine.high %v1834_v61, %v1850_v63  ;;  %v9426_v18 = vand.u32 %v13722_v27, %v15067_v17  ;;  %v491_v63 = vld [vmem:[#allocation13 + $0x340] sm:$0xff] }
 0x443   :  { %10317 = vmatprep.subr.bf16.mxu1 %v13593_v22  ;;  %v9423_v22 = vand.u32 %v13721_v7, %v15067_v17 }
 0x444   :  { %10439 = vmatpush1.bf16.msra.mxu0 %v13562_v26  ;;  %v13690_v26 = vcombine.low %v1802_v56, %v1818_v59  ;;  %v460_v56 = vld [vmem:[#allocation13 + $0x248] sm:$0xff]  ;;  %v12349_v59 = vcombine.high %v459_v51, %v475_v52 }
 0x445   :  { %10440 = vmatprep.subr.bf16.mxu0 %v13595_v31  ;;  %v411_v31 = vld [vmem:[#allocation13 + $0xc0] sm:$0xff] }
 0x446   :  { %10318 = vmatpush1.bf16.msra.mxu1 %v13592_v8  ;;  %v9429_v8 = vand.u32 %v13723_v12, %v15067_v17  ;;  %v12284_v46 = vcombine.low %v395_v58, %v411_v31  ;;  %v508_v12 = vld [vmem:[#allocation13 + $0x3c8] sm:$0xff] }
 0x447   :  { %10319 = vmatprep.subr.bf16.mxu1 %v13625_v38  ;;  %v412_v38 = vld [vmem:[#allocation13 + $0xc8] sm:$0xff] }
 0x448   :  { %10441 = vmatpush1.bf16.msra.mxu0 %v13594_v41  ;;  %v12285_v41 = vcombine.high %v395_v58, %v411_v31  ;;  %v524_v31 = vld [vmem:[#allocation13 + $0x448] sm:$0xff] }
 0x449   :  { %10442 = vmatprep.subr.bf16.mxu0 %v13627_v43  ;;  %v443_v43 = vld [vmem:[#allocation13 + $0x1c0] sm:$0xff] }
 0x44a   :  { %10320 = vmatpush1.bf16.msra.mxu1 %v13624_v45  ;;  %v12287_v45 = vcombine.high %v396_v36, %v412_v38  ;;  %v12317_v49 = vcombine.high %v427_v42, %v443_v43 }
 0x44b   :  { %10321 = vmatprep.subr.bf16.mxu1 %v13657_v48  ;;  %v444_v48 = vld [vmem:[#allocation13 + $0x1c8] sm:$0xff] }
 0x44c   :  { %10443 = vmatpush1.bf16.msra.mxu0 %v13626_v29  ;;  %v12286_v29 = vcombine.low %v396_v36, %v412_v38  ;;  %v12319_v53 = vcombine.high %v428_v47, %v444_v48  ;;  %v12318_v61 = vcombine.low %v428_v47, %v444_v48  ;;  %v555_v38 = vld [vmem:[#allocation13 + $0x540] sm:$0xff] }
 0x44d   :  { %10444 = vmatprep.subr.bf16.mxu0 %v13659_v54  ;;  %v12316_v54 = vcombine.low %v427_v42, %v443_v43  ;;  %v556_v43 = vld [vmem:[#allocation13 + $0x548] sm:$0xff]  ;;  %v587_v48 = vld [vmem:[#allocation13 + $0x640] sm:$0xff] }
 0x44e   :  { %10322 = vmatpush1.bf16.msra.mxu1 %v13656_v30  ;;  %v476_v30 = vld [vmem:[#allocation13 + $0x2c8] sm:$0xff] }
 0x44f   :  { %10323 = vmatprep.subr.bf16.mxu1 %v13689_v2  ;;  %v507_v2 = vld [vmem:[#allocation13 + $0x3c0] sm:$0xff]  ;;  %v12351_v7 = vcombine.high %v460_v56, %v476_v30  ;;  %v12350_v19 = vcombine.low %v460_v56, %v476_v30 }
 0x450   :  { %10445 = vmatpush1.bf16.msra.mxu0 %v13658_v9  ;;  %v12348_v9 = vcombine.low %v459_v51, %v475_v52  ;;  %v12380_v58 = vcombine.low %v491_v63, %v507_v2  ;;  %v588_v52 = vld [vmem:[#allocation13 + $0x648] sm:$0xff]  ;;  %v619_v30 = vld [vmem:[#allocation13 + $0x740] sm:$0xff] }
 0x451   :  { %10446 = vmatprep.subr.bf16.mxu0 %v13691_v10  ;;  %v492_v10 = vld [vmem:[#allocation13 + $0x348] sm:$0xff] }
 0x452   :  { %10324 = vmatpush1.bf16.msra.mxu1 %v13688_v0  ;;  %v12381_v0 = vcombine.high %v491_v63, %v507_v2  ;;  %v12383_v27 = vcombine.high %v492_v10, %v508_v12  ;;  %v12382_v36 = vcombine.low %v492_v10, %v508_v12  ;;  %v1860_v2 = vld [vmem:[#allocation14 + $0x8] sm:$0xff] }
 0x453   :  { %10325 = vmatprep.subr.bf16.mxu1 %v9423_v22  ;;  %v523_v22 = vld [vmem:[#allocation13 + $0x440] sm:$0xff] }
 0x454   :  { %10447 = vmatpush1.bf16.msra.mxu0 %v13690_v26  ;;  %v539_v26 = vld [vmem:[#allocation13 + $0x4c0] sm:$0xff] }
 0x455   :  { %10448 = vmatprep.subr.bf16.mxu0 %v9429_v8  ;;  %v540_v8 = vld [vmem:[#allocation13 + $0x4c8] sm:$0xff]  ;;  %v12412_v42 = vcombine.low %v523_v22, %v539_v26 }
 0x456   :  { %10326 = vmatpush1.bf16.msra.mxu1 %v9420_v34  ;;  %v12413_v34 = vcombine.high %v523_v22, %v539_v26  ;;  %v12414_v47 = vcombine.low %v524_v31, %v540_v8  ;;  %v1902_v22 = vrot.slane %v1860_v2, %v15130_v14 }
 0x457   :  { %10463 = vmatprep.subr.bf16.mxu1 %v12285_v41  ;;  %v571_v41 = vld [vmem:[#allocation13 + $0x5c0] sm:$0xff] }
 0x458   :  { %10449 = vmatpush1.bf16.msra.mxu0 %v9426_v18  ;;  %v12415_v18 = vcombine.high %v524_v31, %v540_v8  ;;  %v12444_v51 = vcombine.low %v555_v38, %v571_v41  ;;  %v652_v31 = vld [vmem:[#allocation13 + $0x848] sm:$0xff] }
 0x459   :  { %10332 = vmatmul.mubr.bf16.vlgmr.msra.gmra.mrb[12].mxu1 %v15075_v39  ;;  %10586 = vmatprep.subr.bf16.mxu0 %v12287_v45  ;;  %v572_v45 = vld [vmem:[#allocation13 + $0x5c8] sm:$0xff] }
 0x45a   :  { %10464 = vmatpush1.bf16.msra.mxu1 %v12284_v46  ;;  %10495 = vmatprep.mubr.bf16.mxu1 %v15033_v62  ;;  %v12445_v46 = vcombine.high %v555_v38, %v571_v41  ;;  %v12446_v56 = vcombine.low %v556_v43, %v572_v45  ;;  %v668_v8 = vld [vmem:[#allocation13 + $0x8c8] sm:$0xff]  ;;  %v1914_v41 = vrot.slane %v1860_v2, %v15145_v16 }
 0x45b   :  { %10455 = vmatmul.mubr.bf16.vlgmr.msra.gmra.mrb[16].mxu0 %v15075_v39  ;;  %10465 = vmatprep.subr.bf16.mxu1 %v12317_v49  ;;  %v603_v49 = vld [vmem:[#allocation13 + $0x6c0] sm:$0xff] }
 0x45c   :  { %10587 = vmatpush1.bf16.msra.mxu0 %v12286_v29  ;;  %10618 = vmatprep.mubr.bf16.mxu0 %v15033_v62  ;;  %v12447_v29 = vcombine.high %v556_v43, %v572_v45  ;;  %v12476_v63 = vcombine.low %v587_v48, %v603_v49  ;;  %v699_v43 = vld [vmem:[#allocation13 + $0x9c0] sm:$0xff] }
 0x45d   :  { %10588 = vmatprep.subr.bf16.mxu0 %v12319_v53  ;;  %v604_v53 = vld [vmem:[#allocation13 + $0x6c8] sm:$0xff] }
 0x45e   :  { %10466 = vmatpush1.bf16.msra.mxu1 %v12316_v54  ;;  %v12477_v54 = vcombine.high %v587_v48, %v603_v49  ;;  %v12478_v12 = vcombine.low %v588_v52, %v604_v53 }
 0x45f   :  { %10467 = vmatprep.subr.bf16.mxu1 %v12349_v59  ;;  %v635_v59 = vld [vmem:[#allocation13 + $0x7c0] sm:$0xff] }
 0x460   :  { %10589 = vmatpush1.bf16.msra.mxu0 %v12318_v61  ;;  %v12479_v61 = vcombine.high %v588_v52, %v604_v53  ;;  %v12509_v10 = vcombine.high %v619_v30, %v635_v59  ;;  %v12542_v52 = vcombine.low %v652_v31, %v668_v8  ;;  %v684_v53 = vld [vmem:[#allocation13 + $0x948] sm:$0xff] }
 0x461   :  { %10590 = vmatprep.subr.bf16.mxu0 %v12351_v7  ;;  %v620_v7 = vld [vmem:[#allocation13 + $0x748] sm:$0xff] }
 0x462   :  { %10468 = vmatpush1.bf16.msra.mxu1 %v12348_v9  ;;  %v636_v9 = vld [vmem:[#allocation13 + $0x7c8] sm:$0xff] }
 0x463   :  { %10469 = vmatprep.subr.bf16.mxu1 %v12381_v0  ;;  %v651_v0 = vld [vmem:[#allocation13 + $0x840] sm:$0xff]  ;;  %v12511_v26 = vcombine.high %v620_v7, %v636_v9 }
 0x464   :  { %10591 = vmatpush1.bf16.msra.mxu0 %v12350_v19  ;;  %v667_v19 = vld [vmem:[#allocation13 + $0x8c0] sm:$0xff] }
 0x465   :  { %10592 = vmatprep.subr.bf16.mxu0 %v12383_v27  ;;  %v1906_v27 = vrot.slane %v1860_v2, %v15135_v23 }
 0x466   :  { %10470 = vmatpush1.bf16.msra.mxu1 %v12380_v58  ;;  %v12508_v58 = vcombine.low %v619_v30, %v635_v59 }
 0x467   :  { %10471 = vmatprep.subr.bf16.mxu1 %v12413_v34  ;;  %v1910_v34 = vrot.slane %v1860_v2, %v15140_v33 }
 0x468   :  { %10593 = vmatpush1.bf16.msra.mxu0 %v12382_v36  ;;  %v12541_v36 = vcombine.high %v651_v0, %v667_v19 }
 0x469   :  { %10594 = vmatprep.subr.bf16.mxu0 %v12415_v18  ;;  %v12510_v18 = vcombine.low %v620_v7, %v636_v9 }
 0x46a   :  { %10472 = vmatpush1.bf16.msra.mxu1 %v12412_v42  ;;  %v683_v42 = vld [vmem:[#allocation13 + $0x940] sm:$0xff] }
 0x46b   :  { %10473 = vmatprep.subr.bf16.mxu1 %v12445_v46 }
 0x46c   :  { %10595 = vmatpush1.bf16.msra.mxu0 %v12414_v47  ;;  %v12543_v47 = vcombine.high %v652_v31, %v668_v8 }
 0x46d   :  { %10596 = vmatprep.subr.bf16.mxu0 %v12447_v29 }
 0x46e   :  { %10474 = vmatpush1.bf16.msra.mxu1 %v12444_v51  ;;  %v12540_v51 = vcombine.low %v651_v0, %v667_v19 }
 0x46f   :  { %10475 = vmatprep.subr.bf16.mxu1 %v12477_v54  ;;  %v700_v54 = vld [vmem:[#allocation13 + $0x9c8] sm:$0xff] }
 0x470   :  { %10597 = vmatpush1.bf16.msra.mxu0 %v12446_v56 }
 0x471   :  { %10598 = vmatprep.subr.bf16.mxu0 %v12479_v61 }
 0x472   :  { %10476 = vmatpush1.bf16.msra.mxu1 %v12476_v63  ;;  %v12573_v63 = vcombine.high %v683_v42, %v699_v43 }
 0x473   :  { %10477 = vmatprep.subr.bf16.mxu1 %v12509_v10  ;;  %v12572_v10 = vcombine.low %v683_v42, %v699_v43  ;;  %v747_v42 = vld [vmem:[#allocation13 + $0xb40] sm:$0xff] }
 0x474   :  { %v10087_v38 = vpop.f32.mrb[8].mxu1  ;;  %10599 = vmatpush1.bf16.msra.mxu0 %v12478_v12  ;;  %v715_v12 = vld [vmem:[#allocation13 + $0xa40] sm:$0xff] }
 0x475   :  { %v13942_v45 = vadd.f32 %v10087_v38, %v1902_v22  ;;  %v10089_v46 = vpop.f32.mrb[9].mxu1  ;;  %10600 = vmatprep.subr.bf16.mxu0 %v12511_v26  ;;  %v731_v22 = vld [vmem:[#allocation13 + $0xac0] sm:$0xff] }
 0x476   :  { %v13943_v48 = vadd.f32 %v10089_v46, %v1906_v27  ;;  %v10091_v49 = vpop.f32.mrb[10].mxu1  ;;  %10478 = vmatpush1.bf16.msra.mxu1 %v12508_v58  ;;  %v10210_v29 = vpop.f32.mrb[12].mxu0  ;;  %v12575_v27 = vcombine.high %v684_v53, %v700_v54  ;;  %v763_v43 = vld [vmem:[#allocation13 + $0xbc0] sm:$0xff]  ;;  %v12604_v6 = vcombine.low %v715_v12, %v731_v22  ;;  %v764_v46 = vld [vmem:[#allocation13 + $0xbc8] sm:$0xff] }
 0x477   :  { %vm11455_vm1 = vcmp.ge.f32.partialorder %v13942_v45, 0.0  ;;  %v11487_v56 = vmul.f32 0.01, %v13942_v45  ;;  %v10092_v30 = vpop.f32.mrb[11].mxu1  ;;  %v13944_v59 = vadd.f32 %v10210_v29, %v1910_v34  ;;  %v10212_v61 = vpop.f32.mrb[13].mxu0  ;;  %10479 = vmatprep.subr.bf16.mxu1 %v12541_v36  ;;  %v716_v34 = vld [vmem:[#allocation13 + $0xa48] sm:$0xff]  ;;  %v12637_v40 = vcombine.high %v747_v42, %v763_v43 }
 0x478   :  { %vm11456_vm2 = vcmp.ge.f32.partialorder %v13943_v48, 0.0  ;;  %v11488_v2 = vmul.f32 0.01, %v13943_v48  ;;  %v13945_v7 = vadd.f32 %v10212_v61, %v1914_v41  ;;  %v10214_v9 = vpop.f32.mrb[14].mxu0  ;;  %10601 = vmatpush1.bf16.msra.mxu0 %v12510_v18  ;;  %v732_v36 = vld [vmem:[#allocation13 + $0xac8] sm:$0xff]  ;;  %v12605_v18 = vcombine.high %v715_v12, %v731_v22 }
 0x479   :  { %v11519_v26 = vsel %vm11455_vm1, %v13942_v45, %v11487_v56  ;;  %vm11457_vm3 = vcmp.ge.f32.partialorder %v13944_v59, 0.0  ;;  %v11489_v0 = vmul.f32 0.01, %v13944_v59  ;;  %v10215_v19 = vpop.f32.mrb[15].mxu0  ;;  %10602 = vmatprep.subr.bf16.mxu0 %v12543_v47  ;;  %v12607_v28 = vcombine.high %v716_v34, %v732_v36  ;;  %v795_v47 = vld [vmem:[#allocation13 + $0xcc0] sm:$0xff]  ;;  %v780_v29 = vld [vmem:[#allocation13 + $0xc48] sm:$0xff] }
 0x47a   :  { %v15256_v58 = vmax.f32 %v11543_v4, %v11519_v26  ;;  %v11520_v31 = vsel %vm11456_vm2, %v13943_v48, %v11488_v2  ;;  %vm11458_vm4 = vcmp.ge.f32.partialorder %v13945_v7, 0.0  ;;  %v11490_v8 = vmul.f32 0.01, %v13945_v7  ;;  %10480 = vmatpush1.bf16.msra.mxu1 %v12540_v51  ;;  %v811_v51 = vld [vmem:[#allocation13 + $0xd40] sm:$0xff]  ;;  %v812_v56 = vld [vmem:[#allocation13 + $0xd48] sm:$0xff] }
 0x47b   :  { %v15261_v38 = vmax.f32 %v11544_v5, %v11520_v31  ;;  %v11521_v41 = vsel %vm11457_vm3, %v13944_v59, %v11489_v0  ;;  %10481 = vmatprep.subr.bf16.mxu1 %v12573_v63  ;;  %v12574_v4 = vcombine.low %v684_v53, %v700_v54  ;;  %v748_v5 = vld [vmem:[#allocation13 + $0xb48] sm:$0xff]  ;;  %v12606_v11 = vcombine.low %v716_v34, %v732_v36  ;;  %v843_v63 = vld [vmem:[#allocation13 + $0xe40] sm:$0xff] }
 0x47c   :  { %v15266_v13 = vmax.f32 %v11545_v15, %v11521_v41  ;;  %v11522_v60 = vsel %vm11458_vm4, %v13945_v7, %v11490_v8  ;;  %10603 = vmatpush1.bf16.msra.mxu0 %v12542_v52  ;;  %v779_v15 = vld [vmem:[#allocation13 + $0xc40] sm:$0xff]  ;;  %v12639_v48 = vcombine.high %v748_v5, %v764_v46  ;;  %v12636_v49 = vcombine.low %v747_v42, %v763_v43  ;;  %v828_v30 = vld [vmem:[#allocation13 + $0xdc8] sm:$0xff] }
 0x47d   :  { %v15271_v45 = vmax.f32 %v11546_v24, %v11522_v60  ;;  %10604 = vmatprep.subr.bf16.mxu0 %v12575_v27  ;;  %v12669_v21 = vcombine.high %v779_v15, %v795_v47  ;;  %v12638_v24 = vcombine.low %v748_v5, %v764_v46  ;;  %v827_v52 = vld [vmem:[#allocation13 + $0xdc0] sm:$0xff]  ;;  %v12671_v53 = vcombine.high %v780_v29, %v796_v44  ;;  %v860_v12 = vld [vmem:[#allocation13 + $0xec8] sm:$0xff] }
 0x47e   :  { %10482 = vmatpush1.bf16.msra.mxu1 %v12572_v10  ;;  %v12668_v54 = vcombine.low %v779_v15, %v795_v47  ;;  %v12701_v59 = vcombine.high %v811_v51, %v827_v52  ;;  %v12670_v61 = vcombine.low %v780_v29, %v796_v44  ;;  %v859_v2 = vld [vmem:[#allocation13 + $0xec0] sm:$0xff]  ;;  %v12703_v7 = vcombine.high %v812_v56, %v828_v30  ;;  %v844_v10 = vld [vmem:[#allocation13 + $0xe48] sm:$0xff] }
 0x47f   :  { %10483 = vmatprep.subr.bf16.mxu1 %v12605_v18  ;;  %v12700_v9 = vcombine.low %v811_v51, %v827_v52  ;;  %v12733_v22 = vcombine.high %v843_v63, %v859_v2  ;;  %v12702_v26 = vcombine.low %v812_v56, %v828_v30  ;;  %v875_v0 = vld [vmem:[#allocation13 + $0xf40] sm:$0xff]  ;;  %v12735_v27 = vcombine.high %v844_v10, %v860_v12  ;;  %v876_v8 = vld [vmem:[#allocation13 + $0xf48] sm:$0xff] }
 0x480   :  { %10605 = vmatpush1.bf16.msra.mxu0 %v12574_v4  ;;  %v891_v19 = vld [vmem:[#allocation13 + $0xfc0] sm:$0xff]  ;;  %v12732_v31 = vcombine.low %v843_v63, %v859_v2  ;;  %v892_v34 = vld [vmem:[#allocation13 + $0xfc8] sm:$0xff]  ;;  %v12734_v41 = vcombine.low %v844_v10, %v860_v12 }
 0x481   :  { %10606 = vmatprep.subr.bf16.mxu0 %v12607_v28  ;;  %v12765_v36 = vcombine.high %v875_v0, %v891_v19  ;;  %v907_v18 = vld [vmem:[#allocation13 + $0x1040] sm:$0xff]  ;;  %v12767_v4 = vcombine.high %v876_v8, %v892_v34  ;;  %v12764_v42 = vcombine.low %v875_v0, %v891_v19  ;;  %v908_v43 = vld [vmem:[#allocation13 + $0x1048] sm:$0xff]  ;;  %v12766_v5 = vcombine.low %v876_v8, %v892_v34 }
 0x482   :  { %10484 = vmatpush1.bf16.msra.mxu1 %v12604_v6  ;;  %v923_v60 = vld [vmem:[#allocation13 + $0x10c0] sm:$0xff]  ;;  %v924_v28 = vld [vmem:[#allocation13 + $0x10c8] sm:$0xff] }
 0x483   :  { %10485 = vmatprep.subr.bf16.mxu1 %v12637_v40  ;;  %v12797_v6 = vcombine.high %v907_v18, %v923_v60  ;;  %v939_v46 = vld [vmem:[#allocation13 + $0x1140] sm:$0xff]  ;;  %v12796_v15 = vcombine.low %v907_v18, %v923_v60  ;;  %v940_v47 = vld [vmem:[#allocation13 + $0x1148] sm:$0xff]  ;;  %v12798_v29 = vcombine.low %v908_v43, %v924_v28 }
 0x484   :  { %10607 = vmatpush1.bf16.msra.mxu0 %v12606_v11  ;;  %v955_v40 = vld [vmem:[#allocation13 + $0x11c0] sm:$0xff]  ;;  %v12799_v11 = vcombine.high %v908_v43, %v924_v28  ;;  %v972_v52 = vld [vmem:[#allocation13 + $0x1248] sm:$0xff] }
 0x485   :  { %10608 = vmatprep.subr.bf16.mxu0 %v12639_v48  ;;  %v956_v48 = vld [vmem:[#allocation13 + $0x11c8] sm:$0xff]  ;;  %v971_v44 = vld [vmem:[#allocation13 + $0x1240] sm:$0xff]  ;;  %v12828_v51 = vcombine.low %v939_v46, %v955_v40 }
 0x486   :  { %10486 = vmatpush1.bf16.msra.mxu1 %v12636_v49  ;;  %v12829_v49 = vcombine.high %v939_v46, %v955_v40  ;;  %v12830_v56 = vcombine.low %v940_v47, %v956_v48  ;;  %v1003_v30 = vld [vmem:[#allocation13 + $0x1340] sm:$0xff]  ;;  %v1004_v2 = vld [vmem:[#allocation13 + $0x1348] sm:$0xff] }
 0x487   :  { %10487 = vmatprep.subr.bf16.mxu1 %v12669_v21  ;;  %v987_v21 = vld [vmem:[#allocation13 + $0x12c0] sm:$0xff]  ;;  %v1036_v19 = vld [vmem:[#allocation13 + $0x1448] sm:$0xff] }
 0x488   :  { %10609 = vmatpush1.bf16.msra.mxu0 %v12638_v24  ;;  %v12831_v24 = vcombine.high %v940_v47, %v956_v48  ;;  %v12860_v63 = vcombine.low %v971_v44, %v987_v21  ;;  %v1035_v12 = vld [vmem:[#allocation13 + $0x1440] sm:$0xff]  ;;  %v1068_v60 = vld [vmem:[#allocation13 + $0x1548] sm:$0xff] }
 0x489   :  { %10610 = vmatprep.subr.bf16.mxu0 %v12671_v53  ;;  %v988_v53 = vld [vmem:[#allocation13 + $0x12c8] sm:$0xff]  ;;  %v1067_v34 = vld [vmem:[#allocation13 + $0x1540] sm:$0xff] }
 0x48a   :  { %10488 = vmatpush1.bf16.msra.mxu1 %v12668_v54  ;;  %v12861_v54 = vcombine.high %v971_v44, %v987_v21  ;;  %v12862_v10 = vcombine.low %v972_v52, %v988_v53  ;;  %v1099_v28 = vld [vmem:[#allocation13 + $0x1640] sm:$0xff]  ;;  %v1100_v40 = vld [vmem:[#allocation13 + $0x1648] sm:$0xff] }
 0x48b   :  { %10489 = vmatprep.subr.bf16.mxu1 %v12701_v59  ;;  %v1019_v59 = vld [vmem:[#allocation13 + $0x13c0] sm:$0xff]  ;;  %v1132_v21 = vld [vmem:[#allocation13 + $0x1748] sm:$0xff] }
 0x48c   :  { %10611 = vmatpush1.bf16.msra.mxu0 %v12670_v61  ;;  %v12863_v61 = vcombine.high %v972_v52, %v988_v53  ;;  %v12892_v0 = vcombine.low %v1003_v30, %v1019_v59  ;;  %v1131_v48 = vld [vmem:[#allocation13 + $0x1740] sm:$0xff] }
 0x48d   :  { %10612 = vmatprep.subr.bf16.mxu0 %v12703_v7  ;;  %v1020_v7 = vld [vmem:[#allocation13 + $0x13c8] sm:$0xff]  ;;  %v1163_v53 = vld [vmem:[#allocation13 + $0x1840] sm:$0xff] }
 0x48e   :  { %10490 = vmatpush1.bf16.msra.mxu1 %v12700_v9  ;;  %v12893_v9 = vcombine.high %v1003_v30, %v1019_v59  ;;  %v12894_v8 = vcombine.low %v1004_v2, %v1020_v7  ;;  %v1164_v59 = vld [vmem:[#allocation13 + $0x1848] sm:$0xff] }
 0x48f   :  { %10491 = vmatprep.subr.bf16.mxu1 %v12733_v22  ;;  %v1051_v22 = vld [vmem:[#allocation13 + $0x14c0] sm:$0xff] }
 0x490   :  { %10613 = vmatpush1.bf16.msra.mxu0 %v12702_v26  ;;  %v12895_v26 = vcombine.high %v1004_v2, %v1020_v7  ;;  %v12924_v18 = vcombine.low %v1035_v12, %v1051_v22  ;;  %v1195_v7 = vld [vmem:[#allocation13 + $0x1940] sm:$0xff] }
 0x491   :  { %10614 = vmatprep.subr.bf16.mxu0 %v12735_v27  ;;  %v1052_v27 = vld [vmem:[#allocation13 + $0x14c8] sm:$0xff] }
 0x492   :  { %10492 = vmatpush1.bf16.msra.mxu1 %v12732_v31  ;;  %v12925_v31 = vcombine.high %v1035_v12, %v1051_v22  ;;  %v12926_v43 = vcombine.low %v1036_v19, %v1052_v27  ;;  %v1196_v22 = vld [vmem:[#allocation13 + $0x1948] sm:$0xff] }
 0x493   :  { %10493 = vmatprep.subr.bf16.mxu1 %v12765_v36  ;;  %v1083_v36 = vld [vmem:[#allocation13 + $0x15c0] sm:$0xff] }
 0x494   :  { %10615 = vmatpush1.bf16.msra.mxu0 %v12734_v41  ;;  %v12927_v41 = vcombine.high %v1036_v19, %v1052_v27  ;;  %v12956_v46 = vcombine.low %v1067_v34, %v1083_v36  ;;  %v1227_v27 = vld [vmem:[#allocation13 + $0x1a40] sm:$0xff] }
 0x495   :  { %10616 = vmatprep.subr.bf16.mxu0 %v12767_v4  ;;  %v1084_v4 = vld [vmem:[#allocation13 + $0x15c8] sm:$0xff] }
 0x496   :  { %10494 = vmatpush1.bf16.msra.mxu1 %v12764_v42  ;;  %v12957_v42 = vcombine.high %v1067_v34, %v1083_v36  ;;  %v12958_v47 = vcombine.low %v1068_v60, %v1084_v4  ;;  %v1228_v36 = vld [vmem:[#allocation13 + $0x1a48] sm:$0xff] }
 0x497   :  { %10504 = vmatprep.subr.bf16.mxu1 %v12797_v6  ;;  %v1115_v6 = vld [vmem:[#allocation13 + $0x16c0] sm:$0xff] }
 0x498   :  { %10617 = vmatpush1.bf16.msra.mxu0 %v12766_v5  ;;  %v12959_v5 = vcombine.high %v1068_v60, %v1084_v4  ;;  %v12988_v44 = vcombine.low %v1099_v28, %v1115_v6  ;;  %v1259_v4 = vld [vmem:[#allocation13 + $0x1b40] sm:$0xff] }
 0x499   :  { %10496 = vmatmul.mubr.bf16.vlgmr.msra.gmra.mrb[16].mxu1 %v15041_v20  ;;  %10627 = vmatprep.subr.bf16.mxu0 %v12799_v11  ;;  %v1116_v11 = vld [vmem:[#allocation13 + $0x16c8] sm:$0xff] }
 0x49a   :  { %10505 = vmatpush1.bf16.msra.mxu1 %v12796_v15  ;;  %10536 = vmatprep.mubr.bf16.mxu1 %v15045_v25  ;;  %v12989_v15 = vcombine.high %v1099_v28, %v1115_v6  ;;  %v12990_v52 = vcombine.low %v1100_v40, %v1116_v11  ;;  %v1260_v6 = vld [vmem:[#allocation13 + $0x1b48] sm:$0xff] }
 0x49b   :  { %10506 = vmatprep.subr.bf16.mxu1 %v12829_v49  ;;  %10619 = vmatmul.mubr.bf16.vlgmr.msra.gmra.mrb[20].mxu0 %v15041_v20  ;;  %v1147_v49 = vld [vmem:[#allocation13 + $0x17c0] sm:$0xff] }
 0x49c   :  { %10628 = vmatpush1.bf16.msra.mxu0 %v12798_v29  ;;  %10659 = vmatprep.mubr.bf16.mxu0 %v15045_v25  ;;  %v12991_v29 = vcombine.high %v1100_v40, %v1116_v11  ;;  %v13020_v30 = vcombine.low %v1131_v48, %v1147_v49  ;;  %v1291_v11 = vld [vmem:[#allocation13 + $0x1c40] sm:$0xff] }
 0x49d   :  { %10629 = vmatprep.subr.bf16.mxu0 %v12831_v24  ;;  %v1148_v24 = vld [vmem:[#allocation13 + $0x17c8] sm:$0xff] }
 0x49e   :  { %10507 = vmatpush1.bf16.msra.mxu1 %v12828_v51  ;;  %v13021_v51 = vcombine.high %v1131_v48, %v1147_v49  ;;  %v13022_v2 = vcombine.low %v1132_v21, %v1148_v24  ;;  %v1292_v49 = vld [vmem:[#allocation13 + $0x1c48] sm:$0xff] }
 0x49f   :  { %10508 = vmatprep.subr.bf16.mxu1 %v12861_v54  ;;  %v1179_v54 = vld [vmem:[#allocation13 + $0x18c0] sm:$0xff] }
 0x4a0   :  { %10630 = vmatpush1.bf16.msra.mxu0 %v12830_v56  ;;  %v13023_v56 = vcombine.high %v1132_v21, %v1148_v24  ;;  %v13052_v12 = vcombine.low %v1163_v53, %v1179_v54  ;;  %v1323_v24 = vld [vmem:[#allocation13 + $0x1d40] sm:$0xff] }
 0x4a1   :  { %10631 = vmatprep.subr.bf16.mxu0 %v12863_v61  ;;  %v1180_v61 = vld [vmem:[#allocation13 + $0x18c8] sm:$0xff] }
 0x4a2   :  { %10509 = vmatpush1.bf16.msra.mxu1 %v12860_v63  ;;  %v13053_v63 = vcombine.high %v1163_v53, %v1179_v54  ;;  %v13054_v19 = vcombine.low %v1164_v59, %v1180_v61  ;;  %v1324_v54 = vld [vmem:[#allocation13 + $0x1d48] sm:$0xff] }
 0x4a3   :  { %10510 = vmatprep.subr.bf16.mxu1 %v12893_v9  ;;  %v1211_v9 = vld [vmem:[#allocation13 + $0x19c0] sm:$0xff] }
 0x4a4   :  { %10632 = vmatpush1.bf16.msra.mxu0 %v12862_v10  ;;  %v13055_v10 = vcombine.high %v1164_v59, %v1180_v61  ;;  %v13084_v34 = vcombine.low %v1195_v7, %v1211_v9  ;;  %v1355_v61 = vld [vmem:[#allocation13 + $0x1e40] sm:$0xff] }
 0x4a5   :  { %10633 = vmatprep.subr.bf16.mxu0 %v12895_v26  ;;  %v1212_v26 = vld [vmem:[#allocation13 + $0x19c8] sm:$0xff] }
 0x4a6   :  { %10511 = vmatpush1.bf16.msra.mxu1 %v12892_v0  ;;  %v13085_v0 = vcombine.high %v1195_v7, %v1211_v9  ;;  %v13086_v60 = vcombine.low %v1196_v22, %v1212_v26  ;;  %v1356_v9 = vld [vmem:[#allocation13 + $0x1e48] sm:$0xff] }
 0x4a7   :  { %10512 = vmatprep.subr.bf16.mxu1 %v12925_v31  ;;  %v1243_v31 = vld [vmem:[#allocation13 + $0x1ac0] sm:$0xff] }
 0x4a8   :  { %10634 = vmatpush1.bf16.msra.mxu0 %v12894_v8  ;;  %v13087_v8 = vcombine.high %v1196_v22, %v1212_v26  ;;  %v13116_v28 = vcombine.low %v1227_v27, %v1243_v31  ;;  %v1387_v26 = vld [vmem:[#allocation13 + $0x1f40] sm:$0xff] }
 0x4a9   :  { %10635 = vmatprep.subr.bf16.mxu0 %v12927_v41  ;;  %v1244_v41 = vld [vmem:[#allocation13 + $0x1ac8] sm:$0xff] }
 0x4aa   :  { %10513 = vmatpush1.bf16.msra.mxu1 %v12924_v18  ;;  %v13117_v18 = vcombine.high %v1227_v27, %v1243_v31  ;;  %v13118_v40 = vcombine.low %v1228_v36, %v1244_v41  ;;  %v1388_v31 = vld [vmem:[#allocation13 + $0x1f48] sm:$0xff] }
 0x4ab   :  { %10514 = vmatprep.subr.bf16.mxu1 %v12957_v42  ;;  %v1275_v42 = vld [vmem:[#allocation13 + $0x1bc0] sm:$0xff] }
 0x4ac   :  { %10636 = vmatpush1.bf16.msra.mxu0 %v12926_v43  ;;  %v13119_v43 = vcombine.high %v1228_v36, %v1244_v41  ;;  %v13148_v48 = vcombine.low %v1259_v4, %v1275_v42  ;;  %v1419_v41 = vld [vmem:[#allocation13 + $0x2040] sm:$0xff] }
 0x4ad   :  { %10637 = vmatprep.subr.bf16.mxu0 %v12959_v5  ;;  %v1276_v5 = vld [vmem:[#allocation13 + $0x1bc8] sm:$0xff] }
 0x4ae   :  { %10515 = vmatpush1.bf16.msra.mxu1 %v12956_v46  ;;  %v13149_v46 = vcombine.high %v1259_v4, %v1275_v42  ;;  %v13150_v21 = vcombine.low %v1260_v6, %v1276_v5  ;;  %v1420_v42 = vld [vmem:[#allocation13 + $0x2048] sm:$0xff] }
 0x4af   :  { %10516 = vmatprep.subr.bf16.mxu1 %v12989_v15  ;;  %v1307_v15 = vld [vmem:[#allocation13 + $0x1cc0] sm:$0xff] }
 0x4b0   :  { %10638 = vmatpush1.bf16.msra.mxu0 %v12958_v47  ;;  %v13151_v47 = vcombine.high %v1260_v6, %v1276_v5  ;;  %v13180_v53 = vcombine.low %v1291_v11, %v1307_v15  ;;  %v1451_v5 = vld [vmem:[#allocation13 + $0x2140] sm:$0xff] }
 0x4b1   :  { %10639 = vmatprep.subr.bf16.mxu0 %v12991_v29  ;;  %v1308_v29 = vld [vmem:[#allocation13 + $0x1cc8] sm:$0xff] }
 0x4b2   :  { %10517 = vmatpush1.bf16.msra.mxu1 %v12988_v44  ;;  %v13181_v44 = vcombine.high %v1291_v11, %v1307_v15  ;;  %v13182_v59 = vcombine.low %v1292_v49, %v1308_v29  ;;  %v1452_v15 = vld [vmem:[#allocation13 + $0x2148] sm:$0xff] }
 0x4b3   :  { %10518 = vmatprep.subr.bf16.mxu1 %v13021_v51  ;;  %v1339_v51 = vld [vmem:[#allocation13 + $0x1dc0] sm:$0xff] }
 0x4b4   :  { %10640 = vmatpush1.bf16.msra.mxu0 %v12990_v52  ;;  %v13183_v52 = vcombine.high %v1292_v49, %v1308_v29  ;;  %v13212_v7 = vcombine.low %v1323_v24, %v1339_v51  ;;  %v1483_v29 = vld [vmem:[#allocation13 + $0x2240] sm:$0xff] }
 0x4b5   :  { %10641 = vmatprep.subr.bf16.mxu0 %v13023_v56  ;;  %v1340_v56 = vld [vmem:[#allocation13 + $0x1dc8] sm:$0xff] }
 0x4b6   :  { %10519 = vmatpush1.bf16.msra.mxu1 %v13020_v30  ;;  %v13213_v30 = vcombine.high %v1323_v24, %v1339_v51  ;;  %v13214_v22 = vcombine.low %v1324_v54, %v1340_v56  ;;  %v1484_v51 = vld [vmem:[#allocation13 + $0x2248] sm:$0xff] }
 0x4b7   :  { %10520 = vmatprep.subr.bf16.mxu1 %v13053_v63  ;;  %v1371_v63 = vld [vmem:[#allocation13 + $0x1ec0] sm:$0xff] }
 0x4b8   :  { %10642 = vmatpush1.bf16.msra.mxu0 %v13022_v2  ;;  %v13215_v2 = vcombine.high %v1324_v54, %v1340_v56  ;;  %v13244_v27 = vcombine.low %v1355_v61, %v1371_v63  ;;  %v1515_v56 = vld [vmem:[#allocation13 + $0x2340] sm:$0xff] }
 0x4b9   :  { %10643 = vmatprep.subr.bf16.mxu0 %v13055_v10  ;;  %v1372_v10 = vld [vmem:[#allocation13 + $0x1ec8] sm:$0xff] }
 0x4ba   :  { %10521 = vmatpush1.bf16.msra.mxu1 %v13052_v12  ;;  %v13245_v12 = vcombine.high %v1355_v61, %v1371_v63  ;;  %v13246_v36 = vcombine.low %v1356_v9, %v1372_v10  ;;  %v1516_v63 = vld [vmem:[#allocation13 + $0x2348] sm:$0xff] }
 0x4bb   :  { %10522 = vmatprep.subr.bf16.mxu1 %v13085_v0  ;;  %v1403_v0 = vld [vmem:[#allocation13 + $0x1fc0] sm:$0xff] }
 0x4bc   :  { %10644 = vmatpush1.bf16.msra.mxu0 %v13054_v19  ;;  %v13247_v19 = vcombine.high %v1356_v9, %v1372_v10  ;;  %v13276_v4 = vcombine.low %v1387_v26, %v1403_v0  ;;  %v1547_v10 = vld [vmem:[#allocation13 + $0x2440] sm:$0xff] }
 0x4bd   :  { %10645 = vmatprep.subr.bf16.mxu0 %v13087_v8  ;;  %v1404_v8 = vld [vmem:[#allocation13 + $0x1fc8] sm:$0xff] }
 0x4be   :  { %10523 = vmatpush1.bf16.msra.mxu1 %v13084_v34  ;;  %v13277_v34 = vcombine.high %v1387_v26, %v1403_v0  ;;  %v13278_v6 = vcombine.low %v1388_v31, %v1404_v8  ;;  %v1548_v0 = vld [vmem:[#allocation13 + $0x2448] sm:$0xff] }
 0x4bf   :  { %10524 = vmatprep.subr.bf16.mxu1 %v13117_v18  ;;  %v1435_v18 = vld [vmem:[#allocation13 + $0x20c0] sm:$0xff] }
 0x4c0   :  { %10646 = vmatpush1.bf16.msra.mxu0 %v13086_v60  ;;  %v13279_v60 = vcombine.high %v1388_v31, %v1404_v8  ;;  %v13308_v11 = vcombine.low %v1419_v41, %v1435_v18  ;;  %v1579_v8 = vld [vmem:[#allocation13 + $0x2540] sm:$0xff] }
 0x4c1   :  { %10647 = vmatprep.subr.bf16.mxu0 %v13119_v43  ;;  %v1436_v43 = vld [vmem:[#allocation13 + $0x20c8] sm:$0xff] }
 0x4c2   :  { %10525 = vmatpush1.bf16.msra.mxu1 %v13116_v28  ;;  %v13309_v28 = vcombine.high %v1419_v41, %v1435_v18  ;;  %v13310_v49 = vcombine.low %v1420_v42, %v1436_v43  ;;  %v1580_v18 = vld [vmem:[#allocation13 + $0x2548] sm:$0xff] }
 0x4c3   :  { %10526 = vmatprep.subr.bf16.mxu1 %v13149_v46  ;;  %v1467_v46 = vld [vmem:[#allocation13 + $0x21c0] sm:$0xff] }
 0x4c4   :  { %10648 = vmatpush1.bf16.msra.mxu0 %v13118_v40  ;;  %v13311_v40 = vcombine.high %v1420_v42, %v1436_v43  ;;  %v13340_v24 = vcombine.low %v1451_v5, %v1467_v46  ;;  %v1611_v43 = vld [vmem:[#allocation13 + $0x2640] sm:$0xff] }
 0x4c5   :  { %10649 = vmatprep.subr.bf16.mxu0 %v13151_v47  ;;  %v1468_v47 = vld [vmem:[#allocation13 + $0x21c8] sm:$0xff] }
 0x4c6   :  { %10527 = vmatpush1.bf16.msra.mxu1 %v13148_v48  ;;  %v13341_v48 = vcombine.high %v1451_v5, %v1467_v46  ;;  %v13342_v54 = vcombine.low %v1452_v15, %v1468_v47  ;;  %v1612_v46 = vld [vmem:[#allocation13 + $0x2648] sm:$0xff] }
 0x4c7   :  { %10528 = vmatprep.subr.bf16.mxu1 %v13181_v44  ;;  %v1499_v44 = vld [vmem:[#allocation13 + $0x22c0] sm:$0xff] }
 0x4c8   :  { %10650 = vmatpush1.bf16.msra.mxu0 %v13150_v21  ;;  %v13343_v21 = vcombine.high %v1452_v15, %v1468_v47  ;;  %v13372_v61 = vcombine.low %v1483_v29, %v1499_v44  ;;  %v1643_v47 = vld [vmem:[#allocation13 + $0x2740] sm:$0xff] }
 0x4c9   :  { %10651 = vmatprep.subr.bf16.mxu0 %v13183_v52  ;;  %v1500_v52 = vld [vmem:[#allocation13 + $0x22c8] sm:$0xff] }
 0x4ca   :  { %10529 = vmatpush1.bf16.msra.mxu1 %v13180_v53  ;;  %v13373_v53 = vcombine.high %v1483_v29, %v1499_v44  ;;  %v13374_v9 = vcombine.low %v1484_v51, %v1500_v52  ;;  %v1644_v44 = vld [vmem:[#allocation13 + $0x2748] sm:$0xff] }
 0x4cb   :  { %10530 = vmatprep.subr.bf16.mxu1 %v13213_v30  ;;  %v1531_v30 = vld [vmem:[#allocation13 + $0x23c0] sm:$0xff] }
 0x4cc   :  { %10652 = vmatpush1.bf16.msra.mxu0 %v13182_v59  ;;  %v13375_v59 = vcombine.high %v1484_v51, %v1500_v52  ;;  %v13404_v26 = vcombine.low %v1515_v56, %v1531_v30  ;;  %v1675_v52 = vld [vmem:[#allocation13 + $0x2840] sm:$0xff] }
 0x4cd   :  { %10653 = vmatprep.subr.bf16.mxu0 %v13215_v2  ;;  %v1532_v2 = vld [vmem:[#allocation13 + $0x23c8] sm:$0xff] }
 0x4ce   :  { %10531 = vmatpush1.bf16.msra.mxu1 %v13212_v7  ;;  %v13405_v7 = vcombine.high %v1515_v56, %v1531_v30  ;;  %v13406_v31 = vcombine.low %v1516_v63, %v1532_v2  ;;  %v1676_v30 = vld [vmem:[#allocation13 + $0x2848] sm:$0xff] }
 0x4cf   :  { %10532 = vmatprep.subr.bf16.mxu1 %v13245_v12  ;;  %v1563_v12 = vld [vmem:[#allocation13 + $0x24c0] sm:$0xff] }
 0x4d0   :  { %10654 = vmatpush1.bf16.msra.mxu0 %v13214_v22  ;;  %v13407_v22 = vcombine.high %v1516_v63, %v1532_v2  ;;  %v13436_v41 = vcombine.low %v1547_v10, %v1563_v12  ;;  %v1707_v2 = vld [vmem:[#allocation13 + $0x2940] sm:$0xff] }
 0x4d1   :  { %10655 = vmatprep.subr.bf16.mxu0 %v13247_v19  ;;  %v1564_v19 = vld [vmem:[#allocation13 + $0x24c8] sm:$0xff] }
 0x4d2   :  { %10533 = vmatpush1.bf16.msra.mxu1 %v13244_v27  ;;  %v13437_v27 = vcombine.high %v1547_v10, %v1563_v12  ;;  %v13438_v42 = vcombine.low %v1548_v0, %v1564_v19  ;;  %v1708_v12 = vld [vmem:[#allocation13 + $0x2948] sm:$0xff] }
 0x4d3   :  { %10534 = vmatprep.subr.bf16.mxu1 %v13277_v34  ;;  %v1595_v34 = vld [vmem:[#allocation13 + $0x25c0] sm:$0xff] }
 0x4d4   :  { %10656 = vmatpush1.bf16.msra.mxu0 %v13246_v36  ;;  %v13439_v36 = vcombine.high %v1548_v0, %v1564_v19  ;;  %v13468_v5 = vcombine.low %v1579_v8, %v1595_v34  ;;  %v1739_v19 = vld [vmem:[#allocation13 + $0x2a40] sm:$0xff] }
 0x4d5   :  { %10657 = vmatprep.subr.bf16.mxu0 %v13279_v60  ;;  %v1596_v60 = vld [vmem:[#allocation13 + $0x25c8] sm:$0xff] }
 0x4d6   :  { %10535 = vmatpush1.bf16.msra.mxu1 %v13276_v4  ;;  %v13469_v4 = vcombine.high %v1579_v8, %v1595_v34  ;;  %v13470_v15 = vcombine.low %v1580_v18, %v1596_v60  ;;  %v1740_v34 = vld [vmem:[#allocation13 + $0x2a48] sm:$0xff] }
 0x4d7   :  { %10545 = vmatprep.subr.bf16.mxu1 %v13309_v28  ;;  %v1627_v28 = vld [vmem:[#allocation13 + $0x26c0] sm:$0xff] }
 0x4d8   :  { %10658 = vmatpush1.bf16.msra.mxu0 %v13278_v6  ;;  %v13471_v6 = vcombine.high %v1580_v18, %v1596_v60  ;;  %v13500_v29 = vcombine.low %v1611_v43, %v1627_v28  ;;  %v1771_v60 = vld [vmem:[#allocation13 + $0x2b40] sm:$0xff] }
 0x4d9   :  { %10537 = vmatmul.mubr.bf16.vlgmr.msra.gmra.mrb[16].mxu1 %v15055_v32  ;;  %10668 = vmatprep.subr.bf16.mxu0 %v13311_v40  ;;  %v1628_v40 = vld [vmem:[#allocation13 + $0x26c8] sm:$0xff] }
 0x4da   :  { %10546 = vmatpush1.bf16.msra.mxu1 %v13308_v11  ;;  %13748 = vmatprep.mubr.msk.bf16.mxu1 %vm9375_vm5, %v15059_v37  ;;  %v13501_v11 = vcombine.high %v1611_v43, %v1627_v28  ;;  %v13502_v51 = vcombine.low %v1612_v46, %v1628_v40  ;;  %v1772_v28 = vld [vmem:[#allocation13 + $0x2b48] sm:$0xff] }
 0x4db   :  { %10547 = vmatprep.subr.bf16.mxu1 %v13341_v48  ;;  %10660 = vmatmul.mubr.bf16.vlgmr.msra.gmra.mrb[20].mxu0 %v15055_v32  ;;  %v1659_v48 = vld [vmem:[#allocation13 + $0x27c0] sm:$0xff] }
 0x4dc   :  { %10669 = vmatpush1.bf16.msra.mxu0 %v13310_v49  ;;  %13749 = vmatprep.mubr.msk.bf16.mxu0 %vm9375_vm5, %v15059_v37  ;;  %v13503_v49 = vcombine.high %v1612_v46, %v1628_v40  ;;  %v13532_v56 = vcombine.low %v1643_v47, %v1659_v48  ;;  %v1803_v46 = vld [vmem:[#allocation13 + $0x2c40] sm:$0xff] }
 0x4dd   :  { %10670 = vmatprep.subr.bf16.mxu0 %v13343_v21  ;;  %v1660_v21 = vld [vmem:[#allocation13 + $0x27c8] sm:$0xff] }
 0x4de   :  { %10548 = vmatpush1.bf16.msra.mxu1 %v13340_v24  ;;  %v13533_v24 = vcombine.high %v1643_v47, %v1659_v48  ;;  %v13534_v63 = vcombine.low %v1644_v44, %v1660_v21  ;;  %v1851_v47 = vld [vmem:[#allocation13 + $0x2dc0] sm:$0x11] }
 0x4df   :  { %10549 = vmatprep.subr.bf16.mxu1 %v13373_v53  ;;  %v1691_v53 = vld [vmem:[#allocation13 + $0x28c0] sm:$0xff] }
 0x4e0   :  { %10671 = vmatpush1.bf16.msra.mxu0 %v13342_v54  ;;  %v13535_v54 = vcombine.high %v1644_v44, %v1660_v21  ;;  %v13564_v10 = vcombine.low %v1675_v52, %v1691_v53  ;;  %v1820_v44 = vld [vmem:[#allocation13 + $0x2cc8] sm:$0xff] }
 0x4e1   :  { %10672 = vmatprep.subr.bf16.mxu0 %v13375_v59  ;;  %v1692_v59 = vld [vmem:[#allocation13 + $0x28c8] sm:$0xff] }
 0x4e2   :  { %10550 = vmatpush1.bf16.msra.mxu1 %v13372_v61  ;;  %v13565_v61 = vcombine.high %v1675_v52, %v1691_v53  ;;  %v13566_v0 = vcombine.low %v1676_v30, %v1692_v59  ;;  %v1836_v21 = vld [vmem:[#allocation13 + $0x2d48] sm:$0xff] }
 0x4e3   :  { %10551 = vmatprep.subr.bf16.mxu1 %v13405_v7  ;;  %v1723_v7 = vld [vmem:[#allocation13 + $0x29c0] sm:$0xff] }
 0x4e4   :  { %10673 = vmatpush1.bf16.msra.mxu0 %v13374_v9  ;;  %v13567_v9 = vcombine.high %v1676_v30, %v1692_v59  ;;  %v13596_v8 = vcombine.low %v1707_v2, %v1723_v7 }
 0x4e5   :  { %10674 = vmatprep.subr.bf16.mxu0 %v13407_v22  ;;  %v1724_v22 = vld [vmem:[#allocation13 + $0x29c8] sm:$0xff] }
 0x4e6   :  { %10552 = vmatpush1.bf16.msra.mxu1 %v13404_v26  ;;  %v13597_v26 = vcombine.high %v1707_v2, %v1723_v7  ;;  %v13598_v18 = vcombine.low %v1708_v12, %v1724_v22  ;;  %v397_v7 = vld [vmem:[#allocation13 + $0x50] sm:$0xff] }
 0x4e7   :  { %10553 = vmatprep.subr.bf16.mxu1 %v13437_v27  ;;  %v1755_v27 = vld [vmem:[#allocation13 + $0x2ac0] sm:$0xff] }
 0x4e8   :  { %10675 = vmatpush1.bf16.msra.mxu0 %v13406_v31  ;;  %v13599_v31 = vcombine.high %v1708_v12, %v1724_v22  ;;  %v13628_v43 = vcombine.low %v1739_v19, %v1755_v27  ;;  %v398_v22 = vld [vmem:[#allocation13 + $0x58] sm:$0xff] }
 0x4e9   :  { %10676 = vmatprep.subr.bf16.mxu0 %v13439_v36  ;;  %v1756_v36 = vld [vmem:[#allocation13 + $0x2ac8] sm:$0xff] }
 0x4ea   :  { %10554 = vmatpush1.bf16.msra.mxu1 %v13436_v41  ;;  %v13629_v41 = vcombine.high %v1739_v19, %v1755_v27  ;;  %v13630_v40 = vcombine.low %v1740_v34, %v1756_v36  ;;  %v429_v27 = vld [vmem:[#allocation13 + $0x150] sm:$0xff] }
 0x4eb   :  { %10555 = vmatprep.subr.bf16.mxu1 %v13469_v4  ;;  %v1787_v4 = vld [vmem:[#allocation13 + $0x2bc0] sm:$0xff] }
 0x4ec   :  { %10677 = vmatpush1.bf16.msra.mxu0 %v13438_v42  ;;  %v13631_v42 = vcombine.high %v1740_v34, %v1756_v36  ;;  %v430_v36 = vld [vmem:[#allocation13 + $0x158] sm:$0xff] }
 0x4ed   :  { %10678 = vmatprep.subr.bf16.mxu0 %v13471_v6  ;;  %v1788_v6 = vld [vmem:[#allocation13 + $0x2bc8] sm:$0xff] }
 0x4ee   :  { %10556 = vmatpush1.bf16.msra.mxu1 %v13468_v5  ;;  %v13661_v5 = vcombine.high %v1771_v60, %v1787_v4  ;;  %v13663_v48 = vcombine.high %v1772_v28, %v1788_v6  ;;  %v13662_v53 = vcombine.low %v1772_v28, %v1788_v6  ;;  %v462_v6 = vld [vmem:[#allocation13 + $0x258] sm:$0xff] }
 0x4ef   :  { %10557 = vmatprep.subr.bf16.mxu1 %v13501_v11  ;;  %v1819_v11 = vld [vmem:[#allocation13 + $0x2cc0] sm:$0xff] }
 0x4f0   :  { %10679 = vmatpush1.bf16.msra.mxu0 %v13470_v15  ;;  %v1835_v15 = vld [vmem:[#allocation13 + $0x2d40] sm:$0xff]  ;;  %v13692_v30 = vcombine.low %v1803_v46, %v1819_v11 }
 0x4f1   :  { %10680 = vmatprep.subr.bf16.mxu0 %v13503_v49  ;;  %v1804_v49 = vld [vmem:[#allocation13 + $0x2c48] sm:$0xff]  ;;  %v13725_v52 = vcombine.high %v1835_v15, %v1851_v47  ;;  %v13724_v59 = vcombine.low %v1835_v15, %v1851_v47  ;;  %v509_v15 = vld [vmem:[#allocation13 + $0x3d0] sm:$0xff] }
 0x4f2   :  { %10558 = vmatpush1.bf16.msra.mxu1 %v13500_v29  ;;  %v13660_v29 = vcombine.low %v1771_v60, %v1787_v4  ;;  %v461_v4 = vld [vmem:[#allocation13 + $0x250] sm:$0xff] }
 0x4f3   :  { %10559 = vmatprep.subr.bf16.mxu1 %v13533_v24  ;;  %v1852_v24 = vld [vmem:[#allocation13 + $0x2dc8] sm:$0x11]  ;;  %v9432_v12 = vand.u32 %v13724_v59, %v15067_v17 }
 0x4f4   :  { %10681 = vmatpush1.bf16.msra.mxu0 %v13502_v51  ;;  %v13693_v51 = vcombine.high %v1803_v46, %v1819_v11  ;;  %v13726_v2 = vcombine.low %v1836_v21, %v1852_v24  ;;  %v493_v11 = vld [vmem:[#allocation13 + $0x350] sm:$0xff] }
 0x4f5   :  { %10682 = vmatprep.subr.bf16.mxu0 %v13535_v54  ;;  %v13695_v54 = vcombine.high %v1804_v49, %v1820_v44 }
 0x4f6   :  { %10560 = vmatpush1.bf16.msra.mxu1 %v13532_v56  ;;  %v13727_v56 = vcombine.high %v1836_v21, %v1852_v24  ;;  %v9438_v19 = vand.u32 %v13726_v2, %v15067_v17  ;;  %v525_v24 = vld [vmem:[#allocation13 + $0x450] sm:$0xff] }
 0x4f7   :  { %10561 = vmatprep.subr.bf16.mxu1 %v13565_v61  ;;  %v9435_v61 = vand.u32 %v13725_v52, %v15067_v17 }
 0x4f8   :  { %10683 = vmatpush1.bf16.msra.mxu0 %v13534_v63  ;;  %v13694_v63 = vcombine.low %v1804_v49, %v1820_v44  ;;  %v494_v49 = vld [vmem:[#allocation13 + $0x358] sm:$0xff]  ;;  %v12385_v44 = vcombine.high %v493_v11, %v509_v15 }
 0x4f9   :  { %10684 = vmatprep.subr.bf16.mxu0 %v13567_v9  ;;  %v413_v9 = vld [vmem:[#allocation13 + $0xd0] sm:$0xff] }
 0x4fa   :  { %10562 = vmatpush1.bf16.msra.mxu1 %v13564_v10  ;;  %v9441_v10 = vand.u32 %v13727_v56, %v15067_v17  ;;  %v12288_v34 = vcombine.low %v397_v7, %v413_v9  ;;  %v542_v56 = vld [vmem:[#allocation13 + $0x4d8] sm:$0xff] }
 0x4fb   :  { %10563 = vmatprep.subr.bf16.mxu1 %v13597_v26  ;;  %v414_v26 = vld [vmem:[#allocation13 + $0xd8] sm:$0xff] }
 0x4fc   :  { %10685 = vmatpush1.bf16.msra.mxu0 %v13566_v0  ;;  %v12289_v0 = vcombine.high %v397_v7, %v413_v9  ;;  %v12290_v60 = vcombine.low %v398_v22, %v414_v26  ;;  %v558_v9 = vld [vmem:[#allocation13 + $0x558] sm:$0xff] }
 0x4fd   :  { %10686 = vmatprep.subr.bf16.mxu0 %v13599_v31  ;;  %v445_v31 = vld [vmem:[#allocation13 + $0x1d0] sm:$0xff] }
 0x4fe   :  { %10564 = vmatpush1.bf16.msra.mxu1 %v13596_v8  ;;  %v12291_v8 = vcombine.high %v398_v22, %v414_v26  ;;  %v12320_v28 = vcombine.low %v429_v27, %v445_v31  ;;  %v589_v26 = vld [vmem:[#allocation13 + $0x650] sm:$0xff] }
 0x4ff   :  { %10565 = vmatprep.subr.bf16.mxu1 %v13629_v41  ;;  %v446_v41 = vld [vmem:[#allocation13 + $0x1d8] sm:$0xff] }
 0x500   :  { %10687 = vmatpush1.bf16.msra.mxu0 %v13598_v18  ;;  %v12321_v18 = vcombine.high %v429_v27, %v445_v31  ;;  %v590_v31 = vld [vmem:[#allocation13 + $0x658] sm:$0xff] }
 0x501   :  { %10688 = vmatprep.subr.bf16.mxu0 %v13631_v42  ;;  %v477_v42 = vld [vmem:[#allocation13 + $0x2d0] sm:$0xff] }
 0x502   :  { %10566 = vmatpush1.bf16.msra.mxu1 %v13628_v43  ;;  %v12323_v43 = vcombine.high %v430_v36, %v446_v41  ;;  %v12353_v46 = vcombine.high %v461_v4, %v477_v42 }
 0x503   :  { %10567 = vmatprep.subr.bf16.mxu1 %v13661_v5  ;;  %v478_v5 = vld [vmem:[#allocation13 + $0x2d8] sm:$0xff] }
 0x504   :  { %10689 = vmatpush1.bf16.msra.mxu0 %v13630_v40  ;;  %v12322_v40 = vcombine.low %v430_v36, %v446_v41  ;;  %v12355_v47 = vcombine.high %v462_v6, %v478_v5  ;;  %v12354_v21 = vcombine.low %v462_v6, %v478_v5  ;;  %v621_v41 = vld [vmem:[#allocation13 + $0x750] sm:$0xff] }
 0x505   :  { %10690 = vmatprep.subr.bf16.mxu0 %v13663_v48  ;;  %v12352_v48 = vcombine.low %v461_v4, %v477_v42  ;;  %v622_v42 = vld [vmem:[#allocation13 + $0x758] sm:$0xff]  ;;  %v653_v5 = vld [vmem:[#allocation13 + $0x850] sm:$0xff] }
 0x506   :  { %10568 = vmatpush1.bf16.msra.mxu1 %v13660_v29  ;;  %v510_v29 = vld [vmem:[#allocation13 + $0x3d8] sm:$0xff] }
 0x507   :  { %10569 = vmatprep.subr.bf16.mxu1 %v13693_v51  ;;  %v541_v51 = vld [vmem:[#allocation13 + $0x4d0] sm:$0xff]  ;;  %v12387_v52 = vcombine.high %v494_v49, %v510_v29  ;;  %v12386_v59 = vcombine.low %v494_v49, %v510_v29  ;;  %v654_v49 = vld [vmem:[#allocation13 + $0x858] sm:$0xff] }
 0x508   :  { %10691 = vmatpush1.bf16.msra.mxu0 %v13662_v53  ;;  %v12384_v53 = vcombine.low %v493_v11, %v509_v15  ;;  %v12416_v7 = vcombine.low %v525_v24, %v541_v51  ;;  %v670_v29 = vld [vmem:[#allocation13 + $0x8d8] sm:$0xff] }
 0x509   :  { %10692 = vmatprep.subr.bf16.mxu0 %v13695_v54  ;;  %v526_v54 = vld [vmem:[#allocation13 + $0x458] sm:$0xff] }
 0x50a   :  { %10570 = vmatpush1.bf16.msra.mxu1 %v13692_v30  ;;  %v12417_v30 = vcombine.high %v525_v24, %v541_v51  ;;  %v12419_v2 = vcombine.high %v526_v54, %v542_v56  ;;  %v12418_v22 = vcombine.low %v526_v54, %v542_v56  ;;  %v701_v54 = vld [vmem:[#allocation13 + $0x9d0] sm:$0xff] }
 0x50b   :  { %10571 = vmatprep.subr.bf16.mxu1 %v9435_v61  ;;  %v557_v61 = vld [vmem:[#allocation13 + $0x550] sm:$0xff] }
 0x50c   :  { %10693 = vmatpush1.bf16.msra.mxu0 %v13694_v63  ;;  %v573_v63 = vld [vmem:[#allocation13 + $0x5d0] sm:$0xff] }
 0x50d   :  { %10694 = vmatprep.subr.bf16.mxu0 %v9441_v10  ;;  %v574_v10 = vld [vmem:[#allocation13 + $0x5d8] sm:$0xff]  ;;  %v12448_v27 = vcombine.low %v557_v61, %v573_v63 }
 0x50e   :  { %10572 = vmatpush1.bf16.msra.mxu1 %v9432_v12  ;;  %v12449_v12 = vcombine.high %v557_v61, %v573_v63  ;;  %v12450_v36 = vcombine.low %v558_v9, %v574_v10 }
 0x50f   :  { %10709 = vmatprep.subr.bf16.mxu1 %v12289_v0  ;;  %v605_v0 = vld [vmem:[#allocation13 + $0x6d0] sm:$0xff] }
 0x510   :  { %10695 = vmatpush1.bf16.msra.mxu0 %v9438_v19  ;;  %v12451_v19 = vcombine.high %v558_v9, %v574_v10  ;;  %v12480_v4 = vcombine.low %v589_v26, %v605_v0  ;;  %v12546_v9 = vcombine.low %v654_v49, %v670_v29  ;;  %v686_v10 = vld [vmem:[#allocation13 + $0x958] sm:$0xff] }
 0x511   :  { %10578 = vmatmul.mubr.bf16.vlgmr.msra.gmra.mrb[16].mxu1 %v15075_v39  ;;  %10832 = vmatprep.subr.bf16.mxu0 %v12291_v8  ;;  %v606_v8 = vld [vmem:[#allocation13 + $0x6d8] sm:$0xff] }
 0x512   :  { %10710 = vmatpush1.bf16.msra.mxu1 %v12288_v34  ;;  %10741 = vmatprep.mubr.bf16.mxu1 %v15033_v62  ;;  %v12481_v34 = vcombine.high %v589_v26, %v605_v0  ;;  %v12482_v6 = vcombine.low %v590_v31, %v606_v8 }
 0x513   :  { %10701 = vmatmul.mubr.bf16.vlgmr.msra.gmra.mrb[20].mxu0 %v15075_v39  ;;  %10711 = vmatprep.subr.bf16.mxu1 %v12321_v18  ;;  %v637_v18 = vld [vmem:[#allocation13 + $0x7d0] sm:$0xff] }
 0x514   :  { %10833 = vmatpush1.bf16.msra.mxu0 %v12290_v60  ;;  %10864 = vmatprep.mubr.bf16.mxu0 %v15033_v62  ;;  %v12483_v60 = vcombine.high %v590_v31, %v606_v8 }
 0x515   :  { %10834 = vmatprep.subr.bf16.mxu0 %v12323_v43  ;;  %v638_v43 = vld [vmem:[#allocation13 + $0x7d8] sm:$0xff] }
 0x516   :  { %10712 = vmatpush1.bf16.msra.mxu1 %v12320_v28  ;;  %v12513_v28 = vcombine.high %v621_v41, %v637_v18  ;;  %v12515_v15 = vcombine.high %v622_v42, %v638_v43 }
 0x517   :  { %10713 = vmatprep.subr.bf16.mxu1 %v12353_v46  ;;  %v669_v46 = vld [vmem:[#allocation13 + $0x8d0] sm:$0xff] }
 0x518   :  { %10835 = vmatpush1.bf16.msra.mxu0 %v12322_v40  ;;  %v14178_v40 = vld [vmem:[#allocation14 + $0x8] sm:$0xff] }
 0x519   :  { %10836 = vmatprep.subr.bf16.mxu0 %v12355_v47  ;;  %v1918_v11 = vrot.slane %v14178_v40, %v15154_v55  ;;  %v1922_v47 = vrot.slane %v14178_v40, %v15157_v57  ;;  %v1930_v51 = vrot.slane %v14178_v40, %v15166_v3 }
 0x51a   :  { %10714 = vmatpush1.bf16.msra.mxu1 %v12352_v48  ;;  %v12512_v48 = vcombine.low %v621_v41, %v637_v18  ;;  %v717_v41 = vld [vmem:[#allocation13 + $0xa50] sm:$0xff] }
 0x51b   :  { %10715 = vmatprep.subr.bf16.mxu1 %v12385_v44  ;;  %v1926_v44 = vrot.slane %v14178_v40, %v15160_v35  ;;  %v733_v18 = vld [vmem:[#allocation13 + $0xad0] sm:$0xff]  ;;  %v734_v40 = vld [vmem:[#allocation13 + $0xad8] sm:$0xff] }
 0x51c   :  { %10837 = vmatpush1.bf16.msra.mxu0 %v12354_v21  ;;  %v12545_v21 = vcombine.high %v653_v5, %v669_v46 }
 0x51d   :  { %10838 = vmatprep.subr.bf16.mxu0 %v12387_v52  ;;  %v12514_v52 = vcombine.low %v622_v42, %v638_v43 }
 0x51e   :  { %10716 = vmatpush1.bf16.msra.mxu1 %v12384_v53  ;;  %v685_v53 = vld [vmem:[#allocation13 + $0x950] sm:$0xff] }
 0x51f   :  { %10717 = vmatprep.subr.bf16.mxu1 %v12417_v30 }
 0x520   :  { %10839 = vmatpush1.bf16.msra.mxu0 %v12386_v59  ;;  %v12547_v59 = vcombine.high %v654_v49, %v670_v29 }
 0x521   :  { %10840 = vmatprep.subr.bf16.mxu0 %v12419_v2 }
 0x522   :  { %10718 = vmatpush1.bf16.msra.mxu1 %v12416_v7  ;;  %v12544_v7 = vcombine.low %v653_v5, %v669_v46  ;;  %v718_v46 = vld [vmem:[#allocation13 + $0xa58] sm:$0xff] }
 0x523   :  { %10719 = vmatprep.subr.bf16.mxu1 %v12449_v12  ;;  %v702_v12 = vld [vmem:[#allocation13 + $0x9d8] sm:$0xff] }
 0x524   :  { %10841 = vmatpush1.bf16.msra.mxu0 %v12418_v22  ;;  %v12579_v43 = vcombine.high %v686_v10, %v702_v12  ;;  %v12578_v29 = vcombine.low %v686_v10, %v702_v12 }
 0x525   :  { %10842 = vmatprep.subr.bf16.mxu0 %v12451_v19 }
 0x526   :  { %10720 = vmatpush1.bf16.msra.mxu1 %v12448_v27  ;;  %v12577_v27 = vcombine.high %v685_v53, %v701_v54 }
 0x527   :  { %10721 = vmatprep.subr.bf16.mxu1 %v12481_v34 }
 0x528   :  { %10843 = vmatpush1.bf16.msra.mxu0 %v12450_v36  ;;  %v12576_v36 = vcombine.low %v685_v53, %v701_v54  ;;  %v750_v53 = vld [vmem:[#allocation13 + $0xb58] sm:$0xff] }
 0x529   :  { %10844 = vmatprep.subr.bf16.mxu0 %v12483_v60  ;;  %v766_v54 = vld [vmem:[#allocation13 + $0xbd8] sm:$0xff] }
 0x52a   :  { %10722 = vmatpush1.bf16.msra.mxu1 %v12480_v4  ;;  %v12642_v12 = vcombine.low %v750_v53, %v766_v54 }
 0x52b   :  { %10723 = vmatprep.subr.bf16.mxu1 %v12513_v28 }
 0x52c   :  { %v10333_v24 = vpop.f32.mrb[12].mxu1  ;;  %10845 = vmatpush1.bf16.msra.mxu0 %v12482_v6 }
 0x52d   :  { %v13946_v56 = vadd.f32 %v10333_v24, %v1918_v11  ;;  %v10335_v30 = vpop.f32.mrb[13].mxu1  ;;  %10846 = vmatprep.subr.bf16.mxu0 %v12515_v15 }
 0x52e   :  { %v13947_v61 = vadd.f32 %v10335_v30, %v1922_v47  ;;  %v10337_v63 = vpop.f32.mrb[14].mxu1  ;;  %10724 = vmatpush1.bf16.msra.mxu1 %v12512_v48  ;;  %v10456_v2 = vpop.f32.mrb[16].mxu0  ;;  %v12609_v47 = vcombine.high %v717_v41, %v733_v18  ;;  %v12610_v30 = vcombine.low %v718_v46, %v734_v40 }
 0x52f   :  { %vm11459_vm6 = vcmp.ge.f32.partialorder %v13946_v56, 0.0  ;;  %v11491_v22 = vmul.f32 0.01, %v13946_v56  ;;  %v10338_v26 = vpop.f32.mrb[15].mxu1  ;;  %v13948_v0 = vadd.f32 %v10456_v2, %v1926_v44  ;;  %v10458_v19 = vpop.f32.mrb[17].mxu0  ;;  %10725 = vmatprep.subr.bf16.mxu1 %v12545_v21  ;;  %v749_v44 = vld [vmem:[#allocation13 + $0xb50] sm:$0xff]  ;;  %v12643_v63 = vcombine.high %v750_v53, %v766_v54 }
 0x530   :  { %vm11460_vm7 = vcmp.ge.f32.partialorder %v13947_v61, 0.0  ;;  %v11492_v31 = vmul.f32 0.01, %v13947_v61  ;;  %v13949_v8 = vadd.f32 %v10458_v19, %v1930_v51  ;;  %v10460_v34 = vpop.f32.mrb[18].mxu0  ;;  %10847 = vmatpush1.bf16.msra.mxu0 %v12514_v52  ;;  %v765_v21 = vld [vmem:[#allocation13 + $0xbd0] sm:$0xff]  ;;  %v12611_v51 = vcombine.high %v718_v46, %v734_v40 }
 0x531   :  { %v15295_v60 = vsel %vm11459_vm6, %v13946_v56, %v11491_v22  ;;  %vm11461_vm8 = vcmp.ge.f32.partialorder %v13948_v0, 0.0  ;;  %v11493_v4 = vmul.f32 0.01, %v13948_v0  ;;  %v10461_v42 = vpop.f32.mrb[19].mxu0  ;;  %10848 = vmatprep.subr.bf16.mxu0 %v12547_v59  ;;  %v12608_v52 = vcombine.low %v717_v41, %v733_v18  ;;  %v781_v59 = vld [vmem:[#allocation13 + $0xc50] sm:$0xff] }
 0x532   :  { %v11551_v28 = vmax.f32 %v15256_v58, %v15295_v60  ;;  %v15299_v6 = vsel %vm11460_vm7, %v13947_v61, %v11492_v31  ;;  %vm11462_vm9 = vcmp.ge.f32.partialorder %v13949_v8, 0.0  ;;  %v11494_v5 = vmul.f32 0.01, %v13949_v8  ;;  %10726 = vmatpush1.bf16.msra.mxu1 %v12544_v7  ;;  %v797_v61 = vld [vmem:[#allocation13 + $0xcd0] sm:$0xff]  ;;  %v782_v7 = vld [vmem:[#allocation13 + $0xc58] sm:$0xff] }
 0x533   :  { %v11552_v11 = vmax.f32 %v15261_v38, %v15299_v6  ;;  %v15303_v15 = vsel %vm11461_vm8, %v13948_v0, %v11493_v4  ;;  %10727 = vmatprep.subr.bf16.mxu1 %v12577_v27  ;;  %v12641_v56 = vcombine.high %v749_v44, %v765_v21  ;;  %v12640_v2 = vcombine.low %v749_v44, %v765_v21  ;;  %v813_v22 = vld [vmem:[#allocation13 + $0xd50] sm:$0xff]  ;;  %v814_v27 = vld [vmem:[#allocation13 + $0xd58] sm:$0xff] }
 0x534   :  { %v11553_v48 = vmax.f32 %v15266_v13, %v15303_v15  ;;  %v15307_v49 = vsel %vm11462_vm9, %v13949_v8, %v11494_v5  ;;  %10849 = vmatpush1.bf16.msra.mxu0 %v12546_v9  ;;  %v798_v9 = vld [vmem:[#allocation13 + $0xcd8] sm:$0xff]  ;;  %v12673_v10 = vcombine.high %v781_v59, %v797_v61  ;;  %v829_v26 = vld [vmem:[#allocation13 + $0xdd0] sm:$0xff]  ;;  %v12672_v19 = vcombine.low %v781_v59, %v797_v61 }
 0x535   :  { %v11554_v24 = vmax.f32 %v15271_v45, %v15307_v49  ;;  %10850 = vmatprep.subr.bf16.mxu0 %v12579_v43  ;;  %v12675_v0 = vcombine.high %v782_v7, %v798_v9  ;;  %v830_v31 = vld [vmem:[#allocation13 + $0xdd8] sm:$0xff]  ;;  %v12705_v8 = vcombine.high %v813_v22, %v829_v26  ;;  %v12674_v34 = vcombine.low %v782_v7, %v798_v9  ;;  %v861_v41 = vld [vmem:[#allocation13 + $0xed0] sm:$0xff]  ;;  %v800_v45 = vld [vmem:[#allocation13 + $0xce8] sm:$0xff] }
 0x536   :  { %10728 = vmatpush1.bf16.msra.mxu1 %v12576_v36  ;;  %v845_v36 = vld [vmem:[#allocation13 + $0xe50] sm:$0xff]  ;;  %v12707_v18 = vcombine.high %v814_v27, %v830_v31  ;;  %v12704_v4 = vcombine.low %v813_v22, %v829_v26  ;;  %v846_v42 = vld [vmem:[#allocation13 + $0xe58] sm:$0xff]  ;;  %v12706_v46 = vcombine.low %v814_v27, %v830_v31 }
 0x537   :  { %10729 = vmatprep.subr.bf16.mxu1 %v12609_v47  ;;  %v862_v43 = vld [vmem:[#allocation13 + $0xed8] sm:$0xff]  ;;  %v12737_v5 = vcombine.high %v845_v36, %v861_v41  ;;  %v877_v40 = vld [vmem:[#allocation13 + $0xf50] sm:$0xff]  ;;  %v12736_v44 = vcombine.low %v845_v36, %v861_v41 }
 0x538   :  { %10851 = vmatpush1.bf16.msra.mxu0 %v12578_v29  ;;  %v893_v47 = vld [vmem:[#allocation13 + $0xfd0] sm:$0xff]  ;;  %v12739_v29 = vcombine.high %v846_v42, %v862_v43  ;;  %v878_v21 = vld [vmem:[#allocation13 + $0xf58] sm:$0xff]  ;;  %v12738_v53 = vcombine.low %v846_v42, %v862_v43 }
 0x539   :  { %10852 = vmatprep.subr.bf16.mxu0 %v12611_v51  ;;  %v894_v51 = vld [vmem:[#allocation13 + $0xfd8] sm:$0xff]  ;;  %v909_v54 = vld [vmem:[#allocation13 + $0x1050] sm:$0xff]  ;;  %v12768_v59 = vcombine.low %v877_v40, %v893_v47 }
 0x53a   :  { %10730 = vmatpush1.bf16.msra.mxu1 %v12608_v52  ;;  %v12769_v52 = vcombine.high %v877_v40, %v893_v47  ;;  %v910_v61 = vld [vmem:[#allocation13 + $0x1058] sm:$0xff]  ;;  %v12770_v7 = vcombine.low %v878_v21, %v894_v51  ;;  %v941_v9 = vld [vmem:[#allocation13 + $0x1150] sm:$0xff] }
 0x53b   :  { %10731 = vmatprep.subr.bf16.mxu1 %v12641_v56  ;;  %v925_v56 = vld [vmem:[#allocation13 + $0x10d0] sm:$0xff]  ;;  %v942_v26 = vld [vmem:[#allocation13 + $0x1158] sm:$0xff] }
 0x53c   :  { %10853 = vmatpush1.bf16.msra.mxu0 %v12610_v30  ;;  %v12771_v30 = vcombine.high %v878_v21, %v894_v51  ;;  %v12800_v22 = vcombine.low %v909_v54, %v925_v56  ;;  %v973_v31 = vld [vmem:[#allocation13 + $0x1250] sm:$0xff]  ;;  %v974_v41 = vld [vmem:[#allocation13 + $0x1258] sm:$0xff] }
 0x53d   :  { %10854 = vmatprep.subr.bf16.mxu0 %v12643_v63  ;;  %v926_v63 = vld [vmem:[#allocation13 + $0x10d8] sm:$0xff]  ;;  %v1005_v43 = vld [vmem:[#allocation13 + $0x1350] sm:$0xff] }
 0x53e   :  { %10732 = vmatpush1.bf16.msra.mxu1 %v12640_v2  ;;  %v12801_v2 = vcombine.high %v909_v54, %v925_v56  ;;  %v12802_v27 = vcombine.low %v910_v61, %v926_v63  ;;  %v1006_v47 = vld [vmem:[#allocation13 + $0x1358] sm:$0xff]  ;;  %v1037_v51 = vld [vmem:[#allocation13 + $0x1450] sm:$0xff] }
 0x53f   :  { %10733 = vmatprep.subr.bf16.mxu1 %v12673_v10  ;;  %v957_v10 = vld [vmem:[#allocation13 + $0x11d0] sm:$0xff]  ;;  %v1038_v56 = vld [vmem:[#allocation13 + $0x1458] sm:$0xff] }
 0x540   :  { %10855 = vmatpush1.bf16.msra.mxu0 %v12642_v12  ;;  %v12803_v12 = vcombine.high %v910_v61, %v926_v63  ;;  %v12832_v36 = vcombine.low %v941_v9, %v957_v10  ;;  %v1069_v63 = vld [vmem:[#allocation13 + $0x1550] sm:$0xff] }
 0x541   :  { %10856 = vmatprep.subr.bf16.mxu0 %v12675_v0  ;;  %v958_v0 = vld [vmem:[#allocation13 + $0x11d8] sm:$0xff] }
 0x542   :  { %10734 = vmatpush1.bf16.msra.mxu1 %v12672_v19  ;;  %v12833_v19 = vcombine.high %v941_v9, %v957_v10  ;;  %v12834_v42 = vcombine.low %v942_v26, %v958_v0  ;;  %v1070_v10 = vld [vmem:[#allocation13 + $0x1558] sm:$0xff] }
 0x543   :  { %10735 = vmatprep.subr.bf16.mxu1 %v12705_v8  ;;  %v989_v8 = vld [vmem:[#allocation13 + $0x12d0] sm:$0xff] }
 0x544   :  { %10857 = vmatpush1.bf16.msra.mxu0 %v12674_v34  ;;  %v12835_v34 = vcombine.high %v942_v26, %v958_v0  ;;  %v12864_v40 = vcombine.low %v973_v31, %v989_v8  ;;  %v1101_v0 = vld [vmem:[#allocation13 + $0x1650] sm:$0xff] }
 0x545   :  { %10858 = vmatprep.subr.bf16.mxu0 %v12707_v18  ;;  %v990_v18 = vld [vmem:[#allocation13 + $0x12d8] sm:$0xff] }
 0x546   :  { %10736 = vmatpush1.bf16.msra.mxu1 %v12704_v4  ;;  %v12865_v4 = vcombine.high %v973_v31, %v989_v8  ;;  %v12866_v21 = vcombine.low %v974_v41, %v990_v18  ;;  %v1102_v8 = vld [vmem:[#allocation13 + $0x1658] sm:$0xff] }
 0x547   :  { %10737 = vmatprep.subr.bf16.mxu1 %v12737_v5  ;;  %v1021_v5 = vld [vmem:[#allocation13 + $0x13d0] sm:$0xff] }
 0x548   :  { %10859 = vmatpush1.bf16.msra.mxu0 %v12706_v46  ;;  %v12867_v46 = vcombine.high %v974_v41, %v990_v18  ;;  %v12896_v54 = vcombine.low %v1005_v43, %v1021_v5  ;;  %v1133_v18 = vld [vmem:[#allocation13 + $0x1750] sm:$0xff] }
 0x549   :  { %10860 = vmatprep.subr.bf16.mxu0 %v12739_v29  ;;  %v1022_v29 = vld [vmem:[#allocation13 + $0x13d8] sm:$0xff] }
 0x54a   :  { %10738 = vmatpush1.bf16.msra.mxu1 %v12736_v44  ;;  %v12897_v44 = vcombine.high %v1005_v43, %v1021_v5  ;;  %v12898_v61 = vcombine.low %v1006_v47, %v1022_v29  ;;  %v1134_v5 = vld [vmem:[#allocation13 + $0x1758] sm:$0xff] }
 0x54b   :  { %10739 = vmatprep.subr.bf16.mxu1 %v12769_v52  ;;  %v1053_v52 = vld [vmem:[#allocation13 + $0x14d0] sm:$0xff] }
 0x54c   :  { %10861 = vmatpush1.bf16.msra.mxu0 %v12738_v53  ;;  %v12899_v53 = vcombine.high %v1006_v47, %v1022_v29  ;;  %v12928_v9 = vcombine.low %v1037_v51, %v1053_v52  ;;  %v1165_v29 = vld [vmem:[#allocation13 + $0x1850] sm:$0xff] }
 0x54d   :  { %10862 = vmatprep.subr.bf16.mxu0 %v12771_v30  ;;  %v1054_v30 = vld [vmem:[#allocation13 + $0x14d8] sm:$0xff] }
 0x54e   :  { %10740 = vmatpush1.bf16.msra.mxu1 %v12768_v59  ;;  %v12929_v59 = vcombine.high %v1037_v51, %v1053_v52  ;;  %v12930_v26 = vcombine.low %v1038_v56, %v1054_v30  ;;  %v1166_v52 = vld [vmem:[#allocation13 + $0x1858] sm:$0xff] }
 0x54f   :  { %10750 = vmatprep.subr.bf16.mxu1 %v12801_v2  ;;  %v1085_v2 = vld [vmem:[#allocation13 + $0x15d0] sm:$0xff] }
 0x550   :  { %10863 = vmatpush1.bf16.msra.mxu0 %v12770_v7  ;;  %v12931_v7 = vcombine.high %v1038_v56, %v1054_v30  ;;  %v12960_v31 = vcombine.low %v1069_v63, %v1085_v2  ;;  %v1197_v30 = vld [vmem:[#allocation13 + $0x1950] sm:$0xff] }
 0x551   :  { %10742 = vmatmul.mubr.bf16.vlgmr.msra.gmra.mrb[20].mxu1 %v15041_v20  ;;  %10873 = vmatprep.subr.bf16.mxu0 %v12803_v12  ;;  %v1086_v12 = vld [vmem:[#allocation13 + $0x15d8] sm:$0xff] }
 0x552   :  { %10751 = vmatpush1.bf16.msra.mxu1 %v12800_v22  ;;  %10782 = vmatprep.mubr.bf16.mxu1 %v15045_v25  ;;  %v12961_v22 = vcombine.high %v1069_v63, %v1085_v2  ;;  %v12962_v41 = vcombine.low %v1070_v10, %v1086_v12  ;;  %v1198_v2 = vld [vmem:[#allocation13 + $0x1958] sm:$0xff] }
 0x553   :  { %10752 = vmatprep.subr.bf16.mxu1 %v12833_v19  ;;  %10865 = vmatmul.mubr.bf16.vlgmr.msra.gmra.mrb[24].mxu0 %v15041_v20  ;;  %v1117_v19 = vld [vmem:[#allocation13 + $0x16d0] sm:$0xff] }
 0x554   :  { %10874 = vmatpush1.bf16.msra.mxu0 %v12802_v27  ;;  %10905 = vmatprep.mubr.bf16.mxu0 %v15045_v25  ;;  %v12963_v27 = vcombine.high %v1070_v10, %v1086_v12  ;;  %v12992_v43 = vcombine.low %v1101_v0, %v1117_v19  ;;  %v1229_v12 = vld [vmem:[#allocation13 + $0x1a50] sm:$0xff] }
 0x555   :  { %10875 = vmatprep.subr.bf16.mxu0 %v12835_v34  ;;  %v1118_v34 = vld [vmem:[#allocation13 + $0x16d8] sm:$0xff] }
 0x556   :  { %10753 = vmatpush1.bf16.msra.mxu1 %v12832_v36  ;;  %v12993_v36 = vcombine.high %v1101_v0, %v1117_v19  ;;  %v12994_v47 = vcombine.low %v1102_v8, %v1118_v34  ;;  %v1230_v19 = vld [vmem:[#allocation13 + $0x1a58] sm:$0xff] }
 0x557   :  { %10754 = vmatprep.subr.bf16.mxu1 %v12865_v4  ;;  %v1149_v4 = vld [vmem:[#allocation13 + $0x17d0] sm:$0xff] }
 0x558   :  { %10876 = vmatpush1.bf16.msra.mxu0 %v12834_v42  ;;  %v12995_v42 = vcombine.high %v1102_v8, %v1118_v34  ;;  %v13024_v51 = vcombine.low %v1133_v18, %v1149_v4  ;;  %v1261_v34 = vld [vmem:[#allocation13 + $0x1b50] sm:$0xff] }
 0x559   :  { %10877 = vmatprep.subr.bf16.mxu0 %v12867_v46  ;;  %v1150_v46 = vld [vmem:[#allocation13 + $0x17d8] sm:$0xff] }
 0x55a   :  { %10755 = vmatpush1.bf16.msra.mxu1 %v12864_v40  ;;  %v13025_v40 = vcombine.high %v1133_v18, %v1149_v4  ;;  %v13026_v56 = vcombine.low %v1134_v5, %v1150_v46  ;;  %v1262_v4 = vld [vmem:[#allocation13 + $0x1b58] sm:$0xff] }
 0x55b   :  { %10756 = vmatprep.subr.bf16.mxu1 %v12897_v44  ;;  %v1181_v44 = vld [vmem:[#allocation13 + $0x18d0] sm:$0xff] }
 0x55c   :  { %10878 = vmatpush1.bf16.msra.mxu0 %v12866_v21  ;;  %v13027_v21 = vcombine.high %v1134_v5, %v1150_v46  ;;  %v13056_v63 = vcombine.low %v1165_v29, %v1181_v44  ;;  %v1293_v46 = vld [vmem:[#allocation13 + $0x1c50] sm:$0xff] }
 0x55d   :  { %10879 = vmatprep.subr.bf16.mxu0 %v12899_v53  ;;  %v1182_v53 = vld [vmem:[#allocation13 + $0x18d8] sm:$0xff] }
 0x55e   :  { %10757 = vmatpush1.bf16.msra.mxu1 %v12896_v54  ;;  %v13057_v54 = vcombine.high %v1165_v29, %v1181_v44  ;;  %v13058_v10 = vcombine.low %v1166_v52, %v1182_v53  ;;  %v1294_v44 = vld [vmem:[#allocation13 + $0x1c58] sm:$0xff] }
 0x55f   :  { %10758 = vmatprep.subr.bf16.mxu1 %v12929_v59  ;;  %v1213_v59 = vld [vmem:[#allocation13 + $0x19d0] sm:$0xff] }
 0x560   :  { %10880 = vmatpush1.bf16.msra.mxu0 %v12898_v61  ;;  %v13059_v61 = vcombine.high %v1166_v52, %v1182_v53  ;;  %v13088_v0 = vcombine.low %v1197_v30, %v1213_v59  ;;  %v1325_v53 = vld [vmem:[#allocation13 + $0x1d50] sm:$0xff] }
 0x561   :  { %10881 = vmatprep.subr.bf16.mxu0 %v12931_v7  ;;  %v1214_v7 = vld [vmem:[#allocation13 + $0x19d8] sm:$0xff] }
 0x562   :  { %10759 = vmatpush1.bf16.msra.mxu1 %v12928_v9  ;;  %v13089_v9 = vcombine.high %v1197_v30, %v1213_v59  ;;  %v13090_v8 = vcombine.low %v1198_v2, %v1214_v7  ;;  %v1326_v59 = vld [vmem:[#allocation13 + $0x1d58] sm:$0xff] }
 0x563   :  { %10760 = vmatprep.subr.bf16.mxu1 %v12961_v22  ;;  %v1245_v22 = vld [vmem:[#allocation13 + $0x1ad0] sm:$0xff] }
 0x564   :  { %10882 = vmatpush1.bf16.msra.mxu0 %v12930_v26  ;;  %v13091_v26 = vcombine.high %v1198_v2, %v1214_v7  ;;  %v13120_v18 = vcombine.low %v1229_v12, %v1245_v22  ;;  %v1357_v7 = vld [vmem:[#allocation13 + $0x1e50] sm:$0xff] }
 0x565   :  { %10883 = vmatprep.subr.bf16.mxu0 %v12963_v27  ;;  %v1246_v27 = vld [vmem:[#allocation13 + $0x1ad8] sm:$0xff] }
 0x566   :  { %10761 = vmatpush1.bf16.msra.mxu1 %v12960_v31  ;;  %v13121_v31 = vcombine.high %v1229_v12, %v1245_v22  ;;  %v13122_v5 = vcombine.low %v1230_v19, %v1246_v27  ;;  %v1358_v22 = vld [vmem:[#allocation13 + $0x1e58] sm:$0xff] }
 0x567   :  { %10762 = vmatprep.subr.bf16.mxu1 %v12993_v36  ;;  %v1277_v36 = vld [vmem:[#allocation13 + $0x1bd0] sm:$0xff] }
 0x568   :  { %10884 = vmatpush1.bf16.msra.mxu0 %v12962_v41  ;;  %v13123_v41 = vcombine.high %v1230_v19, %v1246_v27  ;;  %v13152_v29 = vcombine.low %v1261_v34, %v1277_v36  ;;  %v1389_v27 = vld [vmem:[#allocation13 + $0x1f50] sm:$0xff] }
 0x569   :  { %10885 = vmatprep.subr.bf16.mxu0 %v12995_v42  ;;  %v1278_v42 = vld [vmem:[#allocation13 + $0x1bd8] sm:$0xff] }
 0x56a   :  { %10763 = vmatpush1.bf16.msra.mxu1 %v12992_v43  ;;  %v13153_v43 = vcombine.high %v1261_v34, %v1277_v36  ;;  %v13154_v52 = vcombine.low %v1262_v4, %v1278_v42  ;;  %v1390_v36 = vld [vmem:[#allocation13 + $0x1f58] sm:$0xff] }
 0x56b   :  { %10764 = vmatprep.subr.bf16.mxu1 %v13025_v40  ;;  %v1309_v40 = vld [vmem:[#allocation13 + $0x1cd0] sm:$0xff] }
 0x56c   :  { %10886 = vmatpush1.bf16.msra.mxu0 %v12994_v47  ;;  %v13155_v47 = vcombine.high %v1262_v4, %v1278_v42  ;;  %v13184_v30 = vcombine.low %v1293_v46, %v1309_v40  ;;  %v1421_v42 = vld [vmem:[#allocation13 + $0x2050] sm:$0xff] }
 0x56d   :  { %10887 = vmatprep.subr.bf16.mxu0 %v13027_v21  ;;  %v1310_v21 = vld [vmem:[#allocation13 + $0x1cd8] sm:$0xff] }
 0x56e   :  { %10765 = vmatpush1.bf16.msra.mxu1 %v13024_v51  ;;  %v13185_v51 = vcombine.high %v1293_v46, %v1309_v40  ;;  %v13186_v2 = vcombine.low %v1294_v44, %v1310_v21  ;;  %v1422_v40 = vld [vmem:[#allocation13 + $0x2058] sm:$0xff] }
 0x56f   :  { %10766 = vmatprep.subr.bf16.mxu1 %v13057_v54  ;;  %v1341_v54 = vld [vmem:[#allocation13 + $0x1dd0] sm:$0xff] }
 0x570   :  { %10888 = vmatpush1.bf16.msra.mxu0 %v13026_v56  ;;  %v13187_v56 = vcombine.high %v1294_v44, %v1310_v21  ;;  %v13216_v12 = vcombine.low %v1325_v53, %v1341_v54  ;;  %v1453_v21 = vld [vmem:[#allocation13 + $0x2150] sm:$0xff] }
 0x571   :  { %10889 = vmatprep.subr.bf16.mxu0 %v13059_v61  ;;  %v1342_v61 = vld [vmem:[#allocation13 + $0x1dd8] sm:$0xff] }
 0x572   :  { %10767 = vmatpush1.bf16.msra.mxu1 %v13056_v63  ;;  %v13217_v63 = vcombine.high %v1325_v53, %v1341_v54  ;;  %v13218_v19 = vcombine.low %v1326_v59, %v1342_v61  ;;  %v1454_v54 = vld [vmem:[#allocation13 + $0x2158] sm:$0xff] }
 0x573   :  { %10768 = vmatprep.subr.bf16.mxu1 %v13089_v9  ;;  %v1373_v9 = vld [vmem:[#allocation13 + $0x1ed0] sm:$0xff] }
 0x574   :  { %10890 = vmatpush1.bf16.msra.mxu0 %v13058_v10  ;;  %v13219_v10 = vcombine.high %v1326_v59, %v1342_v61  ;;  %v13248_v34 = vcombine.low %v1357_v7, %v1373_v9  ;;  %v1485_v61 = vld [vmem:[#allocation13 + $0x2250] sm:$0xff] }
 0x575   :  { %10891 = vmatprep.subr.bf16.mxu0 %v13091_v26  ;;  %v1374_v26 = vld [vmem:[#allocation13 + $0x1ed8] sm:$0xff] }
 0x576   :  { %10769 = vmatpush1.bf16.msra.mxu1 %v13088_v0  ;;  %v13249_v0 = vcombine.high %v1357_v7, %v1373_v9  ;;  %v13250_v4 = vcombine.low %v1358_v22, %v1374_v26  ;;  %v1486_v9 = vld [vmem:[#allocation13 + $0x2258] sm:$0xff] }
 0x577   :  { %10770 = vmatprep.subr.bf16.mxu1 %v13121_v31  ;;  %v1405_v31 = vld [vmem:[#allocation13 + $0x1fd0] sm:$0xff] }
 0x578   :  { %10892 = vmatpush1.bf16.msra.mxu0 %v13090_v8  ;;  %v13251_v8 = vcombine.high %v1358_v22, %v1374_v26  ;;  %v13280_v46 = vcombine.low %v1389_v27, %v1405_v31  ;;  %v1517_v26 = vld [vmem:[#allocation13 + $0x2350] sm:$0xff] }
 0x579   :  { %10893 = vmatprep.subr.bf16.mxu0 %v13123_v41  ;;  %v1406_v41 = vld [vmem:[#allocation13 + $0x1fd8] sm:$0xff] }
 0x57a   :  { %10771 = vmatpush1.bf16.msra.mxu1 %v13120_v18  ;;  %v13281_v18 = vcombine.high %v1389_v27, %v1405_v31  ;;  %v13282_v44 = vcombine.low %v1390_v36, %v1406_v41  ;;  %v1518_v31 = vld [vmem:[#allocation13 + $0x2358] sm:$0xff] }
 0x57b   :  { %10772 = vmatprep.subr.bf16.mxu1 %v13153_v43  ;;  %v1437_v43 = vld [vmem:[#allocation13 + $0x20d0] sm:$0xff] }
 0x57c   :  { %10894 = vmatpush1.bf16.msra.mxu0 %v13122_v5  ;;  %v13283_v5 = vcombine.high %v1390_v36, %v1406_v41  ;;  %v13312_v53 = vcombine.low %v1421_v42, %v1437_v43  ;;  %v1549_v41 = vld [vmem:[#allocation13 + $0x2450] sm:$0xff] }
 0x57d   :  { %10895 = vmatprep.subr.bf16.mxu0 %v13155_v47  ;;  %v1438_v47 = vld [vmem:[#allocation13 + $0x20d8] sm:$0xff] }
 0x57e   :  { %10773 = vmatpush1.bf16.msra.mxu1 %v13152_v29  ;;  %v13313_v29 = vcombine.high %v1421_v42, %v1437_v43  ;;  %v13314_v59 = vcombine.low %v1422_v40, %v1438_v47  ;;  %v1550_v43 = vld [vmem:[#allocation13 + $0x2458] sm:$0xff] }
 0x57f   :  { %10774 = vmatprep.subr.bf16.mxu1 %v13185_v51  ;;  %v1469_v51 = vld [vmem:[#allocation13 + $0x21d0] sm:$0xff] }
 0x580   :  { %10896 = vmatpush1.bf16.msra.mxu0 %v13154_v52  ;;  %v13315_v52 = vcombine.high %v1422_v40, %v1438_v47  ;;  %v13344_v7 = vcombine.low %v1453_v21, %v1469_v51  ;;  %v1581_v47 = vld [vmem:[#allocation13 + $0x2550] sm:$0xff] }
 0x581   :  { %10897 = vmatprep.subr.bf16.mxu0 %v13187_v56  ;;  %v1470_v56 = vld [vmem:[#allocation13 + $0x21d8] sm:$0xff] }
 0x582   :  { %10775 = vmatpush1.bf16.msra.mxu1 %v13184_v30  ;;  %v13345_v30 = vcombine.high %v1453_v21, %v1469_v51  ;;  %v13346_v22 = vcombine.low %v1454_v54, %v1470_v56  ;;  %v1582_v51 = vld [vmem:[#allocation13 + $0x2558] sm:$0xff] }
 0x583   :  { %10776 = vmatprep.subr.bf16.mxu1 %v13217_v63  ;;  %v1501_v63 = vld [vmem:[#allocation13 + $0x22d0] sm:$0xff] }
 0x584   :  { %10898 = vmatpush1.bf16.msra.mxu0 %v13186_v2  ;;  %v13347_v2 = vcombine.high %v1454_v54, %v1470_v56  ;;  %v13376_v27 = vcombine.low %v1485_v61, %v1501_v63  ;;  %v1613_v56 = vld [vmem:[#allocation13 + $0x2650] sm:$0xff] }
 0x585   :  { %10899 = vmatprep.subr.bf16.mxu0 %v13219_v10  ;;  %v1502_v10 = vld [vmem:[#allocation13 + $0x22d8] sm:$0xff] }
 0x586   :  { %10777 = vmatpush1.bf16.msra.mxu1 %v13216_v12  ;;  %v13377_v12 = vcombine.high %v1485_v61, %v1501_v63  ;;  %v13378_v36 = vcombine.low %v1486_v9, %v1502_v10  ;;  %v1614_v63 = vld [vmem:[#allocation13 + $0x2658] sm:$0xff] }
 0x587   :  { %10778 = vmatprep.subr.bf16.mxu1 %v13249_v0  ;;  %v1533_v0 = vld [vmem:[#allocation13 + $0x23d0] sm:$0xff] }
 0x588   :  { %10900 = vmatpush1.bf16.msra.mxu0 %v13218_v19  ;;  %v13379_v19 = vcombine.high %v1486_v9, %v1502_v10  ;;  %v13408_v42 = vcombine.low %v1517_v26, %v1533_v0  ;;  %v1645_v10 = vld [vmem:[#allocation13 + $0x2750] sm:$0xff] }
 0x589   :  { %10901 = vmatprep.subr.bf16.mxu0 %v13251_v8  ;;  %v1534_v8 = vld [vmem:[#allocation13 + $0x23d8] sm:$0xff] }
 0x58a   :  { %10779 = vmatpush1.bf16.msra.mxu1 %v13248_v34  ;;  %v13409_v34 = vcombine.high %v1517_v26, %v1533_v0  ;;  %v13410_v40 = vcombine.low %v1518_v31, %v1534_v8  ;;  %v1646_v0 = vld [vmem:[#allocation13 + $0x2758] sm:$0xff] }
 0x58b   :  { %10780 = vmatprep.subr.bf16.mxu1 %v13281_v18  ;;  %v1565_v18 = vld [vmem:[#allocation13 + $0x24d0] sm:$0xff] }
 0x58c   :  { %10902 = vmatpush1.bf16.msra.mxu0 %v13250_v4  ;;  %v13411_v4 = vcombine.high %v1518_v31, %v1534_v8  ;;  %v13440_v21 = vcombine.low %v1549_v41, %v1565_v18  ;;  %v1677_v8 = vld [vmem:[#allocation13 + $0x2850] sm:$0xff] }
 0x58d   :  { %10903 = vmatprep.subr.bf16.mxu0 %v13283_v5  ;;  %v1566_v5 = vld [vmem:[#allocation13 + $0x24d8] sm:$0xff] }
 0x58e   :  { %10781 = vmatpush1.bf16.msra.mxu1 %v13280_v46  ;;  %v13441_v46 = vcombine.high %v1549_v41, %v1565_v18  ;;  %v13442_v54 = vcombine.low %v1550_v43, %v1566_v5  ;;  %v1678_v18 = vld [vmem:[#allocation13 + $0x2858] sm:$0xff] }
 0x58f   :  { %10791 = vmatprep.subr.bf16.mxu1 %v13313_v29  ;;  %v1597_v29 = vld [vmem:[#allocation13 + $0x25d0] sm:$0xff] }
 0x590   :  { %10904 = vmatpush1.bf16.msra.mxu0 %v13282_v44  ;;  %v13443_v44 = vcombine.high %v1550_v43, %v1566_v5  ;;  %v13472_v61 = vcombine.low %v1581_v47, %v1597_v29  ;;  %v1709_v5 = vld [vmem:[#allocation13 + $0x2950] sm:$0xff] }
 0x591   :  { %10783 = vmatmul.mubr.bf16.vlgmr.msra.gmra.mrb[20].mxu1 %v15055_v32  ;;  %10914 = vmatprep.subr.bf16.mxu0 %v13315_v52  ;;  %v1598_v52 = vld [vmem:[#allocation13 + $0x25d8] sm:$0xff] }
 0x592   :  { %10792 = vmatpush1.bf16.msra.mxu1 %v13312_v53  ;;  %13750 = vmatprep.mubr.msk.bf16.mxu1 %vm9375_vm5, %v15059_v37  ;;  %v13473_v53 = vcombine.high %v1581_v47, %v1597_v29  ;;  %v13474_v9 = vcombine.low %v1582_v51, %v1598_v52  ;;  %v1710_v29 = vld [vmem:[#allocation13 + $0x2958] sm:$0xff] }
 0x593   :  { %10793 = vmatprep.subr.bf16.mxu1 %v13345_v30  ;;  %10906 = vmatmul.mubr.bf16.vlgmr.msra.gmra.mrb[24].mxu0 %v15055_v32  ;;  %v1629_v30 = vld [vmem:[#allocation13 + $0x26d0] sm:$0xff] }
 0x594   :  { %10915 = vmatpush1.bf16.msra.mxu0 %v13314_v59  ;;  %13751 = vmatprep.mubr.msk.bf16.mxu0 %vm9375_vm5, %v15059_v37  ;;  %v13475_v59 = vcombine.high %v1582_v51, %v1598_v52  ;;  %v13504_v26 = vcombine.low %v1613_v56, %v1629_v30  ;;  %v1741_v52 = vld [vmem:[#allocation13 + $0x2a50] sm:$0xff] }
 0x595   :  { %10916 = vmatprep.subr.bf16.mxu0 %v13347_v2  ;;  %v1630_v2 = vld [vmem:[#allocation13 + $0x26d8] sm:$0xff] }
 0x596   :  { %10794 = vmatpush1.bf16.msra.mxu1 %v13344_v7  ;;  %v13505_v7 = vcombine.high %v1613_v56, %v1629_v30  ;;  %v13506_v31 = vcombine.low %v1614_v63, %v1630_v2  ;;  %v1742_v30 = vld [vmem:[#allocation13 + $0x2a58] sm:$0xff] }
 0x597   :  { %10795 = vmatprep.subr.bf16.mxu1 %v13377_v12  ;;  %v1661_v12 = vld [vmem:[#allocation13 + $0x27d0] sm:$0xff] }
 0x598   :  { %10917 = vmatpush1.bf16.msra.mxu0 %v13346_v22  ;;  %v13507_v22 = vcombine.high %v1614_v63, %v1630_v2  ;;  %v13536_v41 = vcombine.low %v1645_v10, %v1661_v12  ;;  %v1773_v2 = vld [vmem:[#allocation13 + $0x2b50] sm:$0xff] }
 0x599   :  { %10918 = vmatprep.subr.bf16.mxu0 %v13379_v19  ;;  %v1662_v19 = vld [vmem:[#allocation13 + $0x27d8] sm:$0xff] }
 0x59a   :  { %10796 = vmatpush1.bf16.msra.mxu1 %v13376_v27  ;;  %v13537_v27 = vcombine.high %v1645_v10, %v1661_v12  ;;  %v13538_v43 = vcombine.low %v1646_v0, %v1662_v19  ;;  %v1774_v12 = vld [vmem:[#allocation13 + $0x2b58] sm:$0xff] }
 0x59b   :  { %10797 = vmatprep.subr.bf16.mxu1 %v13409_v34  ;;  %v1693_v34 = vld [vmem:[#allocation13 + $0x28d0] sm:$0xff] }
 0x59c   :  { %10919 = vmatpush1.bf16.msra.mxu0 %v13378_v36  ;;  %v13539_v36 = vcombine.high %v1646_v0, %v1662_v19  ;;  %v13568_v47 = vcombine.low %v1677_v8, %v1693_v34  ;;  %v1805_v0 = vld [vmem:[#allocation13 + $0x2c50] sm:$0xff] }
 0x59d   :  { %10920 = vmatprep.subr.bf16.mxu0 %v13411_v4  ;;  %v1694_v4 = vld [vmem:[#allocation13 + $0x28d8] sm:$0xff] }
 0x59e   :  { %10798 = vmatpush1.bf16.msra.mxu1 %v13408_v42  ;;  %v13569_v42 = vcombine.high %v1677_v8, %v1693_v34  ;;  %v13570_v51 = vcombine.low %v1678_v18, %v1694_v4  ;;  %v1853_v8 = vld [vmem:[#allocation13 + $0x2dd0] sm:$0x11] }
 0x59f   :  { %10799 = vmatprep.subr.bf16.mxu1 %v13441_v46  ;;  %v1725_v46 = vld [vmem:[#allocation13 + $0x29d0] sm:$0xff] }
 0x5a0   :  { %10921 = vmatpush1.bf16.msra.mxu0 %v13410_v40  ;;  %v13571_v40 = vcombine.high %v1678_v18, %v1694_v4  ;;  %v13600_v56 = vcombine.low %v1709_v5, %v1725_v46  ;;  %v1822_v18 = vld [vmem:[#allocation13 + $0x2cd8] sm:$0xff] }
 0x5a1   :  { %10922 = vmatprep.subr.bf16.mxu0 %v13443_v44  ;;  %v1726_v44 = vld [vmem:[#allocation13 + $0x29d8] sm:$0xff] }
 0x5a2   :  { %10800 = vmatpush1.bf16.msra.mxu1 %v13440_v21  ;;  %v13601_v21 = vcombine.high %v1709_v5, %v1725_v46  ;;  %v13602_v63 = vcombine.low %v1710_v29, %v1726_v44  ;;  %v1838_v4 = vld [vmem:[#allocation13 + $0x2d58] sm:$0xff] }
 0x5a3   :  { %10801 = vmatprep.subr.bf16.mxu1 %v13473_v53  ;;  %v1757_v53 = vld [vmem:[#allocation13 + $0x2ad0] sm:$0xff] }
 0x5a4   :  { %10923 = vmatpush1.bf16.msra.mxu0 %v13442_v54  ;;  %v13603_v54 = vcombine.high %v1710_v29, %v1726_v44  ;;  %v13632_v10 = vcombine.low %v1741_v52, %v1757_v53 }
 0x5a5   :  { %10924 = vmatprep.subr.bf16.mxu0 %v13475_v59  ;;  %v1758_v59 = vld [vmem:[#allocation13 + $0x2ad8] sm:$0xff] }
 0x5a6   :  { %10802 = vmatpush1.bf16.msra.mxu1 %v13472_v61  ;;  %v13633_v61 = vcombine.high %v1741_v52, %v1757_v53  ;;  %v13634_v19 = vcombine.low %v1742_v30, %v1758_v59  ;;  %v399_v53 = vld [vmem:[#allocation13 + $0x60] sm:$0xff] }
 0x5a7   :  { %10803 = vmatprep.subr.bf16.mxu1 %v13505_v7  ;;  %v1789_v7 = vld [vmem:[#allocation13 + $0x2bd0] sm:$0xff] }
 0x5a8   :  { %10925 = vmatpush1.bf16.msra.mxu0 %v13474_v9  ;;  %v13635_v9 = vcombine.high %v1742_v30, %v1758_v59  ;;  %v400_v59 = vld [vmem:[#allocation13 + $0x68] sm:$0xff] }
 0x5a9   :  { %10926 = vmatprep.subr.bf16.mxu0 %v13507_v22  ;;  %v1790_v22 = vld [vmem:[#allocation13 + $0x2bd8] sm:$0xff] }
 0x5aa   :  { %10804 = vmatpush1.bf16.msra.mxu1 %v13504_v26  ;;  %v13665_v26 = vcombine.high %v1773_v2, %v1789_v7  ;;  %v13667_v34 = vcombine.high %v1774_v12, %v1790_v22  ;;  %v13666_v46 = vcombine.low %v1774_v12, %v1790_v22  ;;  %v432_v22 = vld [vmem:[#allocation13 + $0x168] sm:$0xff] }
 0x5ab   :  { %10805 = vmatprep.subr.bf16.mxu1 %v13537_v27  ;;  %v1821_v27 = vld [vmem:[#allocation13 + $0x2cd0] sm:$0xff] }
 0x5ac   :  { %10927 = vmatpush1.bf16.msra.mxu0 %v13506_v31  ;;  %v1837_v31 = vld [vmem:[#allocation13 + $0x2d50] sm:$0xff]  ;;  %v13696_v29 = vcombine.low %v1805_v0, %v1821_v27 }
 0x5ad   :  { %10928 = vmatprep.subr.bf16.mxu0 %v13539_v36  ;;  %v1806_v36 = vld [vmem:[#allocation13 + $0x2c58] sm:$0xff]  ;;  %v13729_v5 = vcombine.high %v1837_v31, %v1853_v8  ;;  %v13728_v44 = vcombine.low %v1837_v31, %v1853_v8  ;;  %v479_v31 = vld [vmem:[#allocation13 + $0x2e0] sm:$0xff] }
 0x5ae   :  { %10806 = vmatpush1.bf16.msra.mxu1 %v13536_v41  ;;  %v13664_v41 = vcombine.low %v1773_v2, %v1789_v7  ;;  %v431_v7 = vld [vmem:[#allocation13 + $0x160] sm:$0xff] }
 0x5af   :  { %10807 = vmatprep.subr.bf16.mxu1 %v13569_v42  ;;  %v1854_v42 = vld [vmem:[#allocation13 + $0x2dd8] sm:$0x11]  ;;  %v9444_v30 = vand.u32 %v13728_v44, %v15067_v17 }
 0x5b0   :  { %10929 = vmatpush1.bf16.msra.mxu0 %v13538_v43  ;;  %v13697_v43 = vcombine.high %v1805_v0, %v1821_v27  ;;  %v13730_v52 = vcombine.low %v1838_v4, %v1854_v42  ;;  %v463_v27 = vld [vmem:[#allocation13 + $0x260] sm:$0xff] }
 0x5b1   :  { %10930 = vmatprep.subr.bf16.mxu0 %v13571_v40  ;;  %v13699_v40 = vcombine.high %v1806_v36, %v1822_v18 }
 0x5b2   :  { %10808 = vmatpush1.bf16.msra.mxu1 %v13568_v47  ;;  %v13731_v47 = vcombine.high %v1838_v4, %v1854_v42  ;;  %v9450_v2 = vand.u32 %v13730_v52, %v15067_v17  ;;  %v495_v42 = vld [vmem:[#allocation13 + $0x360] sm:$0xff] }
 0x5b3   :  { %10809 = vmatprep.subr.bf16.mxu1 %v13601_v21  ;;  %v9447_v21 = vand.u32 %v13729_v5, %v15067_v17 }
 0x5b4   :  { %10931 = vmatpush1.bf16.msra.mxu0 %v13570_v51  ;;  %v13698_v51 = vcombine.low %v1806_v36, %v1822_v18  ;;  %v464_v36 = vld [vmem:[#allocation13 + $0x268] sm:$0xff]  ;;  %v12357_v18 = vcombine.high %v463_v27, %v479_v31 }
 0x5b5   :  { %10932 = vmatprep.subr.bf16.mxu0 %v13603_v54  ;;  %v415_v54 = vld [vmem:[#allocation13 + $0xe0] sm:$0xff] }
 0x5b6   :  { %10810 = vmatpush1.bf16.msra.mxu1 %v13600_v56  ;;  %v9453_v56 = vand.u32 %v13731_v47, %v15067_v17  ;;  %v12292_v12 = vcombine.low %v399_v53, %v415_v54  ;;  %v512_v47 = vld [vmem:[#allocation13 + $0x3e8] sm:$0xff] }
 0x5b7   :  { %10811 = vmatprep.subr.bf16.mxu1 %v13633_v61  ;;  %v416_v61 = vld [vmem:[#allocation13 + $0xe8] sm:$0xff] }
 0x5b8   :  { %10933 = vmatpush1.bf16.msra.mxu0 %v13602_v63  ;;  %v12293_v63 = vcombine.high %v399_v53, %v415_v54  ;;  %v528_v54 = vld [vmem:[#allocation13 + $0x468] sm:$0xff] }
 0x5b9   :  { %10934 = vmatprep.subr.bf16.mxu0 %v13635_v9  ;;  %v447_v9 = vld [vmem:[#allocation13 + $0x1e0] sm:$0xff] }
 0x5ba   :  { %10812 = vmatpush1.bf16.msra.mxu1 %v13632_v10  ;;  %v12295_v10 = vcombine.high %v400_v59, %v416_v61  ;;  %v12325_v0 = vcombine.high %v431_v7, %v447_v9 }
 0x5bb   :  { %10813 = vmatprep.subr.bf16.mxu1 %v13665_v26  ;;  %v448_v26 = vld [vmem:[#allocation13 + $0x1e8] sm:$0xff] }
 0x5bc   :  { %10935 = vmatpush1.bf16.msra.mxu0 %v13634_v19  ;;  %v12294_v19 = vcombine.low %v400_v59, %v416_v61  ;;  %v12327_v8 = vcombine.high %v432_v22, %v448_v26  ;;  %v12326_v4 = vcombine.low %v432_v22, %v448_v26  ;;  %v559_v61 = vld [vmem:[#allocation13 + $0x560] sm:$0xff] }
 0x5bd   :  { %10936 = vmatprep.subr.bf16.mxu0 %v13667_v34  ;;  %v12324_v34 = vcombine.low %v431_v7, %v447_v9  ;;  %v560_v9 = vld [vmem:[#allocation13 + $0x568] sm:$0xff]  ;;  %v591_v26 = vld [vmem:[#allocation13 + $0x660] sm:$0xff] }
 0x5be   :  { %10814 = vmatpush1.bf16.msra.mxu1 %v13664_v41  ;;  %v480_v41 = vld [vmem:[#allocation13 + $0x2e8] sm:$0xff] }
 0x5bf   :  { %10815 = vmatprep.subr.bf16.mxu1 %v13697_v43  ;;  %v511_v43 = vld [vmem:[#allocation13 + $0x3e0] sm:$0xff]  ;;  %v12359_v5 = vcombine.high %v464_v36, %v480_v41  ;;  %v12358_v44 = vcombine.low %v464_v36, %v480_v41 }
 0x5c0   :  { %10937 = vmatpush1.bf16.msra.mxu0 %v13666_v46  ;;  %v12356_v46 = vcombine.low %v463_v27, %v479_v31  ;;  %v12388_v53 = vcombine.low %v495_v42, %v511_v43  ;;  %v592_v31 = vld [vmem:[#allocation13 + $0x668] sm:$0xff]  ;;  %v623_v41 = vld [vmem:[#allocation13 + $0x760] sm:$0xff] }
 0x5c1   :  { %10938 = vmatprep.subr.bf16.mxu0 %v13699_v40  ;;  %v496_v40 = vld [vmem:[#allocation13 + $0x368] sm:$0xff] }
 0x5c2   :  { %10816 = vmatpush1.bf16.msra.mxu1 %v13696_v29  ;;  %v12389_v29 = vcombine.high %v495_v42, %v511_v43  ;;  %v12391_v52 = vcombine.high %v496_v40, %v512_v47  ;;  %v12390_v59 = vcombine.low %v496_v40, %v512_v47  ;;  %v1861_v43 = vld [vmem:[#allocation14 + $0x10] sm:$0xff] }
 0x5c3   :  { %10817 = vmatprep.subr.bf16.mxu1 %v9447_v21  ;;  %v527_v21 = vld [vmem:[#allocation13 + $0x460] sm:$0xff] }
 0x5c4   :  { %10939 = vmatpush1.bf16.msra.mxu0 %v13698_v51  ;;  %v543_v51 = vld [vmem:[#allocation13 + $0x4e0] sm:$0xff] }
 0x5c5   :  { %10940 = vmatprep.subr.bf16.mxu0 %v9453_v56  ;;  %v544_v56 = vld [vmem:[#allocation13 + $0x4e8] sm:$0xff]  ;;  %v12420_v7 = vcombine.low %v527_v21, %v543_v51 }
 0x5c6   :  { %10818 = vmatpush1.bf16.msra.mxu1 %v9444_v30  ;;  %v12421_v30 = vcombine.high %v527_v21, %v543_v51  ;;  %v12422_v22 = vcombine.low %v528_v54, %v544_v56  ;;  %v1934_v21 = vrot.slane %v1861_v43, %v15130_v14 }
 0x5c7   :  { %10955 = vmatprep.subr.bf16.mxu1 %v12293_v63  ;;  %v575_v63 = vld [vmem:[#allocation13 + $0x5e0] sm:$0xff] }
 0x5c8   :  { %10941 = vmatpush1.bf16.msra.mxu0 %v9450_v2  ;;  %v12423_v2 = vcombine.high %v528_v54, %v544_v56  ;;  %v12452_v27 = vcombine.low %v559_v61, %v575_v63  ;;  %v656_v54 = vld [vmem:[#allocation13 + $0x868] sm:$0xff] }
 0x5c9   :  { %10824 = vmatmul.mubr.bf16.vlgmr.msra.gmra.mrb[20].mxu1 %v15075_v39  ;;  %11078 = vmatprep.subr.bf16.mxu0 %v12295_v10  ;;  %v576_v10 = vld [vmem:[#allocation13 + $0x5e8] sm:$0xff] }
 0x5ca   :  { %10956 = vmatpush1.bf16.msra.mxu1 %v12292_v12  ;;  %10987 = vmatprep.mubr.bf16.mxu1 %v15033_v62  ;;  %v12453_v12 = vcombine.high %v559_v61, %v575_v63  ;;  %v12454_v36 = vcombine.low %v560_v9, %v576_v10  ;;  %v672_v56 = vld [vmem:[#allocation13 + $0x8e8] sm:$0xff]  ;;  %v1946_v63 = vrot.slane %v1861_v43, %v15145_v16 }
 0x5cb   :  { %10947 = vmatmul.mubr.bf16.vlgmr.msra.gmra.mrb[24].mxu0 %v15075_v39  ;;  %10957 = vmatprep.subr.bf16.mxu1 %v12325_v0  ;;  %v607_v0 = vld [vmem:[#allocation13 + $0x6e0] sm:$0xff] }
 0x5cc   :  { %11079 = vmatpush1.bf16.msra.mxu0 %v12294_v19  ;;  %11110 = vmatprep.mubr.bf16.mxu0 %v15033_v62  ;;  %v12455_v19 = vcombine.high %v560_v9, %v576_v10  ;;  %v12484_v42 = vcombine.low %v591_v26, %v607_v0  ;;  %v703_v9 = vld [vmem:[#allocation13 + $0x9e0] sm:$0xff] }
 0x5cd   :  { %11080 = vmatprep.subr.bf16.mxu0 %v12327_v8  ;;  %v608_v8 = vld [vmem:[#allocation13 + $0x6e8] sm:$0xff] }
 0x5ce   :  { %10958 = vmatpush1.bf16.msra.mxu1 %v12324_v34  ;;  %v12485_v34 = vcombine.high %v591_v26, %v607_v0  ;;  %v12486_v47 = vcombine.low %v592_v31, %v608_v8 }
 0x5cf   :  { %10959 = vmatprep.subr.bf16.mxu1 %v12357_v18  ;;  %v639_v18 = vld [vmem:[#allocation13 + $0x7e0] sm:$0xff] }
 0x5d0   :  { %11081 = vmatpush1.bf16.msra.mxu0 %v12326_v4  ;;  %v12487_v4 = vcombine.high %v592_v31, %v608_v8  ;;  %v12517_v40 = vcombine.high %v623_v41, %v639_v18  ;;  %v12550_v31 = vcombine.low %v656_v54, %v672_v56  ;;  %v688_v8 = vld [vmem:[#allocation13 + $0x968] sm:$0xff] }
 0x5d1   :  { %11082 = vmatprep.subr.bf16.mxu0 %v12359_v5  ;;  %v624_v5 = vld [vmem:[#allocation13 + $0x768] sm:$0xff] }
 0x5d2   :  { %10960 = vmatpush1.bf16.msra.mxu1 %v12356_v46  ;;  %v640_v46 = vld [vmem:[#allocation13 + $0x7e8] sm:$0xff] }
 0x5d3   :  { %10961 = vmatprep.subr.bf16.mxu1 %v12389_v29  ;;  %v655_v29 = vld [vmem:[#allocation13 + $0x860] sm:$0xff]  ;;  %v12519_v51 = vcombine.high %v624_v5, %v640_v46 }
 0x5d4   :  { %11083 = vmatpush1.bf16.msra.mxu0 %v12358_v44  ;;  %v671_v44 = vld [vmem:[#allocation13 + $0x8e0] sm:$0xff] }
 0x5d5   :  { %11084 = vmatprep.subr.bf16.mxu0 %v12391_v52  ;;  %v1938_v52 = vrot.slane %v1861_v43, %v15135_v23 }
 0x5d6   :  { %10962 = vmatpush1.bf16.msra.mxu1 %v12388_v53  ;;  %v12516_v53 = vcombine.low %v623_v41, %v639_v18 }
 0x5d7   :  { %10963 = vmatprep.subr.bf16.mxu1 %v12421_v30  ;;  %v1942_v30 = vrot.slane %v1861_v43, %v15140_v33 }
 0x5d8   :  { %11085 = vmatpush1.bf16.msra.mxu0 %v12390_v59  ;;  %v12549_v59 = vcombine.high %v655_v29, %v671_v44 }
 0x5d9   :  { %11086 = vmatprep.subr.bf16.mxu0 %v12423_v2  ;;  %v12518_v2 = vcombine.low %v624_v5, %v640_v46 }
 0x5da   :  { %10964 = vmatpush1.bf16.msra.mxu1 %v12420_v7  ;;  %v687_v7 = vld [vmem:[#allocation13 + $0x960] sm:$0xff] }
 0x5db   :  { %10965 = vmatprep.subr.bf16.mxu1 %v12453_v12 }
 0x5dc   :  { %11087 = vmatpush1.bf16.msra.mxu0 %v12422_v22  ;;  %v12551_v22 = vcombine.high %v656_v54, %v672_v56 }
 0x5dd   :  { %11088 = vmatprep.subr.bf16.mxu0 %v12455_v19 }
 0x5de   :  { %10966 = vmatpush1.bf16.msra.mxu1 %v12452_v27  ;;  %v12548_v27 = vcombine.low %v655_v29, %v671_v44 }
 0x5df   :  { %10967 = vmatprep.subr.bf16.mxu1 %v12485_v34  ;;  %v704_v34 = vld [vmem:[#allocation13 + $0x9e8] sm:$0xff] }
 0x5e0   :  { %11089 = vmatpush1.bf16.msra.mxu0 %v12454_v36 }
 0x5e1   :  { %11090 = vmatprep.subr.bf16.mxu0 %v12487_v4 }
 0x5e2   :  { %10968 = vmatpush1.bf16.msra.mxu1 %v12484_v42  ;;  %v12581_v42 = vcombine.high %v687_v7, %v703_v9 }
 0x5e3   :  { %10969 = vmatprep.subr.bf16.mxu1 %v12517_v40  ;;  %v12580_v40 = vcombine.low %v687_v7, %v703_v9  ;;  %v751_v7 = vld [vmem:[#allocation13 + $0xb60] sm:$0xff] }
 0x5e4   :  { %v10579_v61 = vpop.f32.mrb[16].mxu1  ;;  %11091 = vmatpush1.bf16.msra.mxu0 %v12486_v47  ;;  %v719_v47 = vld [vmem:[#allocation13 + $0xa60] sm:$0xff] }
 0x5e5   :  { %v13950_v10 = vadd.f32 %v10579_v61, %v1934_v21  ;;  %v10581_v12 = vpop.f32.mrb[17].mxu1  ;;  %11092 = vmatprep.subr.bf16.mxu0 %v12519_v51  ;;  %v735_v21 = vld [vmem:[#allocation13 + $0xae0] sm:$0xff] }
 0x5e6   :  { %v13951_v26 = vadd.f32 %v10581_v12, %v1938_v52  ;;  %v10583_v0 = vpop.f32.mrb[18].mxu1  ;;  %10970 = vmatpush1.bf16.msra.mxu1 %v12516_v53  ;;  %v10702_v19 = vpop.f32.mrb[20].mxu0  ;;  %v12583_v52 = vcombine.high %v688_v8, %v704_v34  ;;  %v767_v9 = vld [vmem:[#allocation13 + $0xbe0] sm:$0xff]  ;;  %v12612_v6 = vcombine.low %v719_v47, %v735_v21  ;;  %v768_v12 = vld [vmem:[#allocation13 + $0xbe8] sm:$0xff] }
 0x5e7   :  { %vm11463_vm10 = vcmp.ge.f32.partialorder %v13950_v10, 0.0  ;;  %v11495_v36 = vmul.f32 0.01, %v13950_v10  ;;  %v10584_v41 = vpop.f32.mrb[19].mxu1  ;;  %v13952_v18 = vadd.f32 %v10702_v19, %v1942_v30  ;;  %v10704_v4 = vpop.f32.mrb[21].mxu0  ;;  %10971 = vmatprep.subr.bf16.mxu1 %v12549_v59  ;;  %v720_v30 = vld [vmem:[#allocation13 + $0xa68] sm:$0xff]  ;;  %v12645_v13 = vcombine.high %v751_v7, %v767_v9 }
 0x5e8   :  { %vm11464_vm11 = vcmp.ge.f32.partialorder %v13951_v26, 0.0  ;;  %v11496_v43 = vmul.f32 0.01, %v13951_v26  ;;  %v13953_v5 = vadd.f32 %v10704_v4, %v1946_v63  ;;  %v10706_v46 = vpop.f32.mrb[22].mxu0  ;;  %11093 = vmatpush1.bf16.msra.mxu0 %v12518_v2  ;;  %v736_v59 = vld [vmem:[#allocation13 + $0xae8] sm:$0xff]  ;;  %v12613_v2 = vcombine.high %v719_v47, %v735_v21 }
 0x5e9   :  { %v11527_v51 = vsel %vm11463_vm10, %v13950_v10, %v11495_v36  ;;  %vm11465_vm12 = vcmp.ge.f32.partialorder %v13952_v18, 0.0  ;;  %v11497_v29 = vmul.f32 0.01, %v13952_v18  ;;  %v10707_v44 = vpop.f32.mrb[23].mxu0  ;;  %11094 = vmatprep.subr.bf16.mxu0 %v12551_v22  ;;  %v12615_v38 = vcombine.high %v720_v30, %v736_v59  ;;  %v799_v22 = vld [vmem:[#allocation13 + $0xce0] sm:$0xff]  ;;  %v784_v19 = vld [vmem:[#allocation13 + $0xc68] sm:$0xff] }
 0x5ea   :  { %v15336_v53 = vmax.f32 %v11551_v28, %v11527_v51  ;;  %v11528_v54 = vsel %vm11464_vm11, %v13951_v26, %v11496_v43  ;;  %vm11466_vm13 = vcmp.ge.f32.partialorder %v13953_v5, 0.0  ;;  %v11498_v56 = vmul.f32 0.01, %v13953_v5  ;;  %10972 = vmatpush1.bf16.msra.mxu1 %v12548_v27  ;;  %v815_v27 = vld [vmem:[#allocation13 + $0xd60] sm:$0xff]  ;;  %v816_v36 = vld [vmem:[#allocation13 + $0xd68] sm:$0xff] }
 0x5eb   :  { %v15341_v61 = vmax.f32 %v11552_v11, %v11528_v54  ;;  %v11529_v63 = vsel %vm11465_vm12, %v13952_v18, %v11497_v29  ;;  %10973 = vmatprep.subr.bf16.mxu1 %v12581_v42  ;;  %v12582_v28 = vcombine.low %v688_v8, %v704_v34  ;;  %v752_v11 = vld [vmem:[#allocation13 + $0xb68] sm:$0xff]  ;;  %v12614_v15 = vcombine.low %v720_v30, %v736_v59  ;;  %v847_v42 = vld [vmem:[#allocation13 + $0xe60] sm:$0xff] }
 0x5ec   :  { %v15346_v58 = vmax.f32 %v11553_v48, %v11529_v63  ;;  %v11530_v60 = vsel %vm11466_vm13, %v13953_v5, %v11498_v56  ;;  %11095 = vmatpush1.bf16.msra.mxu0 %v12550_v31  ;;  %v783_v48 = vld [vmem:[#allocation13 + $0xc60] sm:$0xff]  ;;  %v12647_v26 = vcombine.high %v752_v11, %v768_v12  ;;  %v12644_v0 = vcombine.low %v751_v7, %v767_v9  ;;  %v832_v41 = vld [vmem:[#allocation13 + $0xde8] sm:$0xff] }
 0x5ed   :  { %v15351_v10 = vmax.f32 %v11554_v24, %v11530_v60  ;;  %11096 = vmatprep.subr.bf16.mxu0 %v12583_v52  ;;  %v12677_v49 = vcombine.high %v783_v48, %v799_v22  ;;  %v12646_v24 = vcombine.low %v752_v11, %v768_v12  ;;  %v831_v31 = vld [vmem:[#allocation13 + $0xde0] sm:$0xff]  ;;  %v12679_v8 = vcombine.high %v784_v19, %v800_v45  ;;  %v864_v47 = vld [vmem:[#allocation13 + $0xee8] sm:$0xff] }
 0x5ee   :  { %10974 = vmatpush1.bf16.msra.mxu1 %v12580_v40  ;;  %v12676_v34 = vcombine.low %v783_v48, %v799_v22  ;;  %v12709_v18 = vcombine.high %v815_v27, %v831_v31  ;;  %v12678_v4 = vcombine.low %v784_v19, %v800_v45  ;;  %v863_v43 = vld [vmem:[#allocation13 + $0xee0] sm:$0xff]  ;;  %v12711_v5 = vcombine.high %v816_v36, %v832_v41  ;;  %v848_v40 = vld [vmem:[#allocation13 + $0xe68] sm:$0xff] }
 0x5ef   :  { %10975 = vmatprep.subr.bf16.mxu1 %v12613_v2  ;;  %v12708_v46 = vcombine.low %v815_v27, %v831_v31  ;;  %v12741_v21 = vcombine.high %v847_v42, %v863_v43  ;;  %v12710_v51 = vcombine.low %v816_v36, %v832_v41  ;;  %v879_v29 = vld [vmem:[#allocation13 + $0xf60] sm:$0xff]  ;;  %v12743_v52 = vcombine.high %v848_v40, %v864_v47  ;;  %v880_v56 = vld [vmem:[#allocation13 + $0xf68] sm:$0xff] }
 0x5f0   :  { %11097 = vmatpush1.bf16.msra.mxu0 %v12582_v28  ;;  %v895_v44 = vld [vmem:[#allocation13 + $0xfe0] sm:$0xff]  ;;  %v12740_v54 = vcombine.low %v847_v42, %v863_v43  ;;  %v896_v30 = vld [vmem:[#allocation13 + $0xfe8] sm:$0xff]  ;;  %v12742_v63 = vcombine.low %v848_v40, %v864_v47  ;;  %vm11968_vm11 = vcmask 1041408   ;;  %vm11964_vm12 = vcmask 818176  }
 0x5f1   :  { %11098 = vmatprep.subr.bf16.mxu0 %v12615_v38  ;;  %v12773_v59 = vcombine.high %v879_v29, %v895_v44  ;;  %v911_v2 = vld [vmem:[#allocation13 + $0x1060] sm:$0xff]  ;;  %v12775_v28 = vcombine.high %v880_v56, %v896_v30  ;;  %v12772_v7 = vcombine.low %v879_v29, %v895_v44  ;;  %v912_v9 = vld [vmem:[#allocation13 + $0x1068] sm:$0xff]  ;;  %v12774_v11 = vcombine.low %v880_v56, %v896_v30 }
 0x5f2   :  { %10976 = vmatpush1.bf16.msra.mxu1 %v12612_v6  ;;  %v927_v60 = vld [vmem:[#allocation13 + $0x10e0] sm:$0xff]  ;;  %v928_v38 = vld [vmem:[#allocation13 + $0x10e8] sm:$0xff] }
 0x5f3   :  { %10977 = vmatprep.subr.bf16.mxu1 %v12645_v13  ;;  %v12805_v6 = vcombine.high %v911_v2, %v927_v60  ;;  %v943_v12 = vld [vmem:[#allocation13 + $0x1160] sm:$0xff]  ;;  %v12804_v48 = vcombine.low %v911_v2, %v927_v60  ;;  %v944_v22 = vld [vmem:[#allocation13 + $0x1168] sm:$0xff]  ;;  %v12806_v19 = vcombine.low %v912_v9, %v928_v38 }
 0x5f4   :  { %11099 = vmatpush1.bf16.msra.mxu0 %v12614_v15  ;;  %v959_v13 = vld [vmem:[#allocation13 + $0x11e0] sm:$0xff]  ;;  %v12807_v15 = vcombine.high %v912_v9, %v928_v38  ;;  %v976_v31 = vld [vmem:[#allocation13 + $0x1268] sm:$0xff] }
 0x5f5   :  { %11100 = vmatprep.subr.bf16.mxu0 %v12647_v26  ;;  %v960_v26 = vld [vmem:[#allocation13 + $0x11e8] sm:$0xff]  ;;  %v975_v45 = vld [vmem:[#allocation13 + $0x1260] sm:$0xff]  ;;  %v12836_v27 = vcombine.low %v943_v12, %v959_v13 }
 0x5f6   :  { %10978 = vmatpush1.bf16.msra.mxu1 %v12644_v0  ;;  %v12837_v0 = vcombine.high %v943_v12, %v959_v13  ;;  %v12838_v36 = vcombine.low %v944_v22, %v960_v26  ;;  %v1007_v41 = vld [vmem:[#allocation13 + $0x1360] sm:$0xff]  ;;  %v1008_v43 = vld [vmem:[#allocation13 + $0x1368] sm:$0xff] }
 0x5f7   :  { %10979 = vmatprep.subr.bf16.mxu1 %v12677_v49  ;;  %v991_v49 = vld [vmem:[#allocation13 + $0x12e0] sm:$0xff]  ;;  %v1040_v44 = vld [vmem:[#allocation13 + $0x1468] sm:$0xff] }
 0x5f8   :  { %11101 = vmatpush1.bf16.msra.mxu0 %v12646_v24  ;;  %v12839_v24 = vcombine.high %v944_v22, %v960_v26  ;;  %v12868_v42 = vcombine.low %v975_v45, %v991_v49  ;;  %v1039_v47 = vld [vmem:[#allocation13 + $0x1460] sm:$0xff]  ;;  %v1072_v60 = vld [vmem:[#allocation13 + $0x1568] sm:$0xff] }
 0x5f9   :  { %11102 = vmatprep.subr.bf16.mxu0 %v12679_v8  ;;  %v992_v8 = vld [vmem:[#allocation13 + $0x12e8] sm:$0xff]  ;;  %v1071_v30 = vld [vmem:[#allocation13 + $0x1560] sm:$0xff] }
 0x5fa   :  { %10980 = vmatpush1.bf16.msra.mxu1 %v12676_v34  ;;  %v12869_v34 = vcombine.high %v975_v45, %v991_v49  ;;  %v12870_v40 = vcombine.low %v976_v31, %v992_v8  ;;  %v1103_v38 = vld [vmem:[#allocation13 + $0x1660] sm:$0xff]  ;;  %v1104_v13 = vld [vmem:[#allocation13 + $0x1668] sm:$0xff] }
 0x5fb   :  { %10981 = vmatprep.subr.bf16.mxu1 %v12709_v18  ;;  %v1023_v18 = vld [vmem:[#allocation13 + $0x13e0] sm:$0xff]  ;;  %v1136_v49 = vld [vmem:[#allocation13 + $0x1768] sm:$0xff] }
 0x5fc   :  { %11103 = vmatpush1.bf16.msra.mxu0 %v12678_v4  ;;  %v12871_v4 = vcombine.high %v976_v31, %v992_v8  ;;  %v12900_v29 = vcombine.low %v1007_v41, %v1023_v18  ;;  %v1135_v26 = vld [vmem:[#allocation13 + $0x1760] sm:$0xff] }
 0x5fd   :  { %11104 = vmatprep.subr.bf16.mxu0 %v12711_v5  ;;  %v1024_v5 = vld [vmem:[#allocation13 + $0x13e8] sm:$0xff]  ;;  %v1167_v8 = vld [vmem:[#allocation13 + $0x1860] sm:$0xff] }
 0x5fe   :  { %10982 = vmatpush1.bf16.msra.mxu1 %v12708_v46  ;;  %v12901_v46 = vcombine.high %v1007_v41, %v1023_v18  ;;  %v12902_v56 = vcombine.low %v1008_v43, %v1024_v5  ;;  %v1168_v18 = vld [vmem:[#allocation13 + $0x1868] sm:$0xff] }
 0x5ff   :  { %10983 = vmatprep.subr.bf16.mxu1 %v12741_v21  ;;  %v1055_v21 = vld [vmem:[#allocation13 + $0x14e0] sm:$0xff] }
 0x600   :  { %11105 = vmatpush1.bf16.msra.mxu0 %v12710_v51  ;;  %v12903_v51 = vcombine.high %v1008_v43, %v1024_v5  ;;  %v12932_v2 = vcombine.low %v1039_v47, %v1055_v21  ;;  %v1199_v5 = vld [vmem:[#allocation13 + $0x1960] sm:$0xff] }
 0x601   :  { %11106 = vmatprep.subr.bf16.mxu0 %v12743_v52  ;;  %v1056_v52 = vld [vmem:[#allocation13 + $0x14e8] sm:$0xff] }
 0x602   :  { %10984 = vmatpush1.bf16.msra.mxu1 %v12740_v54  ;;  %v12933_v54 = vcombine.high %v1039_v47, %v1055_v21  ;;  %v12934_v9 = vcombine.low %v1040_v44, %v1056_v52  ;;  %v1200_v21 = vld [vmem:[#allocation13 + $0x1968] sm:$0xff] }
 0x603   :  { %10985 = vmatprep.subr.bf16.mxu1 %v12773_v59  ;;  %v1087_v59 = vld [vmem:[#allocation13 + $0x15e0] sm:$0xff] }
 0x604   :  { %11107 = vmatpush1.bf16.msra.mxu0 %v12742_v63  ;;  %v12935_v63 = vcombine.high %v1040_v44, %v1056_v52  ;;  %v12964_v12 = vcombine.low %v1071_v30, %v1087_v59  ;;  %v1231_v52 = vld [vmem:[#allocation13 + $0x1a60] sm:$0xff] }
 0x605   :  { %11108 = vmatprep.subr.bf16.mxu0 %v12775_v28  ;;  %v1088_v28 = vld [vmem:[#allocation13 + $0x15e8] sm:$0xff] }
 0x606   :  { %10986 = vmatpush1.bf16.msra.mxu1 %v12772_v7  ;;  %v12965_v7 = vcombine.high %v1071_v30, %v1087_v59  ;;  %v12966_v22 = vcombine.low %v1072_v60, %v1088_v28  ;;  %v1232_v59 = vld [vmem:[#allocation13 + $0x1a68] sm:$0xff] }
 0x607   :  { %10996 = vmatprep.subr.bf16.mxu1 %v12805_v6  ;;  %v1119_v6 = vld [vmem:[#allocation13 + $0x16e0] sm:$0xff] }
 0x608   :  { %11109 = vmatpush1.bf16.msra.mxu0 %v12774_v11  ;;  %v12967_v11 = vcombine.high %v1072_v60, %v1088_v28  ;;  %v12996_v45 = vcombine.low %v1103_v38, %v1119_v6  ;;  %v1263_v28 = vld [vmem:[#allocation13 + $0x1b60] sm:$0xff] }
 0x609   :  { %10988 = vmatmul.mubr.bf16.vlgmr.msra.gmra.mrb[24].mxu1 %v15041_v20  ;;  %11119 = vmatprep.subr.bf16.mxu0 %v12807_v15  ;;  %v1120_v15 = vld [vmem:[#allocation13 + $0x16e8] sm:$0xff] }
 0x60a   :  { %10997 = vmatpush1.bf16.msra.mxu1 %v12804_v48  ;;  %11028 = vmatprep.mubr.bf16.mxu1 %v15045_v25  ;;  %v12997_v48 = vcombine.high %v1103_v38, %v1119_v6  ;;  %v12998_v31 = vcombine.low %v1104_v13, %v1120_v15  ;;  %v1264_v6 = vld [vmem:[#allocation13 + $0x1b68] sm:$0xff] }
 0x60b   :  { %10998 = vmatprep.subr.bf16.mxu1 %v12837_v0  ;;  %11111 = vmatmul.mubr.bf16.vlgmr.msra.gmra.mrb[28].mxu0 %v15041_v20  ;;  %v1151_v0 = vld [vmem:[#allocation13 + $0x17e0] sm:$0xff] }
 0x60c   :  { %11120 = vmatpush1.bf16.msra.mxu0 %v12806_v19  ;;  %11151 = vmatprep.mubr.bf16.mxu0 %v15045_v25  ;;  %v12999_v19 = vcombine.high %v1104_v13, %v1120_v15  ;;  %v13028_v41 = vcombine.low %v1135_v26, %v1151_v0  ;;  %v1295_v15 = vld [vmem:[#allocation13 + $0x1c60] sm:$0xff] }
 0x60d   :  { %11121 = vmatprep.subr.bf16.mxu0 %v12839_v24  ;;  %v1152_v24 = vld [vmem:[#allocation13 + $0x17e8] sm:$0xff] }
 0x60e   :  { %10999 = vmatpush1.bf16.msra.mxu1 %v12836_v27  ;;  %v13029_v27 = vcombine.high %v1135_v26, %v1151_v0  ;;  %v13030_v43 = vcombine.low %v1136_v49, %v1152_v24  ;;  %v1296_v0 = vld [vmem:[#allocation13 + $0x1c68] sm:$0xff] }
 0x60f   :  { %11000 = vmatprep.subr.bf16.mxu1 %v12869_v34  ;;  %v1183_v34 = vld [vmem:[#allocation13 + $0x18e0] sm:$0xff] }
 0x610   :  { %11122 = vmatpush1.bf16.msra.mxu0 %v12838_v36  ;;  %v13031_v36 = vcombine.high %v1136_v49, %v1152_v24  ;;  %v13060_v47 = vcombine.low %v1167_v8, %v1183_v34  ;;  %v1327_v24 = vld [vmem:[#allocation13 + $0x1d60] sm:$0xff] }
 0x611   :  { %11123 = vmatprep.subr.bf16.mxu0 %v12871_v4  ;;  %v1184_v4 = vld [vmem:[#allocation13 + $0x18e8] sm:$0xff] }
 0x612   :  { %11001 = vmatpush1.bf16.msra.mxu1 %v12868_v42  ;;  %v13061_v42 = vcombine.high %v1167_v8, %v1183_v34  ;;  %v13062_v44 = vcombine.low %v1168_v18, %v1184_v4  ;;  %v1328_v34 = vld [vmem:[#allocation13 + $0x1d68] sm:$0xff] }
 0x613   :  { %11002 = vmatprep.subr.bf16.mxu1 %v12901_v46  ;;  %v1215_v46 = vld [vmem:[#allocation13 + $0x19e0] sm:$0xff] }
 0x614   :  { %11124 = vmatpush1.bf16.msra.mxu0 %v12870_v40  ;;  %v13063_v40 = vcombine.high %v1168_v18, %v1184_v4  ;;  %v13092_v30 = vcombine.low %v1199_v5, %v1215_v46  ;;  %v1359_v4 = vld [vmem:[#allocation13 + $0x1e60] sm:$0xff] }
 0x615   :  { %11125 = vmatprep.subr.bf16.mxu0 %v12903_v51  ;;  %v1216_v51 = vld [vmem:[#allocation13 + $0x19e8] sm:$0xff] }
 0x616   :  { %11003 = vmatpush1.bf16.msra.mxu1 %v12900_v29  ;;  %v13093_v29 = vcombine.high %v1199_v5, %v1215_v46  ;;  %v13094_v60 = vcombine.low %v1200_v21, %v1216_v51  ;;  %v1360_v46 = vld [vmem:[#allocation13 + $0x1e68] sm:$0xff] }
 0x617   :  { %11004 = vmatprep.subr.bf16.mxu1 %v12933_v54  ;;  %v1247_v54 = vld [vmem:[#allocation13 + $0x1ae0] sm:$0xff] }
 0x618   :  { %11126 = vmatpush1.bf16.msra.mxu0 %v12902_v56  ;;  %v13095_v56 = vcombine.high %v1200_v21, %v1216_v51  ;;  %v13124_v38 = vcombine.low %v1231_v52, %v1247_v54  ;;  %v1391_v51 = vld [vmem:[#allocation13 + $0x1f60] sm:$0xff] }
 0x619   :  { %11127 = vmatprep.subr.bf16.mxu0 %v12935_v63  ;;  %v1248_v63 = vld [vmem:[#allocation13 + $0x1ae8] sm:$0xff] }
 0x61a   :  { %11005 = vmatpush1.bf16.msra.mxu1 %v12932_v2  ;;  %v13125_v2 = vcombine.high %v1231_v52, %v1247_v54  ;;  %v13126_v13 = vcombine.low %v1232_v59, %v1248_v63  ;;  %v1392_v54 = vld [vmem:[#allocation13 + $0x1f68] sm:$0xff] }
 0x61b   :  { %11006 = vmatprep.subr.bf16.mxu1 %v12965_v7  ;;  %v1279_v7 = vld [vmem:[#allocation13 + $0x1be0] sm:$0xff] }
 0x61c   :  { %11128 = vmatpush1.bf16.msra.mxu0 %v12934_v9  ;;  %v13127_v9 = vcombine.high %v1232_v59, %v1248_v63  ;;  %v13156_v26 = vcombine.low %v1263_v28, %v1279_v7  ;;  %v1423_v63 = vld [vmem:[#allocation13 + $0x2060] sm:$0xff] }
 0x61d   :  { %11129 = vmatprep.subr.bf16.mxu0 %v12967_v11  ;;  %v1280_v11 = vld [vmem:[#allocation13 + $0x1be8] sm:$0xff] }
 0x61e   :  { %11007 = vmatpush1.bf16.msra.mxu1 %v12964_v12  ;;  %v13157_v12 = vcombine.high %v1263_v28, %v1279_v7  ;;  %v13158_v49 = vcombine.low %v1264_v6, %v1280_v11  ;;  %v1424_v7 = vld [vmem:[#allocation13 + $0x2068] sm:$0xff] }
 0x61f   :  { %11008 = vmatprep.subr.bf16.mxu1 %v12997_v48  ;;  %v1311_v48 = vld [vmem:[#allocation13 + $0x1ce0] sm:$0xff] }
 0x620   :  { %11130 = vmatpush1.bf16.msra.mxu0 %v12966_v22  ;;  %v13159_v22 = vcombine.high %v1264_v6, %v1280_v11  ;;  %v13188_v8 = vcombine.low %v1295_v15, %v1311_v48  ;;  %v1455_v11 = vld [vmem:[#allocation13 + $0x2160] sm:$0xff] }
 0x621   :  { %11131 = vmatprep.subr.bf16.mxu0 %v12999_v19  ;;  %v1312_v19 = vld [vmem:[#allocation13 + $0x1ce8] sm:$0xff] }
 0x622   :  { %11009 = vmatpush1.bf16.msra.mxu1 %v12996_v45  ;;  %v13189_v45 = vcombine.high %v1295_v15, %v1311_v48  ;;  %v13190_v18 = vcombine.low %v1296_v0, %v1312_v19  ;;  %v1456_v48 = vld [vmem:[#allocation13 + $0x2168] sm:$0xff] }
 0x623   :  { %11010 = vmatprep.subr.bf16.mxu1 %v13029_v27  ;;  %v1343_v27 = vld [vmem:[#allocation13 + $0x1de0] sm:$0xff] }
 0x624   :  { %11132 = vmatpush1.bf16.msra.mxu0 %v12998_v31  ;;  %v13191_v31 = vcombine.high %v1296_v0, %v1312_v19  ;;  %v13220_v5 = vcombine.low %v1327_v24, %v1343_v27  ;;  %v1487_v19 = vld [vmem:[#allocation13 + $0x2260] sm:$0xff] }
 0x625   :  { %11133 = vmatprep.subr.bf16.mxu0 %v13031_v36  ;;  %v1344_v36 = vld [vmem:[#allocation13 + $0x1de8] sm:$0xff] }
 0x626   :  { %11011 = vmatpush1.bf16.msra.mxu1 %v13028_v41  ;;  %v13221_v41 = vcombine.high %v1327_v24, %v1343_v27  ;;  %v13222_v21 = vcombine.low %v1328_v34, %v1344_v36  ;;  %v1488_v27 = vld [vmem:[#allocation13 + $0x2268] sm:$0xff] }
 0x627   :  { %11012 = vmatprep.subr.bf16.mxu1 %v13061_v42  ;;  %v1375_v42 = vld [vmem:[#allocation13 + $0x1ee0] sm:$0xff] }
 0x628   :  { %11134 = vmatpush1.bf16.msra.mxu0 %v13030_v43  ;;  %v13223_v43 = vcombine.high %v1328_v34, %v1344_v36  ;;  %v13252_v52 = vcombine.low %v1359_v4, %v1375_v42  ;;  %v1519_v36 = vld [vmem:[#allocation13 + $0x2360] sm:$0xff] }
 0x629   :  { %11135 = vmatprep.subr.bf16.mxu0 %v13063_v40  ;;  %v1376_v40 = vld [vmem:[#allocation13 + $0x1ee8] sm:$0xff] }
 0x62a   :  { %11013 = vmatpush1.bf16.msra.mxu1 %v13060_v47  ;;  %v13253_v47 = vcombine.high %v1359_v4, %v1375_v42  ;;  %v13254_v59 = vcombine.low %v1360_v46, %v1376_v40  ;;  %v1520_v42 = vld [vmem:[#allocation13 + $0x2368] sm:$0xff] }
 0x62b   :  { %11014 = vmatprep.subr.bf16.mxu1 %v13093_v29  ;;  %v1407_v29 = vld [vmem:[#allocation13 + $0x1fe0] sm:$0xff] }
 0x62c   :  { %11136 = vmatpush1.bf16.msra.mxu0 %v13062_v44  ;;  %v13255_v44 = vcombine.high %v1360_v46, %v1376_v40  ;;  %v13284_v28 = vcombine.low %v1391_v51, %v1407_v29  ;;  %v1551_v40 = vld [vmem:[#allocation13 + $0x2460] sm:$0xff] }
 0x62d   :  { %11137 = vmatprep.subr.bf16.mxu0 %v13095_v56  ;;  %v1408_v56 = vld [vmem:[#allocation13 + $0x1fe8] sm:$0xff] }
 0x62e   :  { %11015 = vmatpush1.bf16.msra.mxu1 %v13092_v30  ;;  %v13285_v30 = vcombine.high %v1391_v51, %v1407_v29  ;;  %v13286_v6 = vcombine.low %v1392_v54, %v1408_v56  ;;  %v1552_v29 = vld [vmem:[#allocation13 + $0x2468] sm:$0xff] }
 0x62f   :  { %11016 = vmatprep.subr.bf16.mxu1 %v13125_v2  ;;  %v1439_v2 = vld [vmem:[#allocation13 + $0x20e0] sm:$0xff] }
 0x630   :  { %11138 = vmatpush1.bf16.msra.mxu0 %v13094_v60  ;;  %v13287_v60 = vcombine.high %v1392_v54, %v1408_v56  ;;  %v13316_v15 = vcombine.low %v1423_v63, %v1439_v2  ;;  %v1583_v56 = vld [vmem:[#allocation13 + $0x2560] sm:$0xff] }
 0x631   :  { %11139 = vmatprep.subr.bf16.mxu0 %v13127_v9  ;;  %v1440_v9 = vld [vmem:[#allocation13 + $0x20e8] sm:$0xff] }
 0x632   :  { %11017 = vmatpush1.bf16.msra.mxu1 %v13124_v38  ;;  %v13317_v38 = vcombine.high %v1423_v63, %v1439_v2  ;;  %v13318_v0 = vcombine.low %v1424_v7, %v1440_v9  ;;  %v1584_v2 = vld [vmem:[#allocation13 + $0x2568] sm:$0xff] }
 0x633   :  { %11018 = vmatprep.subr.bf16.mxu1 %v13157_v12  ;;  %v1471_v12 = vld [vmem:[#allocation13 + $0x21e0] sm:$0xff] }
 0x634   :  { %11140 = vmatpush1.bf16.msra.mxu0 %v13126_v13  ;;  %v13319_v13 = vcombine.high %v1424_v7, %v1440_v9  ;;  %v13348_v24 = vcombine.low %v1455_v11, %v1471_v12  ;;  %v1615_v9 = vld [vmem:[#allocation13 + $0x2660] sm:$0xff] }
 0x635   :  { %11141 = vmatprep.subr.bf16.mxu0 %v13159_v22  ;;  %v1472_v22 = vld [vmem:[#allocation13 + $0x21e8] sm:$0xff] }
 0x636   :  { %11019 = vmatpush1.bf16.msra.mxu1 %v13156_v26  ;;  %v13349_v26 = vcombine.high %v1455_v11, %v1471_v12  ;;  %v13350_v34 = vcombine.low %v1456_v48, %v1472_v22  ;;  %v1616_v12 = vld [vmem:[#allocation13 + $0x2668] sm:$0xff] }
 0x637   :  { %11020 = vmatprep.subr.bf16.mxu1 %v13189_v45  ;;  %v1503_v45 = vld [vmem:[#allocation13 + $0x22e0] sm:$0xff] }
 0x638   :  { %11142 = vmatpush1.bf16.msra.mxu0 %v13158_v49  ;;  %v13351_v49 = vcombine.high %v1456_v48, %v1472_v22  ;;  %v13380_v4 = vcombine.low %v1487_v19, %v1503_v45  ;;  %v1647_v22 = vld [vmem:[#allocation13 + $0x2760] sm:$0xff] }
 0x639   :  { %11143 = vmatprep.subr.bf16.mxu0 %v13191_v31  ;;  %v1504_v31 = vld [vmem:[#allocation13 + $0x22e8] sm:$0xff] }
 0x63a   :  { %11021 = vmatpush1.bf16.msra.mxu1 %v13188_v8  ;;  %v13381_v8 = vcombine.high %v1487_v19, %v1503_v45  ;;  %v13382_v46 = vcombine.low %v1488_v27, %v1504_v31  ;;  %v1648_v45 = vld [vmem:[#allocation13 + $0x2768] sm:$0xff] }
 0x63b   :  { %11022 = vmatprep.subr.bf16.mxu1 %v13221_v41  ;;  %v1535_v41 = vld [vmem:[#allocation13 + $0x23e0] sm:$0xff] }
 0x63c   :  { %11144 = vmatpush1.bf16.msra.mxu0 %v13190_v18  ;;  %v13383_v18 = vcombine.high %v1488_v27, %v1504_v31  ;;  %v13412_v51 = vcombine.low %v1519_v36, %v1535_v41  ;;  %v1679_v31 = vld [vmem:[#allocation13 + $0x2860] sm:$0xff] }
 0x63d   :  { %11145 = vmatprep.subr.bf16.mxu0 %v13223_v43  ;;  %v1536_v43 = vld [vmem:[#allocation13 + $0x23e8] sm:$0xff] }
 0x63e   :  { %11023 = vmatpush1.bf16.msra.mxu1 %v13220_v5  ;;  %v13413_v5 = vcombine.high %v1519_v36, %v1535_v41  ;;  %v13414_v54 = vcombine.low %v1520_v42, %v1536_v43  ;;  %v1680_v41 = vld [vmem:[#allocation13 + $0x2868] sm:$0xff] }
 0x63f   :  { %11024 = vmatprep.subr.bf16.mxu1 %v13253_v47  ;;  %v1567_v47 = vld [vmem:[#allocation13 + $0x24e0] sm:$0xff] }
 0x640   :  { %11146 = vmatpush1.bf16.msra.mxu0 %v13222_v21  ;;  %v13415_v21 = vcombine.high %v1520_v42, %v1536_v43  ;;  %v13444_v63 = vcombine.low %v1551_v40, %v1567_v47  ;;  %v1711_v43 = vld [vmem:[#allocation13 + $0x2960] sm:$0xff] }
 0x641   :  { %11147 = vmatprep.subr.bf16.mxu0 %v13255_v44  ;;  %v1568_v44 = vld [vmem:[#allocation13 + $0x24e8] sm:$0xff] }
 0x642   :  { %11025 = vmatpush1.bf16.msra.mxu1 %v13252_v52  ;;  %v13445_v52 = vcombine.high %v1551_v40, %v1567_v47  ;;  %v13446_v7 = vcombine.low %v1552_v29, %v1568_v44  ;;  %v1712_v47 = vld [vmem:[#allocation13 + $0x2968] sm:$0xff] }
 0x643   :  { %11026 = vmatprep.subr.bf16.mxu1 %v13285_v30  ;;  %v1599_v30 = vld [vmem:[#allocation13 + $0x25e0] sm:$0xff] }
 0x644   :  { %11148 = vmatpush1.bf16.msra.mxu0 %v13254_v59  ;;  %v13447_v59 = vcombine.high %v1552_v29, %v1568_v44  ;;  %v13476_v11 = vcombine.low %v1583_v56, %v1599_v30  ;;  %v1743_v44 = vld [vmem:[#allocation13 + $0x2a60] sm:$0xff] }
 0x645   :  { %11149 = vmatprep.subr.bf16.mxu0 %v13287_v60  ;;  %v1600_v60 = vld [vmem:[#allocation13 + $0x25e8] sm:$0xff] }
 0x646   :  { %11027 = vmatpush1.bf16.msra.mxu1 %v13284_v28  ;;  %v13477_v28 = vcombine.high %v1583_v56, %v1599_v30  ;;  %v13478_v48 = vcombine.low %v1584_v2, %v1600_v60  ;;  %v1744_v30 = vld [vmem:[#allocation13 + $0x2a68] sm:$0xff] }
 0x647   :  { %11037 = vmatprep.subr.bf16.mxu1 %v13317_v38  ;;  %v1631_v38 = vld [vmem:[#allocation13 + $0x26e0] sm:$0xff] }
 0x648   :  { %11150 = vmatpush1.bf16.msra.mxu0 %v13286_v6  ;;  %v13479_v6 = vcombine.high %v1584_v2, %v1600_v60  ;;  %v13508_v19 = vcombine.low %v1615_v9, %v1631_v38  ;;  %v1775_v60 = vld [vmem:[#allocation13 + $0x2b60] sm:$0xff] }
 0x649   :  { %11029 = vmatmul.mubr.bf16.vlgmr.msra.gmra.mrb[24].mxu1 %v15055_v32  ;;  %11160 = vmatprep.subr.bf16.mxu0 %v13319_v13  ;;  %v1632_v13 = vld [vmem:[#allocation13 + $0x26e8] sm:$0xff] }
 0x64a   :  { %11038 = vmatpush1.bf16.msra.mxu1 %v13316_v15  ;;  %13752 = vmatprep.mubr.msk.bf16.mxu1 %vm9375_vm5, %v15059_v37  ;;  %v13509_v15 = vcombine.high %v1615_v9, %v1631_v38  ;;  %v13510_v27 = vcombine.low %v1616_v12, %v1632_v13  ;;  %v1776_v38 = vld [vmem:[#allocation13 + $0x2b68] sm:$0xff] }
 0x64b   :  { %11039 = vmatprep.subr.bf16.mxu1 %v13349_v26  ;;  %11152 = vmatmul.mubr.bf16.vlgmr.msra.gmra.mrb[28].mxu0 %v15055_v32  ;;  %v1663_v26 = vld [vmem:[#allocation13 + $0x27e0] sm:$0xff] }
 0x64c   :  { %11161 = vmatpush1.bf16.msra.mxu0 %v13318_v0  ;;  %13753 = vmatprep.mubr.msk.bf16.mxu0 %vm9375_vm5, %v15059_v37  ;;  %v13511_v0 = vcombine.high %v1616_v12, %v1632_v13  ;;  %v13540_v36 = vcombine.low %v1647_v22, %v1663_v26  ;;  %v1807_v12 = vld [vmem:[#allocation13 + $0x2c60] sm:$0xff] }
 0x64d   :  { %11162 = vmatprep.subr.bf16.mxu0 %v13351_v49  ;;  %v1664_v49 = vld [vmem:[#allocation13 + $0x27e8] sm:$0xff] }
 0x64e   :  { %11040 = vmatpush1.bf16.msra.mxu1 %v13348_v24  ;;  %v13541_v24 = vcombine.high %v1647_v22, %v1663_v26  ;;  %v13542_v42 = vcombine.low %v1648_v45, %v1664_v49  ;;  %v1855_v22 = vld [vmem:[#allocation13 + $0x2de0] sm:$0x11] }
 0x64f   :  { %11041 = vmatprep.subr.bf16.mxu1 %v13381_v8  ;;  %v1695_v8 = vld [vmem:[#allocation13 + $0x28e0] sm:$0xff] }
 0x650   :  { %11163 = vmatpush1.bf16.msra.mxu0 %v13350_v34  ;;  %v13543_v34 = vcombine.high %v1648_v45, %v1664_v49  ;;  %v13572_v40 = vcombine.low %v1679_v31, %v1695_v8  ;;  %v1824_v45 = vld [vmem:[#allocation13 + $0x2ce8] sm:$0xff] }
 0x651   :  { %11164 = vmatprep.subr.bf16.mxu0 %v13383_v18  ;;  %v1696_v18 = vld [vmem:[#allocation13 + $0x28e8] sm:$0xff] }
 0x652   :  { %11042 = vmatpush1.bf16.msra.mxu1 %v13380_v4  ;;  %v13573_v4 = vcombine.high %v1679_v31, %v1695_v8  ;;  %v13574_v29 = vcombine.low %v1680_v41, %v1696_v18  ;;  %v1840_v49 = vld [vmem:[#allocation13 + $0x2d68] sm:$0xff] }
 0x653   :  { %11043 = vmatprep.subr.bf16.mxu1 %v13413_v5  ;;  %v1727_v5 = vld [vmem:[#allocation13 + $0x29e0] sm:$0xff] }
 0x654   :  { %11165 = vmatpush1.bf16.msra.mxu0 %v13382_v46  ;;  %v13575_v46 = vcombine.high %v1680_v41, %v1696_v18  ;;  %v13604_v56 = vcombine.low %v1711_v43, %v1727_v5 }
 0x655   :  { %11166 = vmatprep.subr.bf16.mxu0 %v13415_v21  ;;  %v1728_v21 = vld [vmem:[#allocation13 + $0x29e8] sm:$0xff] }
 0x656   :  { %11044 = vmatpush1.bf16.msra.mxu1 %v13412_v51  ;;  %v13605_v51 = vcombine.high %v1711_v43, %v1727_v5  ;;  %v13606_v2 = vcombine.low %v1712_v47, %v1728_v21  ;;  %v401_v5 = vld [vmem:[#allocation13 + $0x70] sm:$0xff] }
 0x657   :  { %11045 = vmatprep.subr.bf16.mxu1 %v13445_v52  ;;  %v1759_v52 = vld [vmem:[#allocation13 + $0x2ae0] sm:$0xff] }
 0x658   :  { %11167 = vmatpush1.bf16.msra.mxu0 %v13414_v54  ;;  %v13607_v54 = vcombine.high %v1712_v47, %v1728_v21  ;;  %v13636_v9 = vcombine.low %v1743_v44, %v1759_v52  ;;  %v402_v21 = vld [vmem:[#allocation13 + $0x78] sm:$0xff] }
 0x659   :  { %11168 = vmatprep.subr.bf16.mxu0 %v13447_v59  ;;  %v1760_v59 = vld [vmem:[#allocation13 + $0x2ae8] sm:$0xff] }
 0x65a   :  { %11046 = vmatpush1.bf16.msra.mxu1 %v13444_v63  ;;  %v13637_v63 = vcombine.high %v1743_v44, %v1759_v52  ;;  %v13638_v13 = vcombine.low %v1744_v30, %v1760_v59  ;;  %v433_v52 = vld [vmem:[#allocation13 + $0x170] sm:$0xff] }
 0x65b   :  { %11047 = vmatprep.subr.bf16.mxu1 %v13477_v28  ;;  %v1791_v28 = vld [vmem:[#allocation13 + $0x2be0] sm:$0xff] }
 0x65c   :  { %11169 = vmatpush1.bf16.msra.mxu0 %v13446_v7  ;;  %v13639_v7 = vcombine.high %v1744_v30, %v1760_v59  ;;  %v434_v59 = vld [vmem:[#allocation13 + $0x178] sm:$0xff] }
 0x65d   :  { %11170 = vmatprep.subr.bf16.mxu0 %v13479_v6  ;;  %v1792_v6 = vld [vmem:[#allocation13 + $0x2be8] sm:$0xff] }
 0x65e   :  { %11048 = vmatpush1.bf16.msra.mxu1 %v13476_v11  ;;  %v13669_v11 = vcombine.high %v1775_v60, %v1791_v28  ;;  %v13671_v26 = vcombine.high %v1776_v38, %v1792_v6  ;;  %v13670_v8 = vcombine.low %v1776_v38, %v1792_v6  ;;  %v466_v6 = vld [vmem:[#allocation13 + $0x278] sm:$0xff] }
 0x65f   :  { %11049 = vmatprep.subr.bf16.mxu1 %v13509_v15  ;;  %v1823_v15 = vld [vmem:[#allocation13 + $0x2ce0] sm:$0xff] }
 0x660   :  { %11171 = vmatpush1.bf16.msra.mxu0 %v13478_v48  ;;  %v1839_v48 = vld [vmem:[#allocation13 + $0x2d60] sm:$0xff]  ;;  %v13700_v41 = vcombine.low %v1807_v12, %v1823_v15 }
 0x661   :  { %11172 = vmatprep.subr.bf16.mxu0 %v13511_v0  ;;  %v1808_v0 = vld [vmem:[#allocation13 + $0x2c68] sm:$0xff]  ;;  %v13733_v31 = vcombine.high %v1839_v48, %v1855_v22  ;;  %v13732_v18 = vcombine.low %v1839_v48, %v1855_v22  ;;  %v513_v48 = vld [vmem:[#allocation13 + $0x3f0] sm:$0xff] }
 0x662   :  { %11050 = vmatpush1.bf16.msra.mxu1 %v13508_v19  ;;  %v13668_v19 = vcombine.low %v1775_v60, %v1791_v28  ;;  %v465_v28 = vld [vmem:[#allocation13 + $0x270] sm:$0xff] }
 0x663   :  { %11051 = vmatprep.subr.bf16.mxu1 %v13541_v24  ;;  %v1856_v24 = vld [vmem:[#allocation13 + $0x2de8] sm:$0x11]  ;;  %v9456_v47 = vand.u32 %v13732_v18, %v15067_v17  ;;  %v561_v18 = vld [vmem:[#allocation13 + $0x570] sm:$0xff] }
 0x664   :  { %11173 = vmatpush1.bf16.msra.mxu0 %v13510_v27  ;;  %v13701_v27 = vcombine.high %v1807_v12, %v1823_v15  ;;  %v13734_v43 = vcombine.low %v1840_v49, %v1856_v24  ;;  %v497_v15 = vld [vmem:[#allocation13 + $0x370] sm:$0xff] }
 0x665   :  { %11174 = vmatprep.subr.bf16.mxu0 %v13543_v34  ;;  %v13703_v34 = vcombine.high %v1808_v0, %v1824_v45 }
 0x666   :  { %11052 = vmatpush1.bf16.msra.mxu1 %v13540_v36  ;;  %v13735_v36 = vcombine.high %v1840_v49, %v1856_v24  ;;  %v9462_v44 = vand.u32 %v13734_v43, %v15067_v17  ;;  %v529_v24 = vld [vmem:[#allocation13 + $0x470] sm:$0xff] }
 0x667   :  { %11053 = vmatprep.subr.bf16.mxu1 %v13573_v4  ;;  %v9459_v4 = vand.u32 %v13733_v31, %v15067_v17 }
 0x668   :  { %11175 = vmatpush1.bf16.msra.mxu0 %v13542_v42  ;;  %v13702_v42 = vcombine.low %v1808_v0, %v1824_v45  ;;  %v498_v0 = vld [vmem:[#allocation13 + $0x378] sm:$0xff]  ;;  %v12393_v45 = vcombine.high %v497_v15, %v513_v48 }
 0x669   :  { %11176 = vmatprep.subr.bf16.mxu0 %v13575_v46  ;;  %v417_v46 = vld [vmem:[#allocation13 + $0xf0] sm:$0xff] }
 0x66a   :  { %11054 = vmatpush1.bf16.msra.mxu1 %v13572_v40  ;;  %v9465_v40 = vand.u32 %v13735_v36, %v15067_v17  ;;  %v12296_v30 = vcombine.low %v401_v5, %v417_v46  ;;  %v546_v36 = vld [vmem:[#allocation13 + $0x4f8] sm:$0xff] }
 0x66b   :  { %11055 = vmatprep.subr.bf16.mxu1 %v13605_v51  ;;  %v418_v51 = vld [vmem:[#allocation13 + $0xf8] sm:$0xff] }
 0x66c   :  { %11177 = vmatpush1.bf16.msra.mxu0 %v13574_v29  ;;  %v12297_v29 = vcombine.high %v401_v5, %v417_v46  ;;  %v12298_v60 = vcombine.low %v402_v21, %v418_v51  ;;  %v562_v5 = vld [vmem:[#allocation13 + $0x578] sm:$0xff] }
 0x66d   :  { %11178 = vmatprep.subr.bf16.mxu0 %v13607_v54  ;;  %v449_v54 = vld [vmem:[#allocation13 + $0x1f0] sm:$0xff]  ;;  %v578_v46 = vld [vmem:[#allocation13 + $0x5f8] sm:$0xff] }
 0x66e   :  { %11056 = vmatpush1.bf16.msra.mxu1 %v13604_v56  ;;  %v12299_v56 = vcombine.high %v402_v21, %v418_v51  ;;  %v12328_v38 = vcombine.low %v433_v52, %v449_v54  ;;  %v593_v21 = vld [vmem:[#allocation13 + $0x670] sm:$0xff] }
 0x66f   :  { %11057 = vmatprep.subr.bf16.mxu1 %v13637_v63  ;;  %v450_v63 = vld [vmem:[#allocation13 + $0x1f8] sm:$0xff]  ;;  %v609_v51 = vld [vmem:[#allocation13 + $0x6f0] sm:$0xff] }
 0x670   :  { %11179 = vmatpush1.bf16.msra.mxu0 %v13606_v2  ;;  %v12329_v2 = vcombine.high %v433_v52, %v449_v54  ;;  %v594_v52 = vld [vmem:[#allocation13 + $0x678] sm:$0xff] }
 0x671   :  { %11180 = vmatprep.subr.bf16.mxu0 %v13639_v7  ;;  %v481_v7 = vld [vmem:[#allocation13 + $0x2f0] sm:$0xff]  ;;  %v610_v54 = vld [vmem:[#allocation13 + $0x6f8] sm:$0xff] }
 0x672   :  { %11058 = vmatpush1.bf16.msra.mxu1 %v13636_v9  ;;  %v12331_v9 = vcombine.high %v434_v59, %v450_v63  ;;  %v12361_v12 = vcombine.high %v465_v28, %v481_v7 }
 0x673   :  { %11059 = vmatprep.subr.bf16.mxu1 %v13669_v11  ;;  %v482_v11 = vld [vmem:[#allocation13 + $0x2f8] sm:$0xff] }
 0x674   :  { %11181 = vmatpush1.bf16.msra.mxu0 %v13638_v13  ;;  %v12330_v13 = vcombine.low %v434_v59, %v450_v63  ;;  %v12363_v22 = vcombine.high %v466_v6, %v482_v11  ;;  %v12362_v49 = vcombine.low %v466_v6, %v482_v11  ;;  %v625_v59 = vld [vmem:[#allocation13 + $0x770] sm:$0xff] }
 0x675   :  { %11182 = vmatprep.subr.bf16.mxu0 %v13671_v26  ;;  %v12360_v26 = vcombine.low %v465_v28, %v481_v7  ;;  %v641_v63 = vld [vmem:[#allocation13 + $0x7f0] sm:$0xff]  ;;  %v626_v28 = vld [vmem:[#allocation13 + $0x778] sm:$0xff] }
 0x676   :  { %11060 = vmatpush1.bf16.msra.mxu1 %v13668_v19  ;;  %v514_v19 = vld [vmem:[#allocation13 + $0x3f8] sm:$0xff]  ;;  %v657_v6 = vld [vmem:[#allocation13 + $0x870] sm:$0xff] }
 0x677   :  { %11061 = vmatprep.subr.bf16.mxu1 %v13701_v27  ;;  %v545_v27 = vld [vmem:[#allocation13 + $0x4f0] sm:$0xff]  ;;  %v12395_v31 = vcombine.high %v498_v0, %v514_v19  ;;  %v642_v7 = vld [vmem:[#allocation13 + $0x7f8] sm:$0xff] }
 0x678   :  { %11183 = vmatpush1.bf16.msra.mxu0 %v13670_v8  ;;  %v12392_v8 = vcombine.low %v497_v15, %v513_v48  ;;  %v12424_v43 = vcombine.low %v529_v24, %v545_v27  ;;  %v673_v11 = vld [vmem:[#allocation13 + $0x8f0] sm:$0xff]  ;;  %v12523_v15 = vcombine.high %v626_v28, %v642_v7 }
 0x679   :  { %11184 = vmatprep.subr.bf16.mxu0 %v13703_v34  ;;  %v530_v34 = vld [vmem:[#allocation13 + $0x478] sm:$0xff] }
 0x67a   :  { %11062 = vmatpush1.bf16.msra.mxu1 %v13700_v41  ;;  %v12394_v41 = vcombine.low %v498_v0, %v514_v19  ;;  %v674_v0 = vld [vmem:[#allocation13 + $0x8f8] sm:$0xff] }
 0x67b   :  { %11063 = vmatprep.subr.bf16.mxu1 %v9459_v4  ;;  %v577_v4 = vld [vmem:[#allocation13 + $0x5f0] sm:$0xff] }
 0x67c   :  { %11185 = vmatpush1.bf16.msra.mxu0 %v13702_v42  ;;  %v12427_v42 = vcombine.high %v530_v34, %v546_v36 }
 0x67d   :  { %11186 = vmatprep.subr.bf16.mxu0 %v9465_v40  ;;  %v12457_v40 = vcombine.high %v561_v18, %v577_v4 }
 0x67e   :  { %11064 = vmatpush1.bf16.msra.mxu1 %v9456_v47  ;;  %v12426_v47 = vcombine.low %v530_v34, %v546_v36 }
 0x67f   :  { %11201 = vmatprep.subr.bf16.mxu1 %v12297_v29  ;;  %v12459_v29 = vcombine.high %v562_v5, %v578_v46 }
 0x680   :  { %11187 = vmatpush1.bf16.msra.mxu0 %v9462_v44  ;;  %v12456_v44 = vcombine.low %v561_v18, %v577_v4 }
 0x681   :  { %11070 = vmatmul.mubr.bf16.vlgmr.msra.gmra.mrb[24].mxu1 %v15075_v39  ;;  %11324 = vmatprep.subr.bf16.mxu0 %v12299_v56  ;;  %v12489_v56 = vcombine.high %v593_v21, %v609_v51 }
 0x682   :  { %11202 = vmatpush1.bf16.msra.mxu1 %v12296_v30  ;;  %11233 = vmatprep.mubr.bf16.mxu1 %v15033_v62  ;;  %v12458_v30 = vcombine.low %v562_v5, %v578_v46  ;;  %v690_v5 = vld [vmem:[#allocation13 + $0x978] sm:$0xff] }
 0x683   :  { %11193 = vmatmul.mubr.bf16.vlgmr.msra.gmra.mrb[28].mxu0 %v15075_v39  ;;  %11203 = vmatprep.subr.bf16.mxu1 %v12329_v2  ;;  %v12491_v2 = vcombine.high %v594_v52, %v610_v54  ;;  %v706_v46 = vld [vmem:[#allocation13 + $0x9f8] sm:$0xff] }
 0x684   :  { %11325 = vmatpush1.bf16.msra.mxu0 %v12298_v60  ;;  %11356 = vmatprep.mubr.bf16.mxu0 %v15033_v62  ;;  %v12425_v62 = vcombine.high %v529_v24, %v545_v27  ;;  %v12488_v60 = vcombine.low %v593_v21, %v609_v51  ;;  %v12522_v27 = vcombine.low %v626_v28, %v642_v7 }
 0x685   :  { %11326 = vmatprep.subr.bf16.mxu0 %v12331_v9  ;;  %v12521_v9 = vcombine.high %v625_v59, %v641_v63  ;;  %v12587_v28 = vcombine.high %v690_v5, %v706_v46 }
 0x686   :  { %11204 = vmatpush1.bf16.msra.mxu1 %v12328_v38  ;;  %v12490_v38 = vcombine.low %v594_v52, %v610_v54 }
 0x687   :  { %11205 = vmatprep.subr.bf16.mxu1 %v12361_v12  ;;  %v14179_v12 = vld [vmem:[#allocation14 + $0x10] sm:$0xff] }
 0x688   :  { %11327 = vmatpush1.bf16.msra.mxu0 %v12330_v13  ;;  %v1950_v13 = vrot.slane %v14179_v12, %v15154_v55  ;;  %v1954_v48 = vrot.slane %v14179_v12, %v15157_v57  ;;  %v1958_v19 = vrot.slane %v14179_v12, %v15160_v35  ;;  %v1962_v24 = vrot.slane %v14179_v12, %v15166_v3 }
 0x689   :  { %11328 = vmatprep.subr.bf16.mxu0 %v12363_v22  ;;  %v12520_v22 = vcombine.low %v625_v59, %v641_v63  ;;  %v737_v59 = vld [vmem:[#allocation13 + $0xaf0] sm:$0xff] }
 0x68a   :  { %11206 = vmatpush1.bf16.msra.mxu1 %v12360_v26  ;;  %v658_v26 = vld [vmem:[#allocation13 + $0x878] sm:$0xff] }
 0x68b   :  { %11207 = vmatprep.subr.bf16.mxu1 %v12393_v45  ;;  %v12553_v45 = vcombine.high %v657_v6, %v673_v11 }
 0x68c   :  { %11329 = vmatpush1.bf16.msra.mxu0 %v12362_v49 }
 0x68d   :  { %11330 = vmatprep.subr.bf16.mxu0 %v12395_v31  ;;  %v689_v31 = vld [vmem:[#allocation13 + $0x970] sm:$0xff] }
 0x68e   :  { %11208 = vmatpush1.bf16.msra.mxu1 %v12392_v8  ;;  %v705_v8 = vld [vmem:[#allocation13 + $0x9f0] sm:$0xff] }
 0x68f   :  { %11209 = vmatprep.subr.bf16.mxu1 %v12425_v62  ;;  %v12555_v62 = vcombine.high %v658_v26, %v674_v0 }
 0x690   :  { %11331 = vmatpush1.bf16.msra.mxu0 %v12394_v41 }
 0x691   :  { %11332 = vmatprep.subr.bf16.mxu0 %v12427_v42  ;;  %v12552_v42 = vcombine.low %v657_v6, %v673_v11  ;;  %v722_v6 = vld [vmem:[#allocation13 + $0xa78] sm:$0xff] }
 0x692   :  { %11210 = vmatpush1.bf16.msra.mxu1 %v12424_v43  ;;  %v12554_v43 = vcombine.low %v658_v26, %v674_v0  ;;  %v738_v11 = vld [vmem:[#allocation13 + $0xaf8] sm:$0xff]  ;;  %v12586_v26 = vcombine.low %v690_v5, %v706_v46  ;;  %v753_v0 = vld [vmem:[#allocation13 + $0xb70] sm:$0xff] }
 0x693   :  { %11211 = vmatprep.subr.bf16.mxu1 %v12457_v40  ;;  %v817_v46 = vld [vmem:[#allocation13 + $0xd70] sm:$0xff] }
 0x694   :  { %11333 = vmatpush1.bf16.msra.mxu0 %v12426_v47 }
 0x695   :  { %11334 = vmatprep.subr.bf16.mxu0 %v12459_v29  ;;  %v12585_v29 = vcombine.high %v689_v31, %v705_v8 }
 0x696   :  { %11212 = vmatpush1.bf16.msra.mxu1 %v12456_v44 }
 0x697   :  { %11213 = vmatprep.subr.bf16.mxu1 %v12489_v56  ;;  %v12584_v56 = vcombine.low %v689_v31, %v705_v8  ;;  %v770_v31 = vld [vmem:[#allocation13 + $0xbf8] sm:$0xff] }
 0x698   :  { %11335 = vmatpush1.bf16.msra.mxu0 %v12458_v30  ;;  %v721_v30 = vld [vmem:[#allocation13 + $0xa70] sm:$0xff] }
 0x699   :  { %11336 = vmatprep.subr.bf16.mxu0 %v12491_v2 }
 0x69a   :  { %11214 = vmatpush1.bf16.msra.mxu1 %v12488_v60 }
 0x69b   :  { %11215 = vmatprep.subr.bf16.mxu1 %v12521_v9 }
 0x69c   :  { %v10825_v49 = vpop.f32.mrb[20].mxu1  ;;  %11337 = vmatpush1.bf16.msra.mxu0 %v12490_v38 }
 0x69d   :  { %v13954_v34 = vadd.f32 %v10825_v49, %v1950_v13  ;;  %v10827_v36 = vpop.f32.mrb[21].mxu1  ;;  %11338 = vmatprep.subr.bf16.mxu0 %v12523_v15  ;;  %v12617_v15 = vcombine.high %v721_v30, %v737_v59  ;;  %v12619_v49 = vcombine.high %v722_v6, %v738_v11 }
 0x69e   :  { %v13955_v41 = vadd.f32 %v10827_v36, %v1954_v48  ;;  %v10829_v18 = vpop.f32.mrb[22].mxu1  ;;  %11216 = vmatpush1.bf16.msra.mxu1 %v12520_v22  ;;  %v10948_v4 = vpop.f32.mrb[24].mxu0  ;;  %v785_v36 = vld [vmem:[#allocation13 + $0xc70] sm:$0xff] }
 0x69f   :  { %vm11467_vm14 = vcmp.ge.f32.partialorder %v13954_v34, 0.0  ;;  %v11499_v40 = vmul.f32 0.01, %v13954_v34  ;;  %v10830_v47 = vpop.f32.mrb[23].mxu1  ;;  %v13956_v21 = vadd.f32 %v10948_v4, %v1958_v19  ;;  %v10950_v51 = vpop.f32.mrb[25].mxu0  ;;  %11217 = vmatprep.subr.bf16.mxu1 %v12553_v45  ;;  %v769_v19 = vld [vmem:[#allocation13 + $0xbf0] sm:$0xff] }
 0x6a0   :  { %vm11468_vm15 = vcmp.ge.f32.partialorder %v13955_v41, 0.0  ;;  %v11500_v44 = vmul.f32 0.01, %v13955_v41  ;;  %v13957_v52 = vadd.f32 %v10950_v51, %v1962_v24  ;;  %v10952_v54 = vpop.f32.mrb[26].mxu0  ;;  %11339 = vmatpush1.bf16.msra.mxu0 %v12522_v27  ;;  %v12616_v24 = vcombine.low %v721_v30, %v737_v59  ;;  %v754_v27 = vld [vmem:[#allocation13 + $0xb78] sm:$0xff] }
 0x6a1   :  { %v15375_v63 = vsel %vm11467_vm14, %v13954_v34, %v11499_v40  ;;  %vm11469_vm1 = vcmp.ge.f32.partialorder %v13956_v21, 0.0  ;;  %v11501_v2 = vmul.f32 0.01, %v13956_v21  ;;  %v10953_v60 = vpop.f32.mrb[27].mxu0  ;;  %11340 = vmatprep.subr.bf16.mxu0 %v12555_v62  ;;  %v12649_v8 = vcombine.high %v753_v0, %v769_v19  ;;  %v801_v62 = vld [vmem:[#allocation13 + $0xcf0] sm:$0xff]  ;;  %v786_v4 = vld [vmem:[#allocation13 + $0xc78] sm:$0xff] }
 0x6a2   :  { %v11559_v7 = vmax.f32 %v15336_v53, %v15375_v63  ;;  %v15379_v9 = vsel %vm11468_vm15, %v13955_v41, %v11500_v44  ;;  %vm11470_vm2 = vcmp.ge.f32.partialorder %v13957_v52, 0.0  ;;  %v11502_v38 = vmul.f32 0.01, %v13957_v52  ;;  %11218 = vmatpush1.bf16.msra.mxu1 %v12552_v42  ;;  %v802_v42 = vld [vmem:[#allocation13 + $0xcf8] sm:$0xff]  ;;  %v833_v40 = vld [vmem:[#allocation13 + $0xdf0] sm:$0xff]  ;;  %v14152_v63 = vld [vmem:[#allocation17 + $0x70] sm:$0xff]  }
 0x6a3   :  { %v11560_v12 = vmax.f32 %v15341_v61, %v15379_v9  ;;  %v15383_v13 = vsel %vm11469_vm1, %v13956_v21, %v11501_v2  ;;  %11219 = vmatprep.subr.bf16.mxu1 %v12585_v29  ;;  %v12618_v34 = vcombine.low %v722_v6, %v738_v11  ;;  %v12651_v41 = vcombine.high %v754_v27, %v770_v31  ;;  %v818_v51 = vld [vmem:[#allocation13 + $0xd78] sm:$0xff]  ;;  %v849_v54 = vld [vmem:[#allocation13 + $0xe70] sm:$0xff] }
 0x6a4   :  { %v11561_v48 = vmax.f32 %v15346_v58, %v15383_v13  ;;  %v15387_v22 = vsel %vm11470_vm2, %v13957_v52, %v11502_v38  ;;  %11341 = vmatpush1.bf16.msra.mxu0 %v12554_v43  ;;  %v12648_v18 = vcombine.low %v753_v0, %v769_v19  ;;  %v12681_v43 = vcombine.high %v785_v36, %v801_v62  ;;  %v834_v29 = vld [vmem:[#allocation13 + $0xdf8] sm:$0xff]  ;;  %v881_v6 = vld [vmem:[#allocation13 + $0xf70] sm:$0xff]  ;;  %v14157_v58 = vld [vmem:[#allocation17 + $0xf0] sm:$0xff]  }
 0x6a5   :  { %v11562_v45 = vmax.f32 %v15351_v10, %v15387_v22  ;;  %11342 = vmatprep.subr.bf16.mxu0 %v12587_v28  ;;  %v12650_v5 = vcombine.low %v754_v27, %v770_v31  ;;  %v12683_v47 = vcombine.high %v786_v4, %v802_v42  ;;  %v12680_v21 = vcombine.low %v785_v36, %v801_v62  ;;  %v850_v2 = vld [vmem:[#allocation13 + $0xe78] sm:$0xff]  ;;  %v897_v11 = vld [vmem:[#allocation13 + $0xff0] sm:$0xff] }
 0x6a6   :  { %11220 = vmatpush1.bf16.msra.mxu1 %v12584_v56  ;;  %v12713_v44 = vcombine.high %v817_v46, %v833_v40  ;;  %v12682_v52 = vcombine.low %v786_v4, %v802_v42  ;;  %v865_v56 = vld [vmem:[#allocation13 + $0xef0] sm:$0xff]  ;;  %v12715_v30 = vcombine.high %v818_v51, %v834_v29  ;;  %v12712_v59 = vcombine.low %v817_v46, %v833_v40  ;;  %v866_v60 = vld [vmem:[#allocation13 + $0xef8] sm:$0xff] }
 0x6a7   :  { %11221 = vmatprep.subr.bf16.mxu1 %v12617_v15  ;;  %v12745_v28 = vcombine.high %v849_v54, %v865_v56  ;;  %v12714_v38 = vcombine.low %v818_v51, %v834_v29  ;;  %v12747_v15 = vcombine.high %v850_v2, %v866_v60  ;;  %v882_v0 = vld [vmem:[#allocation13 + $0xf78] sm:$0xff]  ;;  %v913_v27 = vld [vmem:[#allocation13 + $0x1070] sm:$0xff]  ;;  %vm12190_vm14 = vcmask 130048  }
 0x6a8   :  { %11343 = vmatpush1.bf16.msra.mxu0 %v12586_v26  ;;  %v12744_v26 = vcombine.low %v849_v54, %v865_v56  ;;  %v898_v19 = vld [vmem:[#allocation13 + $0xff8] sm:$0xff]  ;;  %v929_v31 = vld [vmem:[#allocation13 + $0x10f0] sm:$0xff] }
 0x6a9   :  { %11344 = vmatprep.subr.bf16.mxu0 %v12619_v49  ;;  %v12777_v49 = vcombine.high %v881_v6, %v897_v11  ;;  %v914_v36 = vld [vmem:[#allocation13 + $0x1078] sm:$0xff]  ;;  %v945_v4 = vld [vmem:[#allocation13 + $0x1170] sm:$0xff] }
 0x6aa   :  { %11222 = vmatpush1.bf16.msra.mxu1 %v12616_v24  ;;  %v12746_v24 = vcombine.low %v850_v2, %v866_v60  ;;  %v930_v62 = vld [vmem:[#allocation13 + $0x10f8] sm:$0xff]  ;;  %v961_v42 = vld [vmem:[#allocation13 + $0x11f0] sm:$0xff] }
 0x6ab   :  { %11223 = vmatprep.subr.bf16.mxu1 %v12649_v8  ;;  %v12779_v8 = vcombine.high %v882_v0, %v898_v19  ;;  %v946_v46 = vld [vmem:[#allocation13 + $0x1178] sm:$0xff]  ;;  %v977_v51 = vld [vmem:[#allocation13 + $0x1270] sm:$0xff] }
 0x6ac   :  { %11345 = vmatpush1.bf16.msra.mxu0 %v12618_v34  ;;  %v12776_v34 = vcombine.low %v881_v6, %v897_v11  ;;  %v962_v40 = vld [vmem:[#allocation13 + $0x11f8] sm:$0xff]  ;;  %v993_v29 = vld [vmem:[#allocation13 + $0x12f0] sm:$0xff] }
 0x6ad   :  { %11346 = vmatprep.subr.bf16.mxu0 %v12651_v41  ;;  %v12809_v41 = vcombine.high %v913_v27, %v929_v31  ;;  %v978_v54 = vld [vmem:[#allocation13 + $0x1278] sm:$0xff]  ;;  %v1009_v2 = vld [vmem:[#allocation13 + $0x1370] sm:$0xff] }
 0x6ae   :  { %11224 = vmatpush1.bf16.msra.mxu1 %v12648_v18  ;;  %v12778_v18 = vcombine.low %v882_v0, %v898_v19  ;;  %v994_v56 = vld [vmem:[#allocation13 + $0x12f8] sm:$0xff]  ;;  %v1025_v60 = vld [vmem:[#allocation13 + $0x13f0] sm:$0xff] }
 0x6af   :  { %11225 = vmatprep.subr.bf16.mxu1 %v12681_v43  ;;  %v12811_v43 = vcombine.high %v914_v36, %v930_v62  ;;  %v1010_v6 = vld [vmem:[#allocation13 + $0x1378] sm:$0xff]  ;;  %v1041_v0 = vld [vmem:[#allocation13 + $0x1470] sm:$0xff] }
 0x6b0   :  { %11347 = vmatpush1.bf16.msra.mxu0 %v12650_v5  ;;  %v12808_v5 = vcombine.low %v913_v27, %v929_v31  ;;  %v1026_v11 = vld [vmem:[#allocation13 + $0x13f8] sm:$0xff]  ;;  %v1057_v19 = vld [vmem:[#allocation13 + $0x14f0] sm:$0xff] }
 0x6b1   :  { %11348 = vmatprep.subr.bf16.mxu0 %v12683_v47  ;;  %v12841_v47 = vcombine.high %v945_v4, %v961_v42  ;;  %v1058_v27 = vld [vmem:[#allocation13 + $0x14f8] sm:$0xff]  ;;  %v12906_v31 = vcombine.low %v1010_v6, %v1026_v11  ;;  %v14156_v61 = vld [vmem:[#allocation17 + $0x78] sm:$0xff]  }
 0x6b2   :  { %11226 = vmatpush1.bf16.msra.mxu1 %v12680_v21  ;;  %v12810_v21 = vcombine.low %v914_v36, %v930_v62  ;;  %v12936_v62 = vcombine.low %v1041_v0, %v1057_v19  ;;  %v14151_v53 = vld [vmem:[#allocation17 + $0xa0] sm:$0xff]   ;;  %v14158_v9 = vld [vmem:[#allocation17 + $0x38] sm:$0xff]  }
 0x6b3   :  { %11227 = vmatprep.subr.bf16.mxu1 %v12713_v44  ;;  %v12843_v44 = vcombine.high %v946_v46, %v962_v40  ;;  %v14160_v10 = vld [vmem:[#allocation17 + $0xf8] sm:$0xff]  }
 0x6b4   :  { %11349 = vmatpush1.bf16.msra.mxu0 %v12682_v52  ;;  %v12840_v52 = vcombine.low %v945_v4, %v961_v42  ;;  %v14161_v13 = vld [vmem:[#allocation17 + $0xb8] sm:$0xff]  }
 0x6b5   :  { %11350 = vmatprep.subr.bf16.mxu0 %v12715_v30  ;;  %v12873_v30 = vcombine.high %v977_v51, %v993_v29 }
 0x6b6   :  { %11228 = vmatpush1.bf16.msra.mxu1 %v12712_v59  ;;  %v12842_v59 = vcombine.low %v946_v46, %v962_v40 }
 0x6b7   :  { %11229 = vmatprep.subr.bf16.mxu1 %v12745_v28  ;;  %v12875_v28 = vcombine.high %v978_v54, %v994_v56 }
 0x6b8   :  { %11351 = vmatpush1.bf16.msra.mxu0 %v12714_v38  ;;  %v12872_v38 = vcombine.low %v977_v51, %v993_v29 }
 0x6b9   :  { %11352 = vmatprep.subr.bf16.mxu0 %v12747_v15  ;;  %v12905_v15 = vcombine.high %v1009_v2, %v1025_v60 }
 0x6ba   :  { %11230 = vmatpush1.bf16.msra.mxu1 %v12744_v26  ;;  %v12874_v26 = vcombine.low %v978_v54, %v994_v56 }
 0x6bb   :  { %11231 = vmatprep.subr.bf16.mxu1 %v12777_v49  ;;  %v12904_v49 = vcombine.low %v1009_v2, %v1025_v60 }
 0x6bc   :  { %11353 = vmatpush1.bf16.msra.mxu0 %v12746_v24  ;;  %v1042_v24 = vld [vmem:[#allocation13 + $0x1478] sm:$0xff] }
 0x6bd   :  { %11354 = vmatprep.subr.bf16.mxu0 %v12779_v8  ;;  %v1073_v8 = vld [vmem:[#allocation13 + $0x1570] sm:$0xff]  ;;  %v12939_v36 = vcombine.high %v1042_v24, %v1058_v27  ;;  %v12938_v42 = vcombine.low %v1042_v24, %v1058_v27 }
 0x6be   :  { %11232 = vmatpush1.bf16.msra.mxu1 %v12776_v34  ;;  %v1089_v34 = vld [vmem:[#allocation13 + $0x15f0] sm:$0xff] }
 0x6bf   :  { %11242 = vmatprep.subr.bf16.mxu1 %v12809_v41  ;;  %v1074_v41 = vld [vmem:[#allocation13 + $0x1578] sm:$0xff]  ;;  %v12969_v4 = vcombine.high %v1073_v8, %v1089_v34  ;;  %v12968_v40 = vcombine.low %v1073_v8, %v1089_v34 }
 0x6c0   :  { %11355 = vmatpush1.bf16.msra.mxu0 %v12778_v18  ;;  %v1090_v18 = vld [vmem:[#allocation13 + $0x15f8] sm:$0xff] }
 0x6c1   :  { %11234 = vmatmul.mubr.bf16.vlgmr.msra.gmra.mrb[28].mxu1 %v15041_v20  ;;  %11365 = vmatprep.subr.bf16.mxu0 %v12811_v43  ;;  %v1105_v43 = vld [vmem:[#allocation13 + $0x1670] sm:$0xff]  ;;  %v12971_v46 = vcombine.high %v1074_v41, %v1090_v18  ;;  %v12970_v29 = vcombine.low %v1074_v41, %v1090_v18 }
 0x6c2   :  { %11243 = vmatpush1.bf16.msra.mxu1 %v12808_v5  ;;  %11274 = vmatprep.mubr.bf16.mxu1 %v15045_v25  ;;  %v1121_v5 = vld [vmem:[#allocation13 + $0x16f0] sm:$0xff] }
 0x6c3   :  { %11244 = vmatprep.subr.bf16.mxu1 %v12841_v47  ;;  %11357 = vmatmul.mubr.bf16.vlgmr.msra.gmra.mrb[32].mxu0 %v15041_v20  ;;  %v12907_v20 = vcombine.high %v1010_v6, %v1026_v11  ;;  %v1106_v47 = vld [vmem:[#allocation13 + $0x1678] sm:$0xff]  ;;  %v13001_v51 = vcombine.high %v1105_v43, %v1121_v5  ;;  %v13000_v56 = vcombine.low %v1105_v43, %v1121_v5 }
 0x6c4   :  { %11366 = vmatpush1.bf16.msra.mxu0 %v12810_v21  ;;  %11397 = vmatprep.mubr.bf16.mxu0 %v15045_v25  ;;  %v12937_v25 = vcombine.high %v1041_v0, %v1057_v19  ;;  %v1122_v21 = vld [vmem:[#allocation13 + $0x16f8] sm:$0xff] }
 0x6c5   :  { %11367 = vmatprep.subr.bf16.mxu0 %v12843_v44  ;;  %v1137_v44 = vld [vmem:[#allocation13 + $0x1770] sm:$0xff]  ;;  %v13003_v54 = vcombine.high %v1106_v47, %v1122_v21  ;;  %v13002_v60 = vcombine.low %v1106_v47, %v1122_v21 }
 0x6c6   :  { %11245 = vmatpush1.bf16.msra.mxu1 %v12840_v52  ;;  %v1153_v52 = vld [vmem:[#allocation13 + $0x17f0] sm:$0xff] }
 0x6c7   :  { %11246 = vmatprep.subr.bf16.mxu1 %v12873_v30  ;;  %v1138_v30 = vld [vmem:[#allocation13 + $0x1778] sm:$0xff]  ;;  %v13033_v2 = vcombine.high %v1137_v44, %v1153_v52  ;;  %v13032_v11 = vcombine.low %v1137_v44, %v1153_v52 }
 0x6c8   :  { %11368 = vmatpush1.bf16.msra.mxu0 %v12842_v59  ;;  %v1154_v59 = vld [vmem:[#allocation13 + $0x17f8] sm:$0xff] }
 0x6c9   :  { %11369 = vmatprep.subr.bf16.mxu0 %v12875_v28  ;;  %v1169_v28 = vld [vmem:[#allocation13 + $0x1870] sm:$0xff]  ;;  %v13035_v6 = vcombine.high %v1138_v30, %v1154_v59  ;;  %v13034_v19 = vcombine.low %v1138_v30, %v1154_v59 }
 0x6ca   :  { %11247 = vmatpush1.bf16.msra.mxu1 %v12872_v38  ;;  %v1185_v38 = vld [vmem:[#allocation13 + $0x18f0] sm:$0xff] }
 0x6cb   :  { %11248 = vmatprep.subr.bf16.mxu1 %v12905_v15  ;;  %v1170_v15 = vld [vmem:[#allocation13 + $0x1878] sm:$0xff]  ;;  %v13065_v0 = vcombine.high %v1169_v28, %v1185_v38  ;;  %v13064_v27 = vcombine.low %v1169_v28, %v1185_v38 }
 0x6cc   :  { %11370 = vmatpush1.bf16.msra.mxu0 %v12874_v26  ;;  %v1186_v26 = vld [vmem:[#allocation13 + $0x18f8] sm:$0xff] }
 0x6cd   :  { %11371 = vmatprep.subr.bf16.mxu0 %v12907_v20  ;;  %v1201_v20 = vld [vmem:[#allocation13 + $0x1970] sm:$0xff]  ;;  %v13067_v24 = vcombine.high %v1170_v15, %v1186_v26  ;;  %v13066_v34 = vcombine.low %v1170_v15, %v1186_v26 }
 0x6ce   :  { %11249 = vmatpush1.bf16.msra.mxu1 %v12904_v49  ;;  %v1217_v49 = vld [vmem:[#allocation13 + $0x19f0] sm:$0xff] }
 0x6cf   :  { %11250 = vmatprep.subr.bf16.mxu1 %v12937_v25  ;;  %v1202_v25 = vld [vmem:[#allocation13 + $0x1978] sm:$0xff]  ;;  %v13097_v8 = vcombine.high %v1201_v20, %v1217_v49  ;;  %v13096_v18 = vcombine.low %v1201_v20, %v1217_v49 }
 0x6d0   :  { %11372 = vmatpush1.bf16.msra.mxu0 %v12906_v31  ;;  %v1218_v31 = vld [vmem:[#allocation13 + $0x19f8] sm:$0xff] }
 0x6d1   :  { %11373 = vmatprep.subr.bf16.mxu0 %v12939_v36  ;;  %v1233_v36 = vld [vmem:[#allocation13 + $0x1a70] sm:$0xff]  ;;  %v13099_v41 = vcombine.high %v1202_v25, %v1218_v31  ;;  %v13098_v5 = vcombine.low %v1202_v25, %v1218_v31 }
 0x6d2   :  { %11251 = vmatpush1.bf16.msra.mxu1 %v12936_v62  ;;  %v1249_v62 = vld [vmem:[#allocation13 + $0x1af0] sm:$0xff] }
 0x6d3   :  { %11252 = vmatprep.subr.bf16.mxu1 %v12969_v4  ;;  %v1234_v4 = vld [vmem:[#allocation13 + $0x1a78] sm:$0xff]  ;;  %v13129_v43 = vcombine.high %v1233_v36, %v1249_v62  ;;  %v13128_v21 = vcombine.low %v1233_v36, %v1249_v62 }
 0x6d4   :  { %11374 = vmatpush1.bf16.msra.mxu0 %v12938_v42  ;;  %v1250_v42 = vld [vmem:[#allocation13 + $0x1af8] sm:$0xff] }
 0x6d5   :  { %11375 = vmatprep.subr.bf16.mxu0 %v12971_v46  ;;  %v1265_v46 = vld [vmem:[#allocation13 + $0x1b70] sm:$0xff]  ;;  %v13131_v47 = vcombine.high %v1234_v4, %v1250_v42  ;;  %v13130_v52 = vcombine.low %v1234_v4, %v1250_v42 }
 0x6d6   :  { %11253 = vmatpush1.bf16.msra.mxu1 %v12968_v40  ;;  %v1281_v40 = vld [vmem:[#allocation13 + $0x1bf0] sm:$0xff] }
 0x6d7   :  { %11254 = vmatprep.subr.bf16.mxu1 %v13001_v51  ;;  %v1266_v51 = vld [vmem:[#allocation13 + $0x1b78] sm:$0xff]  ;;  %v13161_v44 = vcombine.high %v1265_v46, %v1281_v40  ;;  %v13160_v59 = vcombine.low %v1265_v46, %v1281_v40 }
 0x6d8   :  { %11376 = vmatpush1.bf16.msra.mxu0 %v12970_v29  ;;  %v1282_v29 = vld [vmem:[#allocation13 + $0x1bf8] sm:$0xff] }
 0x6d9   :  { %11377 = vmatprep.subr.bf16.mxu0 %v13003_v54  ;;  %v1297_v54 = vld [vmem:[#allocation13 + $0x1c70] sm:$0xff]  ;;  %v13163_v30 = vcombine.high %v1266_v51, %v1282_v29  ;;  %v13162_v38 = vcombine.low %v1266_v51, %v1282_v29 }
 0x6da   :  { %11255 = vmatpush1.bf16.msra.mxu1 %v13000_v56  ;;  %v1313_v56 = vld [vmem:[#allocation13 + $0x1cf0] sm:$0xff] }
 0x6db   :  { %11256 = vmatprep.subr.bf16.mxu1 %v13033_v2  ;;  %v1298_v2 = vld [vmem:[#allocation13 + $0x1c78] sm:$0xff]  ;;  %v13193_v28 = vcombine.high %v1297_v54, %v1313_v56  ;;  %v13192_v26 = vcombine.low %v1297_v54, %v1313_v56 }
 0x6dc   :  { %11378 = vmatpush1.bf16.msra.mxu0 %v13002_v60  ;;  %v1314_v60 = vld [vmem:[#allocation13 + $0x1cf8] sm:$0xff] }
 0x6dd   :  { %11379 = vmatprep.subr.bf16.mxu0 %v13035_v6  ;;  %v1329_v6 = vld [vmem:[#allocation13 + $0x1d70] sm:$0xff]  ;;  %v13195_v15 = vcombine.high %v1298_v2, %v1314_v60  ;;  %v13194_v49 = vcombine.low %v1298_v2, %v1314_v60 }
 0x6de   :  { %11257 = vmatpush1.bf16.msra.mxu1 %v13032_v11  ;;  %v1345_v11 = vld [vmem:[#allocation13 + $0x1df0] sm:$0xff] }
 0x6df   :  { %11258 = vmatprep.subr.bf16.mxu1 %v13065_v0  ;;  %v1330_v0 = vld [vmem:[#allocation13 + $0x1d78] sm:$0xff]  ;;  %v13225_v20 = vcombine.high %v1329_v6, %v1345_v11  ;;  %v13224_v31 = vcombine.low %v1329_v6, %v1345_v11 }
 0x6e0   :  { %11380 = vmatpush1.bf16.msra.mxu0 %v13034_v19  ;;  %v1346_v19 = vld [vmem:[#allocation13 + $0x1df8] sm:$0xff] }
 0x6e1   :  { %11381 = vmatprep.subr.bf16.mxu0 %v13067_v24  ;;  %v1361_v24 = vld [vmem:[#allocation13 + $0x1e70] sm:$0xff]  ;;  %v13227_v25 = vcombine.high %v1330_v0, %v1346_v19  ;;  %v13226_v62 = vcombine.low %v1330_v0, %v1346_v19 }
 0x6e2   :  { %11259 = vmatpush1.bf16.msra.mxu1 %v13064_v27  ;;  %v1377_v27 = vld [vmem:[#allocation13 + $0x1ef0] sm:$0xff] }
 0x6e3   :  { %11260 = vmatprep.subr.bf16.mxu1 %v13097_v8  ;;  %v1362_v8 = vld [vmem:[#allocation13 + $0x1e78] sm:$0xff]  ;;  %v13257_v36 = vcombine.high %v1361_v24, %v1377_v27  ;;  %v13256_v42 = vcombine.low %v1361_v24, %v1377_v27 }
 0x6e4   :  { %11382 = vmatpush1.bf16.msra.mxu0 %v13066_v34  ;;  %v1378_v34 = vld [vmem:[#allocation13 + $0x1ef8] sm:$0xff] }
 0x6e5   :  { %11383 = vmatprep.subr.bf16.mxu0 %v13099_v41  ;;  %v1393_v41 = vld [vmem:[#allocation13 + $0x1f70] sm:$0xff]  ;;  %v13259_v4 = vcombine.high %v1362_v8, %v1378_v34  ;;  %v13258_v40 = vcombine.low %v1362_v8, %v1378_v34 }
 0x6e6   :  { %11261 = vmatpush1.bf16.msra.mxu1 %v13096_v18  ;;  %v1409_v18 = vld [vmem:[#allocation13 + $0x1ff0] sm:$0xff] }
 0x6e7   :  { %11262 = vmatprep.subr.bf16.mxu1 %v13129_v43  ;;  %v1394_v43 = vld [vmem:[#allocation13 + $0x1f78] sm:$0xff]  ;;  %v13289_v46 = vcombine.high %v1393_v41, %v1409_v18  ;;  %v13288_v29 = vcombine.low %v1393_v41, %v1409_v18 }
 0x6e8   :  { %11384 = vmatpush1.bf16.msra.mxu0 %v13098_v5  ;;  %v1410_v5 = vld [vmem:[#allocation13 + $0x1ff8] sm:$0xff] }
 0x6e9   :  { %11385 = vmatprep.subr.bf16.mxu0 %v13131_v47  ;;  %v1425_v47 = vld [vmem:[#allocation13 + $0x2070] sm:$0xff]  ;;  %v13291_v51 = vcombine.high %v1394_v43, %v1410_v5  ;;  %v13290_v56 = vcombine.low %v1394_v43, %v1410_v5  ;;  %v1554_v5 = vld [vmem:[#allocation13 + $0x2478] sm:$0xff] }
 0x6ea   :  { %11263 = vmatpush1.bf16.msra.mxu1 %v13128_v21  ;;  %v1441_v21 = vld [vmem:[#allocation13 + $0x20f0] sm:$0xff] }
 0x6eb   :  { %11264 = vmatprep.subr.bf16.mxu1 %v13161_v44  ;;  %v1426_v44 = vld [vmem:[#allocation13 + $0x2078] sm:$0xff]  ;;  %v13321_v54 = vcombine.high %v1425_v47, %v1441_v21  ;;  %v13320_v60 = vcombine.low %v1425_v47, %v1441_v21  ;;  %v1585_v47 = vld [vmem:[#allocation13 + $0x2570] sm:$0xff] }
 0x6ec   :  { %11386 = vmatpush1.bf16.msra.mxu0 %v13130_v52  ;;  %v1442_v52 = vld [vmem:[#allocation13 + $0x20f8] sm:$0xff]  ;;  %v1601_v21 = vld [vmem:[#allocation13 + $0x25f0] sm:$0xff] }
 0x6ed   :  { %11387 = vmatprep.subr.bf16.mxu0 %v13163_v30  ;;  %v1457_v30 = vld [vmem:[#allocation13 + $0x2170] sm:$0xff]  ;;  %v13323_v2 = vcombine.high %v1426_v44, %v1442_v52  ;;  %v13322_v11 = vcombine.low %v1426_v44, %v1442_v52  ;;  %v1586_v44 = vld [vmem:[#allocation13 + $0x2578] sm:$0xff] }
 0x6ee   :  { %11265 = vmatpush1.bf16.msra.mxu1 %v13160_v59  ;;  %v1473_v59 = vld [vmem:[#allocation13 + $0x21f0] sm:$0xff]  ;;  %v1602_v52 = vld [vmem:[#allocation13 + $0x25f8] sm:$0xff] }
 0x6ef   :  { %11266 = vmatprep.subr.bf16.mxu1 %v13193_v28  ;;  %v1458_v28 = vld [vmem:[#allocation13 + $0x2178] sm:$0xff]  ;;  %v13353_v6 = vcombine.high %v1457_v30, %v1473_v59  ;;  %v13352_v19 = vcombine.low %v1457_v30, %v1473_v59  ;;  %v1617_v30 = vld [vmem:[#allocation13 + $0x2670] sm:$0xff] }
 0x6f0   :  { %11388 = vmatpush1.bf16.msra.mxu0 %v13162_v38  ;;  %v1474_v38 = vld [vmem:[#allocation13 + $0x21f8] sm:$0xff]  ;;  %v1633_v59 = vld [vmem:[#allocation13 + $0x26f0] sm:$0xff] }
 0x6f1   :  { %11389 = vmatprep.subr.bf16.mxu0 %v13195_v15  ;;  %v1489_v15 = vld [vmem:[#allocation13 + $0x2270] sm:$0xff]  ;;  %v13355_v0 = vcombine.high %v1458_v28, %v1474_v38  ;;  %v13354_v27 = vcombine.low %v1458_v28, %v1474_v38  ;;  %v1618_v28 = vld [vmem:[#allocation13 + $0x2678] sm:$0xff] }
 0x6f2   :  { %11267 = vmatpush1.bf16.msra.mxu1 %v13192_v26  ;;  %v1505_v26 = vld [vmem:[#allocation13 + $0x22f0] sm:$0xff]  ;;  %v1634_v38 = vld [vmem:[#allocation13 + $0x26f8] sm:$0xff] }
 0x6f3   :  { %11268 = vmatprep.subr.bf16.mxu1 %v13225_v20  ;;  %v1490_v20 = vld [vmem:[#allocation13 + $0x2278] sm:$0xff]  ;;  %v13385_v24 = vcombine.high %v1489_v15, %v1505_v26  ;;  %v13384_v34 = vcombine.low %v1489_v15, %v1505_v26  ;;  %v1649_v15 = vld [vmem:[#allocation13 + $0x2770] sm:$0xff] }
 0x6f4   :  { %11390 = vmatpush1.bf16.msra.mxu0 %v13194_v49  ;;  %v1506_v49 = vld [vmem:[#allocation13 + $0x22f8] sm:$0xff]  ;;  %v1665_v26 = vld [vmem:[#allocation13 + $0x27f0] sm:$0xff] }
 0x6f5   :  { %11391 = vmatprep.subr.bf16.mxu0 %v13227_v25  ;;  %v1521_v25 = vld [vmem:[#allocation13 + $0x2370] sm:$0xff]  ;;  %v13387_v8 = vcombine.high %v1490_v20, %v1506_v49  ;;  %v13386_v18 = vcombine.low %v1490_v20, %v1506_v49  ;;  %v1650_v20 = vld [vmem:[#allocation13 + $0x2778] sm:$0xff] }
 0x6f6   :  { %11269 = vmatpush1.bf16.msra.mxu1 %v13224_v31  ;;  %v1537_v31 = vld [vmem:[#allocation13 + $0x23f0] sm:$0xff]  ;;  %v1666_v49 = vld [vmem:[#allocation13 + $0x27f8] sm:$0xff] }
 0x6f7   :  { %11270 = vmatprep.subr.bf16.mxu1 %v13257_v36  ;;  %v1522_v36 = vld [vmem:[#allocation13 + $0x2378] sm:$0xff]  ;;  %v13417_v41 = vcombine.high %v1521_v25, %v1537_v31  ;;  %v13416_v43 = vcombine.low %v1521_v25, %v1537_v31  ;;  %v1681_v25 = vld [vmem:[#allocation13 + $0x2870] sm:$0xff] }
 0x6f8   :  { %11392 = vmatpush1.bf16.msra.mxu0 %v13226_v62  ;;  %v1538_v62 = vld [vmem:[#allocation13 + $0x23f8] sm:$0xff]  ;;  %v1697_v31 = vld [vmem:[#allocation13 + $0x28f0] sm:$0xff] }
 0x6f9   :  { %11393 = vmatprep.subr.bf16.mxu0 %v13259_v4  ;;  %v1553_v4 = vld [vmem:[#allocation13 + $0x2470] sm:$0xff] }
 0x6fa   :  { %11271 = vmatpush1.bf16.msra.mxu1 %v13256_v42  ;;  %v13419_v42 = vcombine.high %v1522_v36, %v1538_v62 }
 0x6fb   :  { %11272 = vmatprep.subr.bf16.mxu1 %v13289_v46  ;;  %v1570_v46 = vld [vmem:[#allocation13 + $0x24f8] sm:$0xff] }
 0x6fc   :  { %11394 = vmatpush1.bf16.msra.mxu0 %v13258_v40  ;;  %v13418_v40 = vcombine.low %v1522_v36, %v1538_v62  ;;  %v1682_v36 = vld [vmem:[#allocation13 + $0x2878] sm:$0xff] }
 0x6fd   :  { %11395 = vmatprep.subr.bf16.mxu0 %v13291_v51  ;;  %v13451_v51 = vcombine.high %v1554_v5, %v1570_v46  ;;  %v1698_v62 = vld [vmem:[#allocation13 + $0x28f8] sm:$0xff] }
 0x6fe   :  { %11273 = vmatpush1.bf16.msra.mxu1 %v13288_v29 }
 0x6ff   :  { %11283 = vmatprep.subr.bf16.mxu1 %v13321_v54  ;;  %v13481_v54 = vcombine.high %v1585_v47, %v1601_v21 }
 0x700   :  { %11396 = vmatpush1.bf16.msra.mxu0 %v13290_v56  ;;  %v13450_v56 = vcombine.low %v1554_v5, %v1570_v46  ;;  %v1714_v5 = vld [vmem:[#allocation13 + $0x2978] sm:$0xff] }
 0x701   :  { %11275 = vmatmul.mubr.bf16.vlgmr.msra.gmra.mrb[28].mxu1 %v15055_v32  ;;  %11406 = vmatprep.subr.bf16.mxu0 %v13323_v2  ;;  %v13483_v2 = vcombine.high %v1586_v44, %v1602_v52  ;;  %v1730_v46 = vld [vmem:[#allocation13 + $0x29f8] sm:$0xff] }
 0x702   :  { %11284 = vmatpush1.bf16.msra.mxu1 %v13320_v60  ;;  %13754 = vmatprep.mubr.msk.bf16.mxu1 %vm9375_vm5, %v15059_v37  ;;  %v13480_v60 = vcombine.low %v1585_v47, %v1601_v21  ;;  %v1745_v47 = vld [vmem:[#allocation13 + $0x2a70] sm:$0xff] }
 0x703   :  { %11285 = vmatprep.subr.bf16.mxu1 %v13353_v6  ;;  %11398 = vmatmul.mubr.bf16.vlgmr.msra.gmra.mrb[32].mxu0 %v15055_v32  ;;  %v1569_v32 = vld [vmem:[#allocation13 + $0x24f0] sm:$0xff]  ;;  %v13513_v6 = vcombine.high %v1617_v30, %v1633_v59 }
 0x704   :  { %11407 = vmatpush1.bf16.msra.mxu0 %v13322_v11  ;;  %13755 = vmatprep.mubr.msk.bf16.mxu0 %vm9375_vm5, %v15059_v37  ;;  %v13449_v37 = vcombine.high %v1553_v4, %v1569_v32  ;;  %v13448_v29 = vcombine.low %v1553_v4, %v1569_v32  ;;  %v13482_v11 = vcombine.low %v1586_v44, %v1602_v52  ;;  %v1713_v4 = vld [vmem:[#allocation13 + $0x2970] sm:$0xff]  ;;  %v1746_v44 = vld [vmem:[#allocation13 + $0x2a78] sm:$0xff] }
 0x705   :  { %11408 = vmatprep.subr.bf16.mxu0 %v13355_v0  ;;  %v13515_v0 = vcombine.high %v1618_v28, %v1634_v38  ;;  %v1729_v32 = vld [vmem:[#allocation13 + $0x29f0] sm:$0xff]  ;;  %v1762_v52 = vld [vmem:[#allocation13 + $0x2af8] sm:$0xff] }
 0x706   :  { %11286 = vmatpush1.bf16.msra.mxu1 %v13352_v19  ;;  %v13512_v19 = vcombine.low %v1617_v30, %v1633_v59  ;;  %v1761_v21 = vld [vmem:[#allocation13 + $0x2af0] sm:$0xff] }
 0x707   :  { %11287 = vmatprep.subr.bf16.mxu1 %v13385_v24  ;;  %v13545_v24 = vcombine.high %v1649_v15, %v1665_v26  ;;  %v1777_v30 = vld [vmem:[#allocation13 + $0x2b70] sm:$0xff] }
 0x708   :  { %11409 = vmatpush1.bf16.msra.mxu0 %v13354_v27  ;;  %v13514_v27 = vcombine.low %v1618_v28, %v1634_v38  ;;  %v1793_v59 = vld [vmem:[#allocation13 + $0x2bf0] sm:$0xff]  ;;  %v1778_v28 = vld [vmem:[#allocation13 + $0x2b78] sm:$0xff] }
 0x709   :  { %11410 = vmatprep.subr.bf16.mxu0 %v13387_v8  ;;  %v13547_v8 = vcombine.high %v1650_v20, %v1666_v49  ;;  %v1794_v38 = vld [vmem:[#allocation13 + $0x2bf8] sm:$0xff] }
 0x70a   :  { %11288 = vmatpush1.bf16.msra.mxu1 %v13384_v34  ;;  %v13544_v34 = vcombine.low %v1649_v15, %v1665_v26  ;;  %v13642_v15 = vcombine.low %v1746_v44, %v1762_v52  ;;  %v1825_v26 = vld [vmem:[#allocation13 + $0x2cf0] sm:$0xff] }
 0x70b   :  { %11289 = vmatprep.subr.bf16.mxu1 %v13417_v41  ;;  %v13577_v41 = vcombine.high %v1681_v25, %v1697_v31 }
 0x70c   :  { %11411 = vmatpush1.bf16.msra.mxu0 %v13386_v18  ;;  %v13546_v18 = vcombine.low %v1650_v20, %v1666_v49  ;;  %v13675_v20 = vcombine.high %v1778_v28, %v1794_v38  ;;  %v1810_v49 = vld [vmem:[#allocation13 + $0x2c78] sm:$0xff] }
 0x70d   :  { %11412 = vmatprep.subr.bf16.mxu0 %v13419_v42  ;;  %v13579_v42 = vcombine.high %v1682_v36, %v1698_v62 }
 0x70e   :  { %11290 = vmatpush1.bf16.msra.mxu1 %v13416_v43  ;;  %v13576_v43 = vcombine.low %v1681_v25, %v1697_v31  ;;  %v1842_v25 = vld [vmem:[#allocation13 + $0x2d78] sm:$0xff] }
 0x70f   :  { %11291 = vmatprep.subr.bf16.mxu1 %v13449_v37  ;;  %v13609_v37 = vcombine.high %v1713_v4, %v1729_v32  ;;  %v1858_v31 = vld [vmem:[#allocation13 + $0x2df8] sm:$0x11] }
 0x710   :  { %11413 = vmatpush1.bf16.msra.mxu0 %v13418_v40  ;;  %v13578_v40 = vcombine.low %v1682_v36, %v1698_v62  ;;  %v13674_v36 = vcombine.low %v1778_v28, %v1794_v38  ;;  %v14142_v28 = vld [vmem:[#allocation17 + $0x18] sm:$0xff]   ;;  %v14144_v38 = vld [vmem:[#allocation17 + $0x60] sm:$0xff]  }
 0x711   :  { %11414 = vmatprep.subr.bf16.mxu0 %v13451_v51  ;;  %v13611_v51 = vcombine.high %v1714_v5, %v1730_v46 }
 0x712   :  { %11292 = vmatpush1.bf16.msra.mxu1 %v13448_v29  ;;  %v13608_v29 = vcombine.low %v1713_v4, %v1729_v32 }
 0x713   :  { %11293 = vmatprep.subr.bf16.mxu1 %v13481_v54  ;;  %v13641_v54 = vcombine.high %v1745_v47, %v1761_v21 }
 0x714   :  { %11415 = vmatpush1.bf16.msra.mxu0 %v13450_v56  ;;  %v13610_v56 = vcombine.low %v1714_v5, %v1730_v46 }
 0x715   :  { %11416 = vmatprep.subr.bf16.mxu0 %v13483_v2  ;;  %v13643_v2 = vcombine.high %v1746_v44, %v1762_v52  ;;  %v14137_v44 = vld [vmem:[#allocation17 + $0xc8] sm:$0xff]  }
 0x716   :  { %11294 = vmatpush1.bf16.msra.mxu1 %v13480_v60  ;;  %v13640_v60 = vcombine.low %v1745_v47, %v1761_v21  ;;  %v14133_v47 = vld [vmem:[#allocation17 + $0xc0] sm:$0xff]   ;;  %v14134_v52 = vld [vmem:[#allocation17 + $0x8] sm:$0xff]  }
 0x717   :  { %11295 = vmatprep.subr.bf16.mxu1 %v13513_v6  ;;  %v13673_v6 = vcombine.high %v1777_v30, %v1793_v59  ;;  %v14131_v21 = vld [vmem:[#allocation17] sm:$0xff]  }
 0x718   :  { %11417 = vmatpush1.bf16.msra.mxu0 %v13482_v11  ;;  %v1809_v11 = vld [vmem:[#allocation13 + $0x2c70] sm:$0xff] }
 0x719   :  { %11418 = vmatprep.subr.bf16.mxu0 %v13515_v0  ;;  %v1841_v0 = vld [vmem:[#allocation13 + $0x2d70] sm:$0xff] }
 0x71a   :  { %11296 = vmatpush1.bf16.msra.mxu1 %v13512_v19  ;;  %v1857_v19 = vld [vmem:[#allocation13 + $0x2df0] sm:$0x11] }
 0x71b   :  { %11297 = vmatprep.subr.bf16.mxu1 %v13545_v24  ;;  %v13672_v24 = vcombine.low %v1777_v30, %v1793_v59  ;;  %v13736_v4 = vcombine.low %v1841_v0, %v1857_v19  ;;  %v14138_v30 = vld [vmem:[#allocation17 + $0x10] sm:$0xff]   ;;  %v14140_v59 = vld [vmem:[#allocation17 + $0x58] sm:$0xff]  }
 0x71c   :  { %11419 = vmatpush1.bf16.msra.mxu0 %v13514_v27  ;;  %v1826_v27 = vld [vmem:[#allocation13 + $0x2cf8] sm:$0xff] }
 0x71d   :  { %11420 = vmatprep.subr.bf16.mxu0 %v13547_v8  ;;  %v13705_v8 = vcombine.high %v1809_v11, %v1825_v26  ;;  %v13707_v62 = vcombine.high %v1810_v49, %v1826_v27  ;;  %v9468_v46 = vand.u32 %v13736_v4, %v15067_v17 }
 0x71e   :  { %11298 = vmatpush1.bf16.msra.mxu1 %v13544_v34  ;;  %v13737_v34 = vcombine.high %v1841_v0, %v1857_v19 }
 0x71f   :  { %11299 = vmatprep.subr.bf16.mxu1 %v13577_v41  ;;  %v13739_v41 = vcombine.high %v1842_v25, %v1858_v31 }
 0x720   :  { %11421 = vmatpush1.bf16.msra.mxu0 %v13546_v18  ;;  %v13704_v18 = vcombine.low %v1809_v11, %v1825_v26  ;;  %v9471_v32 = vand.u32 %v13737_v34, %v15067_v17  ;;  %v14146_v11 = vld [vmem:[#allocation17 + $0x20] sm:$0xff]  }
 0x721   :  { %11422 = vmatprep.subr.bf16.mxu0 %v13579_v42  ;;  %v13706_v42 = vcombine.low %v1810_v49, %v1826_v27  ;;  %v9477_v5 = vand.u32 %v13739_v41, %v15067_v17  ;;  %v15407_v26 = vld [vmem:[#allocation14 + $0x18] sm:$0xff] }
 0x722   :  { %11300 = vmatpush1.bf16.msra.mxu1 %v13576_v43  ;;  %v13738_v43 = vcombine.low %v1842_v25, %v1858_v31  ;;  %v1966_v0 = vrot.slane %v15407_v26, %v15130_v14  ;;  %v1970_v19 = vrot.slane %v15407_v26, %v15135_v23  ;;  %v1986_v22 = vrot.slane %v15407_v26, %v15157_v57 }
 0x723   :  { %11301 = vmatprep.subr.bf16.mxu1 %v13609_v37  ;;  %v14130_v37 = vld [vmem:[#allocation17 + $0x40] sm:$0xff]  }
 0x724   :  { %11423 = vmatpush1.bf16.msra.mxu0 %v13578_v40  ;;  %v9474_v40 = vand.u32 %v13738_v43, %v15067_v17  ;;  %v14139_v17 = vld [vmem:[#allocation17 + $0x88] sm:$0xff]  }
 0x725   :  { %11424 = vmatprep.subr.bf16.mxu0 %v13611_v51  ;;  %v14132_v51 = vld [vmem:[#allocation17 + $0x48] sm:$0xff]  }
 0x726   :  { %11302 = vmatpush1.bf16.msra.mxu1 %v13608_v29  ;;  %v14135_v29 = vld [vmem:[#allocation17 + $0x80] sm:$0xff]  }
 0x727   :  { %11303 = vmatprep.subr.bf16.mxu1 %v13641_v54  ;;  %v14136_v54 = vld [vmem:[#allocation17 + $0x50] sm:$0xff]  }
 0x728   :  { %11425 = vmatpush1.bf16.msra.mxu0 %v13610_v56  ;;  %v14141_v56 = vld [vmem:[#allocation17 + $0xd0] sm:$0xff]  }
 0x729   :  { %11426 = vmatprep.subr.bf16.mxu0 %v13643_v2  ;;  %v14143_v2 = vld [vmem:[#allocation17 + $0x90] sm:$0xff]  }
 0x72a   :  { %11304 = vmatpush1.bf16.msra.mxu1 %v13640_v60  ;;  %v14145_v60 = vld [vmem:[#allocation17 + $0xd8] sm:$0xff]  }
 0x72b   :  { %11305 = vmatprep.subr.bf16.mxu1 %v13673_v6  ;;  %v14149_v6 = vld [vmem:[#allocation17 + $0xe0] sm:$0xff]  }
 0x72c   :  { %11427 = vmatpush1.bf16.msra.mxu0 %v13642_v15  ;;  %v14148_v15 = vld [vmem:[#allocation17 + $0x68] sm:$0xff]  }
 0x72d   :  { %11428 = vmatprep.subr.bf16.mxu0 %v13675_v20  ;;  %v1974_v20 = vrot.slane %v15407_v26, %v15140_v33 }
 0x72e   :  { %11306 = vmatpush1.bf16.msra.mxu1 %v13672_v24  ;;  %v1978_v24 = vrot.slane %v15407_v26, %v15145_v16 }
 0x72f   :  { %11307 = vmatprep.subr.bf16.mxu1 %v13705_v8 }
 0x730   :  { %11429 = vmatpush1.bf16.msra.mxu0 %v13674_v36 }
 0x731   :  { %11430 = vmatprep.subr.bf16.mxu0 %v13707_v62 }
 0x732   :  { %11308 = vmatpush1.bf16.msra.mxu1 %v13704_v18 }
 0x733   :  { %11309 = vmatprep.subr.bf16.mxu1 %v9471_v32 }
 0x734   :  { %11431 = vmatpush1.bf16.msra.mxu0 %v13706_v42 }
 0x735   :  { %11432 = vmatprep.subr.bf16.mxu0 %v9477_v5 }
 0x736   :  { %11310 = vmatpush1.bf16.msra.mxu1 %v9468_v46 }
 0x737   :  { %13816 = vmatprep.subr.bf16.mxu1 %v14130_v37 }
 0x738   :  { %11433 = vmatpush1.bf16.msra.mxu0 %v9474_v40 }
 0x739   :  { %11316 = vmatmul.mubr.bf16.vlgmr.msra.gmra.mrb[28].mxu1 %v15075_v39  ;;  %13838 = vmatprep.subr.bf16.mxu0 %v14133_v47 }
 0x73a   :  { %13817 = vmatpush3.bf16.msra.mxu1 %v14131_v21 }
 0x73b   :  { %11439 = vmatmul.mubr.bf16.vlgmr.msra.gmra.mrb[32].mxu0 %v15075_v39  ;;  %13818 = vmatprep.subr.bf16.mxu1 %v14132_v51  ;;  %v14147_v39 = vld [vmem:[#allocation17 + $0x98] sm:$0xff]   ;;  %v14150_v51 = vld [vmem:[#allocation17 + $0x28] sm:$0xff]  }
 0x73c   :  { %13839 = vmatpush3.bf16.msra.mxu0 %v14135_v29  ;;  %v14154_v29 = vld [vmem:[#allocation17 + $0x30] sm:$0xff]  }
 0x73d   :  { %13840 = vmatprep.subr.bf16.mxu0 %v14137_v44  ;;  %v14155_v44 = vld [vmem:[#allocation17 + $0xa8] sm:$0xff]  }
 0x73e   :  { %13819 = vmatpush3.bf16.msra.mxu1 %v14134_v52 }
 0x73f   :  { %13820 = vmatprep.subr.bf16.mxu1 %v14136_v54  ;;  %v1994_v54 = vrot.slane %v15407_v26, %v15166_v3 }
 0x740   :  { %13841 = vmatpush3.bf16.msra.mxu0 %v14139_v17 }
 0x741   :  { %13842 = vmatprep.subr.bf16.mxu0 %v14141_v56 }
 0x742   :  { %13821 = vmatpush3.bf16.msra.mxu1 %v14138_v30 }
 0x743   :  { %13822 = vmatprep.subr.bf16.mxu1 %v14140_v59 }
 0x744   :  { %13843 = vmatpush3.bf16.msra.mxu0 %v14143_v2 }
 0x745   :  { %13844 = vmatprep.subr.bf16.mxu0 %v14145_v60 }
 0x746   :  { %13823 = vmatpush3.bf16.msra.mxu1 %v14142_v28 }
 0x747   :  { %13824 = vmatprep.subr.bf16.mxu1 %v14144_v38 }
 0x748   :  { %13845 = vmatpush3.bf16.msra.mxu0 %v14147_v39 }
 0x749   :  { %13846 = vmatprep.subr.bf16.mxu0 %v14149_v6 }
 0x74a   :  { %13825 = vmatpush3.bf16.msra.mxu1 %v14146_v11 }
 0x74b   :  { %13826 = vmatprep.subr.bf16.mxu1 %v14148_v15 }
 0x74c   :  { %13847 = vmatpush3.bf16.msra.mxu0 %v14151_v53 }
 0x74e   :  { %13827 = vmatpush3.bf16.msra.mxu1 %v14150_v51  ;;  %v14176_v51 = vld [vmem:[#allocation23 + $0x38] sm:$0xff]  }
 0x74f   :  { %13828 = vmatprep.subr.bf16.mxu1 %v14152_v63 }
 0x752   :  { %13829 = vmatpush3.bf16.msra.mxu1 %v14154_v29 }
 0x753   :  { %13830 = vmatprep.subr.bf16.mxu1 %v14156_v61 }
 0x754   :  { %v11071_v49 = vpop.f32.mrb[24].mxu1 }
 0x755   :  { %v13958_v27 = vadd.f32 %v11071_v49, %v1966_v0  ;;  %v11073_v25 = vpop.f32.mrb[25].mxu1 }
 0x756   :  { %v13959_v31 = vadd.f32 %v11073_v25, %v1970_v19  ;;  %v11075_v8 = vpop.f32.mrb[26].mxu1  ;;  %v11194_v34 = vpop.f32.mrb[28].mxu0  ;;  %13831 = vmatpush3.bf16.msra.mxu1 %v14158_v9  ;;  %v14162_v25 = vld [vmem:[#allocation16] sm:$0xff]  }
 0x757   :  { %vm11471_vm5 = vcmp.ge.f32.partialorder %v13958_v27, 0.0  ;;  %v11503_v36 = vmul.f32 0.01, %v13958_v27  ;;  %v11076_v62 = vpop.f32.mrb[27].mxu1  ;;  %v13960_v41 = vadd.f32 %v11194_v34, %v1974_v20  ;;  %v11196_v14 = vpop.f32.mrb[29].mxu0  ;;  %13886 = vmatprep.subr.bf16.mxu1 %v14668_v1 }
 0x758   :  { %vm11472_vm3 = vcmp.ge.f32.partialorder %v13959_v31, 0.0  ;;  %v11504_v18 = vmul.f32 0.01, %v13959_v31  ;;  %v13961_v23 = vadd.f32 %v11196_v14, %v1978_v24  ;;  %v11198_v4 = vpop.f32.mrb[30].mxu0  ;;  %v14163_v62 = vld [vmem:[#allocation16 + $0x8] sm:$0xff]   ;;  %v14165_v14 = vld [vmem:[#allocation16 + $0x18] sm:$0xff]  }
 0x759   :  { %v11535_v32 = vsel %vm11471_vm5, %v13958_v27, %v11503_v36  ;;  %vm11473_vm4 = vcmp.ge.f32.partialorder %v13960_v41, 0.0  ;;  %v11505_v33 = vmul.f32 0.01, %v13960_v41  ;;  %v11199_v42 = vpop.f32.mrb[31].mxu0  ;;  %v14167_v4 = vld [vmem:[#allocation16 + $0x28] sm:$0xff]  }
 0x75a   :  { %v11563_v16 = vmax.f32 %v11559_v7, %v11535_v32  ;;  %v11536_v43 = vsel %vm11472_vm3, %v13959_v31, %v11504_v18  ;;  %vm11474_vm6 = vcmp.ge.f32.partialorder %v13961_v23, 0.0  ;;  %v11506_v5 = vmul.f32 0.01, %v13961_v23  ;;  %v14153_v7 = vld [vmem:[#allocation17 + $0xe8] sm:$0xff]  }
 0x75b   :  { %v11564_v46 = vmax.f32 %v11560_v12, %v11536_v43  ;;  %v11537_v37 = vsel %vm11473_vm4, %v13960_v41, %v11505_v33  ;;  %13848 = vmatprep.subr.bf16.mxu0 %v14153_v7  ;;  %v14159_v12 = vld [vmem:[#allocation17 + $0xb0] sm:$0xff]   ;;  %v14164_v41 = vld [vmem:[#allocation16 + $0x10] sm:$0xff]  }
 0x75c   :  { %v11565_v40 = vmax.f32 %v11561_v48, %v11537_v37  ;;  %v11538_v47 = vsel %vm11474_vm6, %v13961_v23, %v11506_v5  ;;  %13849 = vmatpush3.bf16.msra.mxu0 %v14155_v44  ;;  %v1982_v48 = vrot.slane %v15407_v26, %v15154_v55  ;;  %v14166_v18 = vld [vmem:[#allocation16 + $0x20] sm:$0xff]   ;;  %v12259_v23 = vld [vmem:[#allocation11] ss:$0 sm:$0xff]  ;;  %v14168_v33 = vld [vmem:[#allocation16 + $0x30] ss:$0 sps:$4 sm:$0x33]  }
 0x75d   :  { %v11566_v21 = vmax.f32 %v11562_v45, %v11538_v47  ;;  %13850 = vmatprep.subr.bf16.mxu0 %v14157_v58  ;;  %v1990_v45 = vrot.slane %v15407_v26, %v15160_v35  ;;  %v380_v32 = vadd.f32 %v12259_v23, %v15081_v50  ;;  %v14169_v5 = vld [vmem:[#allocation23] sm:$0xff]   ;;  %v14170_v50 = vld [vmem:[#allocation23 + $0x8] sm:$0xff]   ;;  %v14172_v37 = vld [vmem:[#allocation23 + $0x18] sm:$0xff]  }
 0x75e   :  { %v14174_v47 = vld [vmem:[#allocation23 + $0x28] sm:$0xff]  }
 0x75f   :  { %v383_v42 = vmax.f32 %v380_v32, 0.0 }
 0x760   :  { %13851 = vmatpush3.bf16.msra.mxu0 %v14159_v12 }
 0x761   :  { %13852 = vmatprep.subr.bf16.mxu0 %v14160_v10  ;;  %v11571_v43 = vpack.c.bf16 %v383_v42, %v383_v42 }
 0x764   :  { %13853 = vmatpush3.bf16.msra.mxu0 %v14161_v13 }
 0x765   :  { %13904 = vmatprep.subr.bf16.mxu0 %v14668_v1 }
 0x80c   :  { %v11317_v52 = vpop.f32.mrb[28].mxu1 }
 0x80d   :  { %v13962_v17 = vadd.f32 %v11317_v52, %v1982_v48  ;;  %v11319_v56 = vpop.f32.mrb[29].mxu1 }
 0x80e   :  { %v13963_v30 = vadd.f32 %v11319_v56, %v1986_v22  ;;  %v11321_v59 = vpop.f32.mrb[30].mxu1  ;;  %v11440_v2 = vpop.f32.mrb[32].mxu0  ;;  %v13796_v22 = vld [vmem:[#allocation19] ss:$0 sm:$0xff] }
 0x80f   :  { %vm11475_vm7 = vcmp.ge.f32.partialorder %v13962_v17, 0.0  ;;  %v11507_v60 = vmul.f32 0.01, %v13962_v17  ;;  %v11322_v28 = vpop.f32.mrb[31].mxu1  ;;  %v13964_v38 = vadd.f32 %v11440_v2, %v1990_v45  ;;  %v11442_v55 = vpop.f32.mrb[33].mxu0 }
 0x810   :  { %vm11476_vm8 = vcmp.ge.f32.partialorder %v13963_v30, 0.0  ;;  %v11508_v39 = vmul.f32 0.01, %v13963_v30  ;;  %v13965_v57 = vadd.f32 %v11442_v55, %v1994_v54  ;;  %v11444_v6 = vpop.f32.mrb[34].mxu0  ;;  %v13798_v2 = vld [vmem:[#allocation22] ss:$0 sm:$0xff] }
 0x811   :  { %v11539_v11 = vsel %vm11475_vm7, %v13962_v17, %v11507_v60  ;;  %vm11477_vm9 = vcmp.ge.f32.partialorder %v13964_v38, 0.0  ;;  %v11509_v35 = vmul.f32 0.01, %v13964_v38  ;;  %v11445_v15 = vpop.f32.mrb[35].mxu0  ;;  %v12039_v28 = vld [vmem:[#allocation7] sm:$0xff] }
 0x812   :  { %v11567_v0 = vmax.f32 %v11563_v16, %v11539_v11  ;;  %v11540_v3 = vsel %vm11476_vm8, %v13963_v30, %v11508_v39  ;;  %vm11478_vm10 = vcmp.ge.f32.partialorder %v13965_v57, 0.0  ;;  %v11510_v26 = vmul.f32 0.01, %v13965_v57  ;;  %v13797_v30 = vld [vmem:[#allocation20] ss:$0 sm:$0xff] }
 0x813   :  { %v11541_v19 = vsel %vm11477_vm9, %v13964_v38, %v11509_v35  ;;  %v11568_v20 = vmax.f32 %v11564_v46, %v11540_v3  ;;  %v11970_v16 = vsel %vm11968_vm11, %v14168_v33, 0  ;;  %v14171_v46 = vld [vmem:[#allocation23 + $0x10] sm:$0xff]   ;;  %v13799_v6 = vld [vmem:[#allocation25] ss:$0 sm:$0xff] }
 0x814   :  { %v11569_v49 = vmax.f32 %v11565_v40, %v11541_v19  ;;  %v11542_v24 = vsel %vm11478_vm10, %v13965_v57, %v11510_v26  ;;  %v11585_v8 = vpack.c.bf16 %v11567_v0, %v11567_v0  ;;  %v14173_v40 = vld [vmem:[#allocation23 + $0x20] sm:$0xff]  }
 0x815   :  { %v11586_v27 = vpack.c.bf16 %v11568_v20, %v11568_v20  ;;  %v11570_v31 = vmax.f32 %v11566_v21, %v11542_v24  ;;  %v14175_v21 = vld [vmem:[#allocation23 + $0x30] sm:$0xff]   ;;  %v14177_v57 = vld [vmem:[#allocation29] sm:$0xff]   ;;  %v13808_v26 = vld [vmem:[#allocation26] ss:$0 sm:$0xff] }
 0x816   :  { %v11587_v36 = vpack.c.bf16 %v11569_v49, %v11569_v49  ;;  %v13809_v49 = vld [vmem:[#allocation28] ss:$0 sm:$0xff] }
 0x817   :  { %11877 = vmatprep.mubr.bf16.mxu1 %v11586_v27  ;;  %v11588_v34 = vpack.c.bf16 %v11570_v31, %v11570_v31  ;;  %v12172_v27 = vld [vmem:[#allocation8] sm:$0xff] }
 0x818   :  { %11878 = vmatmul.mubr.bf16.vlgmr.msra.gmra.mrb[32].mxu1 %v11585_v8 }
 0x819   :  { %13887 = vmatpush3.bf16.msra.mxu1 %v14162_v25  ;;  %11917 = vmatprep.mubr.bf16.mxu0 %v11588_v34  ;;  %v13810_v34 = vld [vmem:[#allocation31] ss:$0 sm:$0xff] }
 0x81a   :  { %11918 = vmatmul.mubr.bf16.vlgmr.msra.gmra.mrb[36].mxu0 %v11587_v36  ;;  %13888 = vmatprep.subr.bf16.mxu1 %v14668_v1 }
 0x81b   :  { %13900 = vmatprep.mubr.msk.bf16.mxu1 %vm14667_vm0, %v14668_v1  ;;  %13920 = vmatprep.mubr.msk.bf16.mxu0 %vm14667_vm0, %v14668_v1 }
 0x81c   :  { %13905 = vmatpush3.bf16.msra.mxu0 %v14169_v5 }
 0x81d   :  { %13889 = vmatpush3.bf16.msra.mxu1 %v14163_v62  ;;  %13906 = vmatprep.subr.bf16.mxu0 %v14668_v1 }
 0x81e   :  { %13890 = vmatprep.subr.bf16.mxu1 %v14668_v1 }
 0x820   :  { %13907 = vmatpush3.bf16.msra.mxu0 %v14170_v50 }
 0x821   :  { %13891 = vmatpush3.bf16.msra.mxu1 %v14164_v41  ;;  %13908 = vmatprep.subr.bf16.mxu0 %v14668_v1 }
 0x822   :  { %13892 = vmatprep.subr.bf16.mxu1 %v14668_v1 }
 0x824   :  { %13909 = vmatpush3.bf16.msra.mxu0 %v14171_v46 }
 0x825   :  { %13893 = vmatpush3.bf16.msra.mxu1 %v14165_v14  ;;  %13910 = vmatprep.subr.bf16.mxu0 %v14668_v1 }
 0x826   :  { %13894 = vmatprep.subr.bf16.mxu1 %v14668_v1 }
 0x828   :  { %13911 = vmatpush3.bf16.msra.mxu0 %v14172_v37 }
 0x829   :  { %13895 = vmatpush3.bf16.msra.mxu1 %v14166_v18  ;;  %13912 = vmatprep.subr.bf16.mxu0 %v14668_v1 }
 0x82a   :  { %13896 = vmatprep.subr.bf16.mxu1 %v14668_v1 }
 0x82c   :  { %13913 = vmatpush3.bf16.msra.mxu0 %v14173_v40 }
 0x82d   :  { %13897 = vmatpush3.bf16.msra.mxu1 %v14167_v4  ;;  %13914 = vmatprep.subr.bf16.mxu0 %v14668_v1 }
 0x82e   :  { %13898 = vmatprep.subr.bf16.mxu1 %v14668_v1 }
 0x830   :  { %13915 = vmatpush3.bf16.msra.mxu0 %v14174_v47 }
 0x831   :  { %13899 = vmatpush3.bf16.msra.mxu1 %v11970_v16  ;;  %13916 = vmatprep.subr.bf16.mxu0 %v14668_v1 }
 0x832   :  { %13924 = vmatprep.subr.bf16.mxu1 %v14668_v1 }
 0x834   :  { %13901 = vmatmul.mubr.msk.bf16.vlgmr.msra.gmra.mrb[36].mxu1 %vm11964_vm12, %v11571_v43  ;;  %13917 = vmatpush3.bf16.msra.mxu0 %v14175_v21 }
 0x835   :  { %13926 = vmatprep.mubr.msk.bf16.mxu1 %vm14667_vm0, %v14668_v1  ;;  %13918 = vmatprep.subr.bf16.mxu0 %v14668_v1 }
 0x836   :  { %13925 = vmatpush3.bf16.msra.mxu1 %v14177_v57 }
 0x838   :  { %13919 = vmatpush3.bf16.msra.mxu0 %v14176_v51 }
 0x8eb   :  { %v13832_v53 = vpop.f32.mrb[32].mxu1 }
 0x8ec   :  { %v13833_v63 = vpop.f32.mrb[33].mxu1 }
 0x8ed   :  { %v13834_v7 = vadd.f32 %v13833_v63, %v13832_v53  ;;  %v13835_v29 = vpop.f32.mrb[34].mxu1  ;;  %v13854_v44 = vpop.f32.mrb[36].mxu0 }
 0x8ee   :  { %v13836_v61 = vpop.f32.mrb[35].mxu1  ;;  %v13855_v58 = vpop.f32.mrb[37].mxu0 }
 0x8ef   :  { %v13856_v9 = vadd.f32 %v13855_v58, %v13854_v44  ;;  %v13857_v12 = vpop.f32.mrb[38].mxu0 }
 0x8f0   :  { %v13858_v10 = vpop.f32.mrb[39].mxu0 }
 0x8f1   :  { %v11920_v13 = vadd.f32 %v13856_v9, %v13834_v7 }
 0x907   :  { %v12006_v48 = vpop.f32.mrb[36].mxu1 }
 0x908   :  { %v12007_v45 = vadd.f32 %v12006_v48, %v11920_v13  ;;  %v13902_v52 = vpop.f32.mrb[37].mxu1 }
 0x909   :  { %v12009_v54 = vpop.f32.mrb[38].mxu1 }
 0x90a   :  { %v12019_v17 = vadd.f32 %v13796_v22, %v12007_v45  ;;  %v13903_v56 = vpop.f32.mrb[39].mxu1 }
 0x90c   :  { %vm12020_vm0 = vcmp.ge.f32.partialorder %v12019_v17, 0.0  ;;  %v12021_v1 = vmul.f32 0.01, %v12019_v17 }
 0x90e   :  { %v12022_v59 = vsel %vm12020_vm0, %v12019_v17, %v12021_v1 }
 0x90f   :  { %v12030_v60 = vmul.f32 %v13797_v30, %v12022_v59 }
 0x911   :  { %v12038_v38 = vadd.f32 %v13798_v2, %v12030_v60 }
 0x913   :  { %v12040_v55 = vmul.f32 %v12039_v28, %v12038_v38 }
 0x915   :  { %v12041_v39 = vpack.c.bf16 %v12040_v55, %v12040_v55 }
 0x917   :  { %13921 = vmatmul.mubr.bf16.vlgmr.msra.gmra.mrb[40].mxu0 %v12041_v39 }
 0x9ea   :  { %v12147_v11 = vpop.f32.mrb[40].mxu0 }
 0x9eb   :  { %v12148_v35 = vadd.f32 %v13799_v6, %v12147_v11  ;;  %v13922_v15 = vpop.f32.mrb[41].mxu0 }
 0x9ec   :  { %v12150_v0 = vpop.f32.mrb[42].mxu0 }
 0x9ed   :  { %vm12153_vm13 = vcmp.ge.f32.partialorder %v12148_v35, 0.0  ;;  %v12154_v3 = vmul.f32 0.01, %v12148_v35  ;;  %v13923_v19 = vpop.f32.mrb[43].mxu0 }
 0x9ef   :  { %v12155_v20 = vsel %vm12153_vm13, %v12148_v35, %v12154_v3 }
 0x9f0   :  { %v12163_v24 = vmul.f32 %v13808_v26, %v12155_v20 }
 0x9f2   :  { %v12171_v25 = vadd.f32 %v13809_v49, %v12163_v24 }
 0x9f4   :  { %v12173_v31 = vmul.f32 %v12172_v27, %v12171_v25 }
 0x9f6   :  { %v12174_v8 = vpack.c.bf16 %v12173_v31, %v12173_v31 }
 0x9f8   :  { %13927 = vmatmul.mubr.msk.bf16.vlgmr.msra.gmra.mrb[40].mxu1 %vm12190_vm14, %v12174_v8 }
 0xacb   :  { %v12228_v36 = vpop.f32.mrb[40].mxu1 }
 0xacc   :  { %v12229_v62 = vadd.f32 %v13810_v34, %v12228_v36  ;;  %v13928_v41 = vpop.f32.mrb[41].mxu1 }
 0xacd   :  { %v12231_v14 = vpop.f32.mrb[42].mxu1 }
 0xace   :  { %12234 = vst [vmem:[#allocation32] sm:$0xff] %v12229_v62  ;;  %v13929_v18 = vpop.f32.mrb[43].mxu1 }
 0xacf   :  { %14609 = shalt.err (!%p14606_p2)
}
 0xad0   :  { %s14610_s23 = scalar_lea.hbm %s15491_s19, 128 }
 0xad1   :  { %p14611_p3 = scmp.ne.s32.totalorder %s15491_s19, %s14610_s23  ;;  %p14614_p4 = scmp.lt.u32.totalorder %s14610_s23, %s15491_s19 }
 0xad3   :  { %p14616_p5 = pnand %p14614_p4, %p14611_p3 }
 0xad5   :  { %14619 = shalt.err (!%p14616_p5)
}
 0xad6   :  { %12244 = dma.vmem_to_hbm [thread:$0]  %s12242_s8, 128, %s15491_s19, [#allocation4]  }
 0xad7   :  { %14640 = dma.done.wait [#allocation4], 128  }
 0xad8   :  { %14641 = vsyncadd [#allocation4], 4294967168 }
 0xad9   :  { %12248 = vsyncpa [#allocation3], 1 }
 0xada   :  { %12249 = vsyncpa [#allocation6], 1 }
 0xadb   :  { %12250 = vsyncpa [#allocation9], 1 }
 0xadc   :  { %12251 = vsyncpa [#allocation12], 1 }
 0xadd   :  { %12252 = vsyncpa [#allocation15], 1 }
 0xade   :  { %12253 = vsyncpa [#allocation18], 1 }
 0xadf   :  { %12254 = vsyncpa [#allocation21], 1 }
 0xae0   :  { %12255 = vsyncpa [#allocation24], 1 }
 0xae1   :  { %12256 = vsyncpa [#allocation27], 1 }
 0xae2   :  { %12257 = vsyncpa [#allocation30], 1 }
 0xae3   :  { %12258 = vsyncpa [#allocation4], 1 }

</bundles_post_ra>
